<compile_context>
chip_gen: v7x
topology: tpu7x:2x2x1
jax: 0.10.0
libtpu: 0.0.40
codegen_flags: <defaults>
</compile_context>

<pallas_src>
import functools

import jax
import jax.numpy as jnp
from jax.experimental import pallas as pl
from jax.experimental.pallas import tpu as pltpu


_TN = 2048  # linear output tile (lane-dense, divides the padded N=16384 into 8 steps)


# ----------------------------------------------------------------------------
# Kernel 1: the whole conv / conv-transpose stack in ONE tiny pallas_call
# ----------------------------------------------------------------------------
def _conv_stack_kernel(*refs, K, layer_cfg):
    """All 7 (de)conv layers, channels-last, intermediates stay in registers/VMEM.

    refs = (x_ref, w1, b1, ..., w7, b7, o_ref)
      x_ref : (B, L0, C0)            channels-last f32 input
      w_i   : (K, Cin_i, Cout_i)     (transposed-conv weights pre-flipped)
      b_i   : (1, Cout_i)
      o_ref : (B, Lf, 128)           channels-last bf16 output of layer d3
    layer_cfg: static tuple of (is_transposed_conv, apply_relu) per layer.
    """
    n_layers = len(layer_cfg)
    x_ref = refs[0]
    wb_refs = refs[1:1 + 2 * n_layers]
    o_ref = refs[1 + 2 * n_layers]

    h = x_ref[...].astype(jnp.float32)
    for i, (needs_pad, apply_relu) in enumerate(layer_cfg):
        w_ref = wb_refs[2 * i]
        b_ref = wb_refs[2 * i + 1]

        if needs_pad:
            # ConvTranspose1d (stride 1) == valid conv of a zero-padded input
            # with a pre-flipped kernel.  In-register pad (no scratch round-trip).
            Bb, Lc, Cc = h.shape
            z = jnp.zeros((Bb, K - 1, Cc), jnp.float32)
            h = jnp.concatenate([z, h, z], axis=1)

        Bb, Lin, Cin = h.shape
        Lout = Lin - K + 1
        Cout = w_ref.shape[2]
        acc = jnp.zeros((Bb, Lout, Cout), jnp.float32)
        for t in range(K):  # K is tiny and static -> unrolled taps
            acc = acc + jax.lax.dot_general(
                h[:, t:t + Lout, :], w_ref[t],
                dimension_numbers=(((2,), (0,)), ((), ())),
                preferred_element_type=jnp.float32)
        acc = acc + b_ref[...][None]                  # (1,1,Cout) broadcast
        if apply_relu:
            acc = jnp.maximum(acc, 0.0)
        h = acc

    o_ref[...] = h.astype(o_ref.dtype)                # single bf16 cast of the activation


_LAYERS = (
    # name, is_transposed_conv (needs zero pad), apply_relu
    ("c1", False, True),
    ("c2", False, True),
    ("c3", False, True),
    ("c4", False, True),
    ("d1", True, True),    # the single surviving 'Relu5' follows d1
    ("d2", True, False),   # duplicate 'Relu5' name collapsed -> NO ReLU after d2
    ("d3", True, True),    # 'Relu6'
)


def conv_stack(x_blc, kparams, K):
    """x_blc: (B, L, Cin) channels-last f32 -> (B, Lf, 128) channels-last bf16."""
    B, L, C = x_blc.shape
    args = [x_blc]
    cfg = []
    for name, needs_pad, apply_relu in _LAYERS:
        w = kparams[name + "_w"]          # (K, Cin, Cout)
        b = kparams[name + "_b"]          # (1, Cout)
        Cin, Cout = w.shape[1], w.shape[2]
        assert Cin == C, (name, Cin, C)
        L = L + (K - 1) if needs_pad else L - (K - 1)
        C = Cout
        args += [w, b]
        cfg.append((needs_pad, apply_relu))

    kern = functools.partial(_conv_stack_kernel, K=K, layer_cfg=tuple(cfg))
    return pl.pallas_call(
        kern,
        out_shape=jax.ShapeDtypeStruct((B, L, C), jnp.bfloat16),
    )(*args)


# ----------------------------------------------------------------------------
# Kernel 2: the big Linear (fc1), tiled over output rows (contiguous blocks)
# ----------------------------------------------------------------------------
def _linear_kernel(x_ref, w_ref, b_ref, o_ref):
    """One N-tile of  y = x @ W.T + b  with W stored row-major (N, F).

    x_ref: (B, F) bf16   w_ref: (TN, F) bf16   b_ref: (1, TN) f32   o_ref: (B, TN) f32
    """
    y = jax.lax.dot_general(
        x_ref[...], w_ref[...],
        dimension_numbers=(((1,), (1,)), ((), ())),   # contract F with F; no transpose
        preferred_element_type=jnp.float32)
    o_ref[...] = y + b_ref[...]


def linear_pallas(x_bf16, w_nf, b_1n, tn=_TN):
    """y = x @ W.T + b.

    x_bf16: (B, F) bf16 activation.
    w_nf  : (Npad, F) bf16, row-major -> each (tn, F) block is a contiguous HBM slab.
    b_1n  : (1, Npad) f32.
    tn=2048 with Npad=16384 gives 8 grid steps: balanced 4/4 across the two v7x
    TensorCores (via "parallel" semantics), and 2 x 5.24 MB double-buffered weight
    blocks that fit v5e's 16 MiB default scoped VMEM without any flag.
    """
    B, F = x_bf16.shape
    Npad = w_nf.shape[0]
    assert Npad % tn == 0 and tn % 128 == 0 and tn % 8 == 0

    cost = pl.CostEstimate(
        flops=2 * B * F * Npad,
        transcendentals=0,
        bytes_accessed=Npad * F * 2 + B * F * 2 + Npad * 4 + B * Npad * 4,
    )
    return pl.pallas_call(
        _linear_kernel,
        out_shape=jax.ShapeDtypeStruct((B, Npad), jnp.float32),
        grid=(Npad // tn,),
        in_specs=[
            pl.BlockSpec((B, F), lambda j: (0, 0)),    # tiny LHS, re-used every step
            pl.BlockSpec((tn, F), lambda j: (j, 0)),   # contiguous weight row-slab
            pl.BlockSpec((1, tn), lambda j: (0, j)),
        ],
        out_specs=pl.BlockSpec((B, tn), lambda j: (0, j)),
        compiler_params=pltpu.CompilerParams(dimension_semantics=("parallel",)),
        cost_estimate=cost,
    )(x_bf16, w_nf, b_1n)


# ----------------------------------------------------------------------------
# Parameters: PyTorch-layout init + one-time kernel-ready preparation
# ----------------------------------------------------------------------------
def init_params(key, kernel, inp_channels, window_length):
    """Deterministic synthetic parameters in the PyTorch module's layouts."""
    enc_dims = [(inp_channels, 128), (128, 64), (64, 8), (8, 2)]
    dec_dims = [(2, 8), (8, 64), (64, 128)]

    L = window_length
    for _ in range(4):
        L -= (kernel - 1)
    assert L >= 1, "window_length too small for 4 valid convs"
    for _ in range(3):
        L += (kernel - 1)
    linear_in = 128 * L                    # Flatten(start_dim=1) feature count
    linear_out = 16000

    params = {}
    for i, (ci, co) in enumerate(enc_dims):           # Conv1d weight (Cout, Cin, K)
        k1, k2, key = jax.random.split(key, 3)
        scale = 1.0 / jnp.sqrt(ci * kernel)
        params[f"c{i+1}"] = (jax.random.normal(k1, (co, ci, kernel), jnp.float32) * scale,
                             jax.random.normal(k2, (co,), jnp.float32) * scale)
    for i, (ci, co) in enumerate(dec_dims):           # ConvTranspose1d weight (Cin, Cout, K)
        k1, k2, key = jax.random.split(key, 3)
        scale = 1.0 / jnp.sqrt(ci * kernel)
        params[f"d{i+1}"] = (jax.random.normal(k1, (ci, co, kernel), jnp.float32) * scale,
                             jax.random.normal(k2, (co,), jnp.float32) * scale)
    k1, k2, key = jax.random.split(key, 3)            # Linear weight (16000, linear_in)
    scale = 1.0 / jnp.sqrt(linear_in)
    params["fc1"] = (jax.random.normal(k1, (linear_out, linear_in), jnp.float32) * scale,
                     jax.random.normal(k2, (linear_out,), jnp.float32) * scale)
    return params


def prepare_params(pt_params, tn=_TN):
    """One-time, init-side transform of PyTorch-layout params to kernel layouts.

    - Conv1d (Cout, Cin, K)           -> (K, Cin, Cout)
    - ConvTranspose1d (Cin, Cout, K)  -> flip K, -> (K, Cin, Cout)
    - Linear (N, 128*Lf):
        * columns permuted from channel-major (c, l) to (l, c) order so the kernel
          consumes the natural channels-last flatten (exact re-indexing),
        * KEPT row-major (N, F) so weight tiles are contiguous HBM slabs,
        * N zero-padded up to a multiple of tn (16000 -> 16384),
        * cast to bfloat16 (accumulation stays f32 in the kernel).
    """
    kp = {}
    for name in ("c1", "c2", "c3", "c4"):
        W, b = pt_params[name]                                  # (Cout, Cin, K)
        kp[name + "_w"] = jnp.transpose(W, (2, 1, 0))           # (K, Cin, Cout)
        kp[name + "_b"] = b.reshape(1, -1)
    for name in ("d1", "d2", "d3"):
        W, b = pt_params[name]                                  # (Cin, Cout, K)
        kp[name + "_w"] = jnp.transpose(jnp.flip(W, axis=2), (2, 0, 1))
        kp[name + "_b"] = b.reshape(1, -1)

    Wfc, bfc = pt_params["fc1"]                                 # (N, 128*Lf)
    N, F = Wfc.shape
    C = 128
    Lf = F // C
    W_lc = Wfc.reshape(N, C, Lf).transpose(0, 2, 1).reshape(N, F)   # (l,c)-ordered cols
    Npad = ((N + tn - 1) // tn) * tn
    kp["fc1_w"] = jnp.pad(W_lc, ((0, Npad - N), (0, 0))).astype(jnp.bfloat16)   # (Npad, F)
    kp["fc1_b"] = jnp.pad(bfc, (0, Npad - N)).reshape(1, Npad).astype(jnp.float32)
    kp["fc1_n"] = N
    return kp


# ----------------------------------------------------------------------------
# Forward
# ----------------------------------------------------------------------------
def autoencoder_forward(x_ncl, kparams):
    """x_ncl: (B, inp_channels, window_length).  Returns (B, 80, 200)."""
    K = kparams["c1_w"].shape[0]
    h = jnp.transpose(x_ncl, (0, 2, 1))               # tiny: -> (B, L, C)

    h = conv_stack(h, kparams, K)                      # one pallas_call, (B, Lf, 128) bf16

    B = h.shape[0]
    h = h.reshape(B, -1)                               # contiguous (l, c) flatten, bf16

    y = linear_pallas(h, kparams["fc1_w"], kparams["fc1_b"])   # (B, Npad)
    y = y[:, :16000]                                   # drop the zero padding rows
    return y.reshape(-1, 80, 200)


# ----------------------------------------------------------------------------
if __name__ == "__main__":
    KERNEL = 3
    INP_CHANNELS = 16
    WINDOW_LENGTH = 12
    BATCH = 2

    key = jax.random.PRNGKey(0)
    pkey, xkey = jax.random.split(key)
    pt_params = init_params(pkey, KERNEL, INP_CHANNELS, WINDOW_LENGTH)
    kparams = prepare_params(pt_params)                # one-time layout / pad / bf16 prep
    x = jax.random.normal(xkey, (BATCH, INP_CHANNELS, WINDOW_LENGTH), jnp.float32)

    fwd = jax.jit(lambda xx: autoencoder_forward(xx, kparams))
    out = jax.block_until_ready(fwd(x))
    assert out.shape == (BATCH, 80, 200), out.shape
    assert jnp.isfinite(out).all()
    print("KERNEL_OK")
</pallas_src>

<mosaic_0001>
module attributes {stable_mosaic.version = 11 : i64} {
  func.func @_conv_stack_kernel(%arg0: memref<2x12x16xf32, #tpu.memory_space<vmem>>, %arg1: memref<3x16x128xf32, #tpu.memory_space<vmem>>, %arg2: memref<1x128xf32, #tpu.memory_space<vmem>>, %arg3: memref<3x128x64xf32, #tpu.memory_space<vmem>>, %arg4: memref<1x64xf32, #tpu.memory_space<vmem>>, %arg5: memref<3x64x8xf32, #tpu.memory_space<vmem>>, %arg6: memref<1x8xf32, #tpu.memory_space<vmem>>, %arg7: memref<3x8x2xf32, #tpu.memory_space<vmem>>, %arg8: memref<1x2xf32, #tpu.memory_space<vmem>>, %arg9: memref<3x2x8xf32, #tpu.memory_space<vmem>>, %arg10: memref<1x8xf32, #tpu.memory_space<vmem>>, %arg11: memref<3x8x64xf32, #tpu.memory_space<vmem>>, %arg12: memref<1x64xf32, #tpu.memory_space<vmem>>, %arg13: memref<3x64x128xf32, #tpu.memory_space<vmem>>, %arg14: memref<1x128xf32, #tpu.memory_space<vmem>>, %arg15: memref<2x10x128xbf16, #tpu.memory_space<vmem>>) attributes {dimension_semantics = [], scalar_prefetch = 0 : i64, scratch_operands = 0 : i64, tpu.core_type = #tpu.core_type<tc>} {
    %c0 = arith.constant 0 : index
    %c0_0 = arith.constant 0 : index
    %c0_1 = arith.constant 0 : index
    %0 = vector.load %arg0[%c0, %c0_0, %c0_1] : memref<2x12x16xf32, #tpu.memory_space<vmem>>, vector<2x12x16xf32>
    %cst = arith.constant 0.000000e+00 : f32
    %1 = vector.broadcast %cst : f32 to vector<2x10x128xf32>
    %2 = vector.extract_strided_slice %0 {offsets = [0, 0, 0], sizes = [2, 10, 16], strides = [1, 1, 1]} : vector<2x12x16xf32> to vector<2x10x16xf32>
    %c0_2 = arith.constant 0 : index
    %c0_3 = arith.constant 0 : index
    %c0_4 = arith.constant 0 : index
    %3 = vector.load %arg1[%c0_2, %c0_3, %c0_4] : memref<3x16x128xf32, #tpu.memory_space<vmem>>, vector<1x16x128xf32>
    %4 = vector.shape_cast %3 : vector<1x16x128xf32> to vector<16x128xf32>
    %cst_5 = arith.constant dense<0.000000e+00> : vector<2x10x128xf32>
    %5 = tpu.matmul %2, %4, %cst_5 {dimension_numbers = #tpu.dot_dimension_numbers<[2], [0], [0, 1], [1], [0, 0, 0, 1, 1, 1], [], []>} : vector<2x10x16xf32>, vector<16x128xf32>, vector<2x10x128xf32> -> vector<2x10x128xf32>
    %6 = arith.addf %1, %5 : vector<2x10x128xf32>
    %7 = vector.extract_strided_slice %0 {offsets = [0, 1, 0], sizes = [2, 10, 16], strides = [1, 1, 1]} : vector<2x12x16xf32> to vector<2x10x16xf32>
    %c1 = arith.constant 1 : index
    %c0_6 = arith.constant 0 : index
    %c0_7 = arith.constant 0 : index
    %8 = vector.load %arg1[%c1, %c0_6, %c0_7] : memref<3x16x128xf32, #tpu.memory_space<vmem>>, vector<1x16x128xf32>
    %9 = vector.shape_cast %8 : vector<1x16x128xf32> to vector<16x128xf32>
    %cst_8 = arith.constant dense<0.000000e+00> : vector<2x10x128xf32>
    %10 = tpu.matmul %7, %9, %cst_8 {dimension_numbers = #tpu.dot_dimension_numbers<[2], [0], [0, 1], [1], [0, 0, 0, 1, 1, 1], [], []>} : vector<2x10x16xf32>, vector<16x128xf32>, vector<2x10x128xf32> -> vector<2x10x128xf32>
    %11 = arith.addf %6, %10 : vector<2x10x128xf32>
    %12 = vector.extract_strided_slice %0 {offsets = [0, 2, 0], sizes = [2, 10, 16], strides = [1, 1, 1]} : vector<2x12x16xf32> to vector<2x10x16xf32>
    %c2 = arith.constant 2 : index
    %c0_9 = arith.constant 0 : index
    %c0_10 = arith.constant 0 : index
    %13 = vector.load %arg1[%c2, %c0_9, %c0_10] : memref<3x16x128xf32, #tpu.memory_space<vmem>>, vector<1x16x128xf32>
    %14 = vector.shape_cast %13 : vector<1x16x128xf32> to vector<16x128xf32>
    %cst_11 = arith.constant dense<0.000000e+00> : vector<2x10x128xf32>
    %15 = tpu.matmul %12, %14, %cst_11 {dimension_numbers = #tpu.dot_dimension_numbers<[2], [0], [0, 1], [1], [0, 0, 0, 1, 1, 1], [], []>} : vector<2x10x16xf32>, vector<16x128xf32>, vector<2x10x128xf32> -> vector<2x10x128xf32>
    %16 = arith.addf %11, %15 : vector<2x10x128xf32>
    %c0_12 = arith.constant 0 : index
    %c0_13 = arith.constant 0 : index
    %17 = vector.load %arg2[%c0_12, %c0_13] : memref<1x128xf32, #tpu.memory_space<vmem>>, vector<1x128xf32>
    %18 = vector.shape_cast %17 : vector<1x128xf32> to vector<1x1x128xf32>
    %19 = vector.broadcast %18 : vector<1x1x128xf32> to vector<2x10x128xf32>
    %20 = arith.addf %16, %19 : vector<2x10x128xf32>
    %cst_14 = arith.constant 0.000000e+00 : f32
    %21 = vector.broadcast %cst_14 : f32 to vector<2x10x128xf32>
    %22 = arith.maximumf %20, %21 : vector<2x10x128xf32>
    %cst_15 = arith.constant 0.000000e+00 : f32
    %23 = vector.broadcast %cst_15 : f32 to vector<2x8x64xf32>
    %24 = vector.extract_strided_slice %22 {offsets = [0, 0, 0], sizes = [2, 8, 128], strides = [1, 1, 1]} : vector<2x10x128xf32> to vector<2x8x128xf32>
    %c0_16 = arith.constant 0 : index
    %c0_17 = arith.constant 0 : index
    %c0_18 = arith.constant 0 : index
    %25 = vector.load %arg3[%c0_16, %c0_17, %c0_18] : memref<3x128x64xf32, #tpu.memory_space<vmem>>, vector<1x128x64xf32>
    %26 = vector.shape_cast %25 : vector<1x128x64xf32> to vector<128x64xf32>
    %cst_19 = arith.constant dense<0.000000e+00> : vector<2x8x64xf32>
    %27 = tpu.matmul %24, %26, %cst_19 {dimension_numbers = #tpu.dot_dimension_numbers<[2], [0], [0, 1], [1], [0, 0, 0, 1, 1, 1], [], []>} : vector<2x8x128xf32>, vector<128x64xf32>, vector<2x8x64xf32> -> vector<2x8x64xf32>
    %28 = arith.addf %23, %27 : vector<2x8x64xf32>
    %29 = vector.extract_strided_slice %22 {offsets = [0, 1, 0], sizes = [2, 8, 128], strides = [1, 1, 1]} : vector<2x10x128xf32> to vector<2x8x128xf32>
    %c1_20 = arith.constant 1 : index
    %c0_21 = arith.constant 0 : index
    %c0_22 = arith.constant 0 : index
    %30 = vector.load %arg3[%c1_20, %c0_21, %c0_22] : memref<3x128x64xf32, #tpu.memory_space<vmem>>, vector<1x128x64xf32>
    %31 = vector.shape_cast %30 : vector<1x128x64xf32> to vector<128x64xf32>
    %cst_23 = arith.constant dense<0.000000e+00> : vector<2x8x64xf32>
    %32 = tpu.matmul %29, %31, %cst_23 {dimension_numbers = #tpu.dot_dimension_numbers<[2], [0], [0, 1], [1], [0, 0, 0, 1, 1, 1], [], []>} : vector<2x8x128xf32>, vector<128x64xf32>, vector<2x8x64xf32> -> vector<2x8x64xf32>
    %33 = arith.addf %28, %32 : vector<2x8x64xf32>
    %34 = vector.extract_strided_slice %22 {offsets = [0, 2, 0], sizes = [2, 8, 128], strides = [1, 1, 1]} : vector<2x10x128xf32> to vector<2x8x128xf32>
    %c2_24 = arith.constant 2 : index
    %c0_25 = arith.constant 0 : index
    %c0_26 = arith.constant 0 : index
    %35 = vector.load %arg3[%c2_24, %c0_25, %c0_26] : memref<3x128x64xf32, #tpu.memory_space<vmem>>, vector<1x128x64xf32>
    %36 = vector.shape_cast %35 : vector<1x128x64xf32> to vector<128x64xf32>
    %cst_27 = arith.constant dense<0.000000e+00> : vector<2x8x64xf32>
    %37 = tpu.matmul %34, %36, %cst_27 {dimension_numbers = #tpu.dot_dimension_numbers<[2], [0], [0, 1], [1], [0, 0, 0, 1, 1, 1], [], []>} : vector<2x8x128xf32>, vector<128x64xf32>, vector<2x8x64xf32> -> vector<2x8x64xf32>
    %38 = arith.addf %33, %37 : vector<2x8x64xf32>
    %c0_28 = arith.constant 0 : index
    %c0_29 = arith.constant 0 : index
    %39 = vector.load %arg4[%c0_28, %c0_29] : memref<1x64xf32, #tpu.memory_space<vmem>>, vector<1x64xf32>
    %40 = vector.shape_cast %39 : vector<1x64xf32> to vector<1x1x64xf32>
    %41 = vector.broadcast %40 : vector<1x1x64xf32> to vector<2x8x64xf32>
    %42 = arith.addf %38, %41 : vector<2x8x64xf32>
    %cst_30 = arith.constant 0.000000e+00 : f32
    %43 = vector.broadcast %cst_30 : f32 to vector<2x8x64xf32>
    %44 = arith.maximumf %42, %43 : vector<2x8x64xf32>
    %cst_31 = arith.constant 0.000000e+00 : f32
    %45 = vector.broadcast %cst_31 : f32 to vector<2x6x8xf32>
    %46 = vector.extract_strided_slice %44 {offsets = [0, 0, 0], sizes = [2, 6, 64], strides = [1, 1, 1]} : vector<2x8x64xf32> to vector<2x6x64xf32>
    %c0_32 = arith.constant 0 : index
    %c0_33 = arith.constant 0 : index
    %c0_34 = arith.constant 0 : index
    %47 = vector.load %arg5[%c0_32, %c0_33, %c0_34] : memref<3x64x8xf32, #tpu.memory_space<vmem>>, vector<1x64x8xf32>
    %48 = vector.shape_cast %47 : vector<1x64x8xf32> to vector<64x8xf32>
    %cst_35 = arith.constant dense<0.000000e+00> : vector<2x6x8xf32>
    %49 = tpu.matmul %46, %48, %cst_35 {dimension_numbers = #tpu.dot_dimension_numbers<[2], [0], [0, 1], [1], [0, 0, 0, 1, 1, 1], [], []>} : vector<2x6x64xf32>, vector<64x8xf32>, vector<2x6x8xf32> -> vector<2x6x8xf32>
    %50 = arith.addf %45, %49 : vector<2x6x8xf32>
    %51 = vector.extract_strided_slice %44 {offsets = [0, 1, 0], sizes = [2, 6, 64], strides = [1, 1, 1]} : vector<2x8x64xf32> to vector<2x6x64xf32>
    %c1_36 = arith.constant 1 : index
    %c0_37 = arith.constant 0 : index
    %c0_38 = arith.constant 0 : index
    %52 = vector.load %arg5[%c1_36, %c0_37, %c0_38] : memref<3x64x8xf32, #tpu.memory_space<vmem>>, vector<1x64x8xf32>
    %53 = vector.shape_cast %52 : vector<1x64x8xf32> to vector<64x8xf32>
    %cst_39 = arith.constant dense<0.000000e+00> : vector<2x6x8xf32>
    %54 = tpu.matmul %51, %53, %cst_39 {dimension_numbers = #tpu.dot_dimension_numbers<[2], [0], [0, 1], [1], [0, 0, 0, 1, 1, 1], [], []>} : vector<2x6x64xf32>, vector<64x8xf32>, vector<2x6x8xf32> -> vector<2x6x8xf32>
    %55 = arith.addf %50, %54 : vector<2x6x8xf32>
    %56 = vector.extract_strided_slice %44 {offsets = [0, 2, 0], sizes = [2, 6, 64], strides = [1, 1, 1]} : vector<2x8x64xf32> to vector<2x6x64xf32>
    %c2_40 = arith.constant 2 : index
    %c0_41 = arith.constant 0 : index
    %c0_42 = arith.constant 0 : index
    %57 = vector.load %arg5[%c2_40, %c0_41, %c0_42] : memref<3x64x8xf32, #tpu.memory_space<vmem>>, vector<1x64x8xf32>
    %58 = vector.shape_cast %57 : vector<1x64x8xf32> to vector<64x8xf32>
    %cst_43 = arith.constant dense<0.000000e+00> : vector<2x6x8xf32>
    %59 = tpu.matmul %56, %58, %cst_43 {dimension_numbers = #tpu.dot_dimension_numbers<[2], [0], [0, 1], [1], [0, 0, 0, 1, 1, 1], [], []>} : vector<2x6x64xf32>, vector<64x8xf32>, vector<2x6x8xf32> -> vector<2x6x8xf32>
    %60 = arith.addf %55, %59 : vector<2x6x8xf32>
    %c0_44 = arith.constant 0 : index
    %c0_45 = arith.constant 0 : index
    %61 = vector.load %arg6[%c0_44, %c0_45] : memref<1x8xf32, #tpu.memory_space<vmem>>, vector<1x8xf32>
    %62 = vector.shape_cast %61 : vector<1x8xf32> to vector<1x1x8xf32>
    %63 = vector.broadcast %62 : vector<1x1x8xf32> to vector<2x6x8xf32>
    %64 = arith.addf %60, %63 : vector<2x6x8xf32>
    %cst_46 = arith.constant 0.000000e+00 : f32
    %65 = vector.broadcast %cst_46 : f32 to vector<2x6x8xf32>
    %66 = arith.maximumf %64, %65 : vector<2x6x8xf32>
    %cst_47 = arith.constant 0.000000e+00 : f32
    %67 = vector.broadcast %cst_47 : f32 to vector<2x4x2xf32>
    %68 = vector.extract_strided_slice %66 {offsets = [0, 0, 0], sizes = [2, 4, 8], strides = [1, 1, 1]} : vector<2x6x8xf32> to vector<2x4x8xf32>
    %c0_48 = arith.constant 0 : index
    %c0_49 = arith.constant 0 : index
    %c0_50 = arith.constant 0 : index
    %69 = vector.load %arg7[%c0_48, %c0_49, %c0_50] : memref<3x8x2xf32, #tpu.memory_space<vmem>>, vector<1x8x2xf32>
    %70 = vector.shape_cast %69 : vector<1x8x2xf32> to vector<8x2xf32>
    %cst_51 = arith.constant dense<0.000000e+00> : vector<2x4x2xf32>
    %71 = tpu.matmul %68, %70, %cst_51 {dimension_numbers = #tpu.dot_dimension_numbers<[2], [0], [0, 1], [1], [0, 0, 0, 1, 1, 1], [], []>} : vector<2x4x8xf32>, vector<8x2xf32>, vector<2x4x2xf32> -> vector<2x4x2xf32>
    %72 = arith.addf %67, %71 : vector<2x4x2xf32>
    %73 = vector.extract_strided_slice %66 {offsets = [0, 1, 0], sizes = [2, 4, 8], strides = [1, 1, 1]} : vector<2x6x8xf32> to vector<2x4x8xf32>
    %c1_52 = arith.constant 1 : index
    %c0_53 = arith.constant 0 : index
    %c0_54 = arith.constant 0 : index
    %74 = vector.load %arg7[%c1_52, %c0_53, %c0_54] : memref<3x8x2xf32, #tpu.memory_space<vmem>>, vector<1x8x2xf32>
    %75 = vector.shape_cast %74 : vector<1x8x2xf32> to vector<8x2xf32>
    %cst_55 = arith.constant dense<0.000000e+00> : vector<2x4x2xf32>
    %76 = tpu.matmul %73, %75, %cst_55 {dimension_numbers = #tpu.dot_dimension_numbers<[2], [0], [0, 1], [1], [0, 0, 0, 1, 1, 1], [], []>} : vector<2x4x8xf32>, vector<8x2xf32>, vector<2x4x2xf32> -> vector<2x4x2xf32>
    %77 = arith.addf %72, %76 : vector<2x4x2xf32>
    %78 = vector.extract_strided_slice %66 {offsets = [0, 2, 0], sizes = [2, 4, 8], strides = [1, 1, 1]} : vector<2x6x8xf32> to vector<2x4x8xf32>
    %c2_56 = arith.constant 2 : index
    %c0_57 = arith.constant 0 : index
    %c0_58 = arith.constant 0 : index
    %79 = vector.load %arg7[%c2_56, %c0_57, %c0_58] : memref<3x8x2xf32, #tpu.memory_space<vmem>>, vector<1x8x2xf32>
    %80 = vector.shape_cast %79 : vector<1x8x2xf32> to vector<8x2xf32>
    %cst_59 = arith.constant dense<0.000000e+00> : vector<2x4x2xf32>
    %81 = tpu.matmul %78, %80, %cst_59 {dimension_numbers = #tpu.dot_dimension_numbers<[2], [0], [0, 1], [1], [0, 0, 0, 1, 1, 1], [], []>} : vector<2x4x8xf32>, vector<8x2xf32>, vector<2x4x2xf32> -> vector<2x4x2xf32>
    %82 = arith.addf %77, %81 : vector<2x4x2xf32>
    %c0_60 = arith.constant 0 : index
    %c0_61 = arith.constant 0 : index
    %83 = vector.load %arg8[%c0_60, %c0_61] : memref<1x2xf32, #tpu.memory_space<vmem>>, vector<1x2xf32>
    %84 = vector.shape_cast %83 : vector<1x2xf32> to vector<1x1x2xf32>
    %85 = vector.broadcast %84 : vector<1x1x2xf32> to vector<2x4x2xf32>
    %86 = arith.addf %82, %85 : vector<2x4x2xf32>
    %cst_62 = arith.constant 0.000000e+00 : f32
    %87 = vector.broadcast %cst_62 : f32 to vector<2x4x2xf32>
    %88 = arith.maximumf %86, %87 : vector<2x4x2xf32>
    %cst_63 = arith.constant 0.000000e+00 : f32
    %89 = vector.broadcast %cst_63 : f32 to vector<2x2x2xf32>
    %90 = tpu.concatenate %89, %88, %89 in 1 : vector<2x2x2xf32>, vector<2x4x2xf32>, vector<2x2x2xf32> -> vector<2x8x2xf32>
    %cst_64 = arith.constant 0.000000e+00 : f32
    %91 = vector.broadcast %cst_64 : f32 to vector<2x6x8xf32>
    %92 = vector.extract_strided_slice %90 {offsets = [0, 0, 0], sizes = [2, 6, 2], strides = [1, 1, 1]} : vector<2x8x2xf32> to vector<2x6x2xf32>
    %c0_65 = arith.constant 0 : index
    %c0_66 = arith.constant 0 : index
    %c0_67 = arith.constant 0 : index
    %93 = vector.load %arg9[%c0_65, %c0_66, %c0_67] : memref<3x2x8xf32, #tpu.memory_space<vmem>>, vector<1x2x8xf32>
    %94 = vector.shape_cast %93 : vector<1x2x8xf32> to vector<2x8xf32>
    %cst_68 = arith.constant dense<0.000000e+00> : vector<2x6x8xf32>
    %95 = tpu.matmul %92, %94, %cst_68 {dimension_numbers = #tpu.dot_dimension_numbers<[2], [0], [0, 1], [1], [0, 0, 0, 1, 1, 1], [], []>} : vector<2x6x2xf32>, vector<2x8xf32>, vector<2x6x8xf32> -> vector<2x6x8xf32>
    %96 = arith.addf %91, %95 : vector<2x6x8xf32>
    %97 = vector.extract_strided_slice %90 {offsets = [0, 1, 0], sizes = [2, 6, 2], strides = [1, 1, 1]} : vector<2x8x2xf32> to vector<2x6x2xf32>
    %c1_69 = arith.constant 1 : index
    %c0_70 = arith.constant 0 : index
    %c0_71 = arith.constant 0 : index
    %98 = vector.load %arg9[%c1_69, %c0_70, %c0_71] : memref<3x2x8xf32, #tpu.memory_space<vmem>>, vector<1x2x8xf32>
    %99 = vector.shape_cast %98 : vector<1x2x8xf32> to vector<2x8xf32>
    %cst_72 = arith.constant dense<0.000000e+00> : vector<2x6x8xf32>
    %100 = tpu.matmul %97, %99, %cst_72 {dimension_numbers = #tpu.dot_dimension_numbers<[2], [0], [0, 1], [1], [0, 0, 0, 1, 1, 1], [], []>} : vector<2x6x2xf32>, vector<2x8xf32>, vector<2x6x8xf32> -> vector<2x6x8xf32>
    %101 = arith.addf %96, %100 : vector<2x6x8xf32>
    %102 = vector.extract_strided_slice %90 {offsets = [0, 2, 0], sizes = [2, 6, 2], strides = [1, 1, 1]} : vector<2x8x2xf32> to vector<2x6x2xf32>
    %c2_73 = arith.constant 2 : index
    %c0_74 = arith.constant 0 : index
    %c0_75 = arith.constant 0 : index
    %103 = vector.load %arg9[%c2_73, %c0_74, %c0_75] : memref<3x2x8xf32, #tpu.memory_space<vmem>>, vector<1x2x8xf32>
    %104 = vector.shape_cast %103 : vector<1x2x8xf32> to vector<2x8xf32>
    %cst_76 = arith.constant dense<0.000000e+00> : vector<2x6x8xf32>
    %105 = tpu.matmul %102, %104, %cst_76 {dimension_numbers = #tpu.dot_dimension_numbers<[2], [0], [0, 1], [1], [0, 0, 0, 1, 1, 1], [], []>} : vector<2x6x2xf32>, vector<2x8xf32>, vector<2x6x8xf32> -> vector<2x6x8xf32>
    %106 = arith.addf %101, %105 : vector<2x6x8xf32>
    %c0_77 = arith.constant 0 : index
    %c0_78 = arith.constant 0 : index
    %107 = vector.load %arg10[%c0_77, %c0_78] : memref<1x8xf32, #tpu.memory_space<vmem>>, vector<1x8xf32>
    %108 = vector.shape_cast %107 : vector<1x8xf32> to vector<1x1x8xf32>
    %109 = vector.broadcast %108 : vector<1x1x8xf32> to vector<2x6x8xf32>
    %110 = arith.addf %106, %109 : vector<2x6x8xf32>
    %cst_79 = arith.constant 0.000000e+00 : f32
    %111 = vector.broadcast %cst_79 : f32 to vector<2x6x8xf32>
    %112 = arith.maximumf %110, %111 : vector<2x6x8xf32>
    %cst_80 = arith.constant 0.000000e+00 : f32
    %113 = vector.broadcast %cst_80 : f32 to vector<2x2x8xf32>
    %114 = tpu.concatenate %113, %112, %113 in 1 : vector<2x2x8xf32>, vector<2x6x8xf32>, vector<2x2x8xf32> -> vector<2x10x8xf32>
    %cst_81 = arith.constant 0.000000e+00 : f32
    %115 = vector.broadcast %cst_81 : f32 to vector<2x8x64xf32>
    %116 = vector.extract_strided_slice %114 {offsets = [0, 0, 0], sizes = [2, 8, 8], strides = [1, 1, 1]} : vector<2x10x8xf32> to vector<2x8x8xf32>
    %c0_82 = arith.constant 0 : index
    %c0_83 = arith.constant 0 : index
    %c0_84 = arith.constant 0 : index
    %117 = vector.load %arg11[%c0_82, %c0_83, %c0_84] : memref<3x8x64xf32, #tpu.memory_space<vmem>>, vector<1x8x64xf32>
    %118 = vector.shape_cast %117 : vector<1x8x64xf32> to vector<8x64xf32>
    %cst_85 = arith.constant dense<0.000000e+00> : vector<2x8x64xf32>
    %119 = tpu.matmul %116, %118, %cst_85 {dimension_numbers = #tpu.dot_dimension_numbers<[2], [0], [0, 1], [1], [0, 0, 0, 1, 1, 1], [], []>} : vector<2x8x8xf32>, vector<8x64xf32>, vector<2x8x64xf32> -> vector<2x8x64xf32>
    %120 = arith.addf %115, %119 : vector<2x8x64xf32>
    %121 = vector.extract_strided_slice %114 {offsets = [0, 1, 0], sizes = [2, 8, 8], strides = [1, 1, 1]} : vector<2x10x8xf32> to vector<2x8x8xf32>
    %c1_86 = arith.constant 1 : index
    %c0_87 = arith.constant 0 : index
    %c0_88 = arith.constant 0 : index
    %122 = vector.load %arg11[%c1_86, %c0_87, %c0_88] : memref<3x8x64xf32, #tpu.memory_space<vmem>>, vector<1x8x64xf32>
    %123 = vector.shape_cast %122 : vector<1x8x64xf32> to vector<8x64xf32>
    %cst_89 = arith.constant dense<0.000000e+00> : vector<2x8x64xf32>
    %124 = tpu.matmul %121, %123, %cst_89 {dimension_numbers = #tpu.dot_dimension_numbers<[2], [0], [0, 1], [1], [0, 0, 0, 1, 1, 1], [], []>} : vector<2x8x8xf32>, vector<8x64xf32>, vector<2x8x64xf32> -> vector<2x8x64xf32>
    %125 = arith.addf %120, %124 : vector<2x8x64xf32>
    %126 = vector.extract_strided_slice %114 {offsets = [0, 2, 0], sizes = [2, 8, 8], strides = [1, 1, 1]} : vector<2x10x8xf32> to vector<2x8x8xf32>
    %c2_90 = arith.constant 2 : index
    %c0_91 = arith.constant 0 : index
    %c0_92 = arith.constant 0 : index
    %127 = vector.load %arg11[%c2_90, %c0_91, %c0_92] : memref<3x8x64xf32, #tpu.memory_space<vmem>>, vector<1x8x64xf32>
    %128 = vector.shape_cast %127 : vector<1x8x64xf32> to vector<8x64xf32>
    %cst_93 = arith.constant dense<0.000000e+00> : vector<2x8x64xf32>
    %129 = tpu.matmul %126, %128, %cst_93 {dimension_numbers = #tpu.dot_dimension_numbers<[2], [0], [0, 1], [1], [0, 0, 0, 1, 1, 1], [], []>} : vector<2x8x8xf32>, vector<8x64xf32>, vector<2x8x64xf32> -> vector<2x8x64xf32>
    %130 = arith.addf %125, %129 : vector<2x8x64xf32>
    %c0_94 = arith.constant 0 : index
    %c0_95 = arith.constant 0 : index
    %131 = vector.load %arg12[%c0_94, %c0_95] : memref<1x64xf32, #tpu.memory_space<vmem>>, vector<1x64xf32>
    %132 = vector.shape_cast %131 : vector<1x64xf32> to vector<1x1x64xf32>
    %133 = vector.broadcast %132 : vector<1x1x64xf32> to vector<2x8x64xf32>
    %134 = arith.addf %130, %133 : vector<2x8x64xf32>
    %cst_96 = arith.constant 0.000000e+00 : f32
    %135 = vector.broadcast %cst_96 : f32 to vector<2x2x64xf32>
    %136 = tpu.concatenate %135, %134, %135 in 1 : vector<2x2x64xf32>, vector<2x8x64xf32>, vector<2x2x64xf32> -> vector<2x12x64xf32>
    %cst_97 = arith.constant 0.000000e+00 : f32
    %137 = vector.broadcast %cst_97 : f32 to vector<2x10x128xf32>
    %138 = vector.extract_strided_slice %136 {offsets = [0, 0, 0], sizes = [2, 10, 64], strides = [1, 1, 1]} : vector<2x12x64xf32> to vector<2x10x64xf32>
    %c0_98 = arith.constant 0 : index
    %c0_99 = arith.constant 0 : index
    %c0_100 = arith.constant 0 : index
    %139 = vector.load %arg13[%c0_98, %c0_99, %c0_100] : memref<3x64x128xf32, #tpu.memory_space<vmem>>, vector<1x64x128xf32>
    %140 = vector.shape_cast %139 : vector<1x64x128xf32> to vector<64x128xf32>
    %cst_101 = arith.constant dense<0.000000e+00> : vector<2x10x128xf32>
    %141 = tpu.matmul %138, %140, %cst_101 {dimension_numbers = #tpu.dot_dimension_numbers<[2], [0], [0, 1], [1], [0, 0, 0, 1, 1, 1], [], []>} : vector<2x10x64xf32>, vector<64x128xf32>, vector<2x10x128xf32> -> vector<2x10x128xf32>
    %142 = arith.addf %137, %141 : vector<2x10x128xf32>
    %143 = vector.extract_strided_slice %136 {offsets = [0, 1, 0], sizes = [2, 10, 64], strides = [1, 1, 1]} : vector<2x12x64xf32> to vector<2x10x64xf32>
    %c1_102 = arith.constant 1 : index
    %c0_103 = arith.constant 0 : index
    %c0_104 = arith.constant 0 : index
    %144 = vector.load %arg13[%c1_102, %c0_103, %c0_104] : memref<3x64x128xf32, #tpu.memory_space<vmem>>, vector<1x64x128xf32>
    %145 = vector.shape_cast %144 : vector<1x64x128xf32> to vector<64x128xf32>
    %cst_105 = arith.constant dense<0.000000e+00> : vector<2x10x128xf32>
    %146 = tpu.matmul %143, %145, %cst_105 {dimension_numbers = #tpu.dot_dimension_numbers<[2], [0], [0, 1], [1], [0, 0, 0, 1, 1, 1], [], []>} : vector<2x10x64xf32>, vector<64x128xf32>, vector<2x10x128xf32> -> vector<2x10x128xf32>
    %147 = arith.addf %142, %146 : vector<2x10x128xf32>
    %148 = vector.extract_strided_slice %136 {offsets = [0, 2, 0], sizes = [2, 10, 64], strides = [1, 1, 1]} : vector<2x12x64xf32> to vector<2x10x64xf32>
    %c2_106 = arith.constant 2 : index
    %c0_107 = arith.constant 0 : index
    %c0_108 = arith.constant 0 : index
    %149 = vector.load %arg13[%c2_106, %c0_107, %c0_108] : memref<3x64x128xf32, #tpu.memory_space<vmem>>, vector<1x64x128xf32>
    %150 = vector.shape_cast %149 : vector<1x64x128xf32> to vector<64x128xf32>
    %cst_109 = arith.constant dense<0.000000e+00> : vector<2x10x128xf32>
    %151 = tpu.matmul %148, %150, %cst_109 {dimension_numbers = #tpu.dot_dimension_numbers<[2], [0], [0, 1], [1], [0, 0, 0, 1, 1, 1], [], []>} : vector<2x10x64xf32>, vector<64x128xf32>, vector<2x10x128xf32> -> vector<2x10x128xf32>
    %152 = arith.addf %147, %151 : vector<2x10x128xf32>
    %c0_110 = arith.constant 0 : index
    %c0_111 = arith.constant 0 : index
    %153 = vector.load %arg14[%c0_110, %c0_111] : memref<1x128xf32, #tpu.memory_space<vmem>>, vector<1x128xf32>
    %154 = vector.shape_cast %153 : vector<1x128xf32> to vector<1x1x128xf32>
    %155 = vector.broadcast %154 : vector<1x1x128xf32> to vector<2x10x128xf32>
    %156 = arith.addf %152, %155 : vector<2x10x128xf32>
    %cst_112 = arith.constant 0.000000e+00 : f32
    %157 = vector.broadcast %cst_112 : f32 to vector<2x10x128xf32>
    %158 = arith.maximumf %156, %157 : vector<2x10x128xf32>
    %159 = arith.truncf %158 : vector<2x10x128xf32> to vector<2x10x128xbf16>
    %c0_113 = arith.constant 0 : index
    %c0_114 = arith.constant 0 : index
    %c0_115 = arith.constant 0 : index
    %160 = vector.load %arg15[%c0_113, %c0_114, %c0_115] : memref<2x10x128xbf16, #tpu.memory_space<vmem>>, vector<2x10x128xbf16>
    tpu.vector_store %arg15[%c0_113, %c0_114, %c0_115], %159 {strides = array<i32>} : memref<2x10x128xbf16, #tpu.memory_space<vmem>>, vector<2x10x128xbf16>,
    return
  }
}

module attributes {stable_mosaic.version = 11 : i64} {
  func.func @_linear_kernel(%arg0: i32, %arg1: memref<2x1280xbf16, #tpu.memory_space<vmem>>, %arg2: memref<2048x1280xbf16, #tpu.memory_space<vmem>>, %arg3: memref<1x2048xf32, #tpu.memory_space<vmem>>, %arg4: memref<2x2048xf32, #tpu.memory_space<vmem>>) attributes {dimension_semantics = [#tpu.dimension_semantics<parallel>], iteration_bounds = array<i64: 8>, scalar_prefetch = 0 : i64, scratch_operands = 0 : i64, tpu.core_type = #tpu.core_type<tc>, window_params = [{pipeline_mode = #tpu.pipeline_mode<synchronous>, transform_indices = @transform_0, window_bounds = array<i64: 2, 1280>}, {transform_indices = @transform_1, window_bounds = array<i64: 2048, 1280>}, {transform_indices = @transform_2, window_bounds = array<i64: 1, 2048>}, {transform_indices = @transform_3, window_bounds = array<i64: 2, 2048>}]} {
    %c0 = arith.constant 0 : index
    %c0_0 = arith.constant 0 : index
    %0 = vector.load %arg1[%c0, %c0_0] : memref<2x1280xbf16, #tpu.memory_space<vmem>>, vector<2x1280xbf16>
    %c0_1 = arith.constant 0 : index
    %c0_2 = arith.constant 0 : index
    %1 = vector.load %arg2[%c0_1, %c0_2] : memref<2048x1280xbf16, #tpu.memory_space<vmem>>, vector<2048x1280xbf16>
    %cst = arith.constant dense<0.000000e+00> : vector<2x2048xf32>
    %2 = tpu.matmul %0, %1, %cst {dimension_numbers = #tpu.dot_dimension_numbers<[1], [1], [0], [0], [0, 0, 1, 0], [], []>} : vector<2x1280xbf16>, vector<2048x1280xbf16>, vector<2x2048xf32> -> vector<2x2048xf32>
    %c0_3 = arith.constant 0 : index
    %c0_4 = arith.constant 0 : index
    %3 = vector.load %arg3[%c0_3, %c0_4] : memref<1x2048xf32, #tpu.memory_space<vmem>>, vector<1x2048xf32>
    %4 = vector.broadcast %3 : vector<1x2048xf32> to vector<2x2048xf32>
    %5 = arith.addf %2, %4 : vector<2x2048xf32>
    %c0_5 = arith.constant 0 : index
    %c0_6 = arith.constant 0 : index
    %6 = vector.load %arg4[%c0_5, %c0_6] : memref<2x2048xf32, #tpu.memory_space<vmem>>, vector<2x2048xf32>
    tpu.vector_store %arg4[%c0_5, %c0_6], %5 {strides = array<i32>} : memref<2x2048xf32, #tpu.memory_space<vmem>>, vector<2x2048xf32>,
    return
  }
  func.func @transform_0(%arg0: i32) -> (i32, i32) {
    %c0_i32 = arith.constant 0 : i32
    %c0_i32_0 = arith.constant 0 : i32
    %c0_i32_1 = arith.constant 0 : i32
    return %c0_i32, %c0_i32_0 : i32, i32
  }
  func.func @transform_1(%arg0: i32) -> (i32, i32) {
    %c0_i32 = arith.constant 0 : i32
    %c0_i32_0 = arith.constant 0 : i32
    return %arg0, %c0_i32 : i32, i32
  }
  func.func @transform_2(%arg0: i32) -> (i32, i32) {
    %c0_i32 = arith.constant 0 : i32
    %c0_i32_0 = arith.constant 0 : i32
    return %c0_i32, %arg0 : i32, i32
  }
  func.func @transform_3(%arg0: i32) -> (i32, i32) {
    %c0_i32 = arith.constant 0 : i32
    %c0_i32_0 = arith.constant 0 : i32
    return %c0_i32, %arg0 : i32, i32
  }
}

</mosaic_0001>

<bundles_post_ra>
// kernel: _lambda_.2
= control target key start
LH: loop header
LB: loop body
LE: loop exit
PB: predicated region body
PF: predicated region fallthrough
CT: control target
= control target key end

     0   :  { %20 = vsyncpa [#allocation3], 0  ;;  %s5672_s0 = inlined_call_operand.vmem [shape: f32[2,12,16], index: 0, kind: input, shape index: {}]   ;;  %s5673_s1 = inlined_call_operand.hbm [shape: f32[3,16,128], index: 1, kind: input, shape index: {}]   ;;  %s5674_s2 = inlined_call_operand.hbm [shape: f32[1,128], index: 2, kind: input, shape index: {}]   ;;  %s5675_s3 = inlined_call_operand.hbm [shape: f32[3,128,64], index: 3, kind: input, shape index: {}]   ;;  %s5676_s4 = inlined_call_operand.hbm [shape: f32[1,64], index: 4, kind: input, shape index: {}]   ;;  %s5677_s5 = inlined_call_operand.hbm [shape: f32[3,64,8], index: 5, kind: input, shape index: {}]   ;;  %s5678_s6 = inlined_call_operand.hbm [shape: f32[1,8], index: 6, kind: input, shape index: {}]   ;;  %s5679_s7 = inlined_call_operand.hbm [shape: f32[3,8,2], index: 7, kind: input, shape index: {}]   ;;  %s5680_s8 = inlined_call_operand.hbm [shape: f32[1,2], index: 8, kind: input, shape index: {}]   ;;  %s5681_s9 = inlined_call_operand.hbm [shape: f32[3,2,8], index: 9, kind: input, shape index: {}]   ;;  %s5682_s10 = inlined_call_operand.hbm [shape: f32[1,8], index: 10, kind: input, shape index: {}]   ;;  %s5683_s11 = inlined_call_operand.hbm [shape: f32[3,8,64], index: 11, kind: input, shape index: {}]   ;;  %s5684_s12 = inlined_call_operand.hbm [shape: f32[1,64], index: 12, kind: input, shape index: {}]   ;;  %s5685_s13 = inlined_call_operand.hbm [shape: f32[3,64,128], index: 13, kind: input, shape index: {}]   ;;  %s5686_s14 = inlined_call_operand.hbm [shape: f32[1,128], index: 14, kind: input, shape index: {}]   ;;  %s5687_s15 = inlined_call_operand.vmem [shape: bf16[2,10,128], index: 15, kind: output, shape index: {}]  }
   0x1   :  { %21 = vsyncpa [#allocation5], 0 }
   0x2   :  { %22 = vsyncpa [#allocation8], 0 }
   0x3   :  { %23 = vsyncpa [#allocation11], 0 }
   0x4   :  { %24 = vsyncpa [#allocation14], 0 }
   0x5   :  { %25 = vsyncpa [#allocation17], 0 }
   0x6   :  { %26 = vsyncpa [#allocation20], 0 }
   0x7   :  { %27 = vsyncpa [#allocation23], 0  ;;  %s4828_s18 = smov [#allocation4]   ;;  %s4829_s20 = smov [#allocation7]  }
   0x8   :  { %s48_s19 = sshll.u32 %s4828_s18, 4  ;;  %s70_s21 = sshll.u32 %s4829_s20, 4  ;;  %s49_s19 = int_to_ptr.vmem [resolvable:$true] %s48_s19  ;;  %s71_s21 = int_to_ptr.vmem [resolvable:$true] %s70_s21 }
   0x9   :  { %s4504_s24 = scalar_lea.hbm %s5674_s2, 16 }
   0xa   :  { %p4505_p0 = scmp.ne.s32.totalorder %s5674_s2, %s4504_s24  ;;  %p4508_p1 = scmp.lt.u32.totalorder %s4504_s24, %s5674_s2 }
   0xc   :  { %p4510_p2 = pnand %p4508_p1, %p4505_p0 }
   0xe   :  { %4513 = shalt.err (!%p4510_p2)
}
   0xf   :  { %s4514_s29 = scalar_lea.vmem %s49_s19, 16  ;;  %s4518_s30 = scalar_lea.vmem %s49_s19, 32 }
  0x10   :  { %p4515_p3 = scmp.ne.s32.totalorder %s49_s19, %s4514_s29  ;;  %p4519_p4 = scmp.lt.s32.totalorder %s49_s19, %s49_s19 }
  0x11   :  { %p4520_p5 = scmp.lt.s32.totalorder %s4518_s30, %s4514_s29 }
  0x13   :  { %p4521_p6 = por %p4520_p5, %p4519_p4 }
  0x15   :  { %p4522_p7 = pnand %p4521_p6, %p4515_p3 }
  0x17   :  { %4525 = shalt.err (!%p4522_p7)
}
  0x18   :  { %51 = dma.hbm_to_vmem [thread:$0]  %s5674_s2, 16, %s49_s19, [#allocation5]  }
  0x19   :  { %s4526_s22 = scalar_lea.hbm %s5676_s4, 16 }
  0x1a   :  { %p4527_p8 = scmp.ne.s32.totalorder %s5676_s4, %s4526_s22  ;;  %p4530_p9 = scmp.lt.u32.totalorder %s4526_s22, %s5676_s4 }
  0x1c   :  { %p4532_p10 = pnand %p4530_p9, %p4527_p8 }
  0x1e   :  { %4535 = shalt.err (!%p4532_p10)
}
  0x1f   :  { %s4536_s27 = scalar_lea.vmem %s71_s21, 16  ;;  %s4540_s28 = scalar_lea.vmem %s71_s21, 32 }
  0x20   :  { %p4537_p11 = scmp.ne.s32.totalorder %s71_s21, %s4536_s27  ;;  %p4541_p12 = scmp.lt.s32.totalorder %s71_s21, %s71_s21 }
  0x21   :  { %p4542_p13 = scmp.lt.s32.totalorder %s4540_s28, %s4536_s27 }
  0x23   :  { %p4543_p0 = por %p4542_p13, %p4541_p12 }
  0x25   :  { %p4544_p1 = pnand %p4543_p0, %p4537_p11 }
  0x27   :  { %4547 = shalt.err (!%p4544_p1)
}
  0x28   :  { %73 = dma.hbm_to_vmem [thread:$0]  %s5676_s4, 16, %s71_s21, [#allocation8]  }
  0x29   :  { %s4830_s29 = smov [#allocation10]   ;;  %s4831_s16 = smov [#allocation13]  }
  0x2a   :  { %s92_s30 = sshll.u32 %s4830_s29, 4  ;;  %s114_s17 = sshll.u32 %s4831_s16, 4  ;;  %s93_s30 = int_to_ptr.vmem [resolvable:$true] %s92_s30  ;;  %s115_s17 = int_to_ptr.vmem [resolvable:$true] %s114_s17 }
  0x2b   :  { %s4548_s22 = scalar_lea.hbm %s5678_s6, 16 }
  0x2c   :  { %p4549_p2 = scmp.ne.s32.totalorder %s5678_s6, %s4548_s22  ;;  %p4552_p3 = scmp.lt.u32.totalorder %s4548_s22, %s5678_s6 }
  0x2e   :  { %p4554_p4 = pnand %p4552_p3, %p4549_p2 }
  0x30   :  { %4557 = shalt.err (!%p4554_p4)
}
  0x31   :  { %s4558_s4 = scalar_lea.vmem %s93_s30, 16  ;;  %s4562_s21 = scalar_lea.vmem %s93_s30, 32 }
  0x32   :  { %p4559_p5 = scmp.ne.s32.totalorder %s93_s30, %s4558_s4  ;;  %p4563_p6 = scmp.lt.s32.totalorder %s93_s30, %s93_s30 }
  0x33   :  { %p4564_p7 = scmp.lt.s32.totalorder %s4562_s21, %s4558_s4 }
  0x35   :  { %p4565_p8 = por %p4564_p7, %p4563_p6 }
  0x37   :  { %p4566_p9 = pnand %p4565_p8, %p4559_p5 }
  0x39   :  { %4569 = shalt.err (!%p4566_p9)
}
  0x3a   :  { %95 = dma.hbm_to_vmem [thread:$0]  %s5678_s6, 16, %s93_s30, [#allocation11]  }
  0x3b   :  { %s4570_s29 = scalar_lea.hbm %s5680_s8, 16 }
  0x3c   :  { %p4571_p10 = scmp.ne.s32.totalorder %s5680_s8, %s4570_s29  ;;  %p4574_p11 = scmp.lt.u32.totalorder %s4570_s29, %s5680_s8 }
  0x3e   :  { %p4576_p12 = pnand %p4574_p11, %p4571_p10 }
  0x40   :  { %4579 = shalt.err (!%p4576_p12)
}
  0x41   :  { %s4580_s23 = scalar_lea.vmem %s115_s17, 16  ;;  %s4584_s24 = scalar_lea.vmem %s115_s17, 32 }
  0x42   :  { %p4581_p13 = scmp.ne.s32.totalorder %s115_s17, %s4580_s23  ;;  %p4585_p0 = scmp.lt.s32.totalorder %s115_s17, %s115_s17 }
  0x43   :  { %p4586_p1 = scmp.lt.s32.totalorder %s4584_s24, %s4580_s23 }
  0x45   :  { %p4587_p2 = por %p4586_p1, %p4585_p0 }
  0x47   :  { %p4588_p3 = pnand %p4587_p2, %p4581_p13 }
  0x49   :  { %4591 = shalt.err (!%p4588_p3)
}
  0x4a   :  { %117 = dma.hbm_to_vmem [thread:$0]  %s5680_s8, 16, %s115_s17, [#allocation14]  }
  0x4b   :  { %s4832_s25 = smov [#allocation16]   ;;  %s4833_s4 = smov [#allocation19]  }
  0x4c   :  { %s136_s26 = sshll.u32 %s4832_s25, 4  ;;  %s158_s21 = sshll.u32 %s4833_s4, 4  ;;  %s137_s26 = int_to_ptr.vmem [resolvable:$true] %s136_s26  ;;  %s159_s21 = int_to_ptr.vmem [resolvable:$true] %s158_s21 }
  0x4d   :  { %s4592_s2 = scalar_lea.hbm %s5682_s10, 16 }
  0x4e   :  { %p4593_p4 = scmp.ne.s32.totalorder %s5682_s10, %s4592_s2  ;;  %p4596_p5 = scmp.lt.u32.totalorder %s4592_s2, %s5682_s10 }
  0x50   :  { %p4598_p6 = pnand %p4596_p5, %p4593_p4 }
  0x52   :  { %4601 = shalt.err (!%p4598_p6)
}
  0x53   :  { %s4602_s8 = scalar_lea.vmem %s137_s26, 16  ;;  %s4606_s17 = scalar_lea.vmem %s137_s26, 32 }
  0x54   :  { %p4603_p7 = scmp.ne.s32.totalorder %s137_s26, %s4602_s8  ;;  %p4607_p8 = scmp.lt.s32.totalorder %s137_s26, %s137_s26 }
  0x55   :  { %p4608_p9 = scmp.lt.s32.totalorder %s4606_s17, %s4602_s8 }
  0x57   :  { %p4609_p10 = por %p4608_p9, %p4607_p8 }
  0x59   :  { %p4610_p11 = pnand %p4609_p10, %p4603_p7 }
  0x5b   :  { %4613 = shalt.err (!%p4610_p11)
}
  0x5c   :  { %139 = dma.hbm_to_vmem [thread:$0]  %s5682_s10, 16, %s137_s26, [#allocation17]  }
  0x5d   :  { %s4614_s6 = scalar_lea.hbm %s5684_s12, 16 }
  0x5e   :  { %p4615_p12 = scmp.ne.s32.totalorder %s5684_s12, %s4614_s6  ;;  %p4618_p13 = scmp.lt.u32.totalorder %s4614_s6, %s5684_s12 }
  0x60   :  { %p4620_p0 = pnand %p4618_p13, %p4615_p12 }
  0x62   :  { %4623 = shalt.err (!%p4620_p0)
}
  0x63   :  { %s4624_s28 = scalar_lea.vmem %s159_s21, 16  ;;  %s4628_s2 = scalar_lea.vmem %s159_s21, 32 }
  0x64   :  { %p4625_p1 = scmp.ne.s32.totalorder %s159_s21, %s4624_s28  ;;  %p4629_p2 = scmp.lt.s32.totalorder %s159_s21, %s159_s21 }
  0x65   :  { %p4630_p3 = scmp.lt.s32.totalorder %s4628_s2, %s4624_s28 }
  0x67   :  { %p4631_p4 = por %p4630_p3, %p4629_p2 }
  0x69   :  { %p4632_p5 = pnand %p4631_p4, %p4625_p1 }
  0x6b   :  { %4635 = shalt.err (!%p4632_p5)
}
  0x6c   :  { %161 = dma.hbm_to_vmem [thread:$0]  %s5684_s12, 16, %s159_s21, [#allocation20]  }
  0x6d   :  { %s4834_s19 = smov [#allocation2]   ;;  %s4636_s8 = scalar_lea.hbm %s5673_s1, 768 }
  0x6e   :  { %s35_s29 = sshll.u32 %s4834_s19, 4  ;;  %p4637_p6 = scmp.ne.s32.totalorder %s5673_s1, %s4636_s8  ;;  %s36_s29 = int_to_ptr.vmem [resolvable:$true] %s35_s29 }
  0x6f   :  { %p4640_p7 = scmp.lt.u32.totalorder %s4636_s8, %s5673_s1 }
  0x71   :  { %p4642_p8 = pnand %p4640_p7, %p4637_p6 }
  0x73   :  { %4645 = shalt.err (!%p4642_p8)
}
  0x74   :  { %s4646_s24 = scalar_lea.vmem %s36_s29, 768  ;;  %p4651_p10 = scmp.lt.s32.totalorder %s36_s29, %s36_s29 }
  0x75   :  { %p4647_p9 = scmp.ne.s32.totalorder %s36_s29, %s4646_s24  ;;  %p4652_p11 = scmp.lt.s32.totalorder %s4646_s24, %s4646_s24 }
  0x77   :  { %p4653_p12 = por %p4652_p11, %p4651_p10 }
  0x79   :  { %p4654_p13 = pnand %p4653_p12, %p4647_p9 }
  0x7b   :  { %4657 = shalt.err (!%p4654_p13)
}
  0x7c   :  { %s4835_s12 = smov 128   ;;  %s4836_s21 = smov 8  }
  0x7d   :  { %41 = dma.hbm_to_vmem [thread:$0]  %s5673_s1, 768, %s36_s29, [#allocation3], %s4835_s12, %s4835_s12, %s4836_s21  }
  0x7e   :  { %s4837_s25 = smov [#allocation6]   ;;  %s4838_s27 = smov [#allocation9]  }
  0x7f   :  { %s57_s4 = sshll.u32 %s4837_s25, 4  ;;  %s79_s28 = sshll.u32 %s4838_s27, 4  ;;  %s58_s4 = int_to_ptr.vmem [resolvable:$true] %s57_s4  ;;  %s80_s28 = int_to_ptr.vmem [resolvable:$true] %s79_s28 }
  0x80   :  { %s4658_s26 = scalar_lea.hbm %s5675_s3, 6144 }
  0x81   :  { %p4659_p0 = scmp.ne.s32.totalorder %s5675_s3, %s4658_s26  ;;  %p4662_p1 = scmp.lt.u32.totalorder %s4658_s26, %s5675_s3 }
  0x83   :  { %p4664_p2 = pnand %p4662_p1, %p4659_p0 }
  0x85   :  { %4667 = shalt.err (!%p4664_p2)
}
  0x86   :  { %s4668_s1 = scalar_lea.vmem %s58_s4, 6144  ;;  %p4673_p4 = scmp.lt.s32.totalorder %s58_s4, %s58_s4 }
  0x87   :  { %p4669_p3 = scmp.ne.s32.totalorder %s58_s4, %s4668_s1  ;;  %p4674_p5 = scmp.lt.s32.totalorder %s4668_s1, %s4668_s1 }
  0x89   :  { %p4675_p6 = por %p4674_p5, %p4673_p4 }
  0x8b   :  { %p4676_p7 = pnand %p4675_p6, %p4669_p3 }
  0x8d   :  { %4679 = shalt.err (!%p4676_p7)
}
  0x8e   :  { %63 = dma.hbm_to_vmem [thread:$0]  %s5675_s3, 6144, %s58_s4, [#allocation5], %s4835_s12, %s4835_s12, %s4836_s21  }
  0x8f   :  { %s4680_s23 = scalar_lea.hbm %s5677_s5, 3072 }
  0x90   :  { %p4681_p8 = scmp.ne.s32.totalorder %s5677_s5, %s4680_s23  ;;  %p4684_p9 = scmp.lt.u32.totalorder %s4680_s23, %s5677_s5 }
  0x92   :  { %p4686_p10 = pnand %p4684_p9, %p4681_p8 }
  0x94   :  { %4689 = shalt.err (!%p4686_p10)
}
  0x95   :  { %s4690_s27 = scalar_lea.vmem %s80_s28, 3072  ;;  %p4695_p12 = scmp.lt.s32.totalorder %s80_s28, %s80_s28 }
  0x96   :  { %p4691_p11 = scmp.ne.s32.totalorder %s80_s28, %s4690_s27  ;;  %p4696_p13 = scmp.lt.s32.totalorder %s4690_s27, %s4690_s27 }
  0x98   :  { %p4697_p0 = por %p4696_p13, %p4695_p12 }
  0x9a   :  { %p4698_p1 = pnand %p4697_p0, %p4691_p11 }
  0x9c   :  { %4701 = shalt.err (!%p4698_p1)
}
  0x9d   :  { %85 = dma.hbm_to_vmem [thread:$0]  %s5677_s5, 3072, %s80_s28, [#allocation8], %s4835_s12, %s4835_s12, %s4836_s21  }
  0x9e   :  { %s4839_s2 = smov [#allocation12]   ;;  %s4840_s26 = smov [#allocation15]  }
  0x9f   :  { %s101_s10 = sshll.u32 %s4839_s2, 4  ;;  %s123_s19 = sshll.u32 %s4840_s26, 4  ;;  %s102_s10 = int_to_ptr.vmem [resolvable:$true] %s101_s10  ;;  %s124_s19 = int_to_ptr.vmem [resolvable:$true] %s123_s19 }
  0xa0   :  { %s4702_s8 = scalar_lea.hbm %s5679_s7, 384 }
  0xa1   :  { %p4703_p2 = scmp.ne.s32.totalorder %s5679_s7, %s4702_s8  ;;  %p4706_p3 = scmp.lt.u32.totalorder %s4702_s8, %s5679_s7 }
  0xa3   :  { %p4708_p4 = pnand %p4706_p3, %p4703_p2 }
  0xa5   :  { %4711 = shalt.err (!%p4708_p4)
}
  0xa6   :  { %s4712_s5 = scalar_lea.vmem %s102_s10, 384  ;;  %p4717_p6 = scmp.lt.s32.totalorder %s102_s10, %s102_s10 }
  0xa7   :  { %p4713_p5 = scmp.ne.s32.totalorder %s102_s10, %s4712_s5  ;;  %p4718_p7 = scmp.lt.s32.totalorder %s4712_s5, %s4712_s5 }
  0xa9   :  { %p4719_p8 = por %p4718_p7, %p4717_p6 }
  0xab   :  { %p4720_p9 = pnand %p4719_p8, %p4713_p5 }
  0xad   :  { %4723 = shalt.err (!%p4720_p9)
}
  0xae   :  { %107 = dma.hbm_to_vmem [thread:$0]  %s5679_s7, 384, %s102_s10, [#allocation11], %s4835_s12, %s4835_s12, %s4836_s21  }
  0xaf   :  { %s4724_s6 = scalar_lea.hbm %s5681_s9, 96 }
  0xb0   :  { %p4725_p10 = scmp.ne.s32.totalorder %s5681_s9, %s4724_s6  ;;  %p4728_p11 = scmp.lt.u32.totalorder %s4724_s6, %s5681_s9 }
  0xb2   :  { %p4730_p12 = pnand %p4728_p11, %p4725_p10 }
  0xb4   :  { %4733 = shalt.err (!%p4730_p12)
}
  0xb5   :  { %s4734_s4 = scalar_lea.vmem %s124_s19, 96  ;;  %p4739_p0 = scmp.lt.s32.totalorder %s124_s19, %s124_s19 }
  0xb6   :  { %p4735_p13 = scmp.ne.s32.totalorder %s124_s19, %s4734_s4  ;;  %p4740_p1 = scmp.lt.s32.totalorder %s4734_s4, %s4734_s4 }
  0xb8   :  { %p4741_p2 = por %p4740_p1, %p4739_p0 }
  0xba   :  { %p4742_p3 = pnand %p4741_p2, %p4735_p13 }
  0xbc   :  { %4745 = shalt.err (!%p4742_p3)
}
  0xbd   :  { %s4841_s7 = smov 32   ;;  %s4842_s2 = smov 2  }
  0xbe   :  { %129 = dma.hbm_to_vmem [thread:$0]  %s5681_s9, 96, %s124_s19, [#allocation14], %s4841_s7, %s4841_s7, %s4842_s2  }
  0xbf   :  { %s4843_s16 = smov [#allocation18]   ;;  %s4844_s8 = smov [#allocation21]  }
  0xc0   :  { %s145_s18 = sshll.u32 %s4843_s16, 4  ;;  %s167_s1 = sshll.u32 %s4844_s8, 4  ;;  %s146_s18 = int_to_ptr.vmem [resolvable:$true] %s145_s18  ;;  %s168_s1 = int_to_ptr.vmem [resolvable:$true] %s167_s1 }
  0xc1   :  { %s4746_s20 = scalar_lea.hbm %s5683_s11, 384 }
  0xc2   :  { %p4747_p4 = scmp.ne.s32.totalorder %s5683_s11, %s4746_s20  ;;  %p4750_p5 = scmp.lt.u32.totalorder %s4746_s20, %s5683_s11 }
  0xc4   :  { %p4752_p6 = pnand %p4750_p5, %p4747_p4 }
  0xc6   :  { %4755 = shalt.err (!%p4752_p6)
}
  0xc7   :  { %s4756_s9 = scalar_lea.vmem %s146_s18, 384  ;;  %p4761_p8 = scmp.lt.s32.totalorder %s146_s18, %s146_s18 }
  0xc8   :  { %p4757_p7 = scmp.ne.s32.totalorder %s146_s18, %s4756_s9  ;;  %p4762_p9 = scmp.lt.s32.totalorder %s4756_s9, %s4756_s9 }
  0xca   :  { %p4763_p10 = por %p4762_p9, %p4761_p8 }
  0xcc   :  { %p4764_p11 = pnand %p4763_p10, %p4757_p7 }
  0xce   :  { %4767 = shalt.err (!%p4764_p11)
}
  0xcf   :  { %151 = dma.hbm_to_vmem [thread:$0]  %s5683_s11, 384, %s146_s18, [#allocation17], %s4835_s12, %s4835_s12, %s4836_s21  }
  0xd0   :  { %s4768_s25 = scalar_lea.hbm %s5685_s13, 3072 }
  0xd1   :  { %p4769_p12 = scmp.ne.s32.totalorder %s5685_s13, %s4768_s25  ;;  %p4772_p13 = scmp.lt.u32.totalorder %s4768_s25, %s5685_s13 }
  0xd3   :  { %p4774_p0 = pnand %p4772_p13, %p4769_p12 }
  0xd5   :  { %4777 = shalt.err (!%p4774_p0)
}
  0xd6   :  { %s4778_s2 = scalar_lea.vmem %s168_s1, 3072  ;;  %p4783_p2 = scmp.lt.s32.totalorder %s168_s1, %s168_s1 }
  0xd7   :  { %p4779_p1 = scmp.ne.s32.totalorder %s168_s1, %s4778_s2  ;;  %p4784_p3 = scmp.lt.s32.totalorder %s4778_s2, %s4778_s2 }
  0xd9   :  { %p4785_p4 = por %p4784_p3, %p4783_p2 }
  0xdb   :  { %p4786_p5 = pnand %p4785_p4, %p4779_p1 }
  0xdd   :  { %4789 = shalt.err (!%p4786_p5)
}
  0xde   :  { %173 = dma.hbm_to_vmem [thread:$0]  %s5685_s13, 3072, %s168_s1, [#allocation20], %s4835_s12, %s4835_s12, %s4836_s21  }
  0xdf   :  { %s4845_s26 = smov [#allocation22]   ;;  %s4790_s29 = scalar_lea.hbm %s5686_s14, 16 }
  0xe0   :  { %s180_s16 = sshll.u32 %s4845_s26, 4  ;;  %p4791_p6 = scmp.ne.s32.totalorder %s5686_s14, %s4790_s29  ;;  %s181_s16 = int_to_ptr.vmem [resolvable:$true] %s180_s16 }
  0xe1   :  { %p4794_p7 = scmp.lt.u32.totalorder %s4790_s29, %s5686_s14 }
  0xe3   :  { %p4796_p8 = pnand %p4794_p7, %p4791_p6 }
  0xe5   :  { %4799 = shalt.err (!%p4796_p8)
}
  0xe6   :  { %s4800_s22 = scalar_lea.vmem %s181_s16, 16  ;;  %s4804_s13 = scalar_lea.vmem %s181_s16, 32 }
  0xe7   :  { %p4801_p9 = scmp.ne.s32.totalorder %s181_s16, %s4800_s22  ;;  %p4805_p10 = scmp.lt.s32.totalorder %s181_s16, %s181_s16 }
  0xe8   :  { %p4806_p11 = scmp.lt.s32.totalorder %s4804_s13, %s4800_s22 }
  0xea   :  { %p4807_p12 = por %p4806_p11, %p4805_p10 }
  0xec   :  { %p4808_p13 = pnand %p4807_p12, %p4801_p9 }
  0xee   :  { %4811 = shalt.err (!%p4808_p13)
}
  0xef   :  { %183 = dma.hbm_to_vmem [thread:$0]  %s5686_s14, 16, %s181_s16, [#allocation23]  }
  0xf0   :  { %4812 = dma.done.wait [#allocation3], 768  }
  0xf1   :  { %4813 = vsyncadd [#allocation3], 4294966528 }
  0xf2   :  { %4814 = dma.done.wait [#allocation5], 6160  }
  0xf3   :  { %4815 = vsyncadd [#allocation5], 4294961136 }
  0xf4   :  { %4816 = dma.done.wait [#allocation8], 3088  }
  0xf5   :  { %4817 = vsyncadd [#allocation8], 4294964208 }
  0xf6   :  { %4818 = dma.done.wait [#allocation11], 400  }
  0xf7   :  { %4819 = vsyncadd [#allocation11], 4294966896 }
  0xf8   :  { %4820 = dma.done.wait [#allocation14], 112  }
  0xf9   :  { %4821 = vsyncadd [#allocation14], 4294967184 }
  0xfa   :  { %4822 = dma.done.wait [#allocation17], 400  }
  0xfb   :  { %4823 = vsyncadd [#allocation17], 4294966896 }
  0xfc   :  { %4824 = dma.done.wait [#allocation20], 3088  }
  0xfd   :  { %4825 = vsyncadd [#allocation20], 4294964208 }
  0xfe   :  { %4826 = dma.done.wait [#allocation23], 16  }
  0xff   :  { %4827 = vsyncadd [#allocation23], 4294967280  ;;  %v243_v0 = vlaneseq  ;;  %v4846_v1 = vmov 0.0|0.0   ;;  %vm289_vm0 = vcmask 1040384   ;;  %vm290_vm1 = vcmask 1042434   ;;  %v233_v9 = vld [vmem:[#allocation2 + $0x10] sm:$0xff] }
 0x100   :  { %4265 = vmatprep.subr.bf16.mxu0 %v4846_v1  ;;  %4454 = vmatprep.subr.bf16.mxu1 %v4846_v1  ;;  %vm4847_vm2 = vmmov 0   ;;  %v4848_v2 = vmov 0.0   ;;  %v4849_v3 = vmov 1983009808   ;;  %vm291_vm3 = vmor %vm289_vm0, %vm290_vm1  ;;  %vm292_vm4 = vcmask 1044484   ;;  %v234_v10 = vld [vmem:[#allocation2 + $0x18] sm:$0xff] }
 0x101   :  { %3948 = vmatprep.mubr.msk.f32.mxu0 %vm4847_vm2, %v4848_v2  ;;  %3951 = vmatprep.mubr.msk.f32.mxu1 %vm4847_vm2, %v4848_v2  ;;  %v241_v4 = vunpack.c.l.s4 %v4849_v3  ;;  %v244_v5 = vshrl.u32 %v243_v0, 7  ;;  %vm5124_vm5 = vmor %vm291_vm3, %vm292_vm4  ;;  %v226_v11 = vld [vmem:[%s5672_s0] sm:$0xff]  ;;  %vm294_vm6 = vcmask 1046534   ;;  %v4266_v12 = vpack.c.bf16 %v234_v10, %v233_v9  ;;  %v228_v16 = vld [vmem:[%s5672_s0 + $0x10] sm:$0xff] }
 0x102   :  { %v5134_v13 = vld.sshfl [vmem:[%s5672_s0 + $0x8] sm:$0x33 pattern:$0x76325410]  ;;  %v239_v14 = vcombine.high %v226_v11, %v226_v11  ;;  %v264_v19 = vcombine.high %v228_v16, %v228_v16  ;;  %vm5157_vm7 = vmor %vm5124_vm5, %vm294_vm6  ;;  %vm370_vm8 = vcmask 130048   ;;  %v641_v42 = vld [vmem:[#allocation2 + $0x20] sm:$0xff] }
 0x103   :  { %v242_v6 = vunpack.c.0.s8 %v241_v4  ;;  %v307_v17 = vrot.slane %v5134_v13, 7  ;;  %v263_v18 = vcombine.high %v5134_v13, %v5134_v13  ;;  %4267 = vmatpush3.bf16.msra.mxu0 %v4266_v12  ;;  %4455 = vmatpush3.bf16.msra.mxu1 %v4266_v12  ;;  %v5187_v37 = vld.sshfl [vmem:[%s5672_s0 + $0x18] sm:$0x33 pattern:$0x76325410]  ;;  %v642_v43 = vld [vmem:[#allocation2 + $0x28] sm:$0xff] }
 0x104   :  { %4268 = vmatprep.subr.bf16.mxu0 %v4846_v1  ;;  %4271 = vmatprep.subr.bf16.mxu1 %v4846_v1  ;;  %v4272_v55 = vpack.c.bf16 %v642_v43, %v641_v42  ;;  %v288_v59 = vcombine.high %v5187_v37, %v5187_v37  ;;  %v230_v62 = vld [vmem:[#allocation2] sm:$0xff]  ;;  %v231_v63 = vld [vmem:[#allocation2 + $0x8] sm:$0xff]  ;;  %v323_v3 = vrot.slane %v5187_v37, 7  ;;  %vm1413_vm9 = vcmask 523264  }
 0x105   :  { %v5122_v7 = vsub.s32 %v242_v6, %v244_v5  ;;  %v309_v27 = vrot.slane %v307_v17, 2  ;;  %v310_v28 = vrot.slane %v263_v18, 7  ;;  %vm1859_vm10 = vcmask 64512  }
 0x106   :  { %v326_v5 = vrot.slane %v288_v59, 7  ;;  %vm2137_vm11 = vcmask 1041408   ;;  %vm2140_vm12 = vcmask 1045504   ;;  %vm2227_vm13 = vcmask 15360  }
 0x107   :  { %v5137_v15 = vrot.slane %v226_v11, %v5122_v7  ;;  %v5146_v20 = vrot.slane %v228_v16, %v5122_v7  ;;  %v5149_v21 = vrot.slane %v239_v14, %v5122_v7  ;;  %v5164_v25 = vrot.slane %v264_v19, %v5122_v7 }
 0x108   :  { %v311_v34 = vsel %vm5157_vm7, %v309_v27, %v310_v28  ;;  %v325_v11 = vrot.slane %v323_v3, 2  ;;  %v4269_v16 = vpack.c.bf16 %v231_v63, %v230_v62  ;;  %v914_v62 = vld [vmem:[#allocation6 + $0xf0] sm:$0xff]  ;;  %v915_v63 = vld [vmem:[#allocation6 + $0xf8] sm:$0xff]  ;;  %vm2685_vm14 = vcmask 1046528  }
 0x109   :  { %v5153_v22 = vcombine.high %v5137_v15, %v5137_v15  ;;  %v3715_v24 = vrot.slane %v5137_v15, 9  ;;  %v5168_v26 = vcombine.high %v5146_v20, %v5146_v20  ;;  %v255_v29 = vcombine.high %v5149_v21, %v5149_v21 }
 0x10a   :  { %v301_v31 = vrot.slane %v5149_v21, 7  ;;  %v3716_v32 = vrot.slane %v5146_v20, 9  ;;  %v5178_v33 = vcombine.high %v5164_v25, %v5164_v25  ;;  %v317_v36 = vrot.slane %v5164_v25, 7 }
 0x10b   :  { %v298_v30 = vrot.slane %v5153_v22, 7  ;;  %v314_v35 = vrot.slane %v5168_v26, 7  ;;  %v304_v41 = vrot.slane %v255_v29, 7  ;;  %v457_v6 = vcombine.low %v5137_v15, %v5153_v22 }
 0x10c   :  { %v303_v40 = vrot.slane %v301_v31, 2  ;;  %v319_v46 = vrot.slane %v317_v36, 2  ;;  %v320_v47 = vrot.slane %v5178_v33, 7  ;;  %v458_v8 = vcombine.low %v5149_v21, %v255_v29 }
 0x10d   :  { %v299_v38 = vsel %vm5157_vm7, %v3715_v24, %v298_v30  ;;  %v300_v39 = vrot.slane %v298_v30, 2  ;;  %v315_v44 = vsel %vm5157_vm7, %v3716_v32, %v314_v35  ;;  %v316_v45 = vrot.slane %v314_v35, 2 }
 0x10e   :  { %v305_v49 = vsel %vm5157_vm7, %v303_v40, %v304_v41  ;;  %v306_v50 = vrot.slane %v304_v41, 2  ;;  %v345_v51 = vcombine.low %v311_v34, %v315_v44  ;;  %v321_v54 = vsel %vm5157_vm7, %v319_v46, %v320_v47  ;;  %v902_v44 = vld [vmem:[#allocation6 + $0x90] sm:$0xff] }
 0x10f   :  { %v302_v48 = vsel %vm5157_vm7, %v300_v39, %v301_v31  ;;  %v318_v53 = vsel %vm5157_vm7, %v316_v45, %v317_v36  ;;  %v322_v0 = vrot.slane %v320_v47, 2  ;;  %v643_v12 = vcombine.low %v5153_v22, %v5149_v21  ;;  %v903_v45 = vld [vmem:[#allocation6 + $0x98] sm:$0xff]  ;;  %v904_v47 = vld [vmem:[#allocation6 + $0xa0] sm:$0xff] }
 0x110   :  { %v328_v52 = vcombine.low %v299_v38, %v302_v48  ;;  %v308_v56 = vsel %vm5157_vm7, %v306_v50, %v307_v17  ;;  %v346_v57 = vcombine.low %v318_v53, %v321_v54  ;;  %v353_v58 = vrot.slane %v345_v51, %v5122_v7  ;;  %v905_v48 = vld [vmem:[#allocation6 + $0xa8] sm:$0xff]  ;;  %v906_v50 = vld [vmem:[#allocation6 + $0xb0] sm:$0xff]  ;;  %v907_v51 = vld [vmem:[#allocation6 + $0xb8] sm:$0xff] }
 0x111   :  { %v329_v60 = vcombine.low %v305_v49, %v308_v56  ;;  %v324_v10 = vsel %vm5157_vm7, %v322_v0, %v323_v3  ;;  %v644_v17 = vcombine.low %v255_v29, %v5134_v13  ;;  %v327_v19 = vsel %vm5157_vm7, %v325_v11, %v326_v5  ;;  %v908_v53 = vld [vmem:[#allocation6 + $0xc0] sm:$0xff]  ;;  %v909_v54 = vld [vmem:[#allocation6 + $0xc8] sm:$0xff]  ;;  %v910_v56 = vld [vmem:[#allocation6 + $0xd0] sm:$0xff] }
 0x112   :  { %v336_v61 = vrot.slane %v328_v52, %v5122_v7  ;;  %v360_v4 = vrot.slane %v346_v57, %v5122_v7  ;;  %v465_v15 = vrot.slane %v457_v6, %v5122_v7  ;;  %v472_v24 = vrot.slane %v458_v8, %v5122_v7  ;;  %v911_v57 = vld [vmem:[#allocation6 + $0xd8] sm:$0xff]  ;;  %v883_v0 = vld [vmem:[#allocation6] sm:$0xff] }
 0x113   :  { %v343_v9 = vrot.slane %v329_v60, %v5122_v7  ;;  %v362_v27 = vcombine.low %v324_v10, %v327_v19  ;;  %v651_v28 = vrot.slane %v643_v12, %v5122_v7  ;;  %v658_v30 = vrot.slane %v644_v17, %v5122_v7  ;;  %v913_v60 = vld [vmem:[#allocation6 + $0xe8] sm:$0xff]  ;;  %v3727_v10 = vld [vmem:[#allocation4] ss:$0 sm:$0xff] }
 0x114   :  { %v361_v14 = vcombine.low %v353_v58, %v360_v4  ;;  %v474_v21 = vcombine.low %v5134_v13, %v5146_v20  ;;  %v475_v22 = vcombine.low %v5168_v26, %v5164_v25  ;;  %v3723_v29 = vcombine.high %v5134_v13, %v5146_v20  ;;  %v884_v4 = vld [vmem:[#allocation6 + $0x8] sm:$0xff] }
 0x115   :  { %v344_v18 = vcombine.low %v336_v61, %v343_v9  ;;  %v661_v31 = vcombine.low %v5164_v25, %v5178_v33  ;;  %v369_v32 = vrot.slane %v362_v27, %v5122_v7  ;;  %v659_v34 = vcombine.low %v651_v28, %v658_v30 }
 0x116   :  { %3952 = vmatmul.mubr.msk.f32.vlgmr.msra.gmra.mrb[0].mxu1 %vm370_vm8, %v361_v14  ;;  %v668_v26 = vrot.slane %v3723_v29, %v5122_v7  ;;  %v473_v13 = vcombine.low %v465_v15, %v472_v24  ;;  %v482_v20 = vrot.slane %v474_v21, %v5122_v7  ;;  %v489_v25 = vrot.slane %v475_v22, %v5122_v7 }
 0x117   :  { %3949 = vmatmul.mubr.msk.f32.vlgmr.msra.gmra.mrb[0].mxu0 %vm370_vm8, %v344_v18  ;;  %4273 = vmatpush3.bf16.msra.mxu1 %v4272_v55  ;;  %v675_v35 = vrot.slane %v661_v31, %v5122_v7  ;;  %v677_v38 = vcombine.low %v5187_v37, %v288_v59  ;;  %v491_v40 = vcombine.low %v5178_v33, %v5187_v37  ;;  %v900_v33 = vld [vmem:[#allocation6 + $0x80] sm:$0xff]  ;;  %v901_v37 = vld [vmem:[#allocation6 + $0x88] sm:$0xff] }
 0x118   :  { %4270 = vmatpush3.bf16.msra.mxu0 %v4269_v16  ;;  %3954 = vmatprep.mubr.msk.f32.mxu1 %vm4847_vm2, %v4848_v2  ;;  %v490_v39 = vcombine.low %v482_v20, %v489_v25  ;;  %v4274_v43 = vpack.c.bf16 %v901_v37, %v900_v33  ;;  %v4278_v46 = vpack.c.bf16 %v903_v45, %v902_v44  ;;  %v912_v59 = vld [vmem:[#allocation6 + $0xe0] sm:$0xff] }
 0x119   :  { %3961 = vmatprep.mubr.msk.f32.mxu0 %vm4847_vm2, %v4848_v2  ;;  %v676_v36 = vcombine.low %v668_v26, %v675_v35  ;;  %v684_v41 = vrot.slane %v677_v38, %v5122_v7  ;;  %v498_v42 = vrot.slane %v491_v40, %v5122_v7  ;;  %v4282_v49 = vpack.c.bf16 %v905_v48, %v904_v47 }
 0x11a   :  { %3955 = vmatmul.mubr.msk.f32.gmra.mrb[2].mxu1 %vm370_vm8, %v369_v32  ;;  %4275 = vmatprep.subr.bf16.mxu1 %v4274_v43  ;;  %v4286_v52 = vpack.c.bf16 %v907_v51, %v906_v50  ;;  %v4290_v55 = vpack.c.bf16 %v909_v54, %v908_v53  ;;  %v4294_v58 = vpack.c.bf16 %v911_v57, %v910_v56 }
 0x11b   :  { %3974 = vmatprep.mubr.msk.f32.mxu1 %vm4847_vm2, %v4848_v2  ;;  %v4298_v61 = vpack.c.bf16 %v913_v60, %v912_v59  ;;  %v4302_v3 = vpack.c.bf16 %v915_v63, %v914_v62  ;;  %v5266_v5 = vpack.c.bf16 %v884_v4, %v883_v0  ;;  %v842_v12 = vcombine.high %v3727_v10, %v3727_v10 }
 0x11c   :  { %v5270_v16 = vrot.slane %v3727_v10, %v5122_v7 }
 0x11d   :  { %v856_v22 = vrot.slane %v842_v12, %v5122_v7 }
 0x11e   :  { %3975 = vmatmul.mubr.msk.f32.vlgmr.msra.gmra.mrb[4].mxu1 %vm370_vm8, %v659_v34  ;;  %v857_v34 = vcombine.high %v5270_v16, %v5270_v16 }
 0x11f   :  { %3962 = vmatmul.mubr.msk.f32.vlgmr.msra.gmra.mrb[0].mxu0 %vm370_vm8, %v473_v13  ;;  %3977 = vmatprep.mubr.msk.f32.mxu1 %vm4847_vm2, %v4848_v2  ;;  %v858_v44 = vcombine.high %v856_v22, %v856_v22 }
 0x120   :  { %3964 = vmatprep.mubr.msk.f32.mxu0 %vm4847_vm2, %v4848_v2  ;;  %4277 = vmatpush3.bf16.msra.mxu1 %v4274_v43 }
 0x121   :  { %4279 = vmatprep.subr.bf16.mxu1 %v4278_v46 }
 0x122   :  { %3978 = vmatmul.mubr.msk.f32.gmra.mrb[6].mxu1 %vm370_vm8, %v676_v36 }
 0x123   :  { %3965 = vmatmul.mubr.msk.f32.gmra.mrb[2].mxu0 %vm370_vm8, %v490_v39  ;;  %3980 = vmatprep.mubr.msk.f32.mxu1 %vm4847_vm2, %v4848_v2 }
 0x124   :  { %3967 = vmatprep.mubr.msk.f32.mxu0 %vm4847_vm2, %v4848_v2  ;;  %4281 = vmatpush3.bf16.msra.mxu1 %v4278_v46 }
 0x125   :  { %4283 = vmatprep.subr.bf16.mxu1 %v4282_v49 }
 0x126   :  { %3981 = vmatmul.mubr.msk.f32.gmra.mrb[8].mxu1 %vm370_vm8, %v684_v41 }
 0x127   :  { %3968 = vmatmul.mubr.msk.f32.gmra.mrb[4].mxu0 %vm370_vm8, %v498_v42 }
 0x128   :  { %4285 = vmatpush3.bf16.msra.mxu1 %v4282_v49 }
 0x129   :  { %4287 = vmatprep.subr.bf16.mxu1 %v4286_v52 }
 0x12c   :  { %4289 = vmatpush3.bf16.msra.mxu1 %v4286_v52 }
 0x12d   :  { %4291 = vmatprep.subr.bf16.mxu1 %v4290_v55 }
 0x130   :  { %4293 = vmatpush3.bf16.msra.mxu1 %v4290_v55 }
 0x131   :  { %4295 = vmatprep.subr.bf16.mxu1 %v4294_v58 }
 0x134   :  { %4297 = vmatpush3.bf16.msra.mxu1 %v4294_v58 }
 0x135   :  { %4299 = vmatprep.subr.bf16.mxu1 %v4298_v61 }
 0x138   :  { %4301 = vmatpush3.bf16.msra.mxu1 %v4298_v61 }
 0x139   :  { %4303 = vmatprep.subr.bf16.mxu1 %v4302_v3 }
 0x13c   :  { %4305 = vmatpush3.bf16.msra.mxu1 %v4302_v3 }
 0x13d   :  { %4307 = vmatprep.subr.bf16.mxu1 %v5266_v5 }
 0x1e9   :  { %v448_v6 = vpop.f32.mrb[0].mxu1 }
 0x1ea   :  { %v3953_v8 = vpop.f32.mrb[1].mxu1 }
 0x1ed   :  { %v453_v9 = vpop.f32.mrb[2].mxu1 }
 0x1ee   :  { %v3956_v11 = vpop.f32.mrb[3].mxu1 }
 0x1f1   :  { %v757_v14 = vpop.f32.mrb[4].mxu1 }
 0x1f2   :  { %v571_v17 = vpop.f32.mrb[0].mxu0  ;;  %v774_v18 = vcombine.high %v757_v14, %v757_v14  ;;  %v781_v19 = vrot.slane %v757_v14, %v5122_v7  ;;  %v3976_v15 = vpop.f32.mrb[5].mxu1 }
 0x1f3   :  { %v588_v24 = vcombine.high %v571_v17, %v571_v17  ;;  %v595_v27 = vrot.slane %v571_v17, %v5122_v7  ;;  %v3963_v28 = vpop.f32.mrb[1].mxu0 }
 0x1f4   :  { %v788_v30 = vrot.slane %v774_v18, %v5122_v7  ;;  %v789_v21 = vcombine.high %v781_v19, %v781_v19 }
 0x1f5   :  { %v602_v29 = vrot.slane %v588_v24, %v5122_v7  ;;  %v603_v31 = vcombine.high %v595_v27, %v595_v27  ;;  %v826_v32 = vadd.f32 %v781_v19, %v595_v27  ;;  %v762_v26 = vpop.f32.mrb[6].mxu1 }
 0x1f6   :  { %v790_v35 = vcombine.high %v788_v30, %v788_v30  ;;  %v576_v13 = vpop.f32.mrb[2].mxu0  ;;  %v791_v20 = vcombine.high %v762_v26, %v762_v26  ;;  %v798_v25 = vrot.slane %v762_v26, %v5122_v7  ;;  %v3979_v36 = vpop.f32.mrb[7].mxu1 }
 0x1f7   :  { %v604_v38 = vcombine.high %v602_v29, %v602_v29  ;;  %v827_v39 = vadd.f32 %v789_v21, %v603_v31  ;;  %v828_v40 = vadd.f32 %v788_v30, %v602_v29  ;;  %v5281_v41 = vadd.f32 %v5270_v16, %v826_v32  ;;  %v3966_v42 = vpop.f32.mrb[3].mxu0 }
 0x1f8   :  { %v577_v33 = vadd.f32 %v576_v13, %v448_v6  ;;  %v805_v37 = vrot.slane %v791_v20, %v5122_v7  ;;  %v806_v43 = vcombine.high %v798_v25, %v798_v25 }
 0x1f9   :  { %v829_v45 = vadd.f32 %v790_v35, %v604_v38  ;;  %v864_v46 = vadd.f32 %v857_v34, %v827_v39  ;;  %v865_v47 = vadd.f32 %v856_v22, %v828_v40  ;;  %v873_v48 = vmax.f32 %v5281_v41, 0.0  ;;  %v767_v49 = vpop.f32.mrb[8].mxu1 }
 0x1fa   :  { %v605_v50 = vcombine.high %v577_v33, %v577_v33  ;;  %v612_v51 = vrot.slane %v577_v33, %v5122_v7  ;;  %v807_v52 = vcombine.high %v805_v37, %v805_v37  ;;  %v581_v53 = vpop.f32.mrb[4].mxu0  ;;  %v814_v54 = vrot.slane %v767_v49, %v5122_v7  ;;  %v3982_v55 = vpop.f32.mrb[9].mxu1 }
 0x1fb   :  { %v5287_v56 = vmax.f32 %v864_v46, 0.0  ;;  %v5289_v57 = vmax.f32 %v865_v47, 0.0  ;;  %v3728_v58 = vrot.slane %v873_v48, 9  ;;  %v582_v59 = vadd.f32 %v581_v53, %v453_v9  ;;  %v3969_v60 = vpop.f32.mrb[5].mxu0 }
 0x1fc   :  { %v619_v61 = vrot.slane %v605_v50, %v5122_v7  ;;  %v620_v62 = vcombine.high %v612_v51, %v612_v51  ;;  %v830_v63 = vadd.f32 %v798_v25, %v612_v51  ;;  %v815_v0 = vcombine.high %v814_v54, %v814_v54 }
 0x1fd   :  { %v928_v3 = vrot.slane %v5287_v56, 7  ;;  %v931_v4 = vrot.slane %v5289_v57, 7  ;;  %v628_v6 = vrot.slane %v582_v59, %v5122_v7  ;;  %v866_v8 = vadd.f32 %v858_v44, %v829_v45 }
 0x1fe   :  { %v621_v10 = vcombine.high %v619_v61, %v619_v61  ;;  %v831_v11 = vadd.f32 %v806_v43, %v620_v62  ;;  %v832_v12 = vadd.f32 %v805_v37, %v619_v61  ;;  %v867_v14 = vadd.f32 %v5270_v16, %v830_v63 }
 0x1ff   :  { %v629_v17 = vcombine.high %v628_v6, %v628_v6  ;;  %v834_v9 = vadd.f32 %v814_v54, %v628_v6  ;;  %v876_v18 = vmax.f32 %v866_v8, 0.0  ;;  %v929_v19 = vsel %vm5157_vm7, %v3728_v58, %v928_v3 }
 0x200   :  { %v833_v15 = vadd.f32 %v807_v52, %v621_v10  ;;  %v868_v24 = vadd.f32 %v5270_v16, %v831_v11  ;;  %v869_v27 = vadd.f32 %v857_v34, %v832_v12  ;;  %v877_v28 = vmax.f32 %v867_v14, 0.0  ;;  %v886_v11 = vld [vmem:[#allocation6 + $0x18] sm:$0xff] }
 0x201   :  { %v835_v30 = vadd.f32 %v815_v0, %v629_v17  ;;  %v871_v21 = vadd.f32 %v858_v44, %v834_v9  ;;  %v930_v29 = vrot.slane %v928_v3, 2  ;;  %v933_v31 = vrot.slane %v931_v4, 2 }
 0x202   :  { %v870_v32 = vadd.f32 %v856_v22, %v833_v15  ;;  %v878_v26 = vmax.f32 %v868_v24, 0.0  ;;  %v879_v35 = vmax.f32 %v869_v27, 0.0  ;;  %v937_v13 = vrot.slane %v877_v28, 7 }
 0x203   :  { %v872_v20 = vadd.f32 %v5270_v16, %v835_v30  ;;  %v881_v25 = vmax.f32 %v871_v21, 0.0  ;;  %v932_v36 = vsel %vm5157_vm7, %v930_v29, %v931_v4  ;;  %v934_v38 = vrot.slane %v876_v18, 7 }
 0x204   :  { %v880_v39 = vmax.f32 %v870_v32, 0.0  ;;  %v3729_v40 = vrot.slane %v878_v26, 9  ;;  %v941_v42 = vrot.slane %v879_v35, 7  ;;  %v1080_v34 = vcombine.low %v878_v26, %v879_v35  ;;  %v887_v26 = vld [vmem:[#allocation6 + $0x20] sm:$0xff] }
 0x205   :  { %v882_v33 = vmax.f32 %v872_v20, 0.0  ;;  %v947_v37 = vrot.slane %v881_v25, 7  ;;  %v935_v43 = vsel %vm5157_vm7, %v933_v31, %v934_v38  ;;  %v936_v22 = vrot.slane %v934_v38, 2 }
 0x206   :  { %v942_v44 = vsel %vm5157_vm7, %v3729_v40, %v941_v42  ;;  %v943_v45 = vrot.slane %v941_v42, 2  ;;  %v944_v16 = vrot.slane %v880_v39, 7  ;;  %v1081_v46 = vcombine.low %v880_v39, %v881_v25  ;;  %v894_v40 = vld [vmem:[#allocation6 + $0x58] sm:$0xff] }
 0x207   :  { %v949_v47 = vrot.slane %v947_v37, 2  ;;  %v950_v49 = vrot.slane %v882_v33, 7  ;;  %v1209_v50 = vcombine.low %v881_v25, %v882_v33  ;;  %v938_v51 = vsel %vm5157_vm7, %v936_v22, %v937_v13  ;;  %v888_v13 = vld [vmem:[#allocation6 + $0x28] sm:$0xff]  ;;  %v891_v25 = vld [vmem:[#allocation6 + $0x40] sm:$0xff] }
 0x208   :  { %v945_v52 = vsel %vm5157_vm7, %v943_v45, %v944_v16  ;;  %v946_v53 = vrot.slane %v944_v16, 2  ;;  %v952_v54 = vcombine.low %v929_v19, %v932_v36  ;;  %v953_v55 = vcombine.low %v935_v43, %v938_v51  ;;  %v892_v36 = vld [vmem:[#allocation6 + $0x48] sm:$0xff]  ;;  %v898_v43 = vld [vmem:[#allocation6 + $0x78] sm:$0xff] }
 0x209   :  { %v969_v58 = vcombine.low %v942_v44, %v945_v52  ;;  %v951_v59 = vsel %vm5157_vm7, %v949_v47, %v950_v49  ;;  %v1063_v60 = vcombine.low %v873_v48, %v5287_v56  ;;  %v1064_v61 = vcombine.low %v5289_v57, %v876_v18  ;;  %v885_v48 = vld [vmem:[#allocation6 + $0x10] sm:$0xff]  ;;  %v1175_v44 = vld [vmem:[#allocation6 + $0x100] sm:$0xff]  ;;  %v1176_v45 = vld [vmem:[#allocation6 + $0x108] sm:$0xff] }
 0x20a   :  { %v948_v62 = vsel %vm5157_vm7, %v946_v53, %v947_v37  ;;  %v960_v63 = vrot.slane %v952_v54, %v5122_v7  ;;  %v967_v0 = vrot.slane %v953_v55, %v5122_v7  ;;  %v1088_v3 = vrot.slane %v1080_v34, %v5122_v7  ;;  %v895_v34 = vld [vmem:[#allocation6 + $0x60] sm:$0xff]  ;;  %v897_v37 = vld [vmem:[#allocation6 + $0x70] sm:$0xff]  ;;  %v1178_v47 = vld [vmem:[#allocation6 + $0x118] sm:$0xff] }
 0x20b   :  { %v970_v4 = vcombine.low %v948_v62, %v951_v59  ;;  %v977_v6 = vrot.slane %v969_v58, %v5122_v7  ;;  %v1071_v8 = vrot.slane %v1063_v60, %v5122_v7  ;;  %v1078_v10 = vrot.slane %v1064_v61, %v5122_v7  ;;  %v1180_v51 = vld [vmem:[#allocation6 + $0x128] sm:$0xff]  ;;  %v1181_v53 = vld [vmem:[#allocation6 + $0x130] sm:$0xff]  ;;  %v1182_v54 = vld [vmem:[#allocation6 + $0x138] sm:$0xff] }
 0x20c   :  { %v968_v41 = vcombine.low %v960_v63, %v967_v0  ;;  %v1095_v12 = vrot.slane %v1081_v46, %v5122_v7  ;;  %v1191_v14 = vcombine.low %v5287_v56, %v5289_v57  ;;  %v1192_v17 = vcombine.low %v876_v18, %v877_v28  ;;  %v889_v28 = vld [vmem:[#allocation6 + $0x30] sm:$0xff]  ;;  %v1183_v58 = vld [vmem:[#allocation6 + $0x140] sm:$0xff]  ;;  %v1184_v59 = vld [vmem:[#allocation6 + $0x148] sm:$0xff] }
 0x20d   :  { %v984_v9 = vrot.slane %v970_v4, %v5122_v7  ;;  %v1079_v19 = vcombine.low %v1071_v8, %v1078_v10  ;;  %v1208_v15 = vcombine.low %v879_v35, %v880_v39  ;;  %v1223_v24 = vrot.slane %v1209_v50, %v5122_v7  ;;  %v890_v35 = vld [vmem:[#allocation6 + $0x38] sm:$0xff]  ;;  %v893_v39 = vld [vmem:[#allocation6 + $0x50] sm:$0xff]  ;;  %v1179_v50 = vld [vmem:[#allocation6 + $0x120] sm:$0xff] }
 0x20e   :  { %4015 = vmatprep.mubr.f32.mxu1 %v968_v41  ;;  %v1096_v27 = vcombine.low %v1088_v3, %v1095_v12  ;;  %v1199_v30 = vrot.slane %v1191_v14, %v5122_v7  ;;  %v1206_v21 = vrot.slane %v1192_v17, %v5122_v7  ;;  %v4310_v31 = vpack.c.bf16 %v886_v11, %v885_v48  ;;  %v1177_v46 = vld [vmem:[#allocation6 + $0x110] sm:$0xff]  ;;  %v1186_v62 = vld [vmem:[#allocation6 + $0x158] sm:$0xff]  ;;  %v1187_v0 = vld [vmem:[#allocation6 + $0x160] sm:$0xff] }
 0x20f   :  { %v985_v29 = vcombine.low %v977_v6, %v984_v9  ;;  %v1216_v32 = vrot.slane %v1208_v15, %v5122_v7  ;;  %v4314_v18 = vpack.c.bf16 %v888_v13, %v887_v26  ;;  %v4318_v20 = vpack.c.bf16 %v890_v35, %v889_v28  ;;  %v1185_v61 = vld [vmem:[#allocation6 + $0x150] sm:$0xff]  ;;  %v1188_v3 = vld [vmem:[#allocation6 + $0x168] sm:$0xff]  ;;  %v1190_v8 = vld [vmem:[#allocation6 + $0x178] sm:$0xff] }
 0x210   :  { %v1207_v56 = vcombine.low %v1199_v30, %v1206_v21  ;;  %v4322_v38 = vpack.c.bf16 %v892_v36, %v891_v25  ;;  %v4326_v42 = vpack.c.bf16 %v894_v40, %v893_v39  ;;  %v4334_v22 = vpack.c.bf16 %v898_v43, %v897_v37  ;;  %v1189_v6 = vld [vmem:[#allocation6 + $0x170] sm:$0xff]  ;;  %v1324_v41 = vld [vmem:[#allocation9 + $0x40] sm:$0xff]  ;;  %v1327_v14 = vld [vmem:[#allocation9 + $0x58] sm:$0xff] }
 0x211   :  { %4016 = vmatmul.mubr.f32.vlgmr.msra.gmra.mrb[10].mxu1 %v985_v29  ;;  %v5334_v57 = vcombine.low %v1216_v32, %v1223_v24  ;;  %v4338_v16 = vpack.c.bf16 %v1176_v45, %v1175_v44  ;;  %v4342_v49 = vpack.c.bf16 %v1178_v47, %v1177_v46  ;;  %v4346_v52 = vpack.c.bf16 %v1180_v51, %v1179_v50  ;;  %v1325_v48 = vld [vmem:[#allocation9 + $0x48] sm:$0xff]  ;;  %v1326_v11 = vld [vmem:[#allocation9 + $0x50] sm:$0xff]  ;;  %v1328_v9 = vld [vmem:[#allocation9 + $0x60] sm:$0xff] }
 0x212   :  { %4309 = vmatpush3.bf16.msra.mxu1 %v5266_v5  ;;  %4050 = vmatprep.mubr.f32.mxu1 %v1079_v19  ;;  %v896_v5 = vld [vmem:[#allocation6 + $0x68] sm:$0xff]  ;;  %v4350_v55 = vpack.c.bf16 %v1182_v54, %v1181_v53  ;;  %v4354_v60 = vpack.c.bf16 %v1184_v59, %v1183_v58  ;;  %v4358_v63 = vpack.c.bf16 %v1186_v62, %v1185_v61  ;;  %v1330_v24 = vld [vmem:[#allocation9 + $0x70] sm:$0xff]  ;;  %v3730_v32 = vld [vmem:[#allocation7] ss:$0 sm:$0xff] }
 0x213   :  { %4311 = vmatprep.subr.bf16.mxu1 %v4310_v31  ;;  %v4330_v33 = vpack.c.bf16 %v896_v5, %v895_v34  ;;  %v4362_v4 = vpack.c.bf16 %v1188_v3, %v1187_v0  ;;  %v4366_v10 = vpack.c.bf16 %v1190_v8, %v1189_v6  ;;  %v4370_v12 = vpack.c.bf16 %v1325_v48, %v1324_v41  ;;  %v1329_v19 = vld [vmem:[#allocation9 + $0x68] sm:$0xff]  ;;  %v1315_v21 = vld [vmem:[#allocation9] sm:$0xff] }
 0x214   :  { %v4374_v17 = vpack.c.bf16 %v1327_v14, %v1326_v11  ;;  %v4378_v15 = vpack.c.bf16 %v1329_v19, %v1328_v9  ;;  %v1316_v29 = vld [vmem:[#allocation9 + $0x8] sm:$0xff]  ;;  %v1317_v11 = vld [vmem:[#allocation9 + $0x10] sm:$0xff] }
 0x215   :  { %4371 = vmatprep.subr.bf16.mxu0 %v4370_v12 }
 0x216   :  { %4313 = vmatpush3.bf16.msra.mxu1 %v4310_v31  ;;  %4373 = vmatpush3.bf16.msra.mxu0 %v4370_v12  ;;  %v5341_v31 = vpack.c.bf16 %v1316_v29, %v1315_v21  ;;  %v1318_v12 = vld [vmem:[#allocation9 + $0x18] sm:$0xff]  ;;  %v1321_v29 = vld [vmem:[#allocation9 + $0x30] sm:$0xff] }
 0x217   :  { %4315 = vmatprep.subr.bf16.mxu1 %v4314_v18  ;;  %4375 = vmatprep.subr.bf16.mxu0 %v4374_v17 }
 0x21a   :  { %4317 = vmatpush3.bf16.msra.mxu1 %v4314_v18  ;;  %4377 = vmatpush3.bf16.msra.mxu0 %v4374_v17 }
 0x21b   :  { %4319 = vmatprep.subr.bf16.mxu1 %v4318_v20  ;;  %4379 = vmatprep.subr.bf16.mxu0 %v4378_v15 }
 0x21e   :  { %4321 = vmatpush3.bf16.msra.mxu1 %v4318_v20  ;;  %4381 = vmatpush3.bf16.msra.mxu0 %v4378_v15  ;;  %v4390_v15 = vpack.c.bf16 %v1318_v12, %v1317_v11 }
 0x21f   :  { %4323 = vmatprep.subr.bf16.mxu1 %v4322_v38 }
 0x222   :  { %4325 = vmatpush3.bf16.msra.mxu1 %v4322_v38 }
 0x223   :  { %4327 = vmatprep.subr.bf16.mxu1 %v4326_v42 }
 0x226   :  { %4329 = vmatpush3.bf16.msra.mxu1 %v4326_v42 }
 0x227   :  { %4331 = vmatprep.subr.bf16.mxu1 %v4330_v33 }
 0x22a   :  { %4333 = vmatpush3.bf16.msra.mxu1 %v4330_v33 }
 0x22b   :  { %4335 = vmatprep.subr.bf16.mxu1 %v4334_v22 }
 0x22e   :  { %4337 = vmatpush3.bf16.msra.mxu1 %v4334_v22 }
 0x22f   :  { %4339 = vmatprep.subr.bf16.mxu1 %v4338_v16 }
 0x231   :  { %4051 = vmatmul.mubr.f32.vlgmr.msra.gmra.mrb[10].mxu1 %v1096_v27  ;;  %v1331_v27 = vld [vmem:[#allocation9 + $0x78] sm:$0xff] }
 0x232   :  { %4341 = vmatpush3.bf16.msra.mxu1 %v4338_v16  ;;  %4085 = vmatprep.mubr.f32.mxu1 %v1207_v56  ;;  %v4382_v30 = vpack.c.bf16 %v1331_v27, %v1330_v24  ;;  %v1319_v27 = vld [vmem:[#allocation9 + $0x20] sm:$0xff] }
 0x233   :  { %4343 = vmatprep.subr.bf16.mxu1 %v4342_v49 }
 0x234   :  { %4383 = vmatprep.subr.bf16.mxu0 %v4382_v30 }
 0x235   :  { %4385 = vmatpush3.bf16.msra.mxu0 %v4382_v30  ;;  %v1320_v30 = vld [vmem:[#allocation9 + $0x28] sm:$0xff] }
 0x236   :  { %4345 = vmatpush3.bf16.msra.mxu1 %v4342_v49  ;;  %4387 = vmatprep.subr.bf16.mxu0 %v5341_v31  ;;  %v4394_v21 = vpack.c.bf16 %v1320_v30, %v1319_v27 }
 0x237   :  { %4347 = vmatprep.subr.bf16.mxu1 %v4346_v52 }
 0x23a   :  { %4349 = vmatpush3.bf16.msra.mxu1 %v4346_v52 }
 0x23b   :  { %4351 = vmatprep.subr.bf16.mxu1 %v4350_v55 }
 0x23e   :  { %4353 = vmatpush3.bf16.msra.mxu1 %v4350_v55 }
 0x23f   :  { %4355 = vmatprep.subr.bf16.mxu1 %v4354_v60 }
 0x242   :  { %4357 = vmatpush3.bf16.msra.mxu1 %v4354_v60 }
 0x243   :  { %4359 = vmatprep.subr.bf16.mxu1 %v4358_v63 }
 0x246   :  { %4361 = vmatpush3.bf16.msra.mxu1 %v4358_v63 }
 0x247   :  { %4363 = vmatprep.subr.bf16.mxu1 %v4362_v4 }
 0x24a   :  { %4365 = vmatpush3.bf16.msra.mxu1 %v4362_v4 }
 0x24b   :  { %4367 = vmatprep.subr.bf16.mxu1 %v4366_v10 }
 0x24e   :  { %4369 = vmatpush3.bf16.msra.mxu1 %v4366_v10 }
 0x24f   :  { %4442 = vmatprep.subr.bf16.mxu1 %v4846_v1 }
 0x251   :  { %4086 = vmatmul.mubr.f32.vlgmr.msra.gmra.mrb[10].mxu1 %v5334_v57 }
 0x252   :  { %4256 = vmatprep.mubr.msk.f32.mxu1 %vm4847_vm2, %v4848_v2 }
 0x324   :  { %v4087_v26 = vpop.f32.mrb[10].mxu1 }
 0x325   :  { %v1312_v13 = vadd.f32 %v4087_v26, %v3730_v32  ;;  %v1293_v56 = vpop.f32.mrb[11].mxu1 }
 0x326   :  { %v1311_v57 = vadd.f32 %v3730_v32, %v1293_v56  ;;  %v1322_v32 = vld [vmem:[#allocation9 + $0x38] sm:$0xff]  ;;  %v1632_v56 = vld [vmem:[#allocation9 + $0x88] sm:$0xff] }
 0x327   :  { %v1314_v18 = vmax.f32 %v1312_v13, 0.0  ;;  %v4398_v26 = vpack.c.bf16 %v1322_v32, %v1321_v29  ;;  %v1631_v13 = vld [vmem:[#allocation9 + $0x80] sm:$0xff] }
 0x328   :  { %v1313_v28 = vmax.f32 %v1311_v57, 0.0 }
 0x329   :  { %v1351_v35 = vcombine.high %v1314_v18, %v1314_v18  ;;  %v1358_v20 = vrot.slane %v1314_v18, %v5122_v7  ;;  %v4402_v18 = vpack.c.bf16 %v1632_v56, %v1631_v13 }
 0x32a   :  { %v1334_v25 = vcombine.high %v1313_v28, %v1313_v28  ;;  %v1341_v36 = vrot.slane %v1313_v28, %v5122_v7  ;;  %v1633_v28 = vld [vmem:[#allocation9 + $0x90] sm:$0xff] }
 0x32b   :  { %v5347_v38 = vrot.slane %v1351_v35, %v5122_v7  ;;  %v5349_v39 = vcombine.high %v1358_v20, %v1358_v20  ;;  %v3732_v49 = vrot.slane %v1358_v20, 9  ;;  %v1634_v35 = vld [vmem:[#allocation9 + $0x98] sm:$0xff] }
 0x32c   :  { %v1348_v40 = vrot.slane %v1334_v25, %v5122_v7  ;;  %v1349_v42 = vcombine.high %v1341_v36, %v1341_v36  ;;  %v3731_v47 = vrot.slane %v1341_v36, 9  ;;  %v1635_v25 = vld [vmem:[#allocation9 + $0xa0] sm:$0xff] }
 0x32d   :  { %v5354_v34 = vcombine.high %v5347_v38, %v5347_v38  ;;  %v1380_v5 = vrot.slane %v5349_v39, 7  ;;  %v1383_v33 = vrot.slane %v5347_v38, 7  ;;  %v1510_v57 = vcombine.low %v5349_v39, %v5347_v38  ;;  %v1638_v39 = vld [vmem:[#allocation9 + $0xb8] sm:$0xff] }
 0x32e   :  { %v1370_v37 = vrot.slane %v1349_v42, 7  ;;  %v1493_v43 = vcombine.low %v1341_v36, %v1349_v42  ;;  %v1350_v22 = vcombine.high %v1348_v40, %v1348_v40  ;;  %v1373_v44 = vrot.slane %v1348_v40, 7  ;;  %v1636_v36 = vld [vmem:[#allocation9 + $0xa8] sm:$0xff] }
 0x32f   :  { %v1382_v45 = vrot.slane %v1380_v5, 2  ;;  %v1385_v16 = vrot.slane %v1383_v33, 2  ;;  %v1386_v46 = vrot.slane %v5354_v34, 7  ;;  %v1494_v58 = vcombine.low %v1348_v40, %v1358_v20 }
 0x330   :  { %v1372_v50 = vrot.slane %v1370_v37, 2  ;;  %v1375_v51 = vrot.slane %v1373_v44, 2  ;;  %v1376_v52 = vrot.slane %v1350_v22, 7  ;;  %v1371_v55 = vsel %vm5157_vm7, %v3731_v47, %v1370_v37 }
 0x331   :  { %v1384_v53 = vsel %vm5157_vm7, %v1382_v45, %v1383_v33  ;;  %v1387_v54 = vsel %vm5157_vm7, %v1385_v16, %v1386_v46  ;;  %v1381_v61 = vsel %vm5157_vm7, %v3732_v49, %v1380_v5  ;;  %v1501_v62 = vrot.slane %v1493_v43, %v5122_v7  ;;  %v1821_v43 = vld [vmem:[#allocation12 + $0x8] sm:$0xff]  ;;  %v3740_v45 = vld [vmem:[#allocation10] ss:$0 sm:$0xff] }
 0x332   :  { %v1374_v59 = vsel %vm5157_vm7, %v1372_v50, %v1373_v44  ;;  %v1377_v60 = vsel %vm5157_vm7, %v1375_v51, %v1376_v52  ;;  %v1508_v3 = vrot.slane %v1494_v58, %v5122_v7  ;;  %v1405_v4 = vcombine.low %v1384_v53, %v1387_v54 }
 0x333   :  { %v1388_v63 = vcombine.low %v1371_v55, %v1374_v59  ;;  %v1389_v0 = vcombine.low %v1377_v60, %v1381_v61  ;;  %v1639_v6 = vcombine.low %v1349_v42, %v1348_v40  ;;  %v3737_v8 = vcombine.high %v1348_v40, %v1358_v20  ;;  %v1637_v42 = vld [vmem:[#allocation9 + $0xb0] sm:$0xff] }
 0x334   :  { %v1509_v48 = vcombine.low %v1501_v62, %v1508_v3  ;;  %v1412_v19 = vrot.slane %v1405_v4, %v5122_v7  ;;  %v4406_v20 = vpack.c.bf16 %v1634_v35, %v1633_v28  ;;  %v4410_v40 = vpack.c.bf16 %v1636_v36, %v1635_v25 }
 0x335   :  { %v1396_v10 = vrot.slane %v1388_v63, %v5122_v7  ;;  %v1403_v41 = vrot.slane %v1389_v0, %v5122_v7  ;;  %v1647_v14 = vrot.slane %v1639_v6, %v5122_v7  ;;  %v1654_v17 = vrot.slane %v3737_v8, %v5122_v7 }
 0x336   :  { %v4414_v5 = vpack.c.bf16 %v1638_v39, %v1637_v42  ;;  %v1656_v33 = vcombine.low %v5347_v38, %v5354_v34  ;;  %v1795_v38 = vrot.slane %v3740_v45, %v5122_v7  ;;  %v1788_v46 = vcombine.high %v3740_v45, %v3740_v45 }
 0x337   :  { %v1404_v9 = vcombine.low %v1396_v10, %v1403_v41  ;;  %v1655_v24 = vcombine.low %v1647_v14, %v1654_v17 }
 0x338   :  { %v1663_v37 = vrot.slane %v1656_v33, %v5122_v7  ;;  %v1803_v52 = vcombine.high %v1795_v38, %v1795_v38  ;;  %v1802_v61 = vrot.slane %v1788_v46, %v5122_v7 }
 0x339   :  { %4104 = vmatprep.mubr.msk.f32.mxu0 %vm1413_vm9, %v1404_v9 }
 0x33a   :  { %4105 = vmatmul.mubr.msk.f32.vlgmr.msra.gmra.mrb[6].mxu0 %vm1413_vm9, %v1412_v19 }
 0x33b   :  { %4389 = vmatpush3.bf16.msra.mxu0 %v5341_v31  ;;  %4123 = vmatprep.mubr.msk.f32.mxu0 %vm1413_vm9, %v1509_v48  ;;  %v1517_v31 = vrot.slane %v1510_v57, %v5122_v7 }
 0x33c   :  { %4391 = vmatprep.subr.bf16.mxu0 %v4390_v15 }
 0x33f   :  { %4393 = vmatpush3.bf16.msra.mxu0 %v4390_v15 }
 0x340   :  { %4395 = vmatprep.subr.bf16.mxu0 %v4394_v21 }
 0x343   :  { %4397 = vmatpush3.bf16.msra.mxu0 %v4394_v21 }
 0x344   :  { %4399 = vmatprep.subr.bf16.mxu0 %v4398_v26 }
 0x347   :  { %4401 = vmatpush3.bf16.msra.mxu0 %v4398_v26 }
 0x348   :  { %4403 = vmatprep.subr.bf16.mxu0 %v4402_v18 }
 0x34a   :  { %4124 = vmatmul.mubr.msk.f32.vlgmr.msra.gmra.mrb[6].mxu0 %vm1413_vm9, %v1517_v31 }
 0x34b   :  { %4405 = vmatpush3.bf16.msra.mxu0 %v4402_v18  ;;  %4142 = vmatprep.mubr.msk.f32.mxu0 %vm1413_vm9, %v1655_v24 }
 0x34c   :  { %4407 = vmatprep.subr.bf16.mxu0 %v4406_v20 }
 0x34f   :  { %4409 = vmatpush3.bf16.msra.mxu0 %v4406_v20 }
 0x350   :  { %4411 = vmatprep.subr.bf16.mxu0 %v4410_v40 }
 0x353   :  { %4413 = vmatpush3.bf16.msra.mxu0 %v4410_v40 }
 0x354   :  { %4415 = vmatprep.subr.bf16.mxu0 %v4414_v5 }
 0x357   :  { %4417 = vmatpush3.bf16.msra.mxu0 %v4414_v5 }
 0x358   :  { %4145 = vmatprep.subr.mxu0 %v4848_v2 }
 0x35a   :  { %4143 = vmatmul.mubr.msk.f32.vlgmr.msra.gmra.mrb[8].mxu0 %vm1413_vm9, %v1663_v37 }
 0x35b   :  { %4147 = vmatprep.mubr.msk.f32.mxu0 %vm4847_vm2, %v4848_v2  ;;  %4146 = vmatpush3.msra.mxu0 %v1821_v43 }
 0x35c   :  { %4150 = vmatprep.subr.mxu0 %v4848_v2 }
 0x41d   :  { %v4125_v22 = vpop.f32.mrb[6].mxu0 }
 0x41e   :  { %v1588_v44 = vpop.f32.mrb[7].mxu0  ;;  %v1622_v34 = vrot.slane %v4125_v22, %v5122_v7 }
 0x41f   :  { %v1599_v16 = vcombine.high %v1588_v44, %v1588_v44  ;;  %v1606_v47 = vrot.slane %v1588_v44, %v5122_v7 }
 0x420   :  { %v1623_v58 = vcombine.high %v1622_v34, %v1622_v34 }
 0x421   :  { %v1613_v50 = vrot.slane %v1599_v16, %v5122_v7  ;;  %v1614_v62 = vcombine.high %v1606_v47, %v1606_v47 }
 0x423   :  { %v1615_v4 = vcombine.high %v1613_v50, %v1613_v50 }
 0x42d   :  { %v4144_v49 = vpop.f32.mrb[8].mxu0 }
 0x42e   :  { %v1768_v51 = vrot.slane %v4144_v49, %v5122_v7  ;;  %v1734_v53 = vpop.f32.mrb[9].mxu0  ;;  %v1819_v49 = vld [vmem:[#allocation12] sm:$0xff] }
 0x42f   :  { %v1745_v54 = vcombine.high %v1734_v53, %v1734_v53  ;;  %v1752_v55 = vrot.slane %v1734_v53, %v5122_v7 }
 0x430   :  { %v1769_v59 = vcombine.high %v1768_v51, %v1768_v51  ;;  %v1780_v60 = vadd.f32 %v1768_v51, %v1622_v34  ;;  %v2145_v51 = vld [vmem:[#allocation15 + $0x2] sm:$0x3] }
 0x431   :  { %v1759_v63 = vrot.slane %v1745_v54, %v5122_v7  ;;  %v1760_v0 = vcombine.high %v1752_v55, %v1752_v55  ;;  %v1776_v3 = vadd.f32 %v1752_v55, %v1606_v47 }
 0x432   :  { %v1781_v6 = vadd.f32 %v1769_v59, %v1623_v58  ;;  %v1811_v8 = vadd.f32 %v1803_v52, %v1780_v60  ;;  %v3746_v58 = vld [vmem:[#allocation13] ss:$0 sm:$0xff] }
 0x433   :  { %v1761_v10 = vcombine.high %v1759_v63, %v1759_v63  ;;  %v1777_v41 = vadd.f32 %v1760_v0, %v1614_v62  ;;  %v1778_v48 = vadd.f32 %v1759_v63, %v1613_v50  ;;  %v1807_v11 = vadd.f32 %v1795_v38, %v1776_v3  ;;  %v2025_v50 = vld [vmem:[#allocation12 + $0x10] sm:$0xff] }
 0x434   :  { %v1812_v12 = vadd.f32 %v1802_v61, %v1781_v6  ;;  %v1817_v14 = vmax.f32 %v1811_v8, 0.0 }
 0x435   :  { %v1779_v17 = vadd.f32 %v1761_v10, %v1615_v4  ;;  %v1808_v9 = vadd.f32 %v1803_v52, %v1777_v41  ;;  %v1809_v19 = vadd.f32 %v1802_v61, %v1778_v48  ;;  %v1813_v15 = vmax.f32 %v1807_v11, 0.0  ;;  %v5427_v52 = vld [vmem:[#allocation15] sm:$0x3] }
 0x436   :  { %v1818_v24 = vmax.f32 %v1812_v12, 0.0  ;;  %v1837_v27 = vrot.slane %v1817_v14, 7 }
 0x437   :  { %v1810_v30 = vadd.f32 %v1795_v38, %v1779_v17  ;;  %v1814_v21 = vmax.f32 %v1808_v9, 0.0  ;;  %v1815_v29 = vmax.f32 %v1809_v19, 0.0  ;;  %v3741_v57 = vrot.slane %v1813_v15, 9 }
 0x438   :  { %v1839_v32 = vrot.slane %v1837_v27, 2  ;;  %v1840_v26 = vrot.slane %v1818_v24, 7  ;;  %v2027_v13 = vcombine.low %v1817_v14, %v1818_v24 }
 0x439   :  { %v1816_v56 = vmax.f32 %v1810_v30, 0.0  ;;  %v1830_v18 = vrot.slane %v1814_v21, 7  ;;  %v1932_v28 = vcombine.low %v1813_v15, %v1814_v21  ;;  %v1833_v20 = vrot.slane %v1815_v29, 7 }
 0x43a   :  { %v1841_v35 = vsel %vm5157_vm7, %v1839_v32, %v1840_v26  ;;  %v2041_v31 = vrot.slane %v2027_v13, %v5122_v7  ;;  %v2026_v25 = vcombine.low %v1814_v21, %v1815_v29 }
 0x43b   :  { %v1831_v36 = vsel %vm5157_vm7, %v3741_v57, %v1830_v18  ;;  %v1832_v40 = vrot.slane %v1830_v18, 2  ;;  %v3742_v42 = vrot.slane %v1816_v56, 9  ;;  %v1933_v39 = vcombine.low %v1816_v56, %v1817_v14 }
 0x43c   :  { %v2034_v5 = vrot.slane %v2026_v25, %v5122_v7  ;;  %v1940_v43 = vrot.slane %v1932_v28, %v5122_v7 }
 0x43d   :  { %v1834_v33 = vsel %vm5157_vm7, %v1832_v40, %v1833_v20  ;;  %v1838_v37 = vsel %vm5157_vm7, %v3742_v42, %v1837_v27  ;;  %v1947_v22 = vrot.slane %v1933_v39, %v5122_v7 }
 0x43e   :  { %v1842_v44 = vcombine.low %v1831_v36, %v1834_v33  ;;  %v1843_v45 = vcombine.low %v1838_v37, %v1841_v35  ;;  %v2042_v16 = vcombine.low %v2034_v5, %v2041_v31 }
 0x43f   :  { %v1948_v38 = vcombine.low %v1940_v43, %v1947_v22 }
 0x440   :  { %v1850_v34 = vrot.slane %v1842_v44, %v5122_v7  ;;  %v1857_v46 = vrot.slane %v1843_v45, %v5122_v7 }
 0x442   :  { %v1858_v47 = vcombine.low %v1850_v34, %v1857_v46 }
 0x444   :  { %4148 = vmatmul.mubr.msk.f32.vlgmr.msra.gmra.mrb[10].mxu0 %vm1859_vm10, %v1858_v47 }
 0x445   :  { %4151 = vmatpush3.msra.mxu0 %v1819_v49  ;;  %4152 = vmatprep.mubr.msk.f32.mxu0 %vm4847_vm2, %v4848_v2 }
 0x446   :  { %4155 = vmatprep.subr.mxu0 %v4848_v2 }
 0x44c   :  { %4153 = vmatmul.mubr.msk.f32.vlgmr.msra.gmra.mrb[10].mxu0 %vm1859_vm10, %v1948_v38 }
 0x44d   :  { %4156 = vmatpush3.msra.mxu0 %v2025_v50  ;;  %4157 = vmatprep.mubr.msk.f32.mxu0 %vm4847_vm2, %v4848_v2 }
 0x44e   :  { %4160 = vmatprep.subr.msk.mxu0 %vm2137_vm11, %v2145_v51 }
 0x450   :  { %4158 = vmatmul.mubr.msk.f32.vlgmr.msra.gmra.mrb[12].mxu0 %vm1859_vm10, %v2042_v16 }
 0x451   :  { %4161 = vmatpush3.msk.msra.mxu0 %vm2137_vm11, %v2145_v51 }
 0x452   :  { %4165 = vmatprep.subr.msk.mxu0 %vm2137_vm11, %v5427_v52 }
 0x51f   :  { %v2017_v53 = vpop.f32.mrb[10].mxu0 }
 0x520   :  { %v4154_v54 = vpop.f32.mrb[11].mxu0  ;;  %v2022_v59 = vcombine.high %v2017_v53, %v2017_v53 }
 0x523   :  { %v2111_v55 = vpop.f32.mrb[12].mxu0 }
 0x524   :  { %v2116_v60 = vcombine.high %v2111_v55, %v2111_v55  ;;  %v2118_v61 = vadd.f32 %v2111_v55, %v2017_v53  ;;  %v4159_v62 = vpop.f32.mrb[13].mxu0 }
 0x526   :  { %v2119_v63 = vadd.f32 %v2116_v60, %v2022_v59  ;;  %v2127_v0 = vadd.f32 %v3746_v58, %v2118_v61  ;;  %v2451_v60 = vld [vmem:[#allocation15 + $0x4] sm:$0x3] }
 0x528   :  { %v2128_v3 = vadd.f32 %v3746_v58, %v2119_v63  ;;  %v2129_v4 = vmax.f32 %v2127_v0, 0.0 }
 0x52a   :  { %v2130_v6 = vmax.f32 %v2128_v3, 0.0  ;;  %v2133_v8 = vrot.slane %v2129_v4, 6  ;;  %v2681_v3 = vld [vmem:[#allocation18 + $0x8] sm:$0xff]  ;;  %v3759_v4 = vld [vmem:[#allocation16] ss:$0 sm:$0xff] }
 0x52c   :  { %v2134_v10 = vrot.slane %v2130_v6, 6  ;;  %v2138_v41 = vsel %vm2137_vm11, 0.0, %v2133_v8 }
 0x52d   :  { %v2141_v48 = vsel %vm2140_vm12, %v2138_v41, 0.0 }
 0x52e   :  { %v2139_v11 = vsel %vm2137_vm11, 0.0, %v2134_v10  ;;  %v2148_v12 = vcombine.high %v2141_v48, %v2141_v48  ;;  %v2155_v14 = vrot.slane %v2141_v48, %v5122_v7  ;;  %v2611_v10 = vrot.slane %v3759_v4, %v5122_v7 }
 0x52f   :  { %v2142_v17 = vsel %vm2140_vm12, %v2139_v11, 0.0  ;;  %v2604_v11 = vcombine.high %v3759_v4, %v3759_v4 }
 0x530   :  { %v2162_v9 = vrot.slane %v2148_v12, %v5122_v7  ;;  %v2163_v19 = vcombine.high %v2155_v14, %v2155_v14  ;;  %v2165_v15 = vcombine.high %v2142_v17, %v2142_v17  ;;  %v2172_v24 = vrot.slane %v2142_v17, %v5122_v7 }
 0x531   :  { %v3747_v32 = vrot.slane %v2155_v14, 9 }
 0x532   :  { %v2179_v27 = vrot.slane %v2165_v15, %v5122_v7  ;;  %v2180_v30 = vcombine.high %v2172_v24, %v2172_v24  ;;  %v2164_v21 = vcombine.high %v2162_v9, %v2162_v9  ;;  %v2184_v29 = vrot.slane %v2163_v19, 7 }
 0x533   :  { %v2187_v26 = vrot.slane %v2162_v9, 7  ;;  %v2310_v13 = vcombine.low %v2155_v14, %v2163_v19  ;;  %v2311_v56 = vcombine.low %v2162_v9, %v2172_v24  ;;  %v3748_v35 = vrot.slane %v2172_v24, 9 }
 0x534   :  { %v2181_v57 = vcombine.high %v2179_v27, %v2179_v27  ;;  %v2186_v18 = vrot.slane %v2184_v29, 2  ;;  %v2190_v28 = vrot.slane %v2164_v21, 7  ;;  %v2194_v20 = vrot.slane %v2180_v30, 7 }
 0x535   :  { %v2189_v31 = vrot.slane %v2187_v26, 2  ;;  %v2197_v25 = vrot.slane %v2179_v27, 7  ;;  %v2318_v36 = vrot.slane %v2310_v13, %v5122_v7  ;;  %v2185_v40 = vsel %vm5157_vm7, %v3747_v32, %v2184_v29 }
 0x536   :  { %v2188_v42 = vsel %vm5157_vm7, %v2186_v18, %v2187_v26  ;;  %v2200_v39 = vrot.slane %v2181_v57, 7  ;;  %v2325_v5 = vrot.slane %v2311_v56, %v5122_v7  ;;  %v2195_v37 = vsel %vm5157_vm7, %v3748_v35, %v2194_v20 }
 0x537   :  { %v2191_v33 = vsel %vm5157_vm7, %v2189_v31, %v2190_v28  ;;  %v2196_v43 = vrot.slane %v2194_v20, 2  ;;  %v2202_v22 = vcombine.low %v2185_v40, %v2188_v42  ;;  %v2199_v45 = vrot.slane %v2197_v25, 2 }
 0x538   :  { %v2203_v44 = vcombine.low %v2191_v33, %v2195_v37  ;;  %v2326_v16 = vcombine.low %v2318_v36, %v2325_v5  ;;  %v2452_v46 = vcombine.low %v2163_v19, %v2162_v9  ;;  %v3755_v47 = vcombine.high %v2162_v9, %v2172_v24 }
 0x539   :  { %v2210_v38 = vrot.slane %v2202_v22, %v5122_v7  ;;  %v2198_v34 = vsel %vm5157_vm7, %v2196_v43, %v2197_v25  ;;  %v2201_v50 = vsel %vm5157_vm7, %v2199_v45, %v2200_v39  ;;  %v2327_v61 = vcombine.low %v2180_v30, %v2179_v27 }
 0x53a   :  { %v2217_v49 = vrot.slane %v2203_v44, %v5122_v7  ;;  %v2219_v51 = vcombine.low %v2198_v34, %v2201_v50  ;;  %v2460_v53 = vrot.slane %v2452_v46, %v5122_v7  ;;  %v2467_v54 = vrot.slane %v3755_v47, %v5122_v7 }
 0x53b   :  { %v2334_v62 = vrot.slane %v2327_v61, %v5122_v7  ;;  %v2469_v63 = vcombine.low %v2179_v27, %v2181_v57  ;;  %v2619_v19 = vcombine.high %v2611_v10, %v2611_v10  ;;  %v2618_v32 = vrot.slane %v2604_v11, %v5122_v7 }
 0x53c   :  { %v2218_v55 = vcombine.low %v2210_v38, %v2217_v49  ;;  %v2226_v58 = vrot.slane %v2219_v51, %v5122_v7  ;;  %v2468_v59 = vcombine.low %v2460_v53, %v2467_v54 }
 0x53d   :  { %v2476_v0 = vrot.slane %v2469_v63, %v5122_v7 }
 0x53e   :  { %4162 = vmatprep.mubr.msk.f32.mxu0 %vm2227_vm13, %v2218_v55  ;;  %v2687_v55 = vrot.slane %v4848_v2, 1 }
 0x53f   :  { %4163 = vmatmul.mubr.msk.f32.vlgmr.msra.gmra.mrb[14].mxu0 %vm2227_vm13, %v2226_v58 }
 0x540   :  { %4166 = vmatpush3.msk.msra.mxu0 %vm2137_vm11, %v5427_v52  ;;  %4167 = vmatprep.mubr.msk.f32.mxu0 %vm2227_vm13, %v2326_v16  ;;  %v5470_v52 = vld [vmem:[#allocation18] sm:$0xff] }
 0x541   :  { %4170 = vmatprep.subr.msk.mxu0 %vm2137_vm11, %v2451_v60 }
 0x547   :  { %4168 = vmatmul.mubr.msk.f32.vlgmr.msra.gmra.mrb[14].mxu0 %vm2227_vm13, %v2334_v62 }
 0x548   :  { %4171 = vmatpush3.msk.msra.mxu0 %vm2137_vm11, %v2451_v60  ;;  %4172 = vmatprep.mubr.msk.f32.mxu0 %vm2227_vm13, %v2468_v59 }
 0x549   :  { %4175 = vmatprep.subr.mxu0 %v2681_v3 }
 0x54b   :  { %4173 = vmatmul.mubr.msk.f32.vlgmr.msra.gmra.mrb[16].mxu0 %vm2227_vm13, %v2476_v0 }
 0x54c   :  { %4176 = vmatpush3.msra.mxu0 %v2681_v3  ;;  %v2850_v3 = vld [vmem:[#allocation18 + $0x10] sm:$0xff] }
 0x54d   :  { %4180 = vmatprep.subr.mxu0 %v5470_v52 }
 0x61a   :  { %v4169_v6 = vpop.f32.mrb[14].mxu0 }
 0x61b   :  { %v2408_v8 = vpop.f32.mrb[15].mxu0  ;;  %v2442_v48 = vrot.slane %v4169_v6, %v5122_v7  ;;  %v2852_v6 = vrot.slane %v4848_v2, 2 }
 0x61c   :  { %v2419_v41 = vcombine.high %v2408_v8, %v2408_v8  ;;  %v2426_v12 = vrot.slane %v2408_v8, %v5122_v7 }
 0x61d   :  { %v2443_v30 = vcombine.high %v2442_v48, %v2442_v48 }
 0x61e   :  { %v4174_v14 = vpop.f32.mrb[16].mxu0  ;;  %v2433_v17 = vrot.slane %v2419_v41, %v5122_v7  ;;  %v2434_v26 = vcombine.high %v2426_v12, %v2426_v12 }
 0x61f   :  { %v2584_v9 = vrot.slane %v4174_v14, %v5122_v7  ;;  %v2550_v15 = vpop.f32.mrb[17].mxu0  ;;  %v2966_v14 = vld [vmem:[#allocation21 + $0x48] sm:$0xff] }
 0x620   :  { %v2561_v24 = vcombine.high %v2550_v15, %v2550_v15  ;;  %v2568_v27 = vrot.slane %v2550_v15, %v5122_v7  ;;  %v2435_v18 = vcombine.high %v2433_v17, %v2433_v17 }
 0x621   :  { %v2585_v21 = vcombine.high %v2584_v9, %v2584_v9  ;;  %v2596_v29 = vadd.f32 %v2584_v9, %v2442_v48  ;;  %v3372_v48 = vld [vmem:[#allocation21 + $0x88] sm:$0xff] }
 0x622   :  { %v2575_v13 = vrot.slane %v2561_v24, %v5122_v7  ;;  %v2576_v56 = vcombine.high %v2568_v27, %v2568_v27  ;;  %v2592_v57 = vadd.f32 %v2568_v27, %v2426_v12  ;;  %v2965_v12 = vld [vmem:[#allocation21 + $0x40] sm:$0xff]  ;;  %v2967_v24 = vld [vmem:[#allocation21 + $0x50] sm:$0xff]  ;;  %v2968_v27 = vld [vmem:[#allocation21 + $0x58] sm:$0xff] }
 0x623   :  { %v2597_v28 = vadd.f32 %v2585_v21, %v2443_v30  ;;  %v2627_v35 = vadd.f32 %v2619_v19, %v2596_v29  ;;  %v4419_v9 = vpack.c.bf16 %v2966_v14, %v2965_v12  ;;  %v3375_v30 = vld [vmem:[#allocation21 + $0xa0] sm:$0xff]  ;;  %v4422_v21 = vpack.c.bf16 %v2968_v27, %v2967_v24  ;;  %v3376_v29 = vld [vmem:[#allocation21 + $0xa8] sm:$0xff] }
 0x624   :  { %v2577_v31 = vcombine.high %v2575_v13, %v2575_v13  ;;  %v2593_v20 = vadd.f32 %v2576_v56, %v2434_v26  ;;  %v2594_v25 = vadd.f32 %v2575_v13, %v2433_v17  ;;  %v2623_v36 = vadd.f32 %v2611_v10, %v2592_v57  ;;  %v3373_v17 = vld [vmem:[#allocation21 + $0x90] sm:$0xff]  ;;  %v2969_v26 = vld [vmem:[#allocation21 + $0x60] sm:$0xff]  ;;  %v2970_v13 = vld [vmem:[#allocation21 + $0x68] sm:$0xff] }
 0x625   :  { %v2628_v40 = vadd.f32 %v2618_v32, %v2597_v28  ;;  %v2633_v37 = vmax.f32 %v2627_v35, 0.0  ;;  %v3377_v56 = vld [vmem:[#allocation21 + $0xb0] sm:$0xff]  ;;  %v3378_v57 = vld [vmem:[#allocation21 + $0xb8] sm:$0xff] }
 0x626   :  { %v2595_v42 = vadd.f32 %v2577_v31, %v2435_v18  ;;  %v2624_v39 = vadd.f32 %v2619_v19, %v2593_v20  ;;  %v2625_v5 = vadd.f32 %v2618_v32, %v2594_v25  ;;  %v2629_v33 = vmax.f32 %v2623_v36, 0.0  ;;  %v3374_v19 = vld [vmem:[#allocation21 + $0x98] sm:$0xff]  ;;  %v2971_v35 = vld [vmem:[#allocation21 + $0x70] sm:$0xff] }
 0x627   :  { %v2634_v43 = vmax.f32 %v2628_v40, 0.0  ;;  %v4446_v15 = vpack.c.bf16 %v3374_v19, %v3373_v17  ;;  %v4449_v32 = vpack.c.bf16 %v3376_v29, %v3375_v30  ;;  %v4425_v18 = vpack.c.bf16 %v2970_v13, %v2969_v26  ;;  %v2972_v31 = vld [vmem:[#allocation21 + $0x78] sm:$0xff] }
 0x628   :  { %v2626_v22 = vadd.f32 %v2611_v10, %v2595_v42  ;;  %v2630_v44 = vmax.f32 %v2624_v39, 0.0  ;;  %v2631_v45 = vmax.f32 %v2625_v5, 0.0  ;;  %v2641_v16 = vcombine.low %v2629_v33, %v2629_v33  ;;  %v3766_v25 = vld [vmem:[#allocation19] ss:$0 sm:$0xff] }
 0x629   :  { %v2659_v38 = vcombine.low %v2633_v37, %v2634_v43  ;;  %v4452_v28 = vpack.c.bf16 %v3378_v57, %v3377_v56  ;;  %v4428_v20 = vpack.c.bf16 %v2972_v31, %v2971_v35 }
 0x62a   :  { %v2632_v34 = vmax.f32 %v2626_v22, 0.0  ;;  %v2642_v46 = vcombine.low %v2630_v44, %v2631_v45  ;;  %v2649_v47 = vrot.slane %v2641_v16, %v5122_v7 }
 0x62b   :  { %v2673_v51 = vrot.slane %v2659_v38, %v5122_v7 }
 0x62c   :  { %v2656_v49 = vrot.slane %v2642_v46, %v5122_v7  ;;  %v2658_v50 = vcombine.low %v2632_v34, %v2632_v34 }
 0x62e   :  { %v2657_v53 = vcombine.low %v2649_v47, %v2656_v49  ;;  %v2666_v54 = vrot.slane %v2658_v50, %v5122_v7  ;;  %v5521_v47 = vld [vmem:[#allocation21] sm:$0xff]  ;;  %v5523_v49 = vld [vmem:[#allocation21 + $0x8] sm:$0xff] }
 0x630   :  { %v2677_v58 = vsel %vm2137_vm11, 0.0, %v2657_v53  ;;  %v2674_v59 = vcombine.low %v2666_v54, %v2673_v51 }
 0x631   :  { %v2686_v60 = vrot.slane %v2677_v58, 1  ;;  %v2851_v4 = vrot.slane %v2677_v58, 2 }
 0x632   :  { %v2678_v61 = vsel %vm2137_vm11, 0.0, %v2674_v59 }
 0x633   :  { %v2688_v62 = vsel %vm2685_vm14, %v2686_v60, %v2687_v55  ;;  %v2689_v63 = vrot.slane %v2678_v61, 1  ;;  %v2853_v8 = vsel %vm2140_vm12, %v2851_v4, %v2852_v6  ;;  %v2854_v10 = vrot.slane %v2678_v61, 2 }
 0x634   :  { %4177 = vmatprep.mubr.msk.f32.mxu0 %vm1859_vm10, %v2688_v62  ;;  %v4431_v60 = vpack.c.bf16 %v5523_v49, %v5521_v47 }
 0x635   :  { %v2690_v0 = vsel %vm2685_vm14, %v2689_v63, %v2687_v55  ;;  %v2855_v41 = vsel %vm2140_vm12, %v2854_v10, %v2852_v6 }
 0x636   :  { %4178 = vmatmul.mubr.msk.f32.vlgmr.msra.gmra.mrb[18].mxu0 %vm1859_vm10, %v2690_v0 }
 0x637   :  { %4181 = vmatpush3.msra.mxu0 %v5470_v52  ;;  %4182 = vmatprep.mubr.msk.f32.mxu0 %vm1859_vm10, %v2677_v58  ;;  %v3371_v52 = vld [vmem:[#allocation21 + $0x80] sm:$0xff] }
 0x638   :  { %4185 = vmatprep.subr.mxu0 %v2850_v3  ;;  %v4443_v11 = vpack.c.bf16 %v3372_v48, %v3371_v52 }
 0x63a   :  { %4444 = vmatpush3.bf16.msra.mxu1 %v4443_v11 }
 0x63b   :  { %4445 = vmatprep.subr.bf16.mxu1 %v4846_v1 }
 0x63e   :  { %4183 = vmatmul.mubr.msk.f32.vlgmr.msra.gmra.mrb[18].mxu0 %vm1859_vm10, %v2678_v61  ;;  %4447 = vmatpush3.bf16.msra.mxu1 %v4446_v15 }
 0x63f   :  { %4186 = vmatpush3.msra.mxu0 %v2850_v3  ;;  %4187 = vmatprep.mubr.msk.f32.mxu0 %vm1859_vm10, %v2853_v8 }
 0x640   :  { %4418 = vmatprep.subr.bf16.mxu0 %v4846_v1  ;;  %4448 = vmatprep.subr.bf16.mxu1 %v4846_v1 }
 0x642   :  { %4450 = vmatpush3.bf16.msra.mxu1 %v4449_v32 }
 0x643   :  { %4451 = vmatprep.subr.bf16.mxu1 %v4846_v1 }
 0x646   :  { %4188 = vmatmul.mubr.msk.f32.vlgmr.msra.gmra.mrb[18].mxu0 %vm1859_vm10, %v2855_v41  ;;  %4453 = vmatpush3.bf16.msra.mxu1 %v4452_v28 }
 0x647   :  { %4206 = vmatprep.mubr.msk.f32.mxu0 %vm4847_vm2, %v4848_v2  ;;  %4420 = vmatpush3.bf16.msra.mxu0 %v4419_v9 }
 0x648   :  { %4421 = vmatprep.subr.bf16.mxu0 %v4846_v1 }
 0x64b   :  { %4423 = vmatpush3.bf16.msra.mxu0 %v4422_v21 }
 0x64c   :  { %4424 = vmatprep.subr.bf16.mxu0 %v4846_v1 }
 0x64f   :  { %4426 = vmatpush3.bf16.msra.mxu0 %v4425_v18 }
 0x650   :  { %4427 = vmatprep.subr.bf16.mxu0 %v4846_v1 }
 0x653   :  { %4429 = vmatpush3.bf16.msra.mxu0 %v4428_v20 }
 0x654   :  { %4430 = vmatprep.subr.bf16.mxu0 %v4846_v1 }
 0x719   :  { %v4189_v36 = vpop.f32.mrb[18].mxu0 }
 0x71a   :  { %v2945_v40 = vadd.f32 %v4189_v36, %v3766_v25  ;;  %v2926_v42 = vpop.f32.mrb[19].mxu0 }
 0x71b   :  { %v2944_v39 = vadd.f32 %v3766_v25, %v2926_v42 }
 0x71c   :  { %v2949_v5 = vrot.slane %v2945_v40, 6 }
 0x71d   :  { %v2948_v33 = vrot.slane %v2944_v39, 6 }
 0x71e   :  { %v2953_v37 = vsel %vm2137_vm11, 0.0, %v2949_v5  ;;  %v2955_v43 = vsel %vm2137_vm11, %v2949_v5, 0.0 }
 0x71f   :  { %v3002_v22 = vcombine.high %v2953_v37, %v2953_v37  ;;  %v5511_v44 = vrot.slane %v2953_v37, %v5122_v7  ;;  %v5514_v45 = vrot.slane %v2955_v43, %v5122_v7  ;;  %v2952_v16 = vsel %vm2137_vm11, 0.0, %v2948_v33 }
 0x720   :  { %v2954_v38 = vsel %vm2137_vm11, %v2948_v33, 0.0  ;;  %v2977_v34 = vcombine.high %v2952_v16, %v2952_v16  ;;  %v5519_v46 = vrot.slane %v2952_v16, %v5122_v7 }
 0x721   :  { %v5526_v50 = vrot.slane %v3002_v22, %v5122_v7  ;;  %v5530_v51 = vcombine.high %v5511_v44, %v5511_v44  ;;  %v3054_v53 = vrot.slane %v5514_v45, 7  ;;  %v3000_v58 = vrot.slane %v2954_v38, %v5122_v7 }
 0x722   :  { %v5534_v54 = vrot.slane %v2977_v34, %v5122_v7  ;;  %v5538_v55 = vcombine.high %v5519_v46, %v5519_v46  ;;  %v3768_v59 = vrot.slane %v5511_v44, 9  ;;  %v3767_v8 = vrot.slane %v5519_v46, 9 }
 0x723   :  { %v5546_v61 = vcombine.high %v5526_v50, %v5526_v50  ;;  %v3045_v3 = vrot.slane %v5530_v51, 7  ;;  %v3048_v4 = vrot.slane %v5526_v50, 7  ;;  %v3056_v6 = vrot.slane %v3054_v53, 2 }
 0x724   :  { %v5550_v62 = vcombine.high %v5534_v54, %v5534_v54  ;;  %v3029_v63 = vrot.slane %v5538_v55, 7  ;;  %v3032_v0 = vrot.slane %v5534_v54, 7  ;;  %v3001_v10 = vcombine.high %v3000_v58, %v3000_v58 }
 0x725   :  { %v3038_v12 = vrot.slane %v3000_v58, 7  ;;  %v3379_v14 = vcombine.low %v5538_v55, %v5534_v54  ;;  %v3775_v15 = vcombine.high %v3000_v58, %v5511_v44  ;;  %v3397_v24 = vcombine.low %v5526_v50, %v5546_v61 }
 0x726   :  { %v3031_v41 = vrot.slane %v3029_v63, 2  ;;  %v3034_v52 = vrot.slane %v3032_v0, 2  ;;  %v3035_v48 = vrot.slane %v5550_v62, 7  ;;  %v3030_v11 = vsel %vm5157_vm7, %v3767_v8, %v3029_v63  ;;  %v2959_v63 = vld [vmem:[#allocation21 + $0x18] sm:$0xff] }
 0x727   :  { %v3380_v17 = vcombine.low %v5550_v62, %v3000_v58  ;;  %v3047_v27 = vrot.slane %v3045_v3, 2  ;;  %v3387_v21 = vrot.slane %v3379_v14, %v5122_v7  ;;  %v3404_v32 = vrot.slane %v3775_v15, %v5122_v7  ;;  %v2963_v14 = vld [vmem:[#allocation21 + $0x38] sm:$0xff] }
 0x728   :  { %v3033_v9 = vsel %vm5157_vm7, %v3031_v41, %v3032_v0  ;;  %v3037_v19 = vrot.slane %v3035_v48, 2  ;;  %v3411_v26 = vrot.slane %v3397_v24, %v5122_v7  ;;  %v3036_v13 = vsel %vm5157_vm7, %v3034_v52, %v3035_v48  ;;  %v2960_v41 = vld [vmem:[#allocation21 + $0x20] sm:$0xff]  ;;  %v2961_v52 = vld [vmem:[#allocation21 + $0x28] sm:$0xff] }
 0x729   :  { %v3059_v30 = vcombine.low %v3030_v11, %v3033_v9  ;;  %v3394_v29 = vrot.slane %v3380_v17, %v5122_v7  ;;  %v3050_v57 = vrot.slane %v3048_v4, 2  ;;  %v3026_v20 = vcombine.high %v5514_v45, %v5514_v45 }
 0x72a   :  { %v3039_v56 = vsel %vm5157_vm7, %v3037_v19, %v3038_v12  ;;  %v3412_v31 = vcombine.low %v3404_v32, %v3411_v26  ;;  %v3040_v25 = vrot.slane %v3038_v12, 2  ;;  %v3041_v36 = vrot.slane %v3001_v10, 7 }
 0x72b   :  { %v3395_v18 = vcombine.low %v3387_v21, %v3394_v29  ;;  %v3060_v28 = vcombine.low %v3036_v13, %v3039_v56  ;;  %v3067_v35 = vrot.slane %v3059_v30, %v5122_v7  ;;  %v3046_v42 = vsel %vm5157_vm7, %v3768_v59, %v3045_v3  ;;  %v2958_v59 = vld [vmem:[#allocation21 + $0x10] sm:$0xff]  ;;  %v3779_v29 = vld [vmem:[#allocation22] ss:$0 sm:$0xff] }
 0x72c   :  { %v3049_v39 = vsel %vm5157_vm7, %v3047_v27, %v3048_v4  ;;  %v3051_v5 = vrot.slane %v5546_v61, 7  ;;  %v3057_v33 = vrot.slane %v3026_v20, 7  ;;  %v3413_v37 = vcombine.low %v5514_v45, %v3026_v20 }
 0x72d   :  { %4257 = vmatmul.mubr.msk.f32.vlgmr.msra.gmra.mrb[12].mxu1 %vm1413_vm9, %v3395_v18  ;;  %v3074_v40 = vrot.slane %v3060_v28, %v5122_v7  ;;  %v3042_v43 = vsel %vm5157_vm7, %v3040_v25, %v3041_v36  ;;  %v3204_v22 = vcombine.low %v3000_v58, %v5511_v44  ;;  %v3205_v0 = vcombine.low %v5530_v51, %v5526_v50 }
 0x72e   :  { %4259 = vmatprep.mubr.msk.f32.mxu1 %vm4847_vm2, %v4848_v2  ;;  %v3052_v38 = vsel %vm5157_vm7, %v3050_v57, %v3051_v5  ;;  %v3076_v34 = vcombine.low %v3042_v43, %v3046_v42  ;;  %v3053_v47 = vrot.slane %v3051_v5, 2  ;;  %v3420_v51 = vrot.slane %v3413_v37, %v5122_v7 }
 0x72f   :  { %v3075_v16 = vcombine.low %v3067_v35, %v3074_v40  ;;  %v3077_v49 = vcombine.low %v3049_v39, %v3052_v38  ;;  %v3212_v58 = vrot.slane %v3204_v22, %v5122_v7  ;;  %v3219_v50 = vrot.slane %v3205_v0, %v5122_v7 }
 0x730   :  { %v3084_v3 = vrot.slane %v3076_v34, %v5122_v7  ;;  %v3055_v44 = vsel %vm5157_vm7, %v3053_v47, %v3054_v53  ;;  %v4434_v8 = vpack.c.bf16 %v2959_v63, %v2958_v59  ;;  %v3058_v53 = vsel %vm5157_vm7, %v3056_v6, %v3057_v33  ;;  %v2962_v6 = vld [vmem:[#allocation21 + $0x30] sm:$0xff] }
 0x731   :  { %4260 = vmatmul.mubr.msk.f32.gmra.mrb[14].mxu1 %vm1413_vm9, %v3412_v31  ;;  %4207 = vmatmul.mubr.msk.f32.vlgmr.msra.gmra.mrb[20].mxu0 %vm1413_vm9, %v3075_v16  ;;  %v3091_v4 = vrot.slane %v3077_v49, %v5122_v7  ;;  %v3220_v48 = vcombine.low %v3212_v58, %v3219_v50  ;;  %v4437_v11 = vpack.c.bf16 %v2961_v52, %v2960_v41 }
 0x732   :  { %4432 = vmatpush3.bf16.msra.mxu0 %v4431_v60  ;;  %4262 = vmatprep.mubr.msk.f32.mxu1 %vm4847_vm2, %v4848_v2  ;;  %v3093_v60 = vcombine.low %v3055_v44, %v3058_v53  ;;  %v3188_v12 = vcombine.low %v5534_v54, %v5550_v62  ;;  %v3187_v17 = vcombine.low %v5519_v46, %v5538_v55 }
 0x733   :  { %4209 = vmatprep.mubr.msk.f32.mxu0 %vm4847_vm2, %v4848_v2  ;;  %4433 = vmatprep.subr.bf16.mxu0 %v4846_v1  ;;  %v3092_v10 = vcombine.low %v3084_v3, %v3091_v4  ;;  %v4440_v9 = vpack.c.bf16 %v2963_v14, %v2962_v6  ;;  %v3221_v46 = vcombine.low %v5546_v61, %v5514_v45 }
 0x734   :  { %v3100_v23 = vrot.slane %v3093_v60, %v5122_v7  ;;  %v3202_v19 = vrot.slane %v3188_v12, %v5122_v7  ;;  %v3195_v54 = vrot.slane %v3187_v17, %v5122_v7  ;;  %v3578_v26 = vcombine.high %v3779_v29, %v3779_v29 }
 0x735   :  { %4263 = vmatmul.mubr.msk.f32.gmra.mrb[16].mxu1 %vm1413_vm9, %v3420_v51  ;;  %4210 = vmatmul.mubr.msk.f32.gmra.mrb[22].mxu0 %vm1413_vm9, %v3092_v10  ;;  %v3228_v55 = vrot.slane %v3221_v46, %v5122_v7  ;;  %v3585_v13 = vrot.slane %v3779_v29, %v5122_v7 }
 0x736   :  { %4435 = vmatpush3.bf16.msra.mxu0 %v4434_v8  ;;  %4212 = vmatprep.mubr.msk.f32.mxu0 %vm4847_vm2, %v4848_v2  ;;  %v3203_v62 = vcombine.low %v3195_v54, %v3202_v19  ;;  %v3592_v57 = vrot.slane %v3578_v26, %v5122_v7 }
 0x737   :  { %4436 = vmatprep.subr.bf16.mxu0 %v4846_v1  ;;  %v3593_v36 = vcombine.high %v3585_v13, %v3585_v13 }
 0x738   :  { %v3594_v43 = vcombine.high %v3592_v57, %v3592_v57 }
 0x739   :  { %4213 = vmatmul.mubr.msk.f32.gmra.mrb[24].mxu0 %vm1413_vm9, %v3100_v23 }
 0x73a   :  { %4438 = vmatpush3.bf16.msra.mxu0 %v4437_v11  ;;  %4231 = vmatprep.mubr.msk.f32.mxu0 %vm4847_vm2, %v4848_v2 }
 0x73b   :  { %4439 = vmatprep.subr.bf16.mxu0 %v4846_v1 }
 0x73e   :  { %4441 = vmatpush3.bf16.msra.mxu0 %v4440_v9 }
 0x741   :  { %4232 = vmatmul.mubr.msk.f32.vlgmr.msra.gmra.mrb[20].mxu0 %vm1413_vm9, %v3203_v62 }
 0x742   :  { %4234 = vmatprep.mubr.msk.f32.mxu0 %vm4847_vm2, %v4848_v2 }
 0x745   :  { %4235 = vmatmul.mubr.msk.f32.gmra.mrb[22].mxu0 %vm1413_vm9, %v3220_v48 }
 0x746   :  { %4237 = vmatprep.mubr.msk.f32.mxu0 %vm4847_vm2, %v4848_v2 }
 0x749   :  { %4238 = vmatmul.mubr.msk.f32.gmra.mrb[24].mxu0 %vm1413_vm9, %v3228_v55 }
 0x800   :  { %v3493_v1 = vpop.f32.mrb[12].mxu1 }
 0x801   :  { %v4258_v15 = vpop.f32.mrb[13].mxu1  ;;  %v3510_v32 = vcombine.high %v3493_v1, %v3493_v1  ;;  %v3517_v45 = vrot.slane %v3493_v1, %v5122_v7 }
 0x803   :  { %v3524_v2 = vrot.slane %v3510_v32, %v5122_v7  ;;  %v3525_v31 = vcombine.high %v3517_v45, %v3517_v45 }
 0x804   :  { %v3498_v24 = vpop.f32.mrb[14].mxu1 }
 0x805   :  { %v4261_v27 = vpop.f32.mrb[15].mxu1  ;;  %v3527_v61 = vcombine.high %v3498_v24, %v3498_v24  ;;  %v3534_v20 = vrot.slane %v3498_v24, %v5122_v7  ;;  %v3526_v33 = vcombine.high %v3524_v2, %v3524_v2 }
 0x807   :  { %v3541_v25 = vrot.slane %v3527_v61, %v5122_v7  ;;  %v3542_v49 = vcombine.high %v3534_v20, %v3534_v20 }
 0x808   :  { %v3503_v30 = vpop.f32.mrb[16].mxu1 }
 0x809   :  { %v4264_v21 = vpop.f32.mrb[17].mxu1  ;;  %v3550_v40 = vrot.slane %v3503_v30, %v5122_v7  ;;  %v3543_v59 = vcombine.high %v3541_v25, %v3541_v25 }
 0x80b   :  { %v3551_v3 = vcombine.high %v3550_v40, %v3550_v40 }
 0x814   :  { %v3301_v56 = vpop.f32.mrb[20].mxu0 }
 0x815   :  { %v3318_v18 = vcombine.high %v3301_v56, %v3301_v56  ;;  %v3325_v28 = vrot.slane %v3301_v56, %v5122_v7  ;;  %v4233_v35 = vpop.f32.mrb[21].mxu0 }
 0x817   :  { %v3332_v42 = vrot.slane %v3318_v18, %v5122_v7  ;;  %v3333_v39 = vcombine.high %v3325_v28, %v3325_v28  ;;  %v3562_v5 = vadd.f32 %v3517_v45, %v3325_v28 }
 0x818   :  { %v3306_v37 = vpop.f32.mrb[22].mxu0 }
 0x819   :  { %v3334_v22 = vcombine.high %v3332_v42, %v3332_v42  ;;  %v3563_v16 = vadd.f32 %v3525_v31, %v3333_v39  ;;  %v3564_v38 = vadd.f32 %v3524_v2, %v3332_v42  ;;  %v3599_v34 = vadd.f32 %v3585_v13, %v3562_v5  ;;  %v4236_v47 = vpop.f32.mrb[23].mxu0 }
 0x81a   :  { %v3335_v63 = vcombine.high %v3306_v37, %v3306_v37  ;;  %v3342_v0 = vrot.slane %v3306_v37, %v5122_v7 }
 0x81b   :  { %v3565_v44 = vadd.f32 %v3526_v33, %v3334_v22  ;;  %v3600_v58 = vadd.f32 %v3593_v36, %v3563_v16  ;;  %v3601_v4 = vadd.f32 %v3592_v57, %v3564_v38  ;;  %v3609_v50 = vmax.f32 %v3599_v34, 0.0 }
 0x81c   :  { %v3349_v51 = vrot.slane %v3335_v63, %v5122_v7  ;;  %v3350_v8 = vcombine.high %v3342_v0, %v3342_v0  ;;  %v3566_v53 = vadd.f32 %v3534_v20, %v3342_v0  ;;  %v3311_v10 = vpop.f32.mrb[24].mxu0 }
 0x81d   :  { %v3610_v60 = vmax.f32 %v3600_v58, 0.0  ;;  %v3611_v41 = vmax.f32 %v3601_v4, 0.0  ;;  %v3358_v52 = vrot.slane %v3311_v10, %v5122_v7  ;;  %v3602_v48 = vadd.f32 %v3594_v43, %v3565_v44  ;;  %v4239_v11 = vpop.f32.mrb[25].mxu0 }
 0x81e   :  { %v3351_v12 = vcombine.high %v3349_v51, %v3349_v51  ;;  %v3567_v23 = vadd.f32 %v3542_v49, %v3350_v8  ;;  %v3568_v6 = vadd.f32 %v3541_v25, %v3349_v51  ;;  %v3603_v14 = vadd.f32 %v3585_v13, %v3566_v53 }
 0x81f   :  { %v3629_v17 = vcombine.low %v3609_v50, %v3610_v60  ;;  %v3359_v9 = vcombine.high %v3358_v52, %v3358_v52  ;;  %v3570_v19 = vadd.f32 %v3550_v40, %v3358_v52  ;;  %v3612_v54 = vmax.f32 %v3602_v48, 0.0 }
 0x820   :  { %v3569_v62 = vadd.f32 %v3543_v59, %v3351_v12  ;;  %v3604_v46 = vadd.f32 %v3585_v13, %v3567_v23  ;;  %v3605_v55 = vadd.f32 %v3593_v36, %v3568_v6  ;;  %v3613_v1 = vmax.f32 %v3603_v14, 0.0 }
 0x821   :  { %v3571_v15 = vadd.f32 %v3551_v3, %v3359_v9  ;;  %v3607_v24 = vadd.f32 %v3594_v43, %v3570_v19  ;;  %v3630_v27 = vcombine.low %v3611_v41, %v3612_v54  ;;  %v3637_v26 = vrot.slane %v3629_v17, %v5122_v7 }
 0x822   :  { %v3614_v30 = vmax.f32 %v3604_v46, 0.0  ;;  %v3615_v21 = vmax.f32 %v3605_v55, 0.0  ;;  %v3652_v29 = vrot.slane %v3613_v1, %v5122_v7  ;;  %v3606_v32 = vadd.f32 %v3592_v57, %v3569_v62 }
 0x823   :  { %v3608_v45 = vadd.f32 %v3585_v13, %v3571_v15  ;;  %v3617_v61 = vmax.f32 %v3607_v24, 0.0  ;;  %v3644_v2 = vrot.slane %v3630_v27, %v5122_v7 }
 0x824   :  { %v3653_v56 = vcombine.low %v3614_v30, %v3615_v21  ;;  %v3785_v18 = vpack.c.bf16 %v3652_v29, %v3652_v29  ;;  %v3616_v28 = vmax.f32 %v3606_v32, 0.0 }
 0x825   :  { %v3618_v35 = vmax.f32 %v3608_v45, 0.0  ;;  %v3645_v31 = vcombine.low %v3637_v26, %v3644_v2 }
 0x826   :  { %3698 = vst [vmem:[%s5687_s15 + $0x4] sm:$0x1] %v3785_v18  ;;  %v3654_v20 = vcombine.low %v3616_v28, %v3617_v61  ;;  %v3661_v57 = vrot.slane %v3653_v56, %v5122_v7 }
 0x827   :  { %v3676_v25 = vrot.slane %v3618_v35, %v5122_v7  ;;  %v3784_v36 = vpack.c.bf16 %v3645_v31, %v3645_v31 }
 0x828   :  { %v3668_v13 = vrot.slane %v3654_v20, %v5122_v7 }
 0x829   :  { %v3787_v40 = vpack.c.bf16 %v3676_v25, %v3676_v25  ;;  %3697 = vst [vmem:[%s5687_s15] sm:$0xf] %v3784_v36 }
 0x82a   :  { %v3669_v42 = vcombine.low %v3661_v57, %v3668_v13 }
 0x82b   :  { %3700 = vst [vmem:[%s5687_s15 + $0xc] sm:$0x1] %v3787_v40 }
 0x82c   :  { %v3786_v39 = vpack.c.bf16 %v3669_v42, %v3669_v42 }
 0x82e   :  { %3699 = vst [vmem:[%s5687_s15 + $0x8] sm:$0xf] %v3786_v39 }
 0x82f   :  { %3705 = vsyncpa [#allocation3], 1 }
 0x830   :  { %3706 = vsyncpa [#allocation5], 1 }
 0x831   :  { %3707 = vsyncpa [#allocation8], 1 }
 0x832   :  { %3708 = vsyncpa [#allocation11], 1 }
 0x833   :  { %3709 = vsyncpa [#allocation14], 1 }
 0x834   :  { %3710 = vsyncpa [#allocation17], 1 }
 0x835   :  { %3711 = vsyncpa [#allocation20], 1 }
 0x836   :  { %3712 = vsyncpa [#allocation23], 1 }

// kernel: _lambda_.3
= control target key start
LH: loop header
LB: loop body
LE: loop exit
PB: predicated region body
PF: predicated region fallthrough
CT: control target
= control target key end

     0   :  { %8 = vsyncpa [#allocation3], 0  ;;  %s14981_s0 = inlined_call_operand.vmem [shape: bf16[2,1280], index: 0, kind: input, shape index: {}]   ;;  %s14982_s1 = inlined_call_operand.hbm [shape: bf16[16384,1280], index: 1, kind: input, shape index: {}]   ;;  %s14983_s2 = inlined_call_operand.vmem [shape: f32[1,16384], index: 2, kind: input, shape index: {}]   ;;  %s14984_s3 = inlined_call_operand.vmem [shape: f32[2,16384], index: 3, kind: output, shape index: {}]  }
   0x1   :  { %10 = vsyncpa [#allocation3 + $0x1], 0  ;;  %s13369_s12 = smov 0   ;;  %s13371_s13 = smov 0  }
   0x2   :  { %s13373_s14 = smov 0   ;;  %s13375_s15 = smov 0  }
   0x3 LB: > { %s9870_s16 = sadd.s32 4294967295, %s13342_s15   ;;  %s13389_s17 = sadd.s32 1, %s13342_s15   ;;  %s13342_s15 = sphi %s13375_s15, %s14991_s15   ;;  %s13338_s14 = sphi %s13373_s14, %s14990_s14   ;;  %s13334_s13 = sphi %s13371_s13, %s14989_s13   ;;  %s13330_s12 = sphi %s13369_s12, %s14988_s12  }
   0x4   : > { %s41_s18 = ssub.s32 %s13342_s15, %s13389_s17  ;;  %s44_s19 = sadd.s32 1, %s13338_s14 }
   0x5   : > { %p42_p0 = scmp.eq.s32.totalorder %s41_s18, 0  ;;  %p51_p1 = scmp.ne.s32.totalorder %s13338_s14, %s13334_s13 }
   0x6   : > { %p52_p2 = scmp.eq.s32.totalorder %s13342_s15, 0  ;;  %p57_p3 = scmp.ne.s32.totalorder %s13334_s13, %s13330_s12 }
   0x7   : > { %s13399_s20 = scalar_select %p42_p0, %s13338_s14, %s44_s19  }
   0x8   : > { %p53_p4 = por %p52_p2, %p51_p1  ;;  %p58_p5 = scmp.eq.s32.totalorder %s9870_s16, 0 }
   0x9   : > { %p11317_p6 = scmp.lt.s32.totalorder %s13342_s15, 8  ;;  %s136_s22 = sand.u32 1, %s13338_s14  }
   0xa   : > { %p13404_p7 = por %p58_p5, %p57_p3  ;;  %s11308_s23 = smul.u32 10240, %s136_s22 }
   0xb   : > { %s11309_s24 = smul.u32 163840, %s13342_s15  ;;  %p13410_p8 = pnand %p11317_p6, %p53_p4 }
   0xc   : > { %s140_s29 = scalar_lea.vmem [#allocation2], %s11308_s23  ;;  %s13422_s4 = scalar_lea.sflag [#allocation3], %s136_s22 }
   0xd   : > { %s13417_s28 = scalar_lea.hbm %s14982_s1, %s11309_s24  ;;  %s148_s30 = sshll.u32 %s140_s29, 4  ;;  %s13419_s30 = int_to_ptr.vmem [resolvable:$true] %s148_s30 }
   0xe   : > { %s13278_s5 = scalar_lea.hbm %s13417_s28, 163840  ;;  %p13280_p11 = pneg %p13410_p8 }
   0xf   : > { %p13279_p10 = scmp.ne.s32.totalorder %s13417_s28, %s13278_s5  ;;  %s13283_s8 = scalar_lea.hbm %s14982_s1, 1310720 }
  0x10   : > { %p13284_p0 = scmp.lt.u32.totalorder %s13417_s28, %s14982_s1  ;;  %p13285_p1 = scmp.lt.u32.totalorder %s13283_s8, %s13278_s5 }
  0x11   : > { %p13281_p12 = pnand %p13280_p11, %p13279_p10  ;;  %p13287_p3 = scmp.lt.u32.totalorder %s13278_s5, %s13417_s28 }
  0x12   : > { %p13286_p2 = por %p13285_p1, %p13284_p0 }
  0x13   : > { %p13282_p13 = pneg %p13281_p12 }
  0x14   : > { %p13288_p4 = por %p13287_p3, %p13286_p2 }
  0x16   : > { %p13289_p5 = pnand %p13288_p4, %p13282_p13 }
  0x18   : > { %13292 = shalt.err (!%p13289_p5)
}
  0x19   : > { %s13293_s11 = scalar_lea.vmem %s13419_s30, 163840  ;;  %s13344_s12 = smov [#allocation2]  }
  0x1a   : > { %p13294_p6 = scmp.ne.s32.totalorder %s13419_s30, %s13293_s11  ;;  %s13298_s18 = sshll.u32 %s13344_s12, 4  ;;  %s13299_s18 = int_to_ptr.vmem [resolvable:$false] %s13298_s18 }
  0x1b   : > { %s13300_s19 = scalar_lea.vmem %s13299_s18, 327680  ;;  %p13301_p9 = scmp.lt.s32.totalorder %s13419_s30, %s13299_s18 }
  0x1c   : > { %p13296_p10 = pnand %p13294_p6, %p13280_p11  ;;  %p13302_p0 = scmp.lt.s32.totalorder %s13300_s19, %s13293_s11 }
  0x1e   : > { %p13297_p12 = pneg %p13296_p10  ;;  %p13303_p1 = por %p13302_p0, %p13301_p9 }
  0x20   : > { %p13304_p2 = pnand %p13303_p1, %p13297_p12 }
  0x22   : > { %13307 = shalt.err (!%p13304_p2)
}
  0x23   : > { %s13345_s22 = smov 640   ;;  %s13346_s23 = smov 40  }
  0x24   : > { %11316 = dma.hbm_to_vmem [thread:$0]  (!%p13410_p8), %s13417_s28, 163840, %s13419_s30, %s13422_s4, %s13345_s22, %s13345_s22, %s13346_s23  }
  0x25   : > { %p164_p11 = scmp.lt.s32.totalorder %s13342_s15, 9  ;;  %p14987_p13 = scmp.ge.s32.totalorder %s13342_s15, 1 }
  0x27   : > { %p165_p3 = pnand %p14987_p13, %p164_p11 }
  0x28   : > { %s170_s24 = sand.u32 (!%p165_p3), 1, %s13334_s13  }
  0x29   : > { %168 = sbr.rel (%p165_p3) target bundleno = 2833 (0xb11), region = 32  ;;  %s171_s27 = scalar_lea.sflag (!%p165_p3), [#allocation3], %s170_s24 }
  0x2a   : > { %s11310_s26 = smul.u32 (!%p165_p3), 10240, %s170_s24 }
  0x2c   : > { %s13454_s29 = scalar_lea.vmem (!%p165_p3), [#allocation2], %s11310_s26 }
  0x30   : > { %13325 = dma.done.wait (%p13404_p7), %s171_s27, 163840  }
  0x31   : > { %13327 = vsyncadd (%p13404_p7), %s171_s27, 4294803456  ;;  %v11354_v0 = vld [vmem:[%s13454_s29 + $0x4] ss:$40 sps:$4 sm:$0xff]   ;;  %v11358_v2 = vld [vmem:[%s13454_s29] ss:$40 sps:$4 sm:$0xff]   ;;  %v1499_v20 = vlaneseq  ;;  %s9878_s6 = sshll.u32 %s9870_s16, 4 }
  0x32   : > { %v11356_v1 = vld [vmem:[%s13454_s29 + $0x504] ss:$40 sps:$4 sm:$0xff]   ;;  %8062 = vmatprep.subr.bf16.mxu0 %v11354_v0  ;;  %v11359_v3 = vld [vmem:[%s13454_s29 + $0x500] ss:$40 sps:$4 sm:$0xff]   ;;  %v11360_v4 = vld [vmem:[%s13454_s29 + $0x54] ss:$40 sps:$4 sm:$0xff]  }
  0x33   : > { %8267 = vmatprep.subr.bf16.mxu1 %v11356_v1  ;;  %8063 = vmatpush1.bf16.xpose.msra.mxu0 %v11358_v2  ;;  %v11362_v5 = vld [vmem:[%s13454_s29 + $0x554] ss:$40 sps:$4 sm:$0xff]   ;;  %v11364_v6 = vld [vmem:[%s13454_s29 + $0x50] ss:$40 sps:$4 sm:$0xff]   ;;  %v11366_v8 = vld [vmem:[%s13454_s29 + $0xa4] ss:$40 sps:$4 sm:$0xff]  }
  0x34   : > { %8268 = vmatpush1.bf16.xpose.msra.mxu1 %v11359_v3  ;;  %8064 = vmatprep.subr.bf16.mxu0 %v11360_v4  ;;  %v11365_v7 = vld [vmem:[%s13454_s29 + $0x550] ss:$40 sps:$4 sm:$0xff]   ;;  %v11368_v9 = vld [vmem:[%s13454_s29 + $0x5a4] ss:$40 sps:$4 sm:$0xff]   ;;  %v11370_v10 = vld [vmem:[%s13454_s29 + $0xa0] ss:$40 sps:$4 sm:$0xff]  }
  0x35   : > { %8269 = vmatprep.subr.bf16.mxu1 %v11362_v5  ;;  %v11371_v11 = vld [vmem:[%s13454_s29 + $0x5a0] ss:$40 sps:$4 sm:$0xff]   ;;  %v11372_v12 = vld [vmem:[%s13454_s29 + $0xf4] ss:$40 sps:$4 sm:$0xff]   ;;  %v11376_v14 = vld [vmem:[%s13454_s29 + $0xf0] ss:$40 sps:$4 sm:$0xff]  }
  0x36   : > { %v11374_v13 = vld [vmem:[%s13454_s29 + $0x5f4] ss:$40 sps:$4 sm:$0xff]   ;;  %v11377_v15 = vld [vmem:[%s13454_s29 + $0x5f0] ss:$40 sps:$4 sm:$0xff]   ;;  %v11378_v16 = vld [vmem:[%s13454_s29 + $0x144] ss:$40 sps:$4 sm:$0xff]  }
  0x37   : > { %v11380_v17 = vld [vmem:[%s13454_s29 + $0x644] ss:$40 sps:$4 sm:$0xff]   ;;  %v11382_v18 = vld [vmem:[%s13454_s29 + $0x140] ss:$40 sps:$4 sm:$0xff]   ;;  %v13347_v21 = vmov 1966171168  }
  0x38   : > { %v11383_v19 = vld [vmem:[%s13454_s29 + $0x640] ss:$40 sps:$4 sm:$0xff]   ;;  %v1583_v22 = vunpack.c.l.s4 %v13347_v21  ;;  %v11384_v23 = vld [vmem:[%s13454_s29 + $0x194] ss:$40 sps:$4 sm:$0xff]   ;;  %v13482_v25 = vshrl.u32 %v1499_v20, 7  ;;  %p203_p7 = scmp.lt.s32.totalorder %s9878_s6, 127 }
  0x39   : > { %v11386_v24 = vld [vmem:[%s13454_s29 + $0x694] ss:$40 sps:$4 sm:$0xff]   ;;  %v11388_v27 = vld [vmem:[%s13454_s29 + $0x190] ss:$40 sps:$4 sm:$0xff]   ;;  %v11390_v30 = vld [vmem:[%s13454_s29 + $0x1e4] ss:$40 sps:$4 sm:$0xff]  }
  0x3a   : > { %v1584_v26 = vunpack.c.0.s8 %v1583_v22  ;;  %v11389_v28 = vld [vmem:[%s13454_s29 + $0x690] ss:$40 sps:$4 sm:$0xff]   ;;  %v11392_v31 = vld [vmem:[%s13454_s29 + $0x6e4] ss:$40 sps:$4 sm:$0xff]   ;;  %v11394_v34 = vld [vmem:[%s13454_s29 + $0x1e0] ss:$40 sps:$4 sm:$0xff]  }
  0x3b   : > { %8065 = vmatpush1.bf16.xpose.msra.mxu0 %v11364_v6  ;;  %v13494_v32 = vld.sshfl [vmem:[%s14981_s0] sm:$0xff pattern:$0x75316420]  ;;  %v11396_v37 = vld [vmem:[%s13454_s29 + $0x234] ss:$40 sps:$4 sm:$0xff]   ;;  %s14993_s6 = smov (!%p203_p7, %s9878_s6), 127 }
  0x3c   : > { %8270 = vmatpush1.bf16.xpose.msra.mxu1 %v11365_v7  ;;  %8066 = vmatprep.subr.bf16.mxu0 %v11366_v8  ;;  %v13487_v29 = vsub.s32 %v1584_v26, %v13482_v25  ;;  %v1596_v33 = vcombine.high %v13494_v32, %v13494_v32  ;;  %v11395_v36 = vld [vmem:[%s13454_s29 + $0x6e0] ss:$40 sps:$4 sm:$0xff]   ;;  %v11398_v38 = vld [vmem:[%s13454_s29 + $0x734] ss:$40 sps:$4 sm:$0xff]   ;;  %v11400_v39 = vld [vmem:[%s13454_s29 + $0x230] ss:$40 sps:$4 sm:$0xff]   ;;  %s13984_s7 = scalar_lea.vmem %s14983_s2, %s14993_s6 }
  0x3d   : > { %8271 = vmatprep.subr.bf16.mxu1 %v11368_v9  ;;  %v11401_v40 = vld [vmem:[%s13454_s29 + $0x730] ss:$40 sps:$4 sm:$0xff]   ;;  %v11402_v41 = vld [vmem:[%s13454_s29 + $0x284] ss:$40 sps:$4 sm:$0xff]   ;;  %v11406_v43 = vld [vmem:[%s13454_s29 + $0x280] ss:$40 sps:$4 sm:$0xff]  }
  0x3e   : > { %v13500_v35 = vrot.slane %v1596_v33, %v13487_v29  ;;  %v11404_v42 = vld [vmem:[%s13454_s29 + $0x784] ss:$40 sps:$4 sm:$0xff]   ;;  %v11407_v44 = vld [vmem:[%s13454_s29 + $0x780] ss:$40 sps:$4 sm:$0xff]   ;;  %v11408_v45 = vld [vmem:[%s13454_s29 + $0x2d4] ss:$40 sps:$4 sm:$0xff]  }
  0x3f   : > { %v11410_v46 = vld [vmem:[%s13454_s29 + $0x7d4] ss:$40 sps:$4 sm:$0xff]   ;;  %v11412_v47 = vld [vmem:[%s13454_s29 + $0x2d0] ss:$40 sps:$4 sm:$0xff]   ;;  %v11414_v49 = vld [vmem:[%s13454_s29 + $0x324] ss:$40 sps:$4 sm:$0xff]  }
  0x40   : > { %8094 = vmatprep.mubr.bf16.mxu0 %v13500_v35  ;;  %8299 = vmatprep.mubr.bf16.mxu1 %v13500_v35  ;;  %v11413_v48 = vld [vmem:[%s13454_s29 + $0x7d0] ss:$40 sps:$4 sm:$0xff]   ;;  %v11416_v50 = vld [vmem:[%s13454_s29 + $0x824] ss:$40 sps:$4 sm:$0xff]   ;;  %v11418_v51 = vld [vmem:[%s13454_s29 + $0x320] ss:$40 sps:$4 sm:$0xff]  }
  0x41   : > { %v11419_v52 = vld [vmem:[%s13454_s29 + $0x820] ss:$40 sps:$4 sm:$0xff]   ;;  %v11420_v53 = vld [vmem:[%s13454_s29 + $0x374] ss:$40 sps:$4 sm:$0xff]   ;;  %v11424_v55 = vld [vmem:[%s13454_s29 + $0x370] ss:$40 sps:$4 sm:$0xff]  }
  0x42   : > { %v11422_v54 = vld [vmem:[%s13454_s29 + $0x874] ss:$40 sps:$4 sm:$0xff]   ;;  %v11425_v56 = vld [vmem:[%s13454_s29 + $0x870] ss:$40 sps:$4 sm:$0xff]   ;;  %v11426_v57 = vld [vmem:[%s13454_s29 + $0x3c4] ss:$40 sps:$4 sm:$0xff]  }
  0x43   : > { %8067 = vmatpush1.bf16.xpose.msra.mxu0 %v11370_v10  ;;  %v11428_v58 = vld [vmem:[%s13454_s29 + $0x8c4] ss:$40 sps:$4 sm:$0xff]   ;;  %v11430_v59 = vld [vmem:[%s13454_s29 + $0x3c0] ss:$40 sps:$4 sm:$0xff]   ;;  %v11432_v61 = vld [vmem:[%s13454_s29 + $0x414] ss:$40 sps:$4 sm:$0xff]  }
  0x44   : > { %8272 = vmatpush1.bf16.xpose.msra.mxu1 %v11371_v11  ;;  %8068 = vmatprep.subr.bf16.mxu0 %v11372_v12  ;;  %v11431_v60 = vld [vmem:[%s13454_s29 + $0x8c0] ss:$40 sps:$4 sm:$0xff]   ;;  %v11434_v62 = vld [vmem:[%s13454_s29 + $0x914] ss:$40 sps:$4 sm:$0xff]   ;;  %v11436_v63 = vld [vmem:[%s13454_s29 + $0x410] ss:$40 sps:$4 sm:$0xff]  }
  0x45   : > { %8273 = vmatprep.subr.bf16.mxu1 %v11374_v13  ;;  %v11437_v0 = vld [vmem:[%s13454_s29 + $0x910] ss:$40 sps:$4 sm:$0xff]   ;;  %v11438_v1 = vld [vmem:[%s13454_s29 + $0x464] ss:$40 sps:$4 sm:$0xff]   ;;  %v11442_v3 = vld [vmem:[%s13454_s29 + $0x460] ss:$40 sps:$4 sm:$0xff]   ;;  %v13547_v13 = vrot.slane %v13494_v32, %v13487_v29 }
  0x46   : > { %v11440_v2 = vld [vmem:[%s13454_s29 + $0x964] ss:$40 sps:$4 sm:$0xff]   ;;  %v11443_v4 = vld [vmem:[%s13454_s29 + $0x960] ss:$40 sps:$4 sm:$0xff]   ;;  %v11444_v5 = vld [vmem:[%s13454_s29 + $0x4b4] ss:$40 sps:$4 sm:$0xff]  }
  0x47   : > { %v11446_v6 = vld [vmem:[%s13454_s29 + $0x9b4] ss:$40 sps:$4 sm:$0xff]   ;;  %v11448_v7 = vld [vmem:[%s13454_s29 + $0x4b0] ss:$40 sps:$4 sm:$0xff]   ;;  %s9880_s8 = sshll.u32 %s14993_s6, 1 }
  0x48   : > { %v11449_v8 = vld [vmem:[%s13454_s29 + $0x9b0] ss:$40 sps:$4 sm:$0xff]   ;;  %v11452_v9 = vld [vmem:[%s13454_s29 + $0xc] ss:$40 sps:$4 sm:$0xff]   ;;  %v11482_v33 = vld [vmem:[%s13454_s29 + $0x19c] ss:$40 sps:$4 sm:$0xff]   ;;  %s14016_s11 = scalar_lea.vmem %s14984_s3, %s9880_s8 }
  0x49   : > { %v11455_v10 = vld [vmem:[%s13454_s29 + $0x50c] ss:$40 sps:$4 sm:$0xff]   ;;  %v11450_v11 = vld [vmem:[%s13454_s29 + $0x8] ss:$40 sps:$4 sm:$0xff]   ;;  %v11468_v26 = vld [vmem:[%s13454_s29 + $0xf8] ss:$40 sps:$4 sm:$0xff]  }
  0x4a   : > { %v11453_v12 = vld [vmem:[%s13454_s29 + $0x508] ss:$40 sps:$4 sm:$0xff]   ;;  %v11467_v20 = vld [vmem:[%s13454_s29 + $0x5ac] ss:$40 sps:$4 sm:$0xff]  }
  0x4b   : > { %8069 = vmatpush1.bf16.xpose.msra.mxu0 %v11376_v14  ;;  %v11458_v14 = vld [vmem:[%s13454_s29 + $0x5c] ss:$40 sps:$4 sm:$0xff]   ;;  %v11462_v21 = vld [vmem:[%s13454_s29 + $0xa8] ss:$40 sps:$4 sm:$0xff]  }
  0x4c   : > { %8274 = vmatpush1.bf16.xpose.msra.mxu1 %v11377_v15  ;;  %8070 = vmatprep.subr.bf16.mxu0 %v11378_v16  ;;  %v11461_v15 = vld [vmem:[%s13454_s29 + $0x55c] ss:$40 sps:$4 sm:$0xff]   ;;  %v13553_v16 = vcombine.high %v13500_v35, %v13500_v35  ;;  %v11465_v22 = vld [vmem:[%s13454_s29 + $0x5a8] ss:$40 sps:$4 sm:$0xff]  }
  0x4d   : > { %8275 = vmatprep.subr.bf16.mxu1 %v11380_v17  ;;  %v11456_v17 = vld [vmem:[%s13454_s29 + $0x58] ss:$40 sps:$4 sm:$0xff]   ;;  %v11477_v32 = vld [vmem:[%s13454_s29 + $0x648] ss:$40 sps:$4 sm:$0xff]  }
  0x53   : > { %8071 = vmatpush1.bf16.xpose.msra.mxu0 %v11382_v18  ;;  %v11459_v18 = vld [vmem:[%s13454_s29 + $0x558] ss:$40 sps:$4 sm:$0xff]  }
  0x54   : > { %8276 = vmatpush1.bf16.xpose.msra.mxu1 %v11383_v19  ;;  %8072 = vmatprep.subr.bf16.mxu0 %v11384_v23  ;;  %v11464_v19 = vld [vmem:[%s13454_s29 + $0xac] ss:$40 sps:$4 sm:$0xff]   ;;  %v11470_v23 = vld [vmem:[%s13454_s29 + $0xfc] ss:$40 sps:$4 sm:$0xff]  }
  0x55   : > { %8277 = vmatprep.subr.bf16.mxu1 %v11386_v24  ;;  %v11473_v24 = vld [vmem:[%s13454_s29 + $0x5fc] ss:$40 sps:$4 sm:$0xff]  }
  0x5b   : > { %8073 = vmatpush1.bf16.xpose.msra.mxu0 %v11388_v27  ;;  %v11471_v27 = vld [vmem:[%s13454_s29 + $0x5f8] ss:$40 sps:$4 sm:$0xff]  }
  0x5c   : > { %8278 = vmatpush1.bf16.xpose.msra.mxu1 %v11389_v28  ;;  %8074 = vmatprep.subr.bf16.mxu0 %v11390_v30  ;;  %v11476_v28 = vld [vmem:[%s13454_s29 + $0x14c] ss:$40 sps:$4 sm:$0xff]  }
  0x5d   : > { %8279 = vmatprep.subr.bf16.mxu1 %v11392_v31  ;;  %v11479_v30 = vld [vmem:[%s13454_s29 + $0x64c] ss:$40 sps:$4 sm:$0xff]   ;;  %v11474_v31 = vld [vmem:[%s13454_s29 + $0x148] ss:$40 sps:$4 sm:$0xff]  }
  0x63   : > { %8075 = vmatpush1.bf16.xpose.msra.mxu0 %v11394_v34  ;;  %v11485_v34 = vld [vmem:[%s13454_s29 + $0x69c] ss:$40 sps:$4 sm:$0xff]  }
  0x64   : > { %8280 = vmatpush1.bf16.xpose.msra.mxu1 %v11395_v36  ;;  %8076 = vmatprep.subr.bf16.mxu0 %v11396_v37  ;;  %v11480_v36 = vld [vmem:[%s13454_s29 + $0x198] ss:$40 sps:$4 sm:$0xff]  }
  0x65   : > { %8281 = vmatprep.subr.bf16.mxu1 %v11398_v38  ;;  %v11483_v37 = vld [vmem:[%s13454_s29 + $0x698] ss:$40 sps:$4 sm:$0xff]   ;;  %v11488_v38 = vld [vmem:[%s13454_s29 + $0x1ec] ss:$40 sps:$4 sm:$0xff]  }
  0x6b   : > { %8077 = vmatpush1.bf16.xpose.msra.mxu0 %v11400_v39  ;;  %v11491_v39 = vld [vmem:[%s13454_s29 + $0x6ec] ss:$40 sps:$4 sm:$0xff]  }
  0x6c   : > { %8282 = vmatpush1.bf16.xpose.msra.mxu1 %v11401_v40  ;;  %8078 = vmatprep.subr.bf16.mxu0 %v11402_v41  ;;  %v11486_v40 = vld [vmem:[%s13454_s29 + $0x1e8] ss:$40 sps:$4 sm:$0xff]  }
  0x6d   : > { %8283 = vmatprep.subr.bf16.mxu1 %v11404_v42  ;;  %v11489_v41 = vld [vmem:[%s13454_s29 + $0x6e8] ss:$40 sps:$4 sm:$0xff]   ;;  %v11494_v42 = vld [vmem:[%s13454_s29 + $0x23c] ss:$40 sps:$4 sm:$0xff]  }
  0x73   : > { %8079 = vmatpush1.bf16.xpose.msra.mxu0 %v11406_v43  ;;  %v11497_v43 = vld [vmem:[%s13454_s29 + $0x73c] ss:$40 sps:$4 sm:$0xff]  }
  0x74   : > { %8284 = vmatpush1.bf16.xpose.msra.mxu1 %v11407_v44  ;;  %8080 = vmatprep.subr.bf16.mxu0 %v11408_v45  ;;  %v11492_v44 = vld [vmem:[%s13454_s29 + $0x238] ss:$40 sps:$4 sm:$0xff]  }
  0x75   : > { %8285 = vmatprep.subr.bf16.mxu1 %v11410_v46  ;;  %v11495_v45 = vld [vmem:[%s13454_s29 + $0x738] ss:$40 sps:$4 sm:$0xff]   ;;  %v11500_v46 = vld [vmem:[%s13454_s29 + $0x28c] ss:$40 sps:$4 sm:$0xff]  }
  0x7b   : > { %8081 = vmatpush1.bf16.xpose.msra.mxu0 %v11412_v47  ;;  %v11503_v47 = vld [vmem:[%s13454_s29 + $0x78c] ss:$40 sps:$4 sm:$0xff]  }
  0x7c   : > { %8286 = vmatpush1.bf16.xpose.msra.mxu1 %v11413_v48  ;;  %8082 = vmatprep.subr.bf16.mxu0 %v11414_v49  ;;  %v11498_v48 = vld [vmem:[%s13454_s29 + $0x288] ss:$40 sps:$4 sm:$0xff]  }
  0x7d   : > { %8287 = vmatprep.subr.bf16.mxu1 %v11416_v50  ;;  %v11501_v49 = vld [vmem:[%s13454_s29 + $0x788] ss:$40 sps:$4 sm:$0xff]   ;;  %v11506_v50 = vld [vmem:[%s13454_s29 + $0x2dc] ss:$40 sps:$4 sm:$0xff]  }
  0x83   : > { %8083 = vmatpush1.bf16.xpose.msra.mxu0 %v11418_v51  ;;  %v11509_v51 = vld [vmem:[%s13454_s29 + $0x7dc] ss:$40 sps:$4 sm:$0xff]  }
  0x84   : > { %8288 = vmatpush1.bf16.xpose.msra.mxu1 %v11419_v52  ;;  %8084 = vmatprep.subr.bf16.mxu0 %v11420_v53  ;;  %v11504_v52 = vld [vmem:[%s13454_s29 + $0x2d8] ss:$40 sps:$4 sm:$0xff]  }
  0x85   : > { %8289 = vmatprep.subr.bf16.mxu1 %v11422_v54  ;;  %v11507_v53 = vld [vmem:[%s13454_s29 + $0x7d8] ss:$40 sps:$4 sm:$0xff]   ;;  %v11512_v54 = vld [vmem:[%s13454_s29 + $0x32c] ss:$40 sps:$4 sm:$0xff]  }
  0x8b   : > { %8085 = vmatpush1.bf16.xpose.msra.mxu0 %v11424_v55  ;;  %v11515_v55 = vld [vmem:[%s13454_s29 + $0x82c] ss:$40 sps:$4 sm:$0xff]  }
  0x8c   : > { %8290 = vmatpush1.bf16.xpose.msra.mxu1 %v11425_v56  ;;  %8086 = vmatprep.subr.bf16.mxu0 %v11426_v57  ;;  %v11510_v56 = vld [vmem:[%s13454_s29 + $0x328] ss:$40 sps:$4 sm:$0xff]  }
  0x8d   : > { %8291 = vmatprep.subr.bf16.mxu1 %v11428_v58  ;;  %v11513_v57 = vld [vmem:[%s13454_s29 + $0x828] ss:$40 sps:$4 sm:$0xff]   ;;  %v11518_v58 = vld [vmem:[%s13454_s29 + $0x37c] ss:$40 sps:$4 sm:$0xff]  }
  0x93   : > { %8087 = vmatpush1.bf16.xpose.msra.mxu0 %v11430_v59  ;;  %v11521_v59 = vld [vmem:[%s13454_s29 + $0x87c] ss:$40 sps:$4 sm:$0xff]  }
  0x94   : > { %8292 = vmatpush1.bf16.xpose.msra.mxu1 %v11431_v60  ;;  %8088 = vmatprep.subr.bf16.mxu0 %v11432_v61  ;;  %v11516_v60 = vld [vmem:[%s13454_s29 + $0x378] ss:$40 sps:$4 sm:$0xff]  }
  0x95   : > { %8293 = vmatprep.subr.bf16.mxu1 %v11434_v62  ;;  %v11519_v61 = vld [vmem:[%s13454_s29 + $0x878] ss:$40 sps:$4 sm:$0xff]   ;;  %v11524_v62 = vld [vmem:[%s13454_s29 + $0x3cc] ss:$40 sps:$4 sm:$0xff]  }
  0x9b   : > { %8089 = vmatpush1.bf16.xpose.msra.mxu0 %v11436_v63  ;;  %v11527_v63 = vld [vmem:[%s13454_s29 + $0x8cc] ss:$40 sps:$4 sm:$0xff]  }
  0x9c   : > { %8294 = vmatpush1.bf16.xpose.msra.mxu1 %v11437_v0  ;;  %8090 = vmatprep.subr.bf16.mxu0 %v11438_v1  ;;  %v11522_v0 = vld [vmem:[%s13454_s29 + $0x3c8] ss:$40 sps:$4 sm:$0xff]  }
  0x9d   : > { %8295 = vmatprep.subr.bf16.mxu1 %v11440_v2  ;;  %v11525_v1 = vld [vmem:[%s13454_s29 + $0x8c8] ss:$40 sps:$4 sm:$0xff]   ;;  %v11530_v2 = vld [vmem:[%s13454_s29 + $0x41c] ss:$40 sps:$4 sm:$0xff]  }
  0xa3   : > { %8091 = vmatpush1.bf16.xpose.msra.mxu0 %v11442_v3  ;;  %v11533_v3 = vld [vmem:[%s13454_s29 + $0x91c] ss:$40 sps:$4 sm:$0xff]  }
  0xa4   : > { %8296 = vmatpush1.bf16.xpose.msra.mxu1 %v11443_v4  ;;  %8092 = vmatprep.subr.bf16.mxu0 %v11444_v5  ;;  %v11528_v4 = vld [vmem:[%s13454_s29 + $0x418] ss:$40 sps:$4 sm:$0xff]  }
  0xa5   : > { %8297 = vmatprep.subr.bf16.mxu1 %v11446_v6  ;;  %v11531_v5 = vld [vmem:[%s13454_s29 + $0x918] ss:$40 sps:$4 sm:$0xff]   ;;  %v11536_v6 = vld [vmem:[%s13454_s29 + $0x46c] ss:$40 sps:$4 sm:$0xff]  }
  0xab   : > { %8093 = vmatpush1.bf16.xpose.msra.mxu0 %v11448_v7  ;;  %v11539_v7 = vld [vmem:[%s13454_s29 + $0x96c] ss:$40 sps:$4 sm:$0xff]  }
  0xac   : > { %8298 = vmatpush1.bf16.xpose.msra.mxu1 %v11449_v8  ;;  %8103 = vmatprep.subr.bf16.mxu0 %v11452_v9  ;;  %v11534_v8 = vld [vmem:[%s13454_s29 + $0x468] ss:$40 sps:$4 sm:$0xff]  }
  0xad   : > { %8308 = vmatprep.subr.bf16.mxu1 %v11455_v10  ;;  %v11537_v9 = vld [vmem:[%s13454_s29 + $0x968] ss:$40 sps:$4 sm:$0xff]   ;;  %v11542_v10 = vld [vmem:[%s13454_s29 + $0x4bc] ss:$40 sps:$4 sm:$0xff]  }
  0xb2   : > { %8095 = vmatmul.mubr.bf16.vlgmr.msra.gmra.mrb[0].mxu0 %v13547_v13 }
  0xb3   : > { %8300 = vmatmul.mubr.bf16.vlgmr.msra.gmra.mrb[0].mxu1 %v13547_v13  ;;  %8104 = vmatpush1.bf16.xpose.msra.mxu0 %v11450_v11  ;;  %v11545_v11 = vld [vmem:[%s13454_s29 + $0x9bc] ss:$40 sps:$4 sm:$0xff]  }
  0xb4   : > { %8309 = vmatpush1.bf16.xpose.msra.mxu1 %v11453_v12  ;;  %8105 = vmatprep.subr.bf16.mxu0 %v11458_v14  ;;  %v11540_v12 = vld [vmem:[%s13454_s29 + $0x4b8] ss:$40 sps:$4 sm:$0xff]  }
  0xb5   : > { %8310 = vmatprep.subr.bf16.mxu1 %v11461_v15  ;;  %8135 = vmatprep.mubr.bf16.mxu0 %v13553_v16  ;;  %v11543_v14 = vld [vmem:[%s13454_s29 + $0x9b8] ss:$40 sps:$4 sm:$0xff]   ;;  %v11548_v15 = vld [vmem:[%s13454_s29 + $0x14] ss:$40 sps:$4 sm:$0xff]  }
  0xb6   : > { %8340 = vmatprep.mubr.bf16.mxu1 %v13553_v16 }
  0xbb   : > { %8106 = vmatpush1.bf16.xpose.msra.mxu0 %v11456_v17  ;;  %v11551_v17 = vld [vmem:[%s13454_s29 + $0x514] ss:$40 sps:$4 sm:$0xff]  }
  0xbc   : > { %8311 = vmatpush1.bf16.xpose.msra.mxu1 %v11459_v18  ;;  %8107 = vmatprep.subr.bf16.mxu0 %v11464_v19  ;;  %v13275_v18 = vld [vmem:[%s14981_s0] sm:$0xff] }
  0xbd   : > { %8312 = vmatprep.subr.bf16.mxu1 %v11467_v20  ;;  %v1581_v19 = vcombine.high %v13275_v18, %v13275_v18  ;;  %v11627_v18 = vld [vmem:[%s13454_s29 + $0x920] ss:$40 sps:$4 sm:$0xff]  }
  0xbf   : > { %v13623_v20 = vrot.slane %v1581_v19, %v13487_v29  ;;  %v11632_v19 = vld [vmem:[%s13454_s29 + $0x474] ss:$40 sps:$4 sm:$0xff]  }
  0xc3   : > { %8108 = vmatpush1.bf16.xpose.msra.mxu0 %v11462_v21  ;;  %v11546_v21 = vld [vmem:[%s13454_s29 + $0x10] ss:$40 sps:$4 sm:$0xff]  }
  0xc4   : > { %8313 = vmatpush1.bf16.xpose.msra.mxu1 %v11465_v22  ;;  %8109 = vmatprep.subr.bf16.mxu0 %v11470_v23  ;;  %v11549_v22 = vld [vmem:[%s13454_s29 + $0x510] ss:$40 sps:$4 sm:$0xff]   ;;  %v13629_v23 = vcombine.high %v13547_v13, %v13547_v13 }
  0xc5   : > { %8314 = vmatprep.subr.bf16.mxu1 %v11473_v24  ;;  %v11554_v24 = vld [vmem:[%s13454_s29 + $0x64] ss:$40 sps:$4 sm:$0xff]  }
  0xcb   : > { %8110 = vmatpush1.bf16.xpose.msra.mxu0 %v11468_v26  ;;  %v11557_v26 = vld [vmem:[%s13454_s29 + $0x564] ss:$40 sps:$4 sm:$0xff]  }
  0xcc   : > { %8315 = vmatpush1.bf16.xpose.msra.mxu1 %v11471_v27  ;;  %8111 = vmatprep.subr.bf16.mxu0 %v11476_v28  ;;  %v1597_v27 = vcombine.high %v13623_v20, %v13623_v20 }
  0xcd   : > { %8316 = vmatprep.subr.bf16.mxu1 %v11479_v30  ;;  %v11552_v30 = vld [vmem:[%s13454_s29 + $0x60] ss:$40 sps:$4 sm:$0xff]  }
  0xce   : > { %v13636_v28 = vrot.slane %v1597_v27, %v13487_v29  ;;  %v11641_v27 = vld [vmem:[%s13454_s29 + $0x9c4] ss:$40 sps:$4 sm:$0xff]  }
  0xd3   : > { %8112 = vmatpush1.bf16.xpose.msra.mxu0 %v11474_v31  ;;  %v11555_v31 = vld [vmem:[%s13454_s29 + $0x560] ss:$40 sps:$4 sm:$0xff]  }
  0xd4   : > { %8317 = vmatpush1.bf16.xpose.msra.mxu1 %v11477_v32  ;;  %8113 = vmatprep.subr.bf16.mxu0 %v11482_v33  ;;  %v11560_v32 = vld [vmem:[%s13454_s29 + $0xb4] ss:$40 sps:$4 sm:$0xff]  }
  0xd5   : > { %8318 = vmatprep.subr.bf16.mxu1 %v11485_v34  ;;  %v11563_v33 = vld [vmem:[%s13454_s29 + $0x5b4] ss:$40 sps:$4 sm:$0xff]   ;;  %v11558_v34 = vld [vmem:[%s13454_s29 + $0xb0] ss:$40 sps:$4 sm:$0xff]  }
  0xdb   : > { %8114 = vmatpush1.bf16.xpose.msra.mxu0 %v11480_v36  ;;  %v11561_v36 = vld [vmem:[%s13454_s29 + $0x5b0] ss:$40 sps:$4 sm:$0xff]  }
  0xdc   : > { %8319 = vmatpush1.bf16.xpose.msra.mxu1 %v11483_v37  ;;  %8115 = vmatprep.subr.bf16.mxu0 %v11488_v38  ;;  %v11566_v37 = vld [vmem:[%s13454_s29 + $0x104] ss:$40 sps:$4 sm:$0xff]  }
  0xdd   : > { %8320 = vmatprep.subr.bf16.mxu1 %v11491_v39  ;;  %v11569_v38 = vld [vmem:[%s13454_s29 + $0x604] ss:$40 sps:$4 sm:$0xff]   ;;  %v11564_v39 = vld [vmem:[%s13454_s29 + $0x100] ss:$40 sps:$4 sm:$0xff]  }
  0xe3   : > { %8116 = vmatpush1.bf16.xpose.msra.mxu0 %v11486_v40  ;;  %v11567_v40 = vld [vmem:[%s13454_s29 + $0x600] ss:$40 sps:$4 sm:$0xff]  }
  0xe4   : > { %8321 = vmatpush1.bf16.xpose.msra.mxu1 %v11489_v41  ;;  %8117 = vmatprep.subr.bf16.mxu0 %v11494_v42  ;;  %v11572_v41 = vld [vmem:[%s13454_s29 + $0x154] ss:$40 sps:$4 sm:$0xff]  }
  0xe5   : > { %8322 = vmatprep.subr.bf16.mxu1 %v11497_v43  ;;  %v11575_v42 = vld [vmem:[%s13454_s29 + $0x654] ss:$40 sps:$4 sm:$0xff]   ;;  %v11570_v43 = vld [vmem:[%s13454_s29 + $0x150] ss:$40 sps:$4 sm:$0xff]  }
  0xeb   : > { %8118 = vmatpush1.bf16.xpose.msra.mxu0 %v11492_v44  ;;  %v11573_v44 = vld [vmem:[%s13454_s29 + $0x650] ss:$40 sps:$4 sm:$0xff]  }
  0xec   : > { %8323 = vmatpush1.bf16.xpose.msra.mxu1 %v11495_v45  ;;  %8119 = vmatprep.subr.bf16.mxu0 %v11500_v46  ;;  %v11578_v45 = vld [vmem:[%s13454_s29 + $0x1a4] ss:$40 sps:$4 sm:$0xff]  }
  0xed   : > { %8324 = vmatprep.subr.bf16.mxu1 %v11503_v47  ;;  %v11581_v46 = vld [vmem:[%s13454_s29 + $0x6a4] ss:$40 sps:$4 sm:$0xff]   ;;  %v11576_v47 = vld [vmem:[%s13454_s29 + $0x1a0] ss:$40 sps:$4 sm:$0xff]  }
  0xf3   : > { %8120 = vmatpush1.bf16.xpose.msra.mxu0 %v11498_v48  ;;  %v11579_v48 = vld [vmem:[%s13454_s29 + $0x6a0] ss:$40 sps:$4 sm:$0xff]  }
  0xf4   : > { %8325 = vmatpush1.bf16.xpose.msra.mxu1 %v11501_v49  ;;  %8121 = vmatprep.subr.bf16.mxu0 %v11506_v50  ;;  %v11584_v49 = vld [vmem:[%s13454_s29 + $0x1f4] ss:$40 sps:$4 sm:$0xff]  }
  0xf5   : > { %8326 = vmatprep.subr.bf16.mxu1 %v11509_v51  ;;  %v11587_v50 = vld [vmem:[%s13454_s29 + $0x6f4] ss:$40 sps:$4 sm:$0xff]   ;;  %v11582_v51 = vld [vmem:[%s13454_s29 + $0x1f0] ss:$40 sps:$4 sm:$0xff]  }
  0xfb   : > { %8122 = vmatpush1.bf16.xpose.msra.mxu0 %v11504_v52  ;;  %v11585_v52 = vld [vmem:[%s13454_s29 + $0x6f0] ss:$40 sps:$4 sm:$0xff]  }
  0xfc   : > { %8327 = vmatpush1.bf16.xpose.msra.mxu1 %v11507_v53  ;;  %8123 = vmatprep.subr.bf16.mxu0 %v11512_v54  ;;  %v11590_v53 = vld [vmem:[%s13454_s29 + $0x244] ss:$40 sps:$4 sm:$0xff]  }
  0xfd   : > { %8328 = vmatprep.subr.bf16.mxu1 %v11515_v55  ;;  %v11593_v54 = vld [vmem:[%s13454_s29 + $0x744] ss:$40 sps:$4 sm:$0xff]   ;;  %v11588_v55 = vld [vmem:[%s13454_s29 + $0x240] ss:$40 sps:$4 sm:$0xff]  }
 0x103   : > { %8124 = vmatpush1.bf16.xpose.msra.mxu0 %v11510_v56  ;;  %v11591_v56 = vld [vmem:[%s13454_s29 + $0x740] ss:$40 sps:$4 sm:$0xff]  }
 0x104   : > { %8329 = vmatpush1.bf16.xpose.msra.mxu1 %v11513_v57  ;;  %8125 = vmatprep.subr.bf16.mxu0 %v11518_v58  ;;  %v11596_v57 = vld [vmem:[%s13454_s29 + $0x294] ss:$40 sps:$4 sm:$0xff]  }
 0x105   : > { %8330 = vmatprep.subr.bf16.mxu1 %v11521_v59  ;;  %v11599_v58 = vld [vmem:[%s13454_s29 + $0x794] ss:$40 sps:$4 sm:$0xff]   ;;  %v11594_v59 = vld [vmem:[%s13454_s29 + $0x290] ss:$40 sps:$4 sm:$0xff]  }
 0x10b   : > { %8126 = vmatpush1.bf16.xpose.msra.mxu0 %v11516_v60  ;;  %v11597_v60 = vld [vmem:[%s13454_s29 + $0x790] ss:$40 sps:$4 sm:$0xff]  }
 0x10c   : > { %8331 = vmatpush1.bf16.xpose.msra.mxu1 %v11519_v61  ;;  %8127 = vmatprep.subr.bf16.mxu0 %v11524_v62  ;;  %v11602_v61 = vld [vmem:[%s13454_s29 + $0x2e4] ss:$40 sps:$4 sm:$0xff]  }
 0x10d   : > { %8332 = vmatprep.subr.bf16.mxu1 %v11527_v63  ;;  %v11605_v62 = vld [vmem:[%s13454_s29 + $0x7e4] ss:$40 sps:$4 sm:$0xff]   ;;  %v11600_v63 = vld [vmem:[%s13454_s29 + $0x2e0] ss:$40 sps:$4 sm:$0xff]  }
 0x113   : > { %8128 = vmatpush1.bf16.xpose.msra.mxu0 %v11522_v0  ;;  %v11603_v0 = vld [vmem:[%s13454_s29 + $0x7e0] ss:$40 sps:$4 sm:$0xff]  }
 0x114   : > { %8333 = vmatpush1.bf16.xpose.msra.mxu1 %v11525_v1  ;;  %8129 = vmatprep.subr.bf16.mxu0 %v11530_v2  ;;  %v11608_v1 = vld [vmem:[%s13454_s29 + $0x334] ss:$40 sps:$4 sm:$0xff]  }
 0x115   : > { %8334 = vmatprep.subr.bf16.mxu1 %v11533_v3  ;;  %v11611_v2 = vld [vmem:[%s13454_s29 + $0x834] ss:$40 sps:$4 sm:$0xff]   ;;  %v11606_v3 = vld [vmem:[%s13454_s29 + $0x330] ss:$40 sps:$4 sm:$0xff]  }
 0x11b   : > { %8130 = vmatpush1.bf16.xpose.msra.mxu0 %v11528_v4  ;;  %v11609_v4 = vld [vmem:[%s13454_s29 + $0x830] ss:$40 sps:$4 sm:$0xff]  }
 0x11c   : > { %8335 = vmatpush1.bf16.xpose.msra.mxu1 %v11531_v5  ;;  %8131 = vmatprep.subr.bf16.mxu0 %v11536_v6  ;;  %v11614_v5 = vld [vmem:[%s13454_s29 + $0x384] ss:$40 sps:$4 sm:$0xff]  }
 0x11d   : > { %8336 = vmatprep.subr.bf16.mxu1 %v11539_v7  ;;  %v11617_v6 = vld [vmem:[%s13454_s29 + $0x884] ss:$40 sps:$4 sm:$0xff]   ;;  %v11612_v7 = vld [vmem:[%s13454_s29 + $0x380] ss:$40 sps:$4 sm:$0xff]  }
 0x123   : > { %8132 = vmatpush1.bf16.xpose.msra.mxu0 %v11534_v8  ;;  %v11615_v8 = vld [vmem:[%s13454_s29 + $0x880] ss:$40 sps:$4 sm:$0xff]  }
 0x124   : > { %8337 = vmatpush1.bf16.xpose.msra.mxu1 %v11537_v9  ;;  %8133 = vmatprep.subr.bf16.mxu0 %v11542_v10  ;;  %v11620_v9 = vld [vmem:[%s13454_s29 + $0x3d4] ss:$40 sps:$4 sm:$0xff]  }
 0x125   : > { %8338 = vmatprep.subr.bf16.mxu1 %v11545_v11  ;;  %v11623_v10 = vld [vmem:[%s13454_s29 + $0x8d4] ss:$40 sps:$4 sm:$0xff]   ;;  %v11618_v11 = vld [vmem:[%s13454_s29 + $0x3d0] ss:$40 sps:$4 sm:$0xff]  }
 0x12b   : > { %8134 = vmatpush1.bf16.xpose.msra.mxu0 %v11540_v12  ;;  %v11621_v12 = vld [vmem:[%s13454_s29 + $0x8d0] ss:$40 sps:$4 sm:$0xff]  }
 0x12c   : > { %8339 = vmatpush1.bf16.xpose.msra.mxu1 %v11543_v14  ;;  %8144 = vmatprep.subr.bf16.mxu0 %v11548_v15  ;;  %v11626_v14 = vld [vmem:[%s13454_s29 + $0x424] ss:$40 sps:$4 sm:$0xff]  }
 0x12d   : > { %8349 = vmatprep.subr.bf16.mxu1 %v11551_v17  ;;  %v11629_v15 = vld [vmem:[%s13454_s29 + $0x924] ss:$40 sps:$4 sm:$0xff]   ;;  %v11624_v17 = vld [vmem:[%s13454_s29 + $0x420] ss:$40 sps:$4 sm:$0xff]  }
 0x132   : > { %8136 = vmatmul.mubr.bf16.vlgmr.msra.gmra.mrb[0].mxu0 %v13629_v23 }
 0x133   : > { %8341 = vmatmul.mubr.bf16.vlgmr.msra.gmra.mrb[0].mxu1 %v13629_v23  ;;  %8145 = vmatpush1.bf16.xpose.msra.mxu0 %v11546_v21  ;;  %v11635_v21 = vld [vmem:[%s13454_s29 + $0x974] ss:$40 sps:$4 sm:$0xff]  }
 0x134   : > { %8350 = vmatpush1.bf16.xpose.msra.mxu1 %v11549_v22  ;;  %8146 = vmatprep.subr.bf16.mxu0 %v11554_v24  ;;  %v11630_v22 = vld [vmem:[%s13454_s29 + $0x470] ss:$40 sps:$4 sm:$0xff]  }
 0x135   : > { %8351 = vmatprep.subr.bf16.mxu1 %v11557_v26  ;;  %8176 = vmatprep.mubr.bf16.mxu0 %v13636_v28  ;;  %v11633_v24 = vld [vmem:[%s13454_s29 + $0x970] ss:$40 sps:$4 sm:$0xff]   ;;  %v11638_v26 = vld [vmem:[%s13454_s29 + $0x4c4] ss:$40 sps:$4 sm:$0xff]  }
 0x136   : > { %8381 = vmatprep.mubr.bf16.mxu1 %v13636_v28 }
 0x13b   : > { %8147 = vmatpush1.bf16.xpose.msra.mxu0 %v11552_v30  ;;  %v11636_v30 = vld [vmem:[%s13454_s29 + $0x4c0] ss:$40 sps:$4 sm:$0xff]  }
 0x13c   : > { %8352 = vmatpush1.bf16.xpose.msra.mxu1 %v11555_v31  ;;  %8148 = vmatprep.subr.bf16.mxu0 %v11560_v32  ;;  %v11639_v31 = vld [vmem:[%s13454_s29 + $0x9c0] ss:$40 sps:$4 sm:$0xff]   ;;  %v11645_v32 = vld [vmem:[%s13454_s29 + $0x1c] ss:$40 sps:$4 sm:$0xff]  }
 0x13d   : > { %8353 = vmatprep.subr.bf16.mxu1 %v11563_v33  ;;  %v11648_v33 = vld [vmem:[%s13454_s29 + $0x51c] ss:$40 sps:$4 sm:$0xff]  }
 0x143   : > { %8149 = vmatpush1.bf16.xpose.msra.mxu0 %v11558_v34  ;;  %v11643_v34 = vld [vmem:[%s13454_s29 + $0x18] ss:$40 sps:$4 sm:$0xff]  }
 0x144   : > { %8354 = vmatpush1.bf16.xpose.msra.mxu1 %v11561_v36  ;;  %8150 = vmatprep.subr.bf16.mxu0 %v11566_v37  ;;  %v11646_v36 = vld [vmem:[%s13454_s29 + $0x518] ss:$40 sps:$4 sm:$0xff]   ;;  %v13706_v37 = vrot.slane %v13623_v20, %v13487_v29  ;;  %v11649_v20 = vld [vmem:[%s13454_s29 + $0x68] ss:$40 sps:$4 sm:$0xff]  }
 0x145   : > { %8355 = vmatprep.subr.bf16.mxu1 %v11569_v38  ;;  %v11651_v38 = vld [vmem:[%s13454_s29 + $0x6c] ss:$40 sps:$4 sm:$0xff]  }
 0x14b   : > { %8151 = vmatpush1.bf16.xpose.msra.mxu0 %v11564_v39  ;;  %v11654_v39 = vld [vmem:[%s13454_s29 + $0x56c] ss:$40 sps:$4 sm:$0xff]  }
 0x14c   : > { %8356 = vmatpush1.bf16.xpose.msra.mxu1 %v11567_v40  ;;  %8152 = vmatprep.subr.bf16.mxu0 %v11572_v41  ;;  %v13712_v40 = vcombine.high %v13636_v28, %v13636_v28  ;;  %v11652_v41 = vld [vmem:[%s13454_s29 + $0x568] ss:$40 sps:$4 sm:$0xff]  }
 0x14d   : > { %8357 = vmatprep.subr.bf16.mxu1 %v11575_v42  ;;  %v11657_v42 = vld [vmem:[%s13454_s29 + $0xbc] ss:$40 sps:$4 sm:$0xff]  }
 0x153   : > { %8153 = vmatpush1.bf16.xpose.msra.mxu0 %v11570_v43  ;;  %v11660_v43 = vld [vmem:[%s13454_s29 + $0x5bc] ss:$40 sps:$4 sm:$0xff]  }
 0x154   : > { %8358 = vmatpush1.bf16.xpose.msra.mxu1 %v11573_v44  ;;  %8154 = vmatprep.subr.bf16.mxu0 %v11578_v45  ;;  %v11655_v44 = vld [vmem:[%s13454_s29 + $0xb8] ss:$40 sps:$4 sm:$0xff]  }
 0x155   : > { %8359 = vmatprep.subr.bf16.mxu1 %v11581_v46  ;;  %v11658_v45 = vld [vmem:[%s13454_s29 + $0x5b8] ss:$40 sps:$4 sm:$0xff]   ;;  %v11663_v46 = vld [vmem:[%s13454_s29 + $0x10c] ss:$40 sps:$4 sm:$0xff]  }
 0x15b   : > { %8155 = vmatpush1.bf16.xpose.msra.mxu0 %v11576_v47  ;;  %v11666_v47 = vld [vmem:[%s13454_s29 + $0x60c] ss:$40 sps:$4 sm:$0xff]  }
 0x15c   : > { %8360 = vmatpush1.bf16.xpose.msra.mxu1 %v11579_v48  ;;  %8156 = vmatprep.subr.bf16.mxu0 %v11584_v49  ;;  %v11661_v48 = vld [vmem:[%s13454_s29 + $0x108] ss:$40 sps:$4 sm:$0xff]  }
 0x15d   : > { %8361 = vmatprep.subr.bf16.mxu1 %v11587_v50  ;;  %v11664_v49 = vld [vmem:[%s13454_s29 + $0x608] ss:$40 sps:$4 sm:$0xff]   ;;  %v11669_v50 = vld [vmem:[%s13454_s29 + $0x15c] ss:$40 sps:$4 sm:$0xff]  }
 0x163   : > { %8157 = vmatpush1.bf16.xpose.msra.mxu0 %v11582_v51  ;;  %v11672_v51 = vld [vmem:[%s13454_s29 + $0x65c] ss:$40 sps:$4 sm:$0xff]  }
 0x164   : > { %8362 = vmatpush1.bf16.xpose.msra.mxu1 %v11585_v52  ;;  %8158 = vmatprep.subr.bf16.mxu0 %v11590_v53  ;;  %v11667_v52 = vld [vmem:[%s13454_s29 + $0x158] ss:$40 sps:$4 sm:$0xff]  }
 0x165   : > { %8363 = vmatprep.subr.bf16.mxu1 %v11593_v54  ;;  %v11670_v53 = vld [vmem:[%s13454_s29 + $0x658] ss:$40 sps:$4 sm:$0xff]   ;;  %v11675_v54 = vld [vmem:[%s13454_s29 + $0x1ac] ss:$40 sps:$4 sm:$0xff]  }
 0x16b   : > { %8159 = vmatpush1.bf16.xpose.msra.mxu0 %v11588_v55  ;;  %v11678_v55 = vld [vmem:[%s13454_s29 + $0x6ac] ss:$40 sps:$4 sm:$0xff]  }
 0x16c   : > { %8364 = vmatpush1.bf16.xpose.msra.mxu1 %v11591_v56  ;;  %8160 = vmatprep.subr.bf16.mxu0 %v11596_v57  ;;  %v11673_v56 = vld [vmem:[%s13454_s29 + $0x1a8] ss:$40 sps:$4 sm:$0xff]  }
 0x16d   : > { %8365 = vmatprep.subr.bf16.mxu1 %v11599_v58  ;;  %v11676_v57 = vld [vmem:[%s13454_s29 + $0x6a8] ss:$40 sps:$4 sm:$0xff]   ;;  %v11681_v58 = vld [vmem:[%s13454_s29 + $0x1fc] ss:$40 sps:$4 sm:$0xff]  }
 0x173   : > { %8161 = vmatpush1.bf16.xpose.msra.mxu0 %v11594_v59  ;;  %v11684_v59 = vld [vmem:[%s13454_s29 + $0x6fc] ss:$40 sps:$4 sm:$0xff]  }
 0x174   : > { %8366 = vmatpush1.bf16.xpose.msra.mxu1 %v11597_v60  ;;  %8162 = vmatprep.subr.bf16.mxu0 %v11602_v61  ;;  %v11679_v60 = vld [vmem:[%s13454_s29 + $0x1f8] ss:$40 sps:$4 sm:$0xff]  }
 0x175   : > { %8367 = vmatprep.subr.bf16.mxu1 %v11605_v62  ;;  %v11682_v61 = vld [vmem:[%s13454_s29 + $0x6f8] ss:$40 sps:$4 sm:$0xff]   ;;  %v11687_v62 = vld [vmem:[%s13454_s29 + $0x24c] ss:$40 sps:$4 sm:$0xff]  }
 0x17b   : > { %8163 = vmatpush1.bf16.xpose.msra.mxu0 %v11600_v63  ;;  %v11690_v63 = vld [vmem:[%s13454_s29 + $0x74c] ss:$40 sps:$4 sm:$0xff]  }
 0x17c   : > { %8368 = vmatpush1.bf16.xpose.msra.mxu1 %v11603_v0  ;;  %8164 = vmatprep.subr.bf16.mxu0 %v11608_v1  ;;  %v11685_v0 = vld [vmem:[%s13454_s29 + $0x248] ss:$40 sps:$4 sm:$0xff]  }
 0x17d   : > { %8369 = vmatprep.subr.bf16.mxu1 %v11611_v2  ;;  %v11688_v1 = vld [vmem:[%s13454_s29 + $0x748] ss:$40 sps:$4 sm:$0xff]   ;;  %v11693_v2 = vld [vmem:[%s13454_s29 + $0x29c] ss:$40 sps:$4 sm:$0xff]  }
 0x183   : > { %8165 = vmatpush1.bf16.xpose.msra.mxu0 %v11606_v3  ;;  %v11696_v3 = vld [vmem:[%s13454_s29 + $0x79c] ss:$40 sps:$4 sm:$0xff]  }
 0x184   : > { %8370 = vmatpush1.bf16.xpose.msra.mxu1 %v11609_v4  ;;  %8166 = vmatprep.subr.bf16.mxu0 %v11614_v5  ;;  %v11691_v4 = vld [vmem:[%s13454_s29 + $0x298] ss:$40 sps:$4 sm:$0xff]  }
 0x185   : > { %8371 = vmatprep.subr.bf16.mxu1 %v11617_v6  ;;  %v11694_v5 = vld [vmem:[%s13454_s29 + $0x798] ss:$40 sps:$4 sm:$0xff]   ;;  %v11699_v6 = vld [vmem:[%s13454_s29 + $0x2ec] ss:$40 sps:$4 sm:$0xff]  }
 0x18b   : > { %8167 = vmatpush1.bf16.xpose.msra.mxu0 %v11612_v7  ;;  %v11702_v7 = vld [vmem:[%s13454_s29 + $0x7ec] ss:$40 sps:$4 sm:$0xff]  }
 0x18c   : > { %8372 = vmatpush1.bf16.xpose.msra.mxu1 %v11615_v8  ;;  %8168 = vmatprep.subr.bf16.mxu0 %v11620_v9  ;;  %v11697_v8 = vld [vmem:[%s13454_s29 + $0x2e8] ss:$40 sps:$4 sm:$0xff]  }
 0x18d   : > { %8373 = vmatprep.subr.bf16.mxu1 %v11623_v10  ;;  %v11700_v9 = vld [vmem:[%s13454_s29 + $0x7e8] ss:$40 sps:$4 sm:$0xff]   ;;  %v11705_v10 = vld [vmem:[%s13454_s29 + $0x33c] ss:$40 sps:$4 sm:$0xff]  }
 0x193   : > { %8169 = vmatpush1.bf16.xpose.msra.mxu0 %v11618_v11  ;;  %v11708_v11 = vld [vmem:[%s13454_s29 + $0x83c] ss:$40 sps:$4 sm:$0xff]  }
 0x194   : > { %8374 = vmatpush1.bf16.xpose.msra.mxu1 %v11621_v12  ;;  %8170 = vmatprep.subr.bf16.mxu0 %v11626_v14  ;;  %v11703_v12 = vld [vmem:[%s13454_s29 + $0x338] ss:$40 sps:$4 sm:$0xff]  }
 0x195   : > { %8375 = vmatprep.subr.bf16.mxu1 %v11629_v15  ;;  %v11706_v14 = vld [vmem:[%s13454_s29 + $0x838] ss:$40 sps:$4 sm:$0xff]   ;;  %v11711_v15 = vld [vmem:[%s13454_s29 + $0x38c] ss:$40 sps:$4 sm:$0xff]  }
 0x19b   : > { %8171 = vmatpush1.bf16.xpose.msra.mxu0 %v11624_v17  ;;  %v11714_v17 = vld [vmem:[%s13454_s29 + $0x88c] ss:$40 sps:$4 sm:$0xff]  }
 0x19c   : > { %8376 = vmatpush1.bf16.xpose.msra.mxu1 %v11627_v18  ;;  %8172 = vmatprep.subr.bf16.mxu0 %v11632_v19  ;;  %v11709_v18 = vld [vmem:[%s13454_s29 + $0x388] ss:$40 sps:$4 sm:$0xff]  }
 0x19d   : > { %8377 = vmatprep.subr.bf16.mxu1 %v11635_v21  ;;  %v11712_v19 = vld [vmem:[%s13454_s29 + $0x888] ss:$40 sps:$4 sm:$0xff]   ;;  %v11717_v21 = vld [vmem:[%s13454_s29 + $0x3dc] ss:$40 sps:$4 sm:$0xff]  }
 0x1a3   : > { %8173 = vmatpush1.bf16.xpose.msra.mxu0 %v11630_v22  ;;  %v11720_v22 = vld [vmem:[%s13454_s29 + $0x8dc] ss:$40 sps:$4 sm:$0xff]  }
 0x1a4   : > { %8378 = vmatpush1.bf16.xpose.msra.mxu1 %v11633_v24  ;;  %8174 = vmatprep.subr.bf16.mxu0 %v11638_v26  ;;  %v11715_v24 = vld [vmem:[%s13454_s29 + $0x3d8] ss:$40 sps:$4 sm:$0xff]  }
 0x1a5   : > { %8379 = vmatprep.subr.bf16.mxu1 %v11641_v27  ;;  %v11718_v26 = vld [vmem:[%s13454_s29 + $0x8d8] ss:$40 sps:$4 sm:$0xff]   ;;  %v11723_v27 = vld [vmem:[%s13454_s29 + $0x42c] ss:$40 sps:$4 sm:$0xff]  }
 0x1ab   : > { %8175 = vmatpush1.bf16.xpose.msra.mxu0 %v11636_v30  ;;  %v11726_v30 = vld [vmem:[%s13454_s29 + $0x92c] ss:$40 sps:$4 sm:$0xff]  }
 0x1ac   : > { %8380 = vmatpush1.bf16.xpose.msra.mxu1 %v11639_v31  ;;  %8185 = vmatprep.subr.bf16.mxu0 %v11645_v32  ;;  %v11721_v31 = vld [vmem:[%s13454_s29 + $0x428] ss:$40 sps:$4 sm:$0xff]  }
 0x1ad   : > { %8390 = vmatprep.subr.bf16.mxu1 %v11648_v33  ;;  %v11724_v32 = vld [vmem:[%s13454_s29 + $0x928] ss:$40 sps:$4 sm:$0xff]   ;;  %v11729_v33 = vld [vmem:[%s13454_s29 + $0x47c] ss:$40 sps:$4 sm:$0xff]  }
 0x1b2   : > { %8177 = vmatmul.mubr.bf16.vlgmr.msra.gmra.mrb[0].mxu0 %v13706_v37 }
 0x1b3   : > { %8382 = vmatmul.mubr.bf16.vlgmr.msra.gmra.mrb[0].mxu1 %v13706_v37  ;;  %8186 = vmatpush1.bf16.xpose.msra.mxu0 %v11643_v34  ;;  %v11732_v34 = vld [vmem:[%s13454_s29 + $0x97c] ss:$40 sps:$4 sm:$0xff]  }
 0x1b4   : > { %8391 = vmatpush1.bf16.xpose.msra.mxu1 %v11646_v36  ;;  %8187 = vmatprep.subr.bf16.mxu0 %v11651_v38  ;;  %v11727_v36 = vld [vmem:[%s13454_s29 + $0x478] ss:$40 sps:$4 sm:$0xff]  }
 0x1b5   : > { %8392 = vmatprep.subr.bf16.mxu1 %v11654_v39  ;;  %8217 = vmatprep.mubr.bf16.mxu0 %v13712_v40  ;;  %v11730_v38 = vld [vmem:[%s13454_s29 + $0x978] ss:$40 sps:$4 sm:$0xff]   ;;  %v11735_v39 = vld [vmem:[%s13454_s29 + $0x4cc] ss:$40 sps:$4 sm:$0xff]  }
 0x1b6   : > { %8422 = vmatprep.mubr.bf16.mxu1 %v13712_v40 }
 0x1bb   : > { %8188 = vmatpush1.bf16.xpose.msra.mxu0 %v11649_v20  ;;  %v11738_v20 = vld [vmem:[%s13454_s29 + $0x9cc] ss:$40 sps:$4 sm:$0xff]  }
 0x1bc   : > { %8393 = vmatpush1.bf16.xpose.msra.mxu1 %v11652_v41  ;;  %8189 = vmatprep.subr.bf16.mxu0 %v11657_v42  ;;  %v11733_v41 = vld [vmem:[%s13454_s29 + $0x4c8] ss:$40 sps:$4 sm:$0xff]  }
 0x1bd   : > { %8394 = vmatprep.subr.bf16.mxu1 %v11660_v43  ;;  %v11736_v42 = vld [vmem:[%s13454_s29 + $0x9c8] ss:$40 sps:$4 sm:$0xff]   ;;  %v11741_v43 = vld [vmem:[%s13454_s29 + $0x24] ss:$40 sps:$4 sm:$0xff]  }
 0x1c3   : > { %8190 = vmatpush1.bf16.xpose.msra.mxu0 %v11655_v44  ;;  %v11744_v44 = vld [vmem:[%s13454_s29 + $0x524] ss:$40 sps:$4 sm:$0xff]  }
 0x1c4   : > { %8395 = vmatpush1.bf16.xpose.msra.mxu1 %v11658_v45  ;;  %8191 = vmatprep.subr.bf16.mxu0 %v11663_v46  ;;  %v13781_v45 = vld.sshfl [vmem:[%s14981_s0 + $0x8] sm:$0x11 pattern:$0x75316420] }
 0x1c5   : > { %8396 = vmatprep.subr.bf16.mxu1 %v11666_v47  ;;  %v11739_v46 = vld [vmem:[%s13454_s29 + $0x20] ss:$40 sps:$4 sm:$0xff]  }
 0x1c6   : > { %v11742_v47 = vld [vmem:[%s13454_s29 + $0x520] ss:$40 sps:$4 sm:$0xff]  }
 0x1cb   : > { %8192 = vmatpush1.bf16.xpose.msra.mxu0 %v11661_v48  ;;  %v1637_v48 = vcombine.high %v13781_v45, %v13781_v45 }
 0x1cc   : > { %8397 = vmatpush1.bf16.xpose.msra.mxu1 %v11664_v49  ;;  %8193 = vmatprep.subr.bf16.mxu0 %v11669_v50  ;;  %v13789_v49 = vcombine.high %v13706_v37, %v13706_v37  ;;  %v11747_v50 = vld [vmem:[%s13454_s29 + $0x74] ss:$40 sps:$4 sm:$0xff]  }
 0x1cd   : > { %8398 = vmatprep.subr.bf16.mxu1 %v11672_v51  ;;  %v11750_v51 = vld [vmem:[%s13454_s29 + $0x574] ss:$40 sps:$4 sm:$0xff]  }
 0x1d3   : > { %8194 = vmatpush1.bf16.xpose.msra.mxu0 %v11667_v52  ;;  %v13794_v52 = vrot.slane %v1637_v48, %v13487_v29  ;;  %v11820_v48 = vld [vmem:[%s13454_s29 + $0x930] ss:$40 sps:$4 sm:$0xff]  }
 0x1d4   : > { %8399 = vmatpush1.bf16.xpose.msra.mxu1 %v11670_v53  ;;  %8195 = vmatprep.subr.bf16.mxu0 %v11675_v54  ;;  %v11745_v53 = vld [vmem:[%s13454_s29 + $0x70] ss:$40 sps:$4 sm:$0xff]  }
 0x1d5   : > { %8400 = vmatprep.subr.bf16.mxu1 %v11678_v55  ;;  %v11748_v54 = vld [vmem:[%s13454_s29 + $0x570] ss:$40 sps:$4 sm:$0xff]   ;;  %v11753_v55 = vld [vmem:[%s13454_s29 + $0xc4] ss:$40 sps:$4 sm:$0xff]  }
 0x1db   : > { %8196 = vmatpush1.bf16.xpose.msra.mxu0 %v11673_v56  ;;  %v11756_v56 = vld [vmem:[%s13454_s29 + $0x5c4] ss:$40 sps:$4 sm:$0xff]  }
 0x1dc   : > { %8401 = vmatpush1.bf16.xpose.msra.mxu1 %v11676_v57  ;;  %8197 = vmatprep.subr.bf16.mxu0 %v11681_v58  ;;  %v11751_v57 = vld [vmem:[%s13454_s29 + $0xc0] ss:$40 sps:$4 sm:$0xff]  }
 0x1dd   : > { %8402 = vmatprep.subr.bf16.mxu1 %v11684_v59  ;;  %v11754_v58 = vld [vmem:[%s13454_s29 + $0x5c0] ss:$40 sps:$4 sm:$0xff]   ;;  %v11759_v59 = vld [vmem:[%s13454_s29 + $0x114] ss:$40 sps:$4 sm:$0xff]  }
 0x1e3   : > { %8198 = vmatpush1.bf16.xpose.msra.mxu0 %v11679_v60  ;;  %v11762_v60 = vld [vmem:[%s13454_s29 + $0x614] ss:$40 sps:$4 sm:$0xff]  }
 0x1e4   : > { %8403 = vmatpush1.bf16.xpose.msra.mxu1 %v11682_v61  ;;  %8199 = vmatprep.subr.bf16.mxu0 %v11687_v62  ;;  %v11757_v61 = vld [vmem:[%s13454_s29 + $0x110] ss:$40 sps:$4 sm:$0xff]  }
 0x1e5   : > { %8404 = vmatprep.subr.bf16.mxu1 %v11690_v63  ;;  %v11760_v62 = vld [vmem:[%s13454_s29 + $0x610] ss:$40 sps:$4 sm:$0xff]   ;;  %v11765_v63 = vld [vmem:[%s13454_s29 + $0x164] ss:$40 sps:$4 sm:$0xff]  }
 0x1eb   : > { %8200 = vmatpush1.bf16.xpose.msra.mxu0 %v11685_v0  ;;  %v11768_v0 = vld [vmem:[%s13454_s29 + $0x664] ss:$40 sps:$4 sm:$0xff]  }
 0x1ec   : > { %8405 = vmatpush1.bf16.xpose.msra.mxu1 %v11688_v1  ;;  %8201 = vmatprep.subr.bf16.mxu0 %v11693_v2  ;;  %v11763_v1 = vld [vmem:[%s13454_s29 + $0x160] ss:$40 sps:$4 sm:$0xff]  }
 0x1ed   : > { %8406 = vmatprep.subr.bf16.mxu1 %v11696_v3  ;;  %v11766_v2 = vld [vmem:[%s13454_s29 + $0x660] ss:$40 sps:$4 sm:$0xff]   ;;  %v11771_v3 = vld [vmem:[%s13454_s29 + $0x1b4] ss:$40 sps:$4 sm:$0xff]  }
 0x1f3   : > { %8202 = vmatpush1.bf16.xpose.msra.mxu0 %v11691_v4  ;;  %v11774_v4 = vld [vmem:[%s13454_s29 + $0x6b4] ss:$40 sps:$4 sm:$0xff]  }
 0x1f4   : > { %8407 = vmatpush1.bf16.xpose.msra.mxu1 %v11694_v5  ;;  %8203 = vmatprep.subr.bf16.mxu0 %v11699_v6  ;;  %v11769_v5 = vld [vmem:[%s13454_s29 + $0x1b0] ss:$40 sps:$4 sm:$0xff]  }
 0x1f5   : > { %8408 = vmatprep.subr.bf16.mxu1 %v11702_v7  ;;  %v11772_v6 = vld [vmem:[%s13454_s29 + $0x6b0] ss:$40 sps:$4 sm:$0xff]   ;;  %v11777_v7 = vld [vmem:[%s13454_s29 + $0x204] ss:$40 sps:$4 sm:$0xff]  }
 0x1fb   : > { %8204 = vmatpush1.bf16.xpose.msra.mxu0 %v11697_v8  ;;  %v11780_v8 = vld [vmem:[%s13454_s29 + $0x704] ss:$40 sps:$4 sm:$0xff]  }
 0x1fc   : > { %8409 = vmatpush1.bf16.xpose.msra.mxu1 %v11700_v9  ;;  %8205 = vmatprep.subr.bf16.mxu0 %v11705_v10  ;;  %v11775_v9 = vld [vmem:[%s13454_s29 + $0x200] ss:$40 sps:$4 sm:$0xff]  }
 0x1fd   : > { %8410 = vmatprep.subr.bf16.mxu1 %v11708_v11  ;;  %v11778_v10 = vld [vmem:[%s13454_s29 + $0x700] ss:$40 sps:$4 sm:$0xff]   ;;  %v11783_v11 = vld [vmem:[%s13454_s29 + $0x254] ss:$40 sps:$4 sm:$0xff]  }
 0x203   : > { %8206 = vmatpush1.bf16.xpose.msra.mxu0 %v11703_v12  ;;  %v11786_v12 = vld [vmem:[%s13454_s29 + $0x754] ss:$40 sps:$4 sm:$0xff]  }
 0x204   : > { %8411 = vmatpush1.bf16.xpose.msra.mxu1 %v11706_v14  ;;  %8207 = vmatprep.subr.bf16.mxu0 %v11711_v15  ;;  %v11781_v14 = vld [vmem:[%s13454_s29 + $0x250] ss:$40 sps:$4 sm:$0xff]  }
 0x205   : > { %8412 = vmatprep.subr.bf16.mxu1 %v11714_v17  ;;  %v11784_v15 = vld [vmem:[%s13454_s29 + $0x750] ss:$40 sps:$4 sm:$0xff]   ;;  %v11789_v17 = vld [vmem:[%s13454_s29 + $0x2a4] ss:$40 sps:$4 sm:$0xff]  }
 0x20b   : > { %8208 = vmatpush1.bf16.xpose.msra.mxu0 %v11709_v18  ;;  %v11792_v18 = vld [vmem:[%s13454_s29 + $0x7a4] ss:$40 sps:$4 sm:$0xff]  }
 0x20c   : > { %8413 = vmatpush1.bf16.xpose.msra.mxu1 %v11712_v19  ;;  %8209 = vmatprep.subr.bf16.mxu0 %v11717_v21  ;;  %v11787_v19 = vld [vmem:[%s13454_s29 + $0x2a0] ss:$40 sps:$4 sm:$0xff]  }
 0x20d   : > { %8414 = vmatprep.subr.bf16.mxu1 %v11720_v22  ;;  %v11790_v21 = vld [vmem:[%s13454_s29 + $0x7a0] ss:$40 sps:$4 sm:$0xff]   ;;  %v11795_v22 = vld [vmem:[%s13454_s29 + $0x2f4] ss:$40 sps:$4 sm:$0xff]  }
 0x213   : > { %8210 = vmatpush1.bf16.xpose.msra.mxu0 %v11715_v24  ;;  %v11798_v24 = vld [vmem:[%s13454_s29 + $0x7f4] ss:$40 sps:$4 sm:$0xff]  }
 0x214   : > { %8415 = vmatpush1.bf16.xpose.msra.mxu1 %v11718_v26  ;;  %8211 = vmatprep.subr.bf16.mxu0 %v11723_v27  ;;  %v11793_v26 = vld [vmem:[%s13454_s29 + $0x2f0] ss:$40 sps:$4 sm:$0xff]  }
 0x215   : > { %8416 = vmatprep.subr.bf16.mxu1 %v11726_v30  ;;  %v11796_v27 = vld [vmem:[%s13454_s29 + $0x7f0] ss:$40 sps:$4 sm:$0xff]   ;;  %v11801_v30 = vld [vmem:[%s13454_s29 + $0x344] ss:$40 sps:$4 sm:$0xff]  }
 0x21b   : > { %8212 = vmatpush1.bf16.xpose.msra.mxu0 %v11721_v31  ;;  %v11804_v31 = vld [vmem:[%s13454_s29 + $0x844] ss:$40 sps:$4 sm:$0xff]  }
 0x21c   : > { %8417 = vmatpush1.bf16.xpose.msra.mxu1 %v11724_v32  ;;  %8213 = vmatprep.subr.bf16.mxu0 %v11729_v33  ;;  %v11799_v32 = vld [vmem:[%s13454_s29 + $0x340] ss:$40 sps:$4 sm:$0xff]  }
 0x21d   : > { %8418 = vmatprep.subr.bf16.mxu1 %v11732_v34  ;;  %v11802_v33 = vld [vmem:[%s13454_s29 + $0x840] ss:$40 sps:$4 sm:$0xff]   ;;  %v11807_v34 = vld [vmem:[%s13454_s29 + $0x394] ss:$40 sps:$4 sm:$0xff]  }
 0x223   : > { %8214 = vmatpush1.bf16.xpose.msra.mxu0 %v11727_v36  ;;  %v11810_v36 = vld [vmem:[%s13454_s29 + $0x894] ss:$40 sps:$4 sm:$0xff]  }
 0x224   : > { %8419 = vmatpush1.bf16.xpose.msra.mxu1 %v11730_v38  ;;  %8215 = vmatprep.subr.bf16.mxu0 %v11735_v39  ;;  %v11805_v38 = vld [vmem:[%s13454_s29 + $0x390] ss:$40 sps:$4 sm:$0xff]  }
 0x225   : > { %8420 = vmatprep.subr.bf16.mxu1 %v11738_v20  ;;  %v11808_v39 = vld [vmem:[%s13454_s29 + $0x890] ss:$40 sps:$4 sm:$0xff]   ;;  %v11813_v20 = vld [vmem:[%s13454_s29 + $0x3e4] ss:$40 sps:$4 sm:$0xff]  }
 0x22b   : > { %8216 = vmatpush1.bf16.xpose.msra.mxu0 %v11733_v41  ;;  %v11816_v41 = vld [vmem:[%s13454_s29 + $0x8e4] ss:$40 sps:$4 sm:$0xff]  }
 0x22c   : > { %8421 = vmatpush1.bf16.xpose.msra.mxu1 %v11736_v42  ;;  %8226 = vmatprep.subr.bf16.mxu0 %v11741_v43  ;;  %v11811_v42 = vld [vmem:[%s13454_s29 + $0x3e0] ss:$40 sps:$4 sm:$0xff]  }
 0x22d   : > { %8431 = vmatprep.subr.bf16.mxu1 %v11744_v44  ;;  %v11814_v43 = vld [vmem:[%s13454_s29 + $0x8e0] ss:$40 sps:$4 sm:$0xff]   ;;  %v11819_v44 = vld [vmem:[%s13454_s29 + $0x434] ss:$40 sps:$4 sm:$0xff]  }
 0x232   : > { %8218 = vmatmul.mubr.bf16.vlgmr.msra.gmra.mrb[0].mxu0 %v13789_v49 }
 0x233   : > { %8423 = vmatmul.mubr.bf16.vlgmr.msra.gmra.mrb[0].mxu1 %v13789_v49  ;;  %8227 = vmatpush1.bf16.xpose.msra.mxu0 %v11739_v46  ;;  %v11822_v46 = vld [vmem:[%s13454_s29 + $0x934] ss:$40 sps:$4 sm:$0xff]  }
 0x234   : > { %8432 = vmatpush1.bf16.xpose.msra.mxu1 %v11742_v47  ;;  %8228 = vmatprep.subr.bf16.mxu0 %v11747_v50  ;;  %v11817_v47 = vld [vmem:[%s13454_s29 + $0x430] ss:$40 sps:$4 sm:$0xff]   ;;  %v11825_v50 = vld [vmem:[%s13454_s29 + $0x484] ss:$40 sps:$4 sm:$0xff]  }
 0x235   : > { %8433 = vmatprep.subr.bf16.mxu1 %v11750_v51  ;;  %8258 = vmatprep.mubr.bf16.mxu0 %v13794_v52  ;;  %v11828_v51 = vld [vmem:[%s13454_s29 + $0x984] ss:$40 sps:$4 sm:$0xff]  }
 0x236   : > { %8463 = vmatprep.mubr.bf16.mxu1 %v13794_v52 }
 0x23b   : > { %8229 = vmatpush1.bf16.xpose.msra.mxu0 %v11745_v53  ;;  %v11823_v53 = vld [vmem:[%s13454_s29 + $0x480] ss:$40 sps:$4 sm:$0xff]  }
 0x23c   : > { %8434 = vmatpush1.bf16.xpose.msra.mxu1 %v11748_v54  ;;  %8230 = vmatprep.subr.bf16.mxu0 %v11753_v55  ;;  %v11826_v54 = vld [vmem:[%s13454_s29 + $0x980] ss:$40 sps:$4 sm:$0xff]   ;;  %v11831_v55 = vld [vmem:[%s13454_s29 + $0x4d4] ss:$40 sps:$4 sm:$0xff]  }
 0x23d   : > { %8435 = vmatprep.subr.bf16.mxu1 %v11756_v56  ;;  %v11834_v56 = vld [vmem:[%s13454_s29 + $0x9d4] ss:$40 sps:$4 sm:$0xff]  }
 0x243   : > { %8231 = vmatpush1.bf16.xpose.msra.mxu0 %v11751_v57  ;;  %v11829_v57 = vld [vmem:[%s13454_s29 + $0x4d0] ss:$40 sps:$4 sm:$0xff]  }
 0x244   : > { %8436 = vmatpush1.bf16.xpose.msra.mxu1 %v11754_v58  ;;  %8232 = vmatprep.subr.bf16.mxu0 %v11759_v59  ;;  %v11832_v58 = vld [vmem:[%s13454_s29 + $0x9d0] ss:$40 sps:$4 sm:$0xff]   ;;  %v11837_v59 = vld [vmem:[%s13454_s29 + $0xa04] ss:$40 sps:$4 sm:$0xff]  }
 0x245   : > { %8437 = vmatprep.subr.bf16.mxu1 %v11762_v60  ;;  %v11840_v60 = vld [vmem:[%s13454_s29 + $0xf04] ss:$40 sps:$4 sm:$0xff]  }
 0x24b   : > { %8233 = vmatpush1.bf16.xpose.msra.mxu0 %v11757_v61  ;;  %v13862_v61 = vrot.slane %v13781_v45, %v13487_v29  ;;  %v11841_v29 = vld [vmem:[%s13454_s29 + $0xa50] ss:$40 sps:$4 sm:$0xff]  }
 0x24c   : > { %8438 = vmatpush1.bf16.xpose.msra.mxu1 %v11760_v62  ;;  %8234 = vmatprep.subr.bf16.mxu0 %v11765_v63  ;;  %v11835_v62 = vld [vmem:[%s13454_s29 + $0xa00] ss:$40 sps:$4 sm:$0xff]   ;;  %v11844_v45 = vld [vmem:[%s13454_s29 + $0xf50] ss:$40 sps:$4 sm:$0xff]  }
 0x24d   : > { %8439 = vmatprep.subr.bf16.mxu1 %v11768_v0  ;;  %v11838_v63 = vld [vmem:[%s13454_s29 + $0xf00] ss:$40 sps:$4 sm:$0xff]   ;;  %v11843_v0 = vld [vmem:[%s13454_s29 + $0xa54] ss:$40 sps:$4 sm:$0xff]  }
 0x253   : > { %8235 = vmatpush1.bf16.xpose.msra.mxu0 %v11763_v1  ;;  %v11846_v1 = vld [vmem:[%s13454_s29 + $0xf54] ss:$40 sps:$4 sm:$0xff]  }
 0x254   : > { %8440 = vmatpush1.bf16.xpose.msra.mxu1 %v11766_v2  ;;  %8236 = vmatprep.subr.bf16.mxu0 %v11771_v3  ;;  %v11849_v2 = vld [vmem:[%s13454_s29 + $0xaa4] ss:$40 sps:$4 sm:$0xff]  }
 0x255   : > { %8441 = vmatprep.subr.bf16.mxu1 %v11774_v4  ;;  %v11852_v3 = vld [vmem:[%s13454_s29 + $0xfa4] ss:$40 sps:$4 sm:$0xff]   ;;  %v11847_v4 = vld [vmem:[%s13454_s29 + $0xaa0] ss:$40 sps:$4 sm:$0xff]  }
 0x25b   : > { %8237 = vmatpush1.bf16.xpose.msra.mxu0 %v11769_v5  ;;  %v11850_v5 = vld [vmem:[%s13454_s29 + $0xfa0] ss:$40 sps:$4 sm:$0xff]  }
 0x25c   : > { %8442 = vmatpush1.bf16.xpose.msra.mxu1 %v11772_v6  ;;  %8238 = vmatprep.subr.bf16.mxu0 %v11777_v7  ;;  %v11855_v6 = vld [vmem:[%s13454_s29 + $0xaf4] ss:$40 sps:$4 sm:$0xff]  }
 0x25d   : > { %8443 = vmatprep.subr.bf16.mxu1 %v11780_v8  ;;  %v11858_v7 = vld [vmem:[%s13454_s29 + $0xff4] ss:$40 sps:$4 sm:$0xff]   ;;  %v11853_v8 = vld [vmem:[%s13454_s29 + $0xaf0] ss:$40 sps:$4 sm:$0xff]  }
 0x263   : > { %8239 = vmatpush1.bf16.xpose.msra.mxu0 %v11775_v9  ;;  %v11856_v9 = vld [vmem:[%s13454_s29 + $0xff0] ss:$40 sps:$4 sm:$0xff]  }
 0x264   : > { %8444 = vmatpush1.bf16.xpose.msra.mxu1 %v11778_v10  ;;  %8240 = vmatprep.subr.bf16.mxu0 %v11783_v11  ;;  %v11861_v10 = vld [vmem:[%s13454_s29 + $0xb44] ss:$40 sps:$4 sm:$0xff]  }
 0x265   : > { %8445 = vmatprep.subr.bf16.mxu1 %v11786_v12  ;;  %v11864_v11 = vld [vmem:[%s13454_s29 + $0x1044] ss:$40 sps:$4 sm:$0xff]   ;;  %v11859_v12 = vld [vmem:[%s13454_s29 + $0xb40] ss:$40 sps:$4 sm:$0xff]  }
 0x26b   : > { %8241 = vmatpush1.bf16.xpose.msra.mxu0 %v11781_v14  ;;  %v11862_v14 = vld [vmem:[%s13454_s29 + $0x1040] ss:$40 sps:$4 sm:$0xff]  }
 0x26c   : > { %8446 = vmatpush1.bf16.xpose.msra.mxu1 %v11784_v15  ;;  %8242 = vmatprep.subr.bf16.mxu0 %v11789_v17  ;;  %v11867_v15 = vld [vmem:[%s13454_s29 + $0xb94] ss:$40 sps:$4 sm:$0xff]  }
 0x26d   : > { %8447 = vmatprep.subr.bf16.mxu1 %v11792_v18  ;;  %v11870_v17 = vld [vmem:[%s13454_s29 + $0x1094] ss:$40 sps:$4 sm:$0xff]   ;;  %v11865_v18 = vld [vmem:[%s13454_s29 + $0xb90] ss:$40 sps:$4 sm:$0xff]  }
 0x273   : > { %8243 = vmatpush1.bf16.xpose.msra.mxu0 %v11787_v19  ;;  %v11868_v19 = vld [vmem:[%s13454_s29 + $0x1090] ss:$40 sps:$4 sm:$0xff]  }
 0x274   : > { %8448 = vmatpush1.bf16.xpose.msra.mxu1 %v11790_v21  ;;  %8244 = vmatprep.subr.bf16.mxu0 %v11795_v22  ;;  %v11873_v21 = vld [vmem:[%s13454_s29 + $0xbe4] ss:$40 sps:$4 sm:$0xff]  }
 0x275   : > { %8449 = vmatprep.subr.bf16.mxu1 %v11798_v24  ;;  %v11876_v22 = vld [vmem:[%s13454_s29 + $0x10e4] ss:$40 sps:$4 sm:$0xff]   ;;  %v11871_v24 = vld [vmem:[%s13454_s29 + $0xbe0] ss:$40 sps:$4 sm:$0xff]  }
 0x27b   : > { %8245 = vmatpush1.bf16.xpose.msra.mxu0 %v11793_v26  ;;  %v11874_v26 = vld [vmem:[%s13454_s29 + $0x10e0] ss:$40 sps:$4 sm:$0xff]  }
 0x27c   : > { %8450 = vmatpush1.bf16.xpose.msra.mxu1 %v11796_v27  ;;  %8246 = vmatprep.subr.bf16.mxu0 %v11801_v30  ;;  %v11879_v27 = vld [vmem:[%s13454_s29 + $0xc34] ss:$40 sps:$4 sm:$0xff]  }
 0x27d   : > { %8451 = vmatprep.subr.bf16.mxu1 %v11804_v31  ;;  %v11882_v30 = vld [vmem:[%s13454_s29 + $0x1134] ss:$40 sps:$4 sm:$0xff]   ;;  %v11877_v31 = vld [vmem:[%s13454_s29 + $0xc30] ss:$40 sps:$4 sm:$0xff]  }
 0x283   : > { %8247 = vmatpush1.bf16.xpose.msra.mxu0 %v11799_v32  ;;  %v11880_v32 = vld [vmem:[%s13454_s29 + $0x1130] ss:$40 sps:$4 sm:$0xff]  }
 0x284   : > { %8452 = vmatpush1.bf16.xpose.msra.mxu1 %v11802_v33  ;;  %8248 = vmatprep.subr.bf16.mxu0 %v11807_v34  ;;  %v11885_v33 = vld [vmem:[%s13454_s29 + $0xc84] ss:$40 sps:$4 sm:$0xff]  }
 0x285   : > { %8453 = vmatprep.subr.bf16.mxu1 %v11810_v36  ;;  %v11888_v34 = vld [vmem:[%s13454_s29 + $0x1184] ss:$40 sps:$4 sm:$0xff]   ;;  %v11883_v36 = vld [vmem:[%s13454_s29 + $0xc80] ss:$40 sps:$4 sm:$0xff]  }
 0x28b   : > { %8249 = vmatpush1.bf16.xpose.msra.mxu0 %v11805_v38  ;;  %v11886_v38 = vld [vmem:[%s13454_s29 + $0x1180] ss:$40 sps:$4 sm:$0xff]  }
 0x28c   : > { %8454 = vmatpush1.bf16.xpose.msra.mxu1 %v11808_v39  ;;  %8250 = vmatprep.subr.bf16.mxu0 %v11813_v20  ;;  %v11891_v39 = vld [vmem:[%s13454_s29 + $0xcd4] ss:$40 sps:$4 sm:$0xff]  }
 0x28d   : > { %8455 = vmatprep.subr.bf16.mxu1 %v11816_v41  ;;  %v11894_v20 = vld [vmem:[%s13454_s29 + $0x11d4] ss:$40 sps:$4 sm:$0xff]   ;;  %v11889_v41 = vld [vmem:[%s13454_s29 + $0xcd0] ss:$40 sps:$4 sm:$0xff]  }
 0x293   : > { %8251 = vmatpush1.bf16.xpose.msra.mxu0 %v11811_v42  ;;  %v11892_v42 = vld [vmem:[%s13454_s29 + $0x11d0] ss:$40 sps:$4 sm:$0xff]  }
 0x294   : > { %8456 = vmatpush1.bf16.xpose.msra.mxu1 %v11814_v43  ;;  %8252 = vmatprep.subr.bf16.mxu0 %v11819_v44  ;;  %v11897_v43 = vld [vmem:[%s13454_s29 + $0xd24] ss:$40 sps:$4 sm:$0xff]  }
 0x295   : > { %8457 = vmatprep.subr.bf16.mxu1 %v11822_v46  ;;  %v11900_v44 = vld [vmem:[%s13454_s29 + $0x1224] ss:$40 sps:$4 sm:$0xff]   ;;  %v11895_v46 = vld [vmem:[%s13454_s29 + $0xd20] ss:$40 sps:$4 sm:$0xff]  }
 0x29b   : > { %8253 = vmatpush1.bf16.xpose.msra.mxu0 %v11817_v47  ;;  %v11898_v47 = vld [vmem:[%s13454_s29 + $0x1220] ss:$40 sps:$4 sm:$0xff]  }
 0x29c   : > { %8458 = vmatpush1.bf16.xpose.msra.mxu1 %v11820_v48  ;;  %8254 = vmatprep.subr.bf16.mxu0 %v11825_v50  ;;  %v11903_v48 = vld [vmem:[%s13454_s29 + $0xd74] ss:$40 sps:$4 sm:$0xff]  }
 0x29d   : > { %8459 = vmatprep.subr.bf16.mxu1 %v11828_v51  ;;  %v11906_v50 = vld [vmem:[%s13454_s29 + $0x1274] ss:$40 sps:$4 sm:$0xff]   ;;  %v11901_v51 = vld [vmem:[%s13454_s29 + $0xd70] ss:$40 sps:$4 sm:$0xff]  }
 0x2a3   : > { %8255 = vmatpush1.bf16.xpose.msra.mxu0 %v11823_v53  ;;  %v11904_v53 = vld [vmem:[%s13454_s29 + $0x1270] ss:$40 sps:$4 sm:$0xff]  }
 0x2a4   : > { %8460 = vmatpush1.bf16.xpose.msra.mxu1 %v11826_v54  ;;  %8256 = vmatprep.subr.bf16.mxu0 %v11831_v55  ;;  %v11909_v54 = vld [vmem:[%s13454_s29 + $0xdc4] ss:$40 sps:$4 sm:$0xff]  }
 0x2a5   : > { %8461 = vmatprep.subr.bf16.mxu1 %v11834_v56  ;;  %v11912_v55 = vld [vmem:[%s13454_s29 + $0x12c4] ss:$40 sps:$4 sm:$0xff]   ;;  %v11907_v56 = vld [vmem:[%s13454_s29 + $0xdc0] ss:$40 sps:$4 sm:$0xff]  }
 0x2ab   : > { %8257 = vmatpush1.bf16.xpose.msra.mxu0 %v11829_v57  ;;  %v11910_v57 = vld [vmem:[%s13454_s29 + $0x12c0] ss:$40 sps:$4 sm:$0xff]  }
 0x2ac   : > { %8462 = vmatpush1.bf16.xpose.msra.mxu1 %v11832_v58  ;;  %8472 = vmatprep.subr.bf16.mxu0 %v11837_v59  ;;  %v11915_v58 = vld [vmem:[%s13454_s29 + $0xe14] ss:$40 sps:$4 sm:$0xff]  }
 0x2ad   : > { %8677 = vmatprep.subr.bf16.mxu1 %v11840_v60  ;;  %v11918_v59 = vld [vmem:[%s13454_s29 + $0x1314] ss:$40 sps:$4 sm:$0xff]   ;;  %v11913_v60 = vld [vmem:[%s13454_s29 + $0xe10] ss:$40 sps:$4 sm:$0xff]  }
 0x2b2   : > { %8259 = vmatmul.mubr.bf16.vlgmr.msra.gmra.mrb[0].mxu0 %v13862_v61 }
 0x2b3   : > { %8464 = vmatmul.mubr.bf16.vlgmr.msra.gmra.mrb[0].mxu1 %v13862_v61  ;;  %8473 = vmatpush1.bf16.xpose.msra.mxu0 %v11835_v62  ;;  %v11916_v62 = vld [vmem:[%s13454_s29 + $0x1310] ss:$40 sps:$4 sm:$0xff]  }
 0x2b4   : > { %8678 = vmatpush1.bf16.xpose.msra.mxu1 %v11838_v63  ;;  %8474 = vmatprep.subr.bf16.mxu0 %v11843_v0  ;;  %v11921_v63 = vld [vmem:[%s13454_s29 + $0xe64] ss:$40 sps:$4 sm:$0xff]  }
 0x2b5   : > { %8679 = vmatprep.subr.bf16.mxu1 %v11846_v1  ;;  %8504 = vmatprep.mubr.bf16.mxu0 %v13500_v35  ;;  %v11924_v0 = vld [vmem:[%s13454_s29 + $0x1364] ss:$40 sps:$4 sm:$0xff]   ;;  %v11919_v1 = vld [vmem:[%s13454_s29 + $0xe60] ss:$40 sps:$4 sm:$0xff]  }
 0x2b6   : > { %8709 = vmatprep.mubr.bf16.mxu1 %v13500_v35 }
 0x2bb   : > { %8475 = vmatpush1.bf16.xpose.msra.mxu0 %v11841_v29  ;;  %v11922_v29 = vld [vmem:[%s13454_s29 + $0x1360] ss:$40 sps:$4 sm:$0xff]  }
 0x2bc   : > { %8680 = vmatpush1.bf16.xpose.msra.mxu1 %v11844_v45  ;;  %8476 = vmatprep.subr.bf16.mxu0 %v11849_v2  ;;  %v11927_v45 = vld [vmem:[%s13454_s29 + $0xeb4] ss:$40 sps:$4 sm:$0xff]  }
 0x2bd   : > { %8681 = vmatprep.subr.bf16.mxu1 %v11852_v3  ;;  %v11930_v2 = vld [vmem:[%s13454_s29 + $0x13b4] ss:$40 sps:$4 sm:$0xff]   ;;  %v11925_v3 = vld [vmem:[%s13454_s29 + $0xeb0] ss:$40 sps:$4 sm:$0xff]  }
 0x2c3   : > { %8477 = vmatpush1.bf16.xpose.msra.mxu0 %v11847_v4  ;;  %v11928_v4 = vld [vmem:[%s13454_s29 + $0x13b0] ss:$40 sps:$4 sm:$0xff]  }
 0x2c4   : > { %8682 = vmatpush1.bf16.xpose.msra.mxu1 %v11850_v5  ;;  %8478 = vmatprep.subr.bf16.mxu0 %v11855_v6  ;;  %v11933_v5 = vld [vmem:[%s13454_s29 + $0xa0c] ss:$40 sps:$4 sm:$0xff]  }
 0x2c5   : > { %8683 = vmatprep.subr.bf16.mxu1 %v11858_v7  ;;  %v11936_v6 = vld [vmem:[%s13454_s29 + $0xf0c] ss:$40 sps:$4 sm:$0xff]   ;;  %v11931_v7 = vld [vmem:[%s13454_s29 + $0xa08] ss:$40 sps:$4 sm:$0xff]  }
 0x2cb   : > { %8479 = vmatpush1.bf16.xpose.msra.mxu0 %v11853_v8  ;;  %v11934_v8 = vld [vmem:[%s13454_s29 + $0xf08] ss:$40 sps:$4 sm:$0xff]  }
 0x2cc   : > { %8684 = vmatpush1.bf16.xpose.msra.mxu1 %v11856_v9  ;;  %8480 = vmatprep.subr.bf16.mxu0 %v11861_v10  ;;  %v11939_v9 = vld [vmem:[%s13454_s29 + $0xa5c] ss:$40 sps:$4 sm:$0xff]  }
 0x2cd   : > { %8685 = vmatprep.subr.bf16.mxu1 %v11864_v11  ;;  %v11942_v10 = vld [vmem:[%s13454_s29 + $0xf5c] ss:$40 sps:$4 sm:$0xff]   ;;  %v11937_v11 = vld [vmem:[%s13454_s29 + $0xa58] ss:$40 sps:$4 sm:$0xff]  }
 0x2d3   : > { %8481 = vmatpush1.bf16.xpose.msra.mxu0 %v11859_v12  ;;  %v11940_v12 = vld [vmem:[%s13454_s29 + $0xf58] ss:$40 sps:$4 sm:$0xff]  }
 0x2d4   : > { %8686 = vmatpush1.bf16.xpose.msra.mxu1 %v11862_v14  ;;  %8482 = vmatprep.subr.bf16.mxu0 %v11867_v15  ;;  %v11945_v14 = vld [vmem:[%s13454_s29 + $0xaac] ss:$40 sps:$4 sm:$0xff]  }
 0x2d5   : > { %8687 = vmatprep.subr.bf16.mxu1 %v11870_v17  ;;  %v11948_v15 = vld [vmem:[%s13454_s29 + $0xfac] ss:$40 sps:$4 sm:$0xff]   ;;  %v11943_v17 = vld [vmem:[%s13454_s29 + $0xaa8] ss:$40 sps:$4 sm:$0xff]  }
 0x2db   : > { %8483 = vmatpush1.bf16.xpose.msra.mxu0 %v11865_v18  ;;  %v11946_v18 = vld [vmem:[%s13454_s29 + $0xfa8] ss:$40 sps:$4 sm:$0xff]  }
 0x2dc   : > { %8688 = vmatpush1.bf16.xpose.msra.mxu1 %v11868_v19  ;;  %8484 = vmatprep.subr.bf16.mxu0 %v11873_v21  ;;  %v11951_v19 = vld [vmem:[%s13454_s29 + $0xafc] ss:$40 sps:$4 sm:$0xff]  }
 0x2dd   : > { %8689 = vmatprep.subr.bf16.mxu1 %v11876_v22  ;;  %v11954_v21 = vld [vmem:[%s13454_s29 + $0xffc] ss:$40 sps:$4 sm:$0xff]   ;;  %v11949_v22 = vld [vmem:[%s13454_s29 + $0xaf8] ss:$40 sps:$4 sm:$0xff]  }
 0x2e3   : > { %8485 = vmatpush1.bf16.xpose.msra.mxu0 %v11871_v24  ;;  %v11952_v24 = vld [vmem:[%s13454_s29 + $0xff8] ss:$40 sps:$4 sm:$0xff]  }
 0x2e4   : > { %8690 = vmatpush1.bf16.xpose.msra.mxu1 %v11874_v26  ;;  %8486 = vmatprep.subr.bf16.mxu0 %v11879_v27  ;;  %v11957_v26 = vld [vmem:[%s13454_s29 + $0xb4c] ss:$40 sps:$4 sm:$0xff]  }
 0x2e5   : > { %8691 = vmatprep.subr.bf16.mxu1 %v11882_v30  ;;  %v11960_v27 = vld [vmem:[%s13454_s29 + $0x104c] ss:$40 sps:$4 sm:$0xff]   ;;  %v11955_v30 = vld [vmem:[%s13454_s29 + $0xb48] ss:$40 sps:$4 sm:$0xff]  }
 0x2eb   : > { %8487 = vmatpush1.bf16.xpose.msra.mxu0 %v11877_v31  ;;  %v11958_v31 = vld [vmem:[%s13454_s29 + $0x1048] ss:$40 sps:$4 sm:$0xff]  }
 0x2ec   : > { %8692 = vmatpush1.bf16.xpose.msra.mxu1 %v11880_v32  ;;  %8488 = vmatprep.subr.bf16.mxu0 %v11885_v33  ;;  %v11963_v32 = vld [vmem:[%s13454_s29 + $0xb9c] ss:$40 sps:$4 sm:$0xff]  }
 0x2ed   : > { %8693 = vmatprep.subr.bf16.mxu1 %v11888_v34  ;;  %v11966_v33 = vld [vmem:[%s13454_s29 + $0x109c] ss:$40 sps:$4 sm:$0xff]   ;;  %v11961_v34 = vld [vmem:[%s13454_s29 + $0xb98] ss:$40 sps:$4 sm:$0xff]  }
 0x2f3   : > { %8489 = vmatpush1.bf16.xpose.msra.mxu0 %v11883_v36  ;;  %v11964_v36 = vld [vmem:[%s13454_s29 + $0x1098] ss:$40 sps:$4 sm:$0xff]  }
 0x2f4   : > { %8694 = vmatpush1.bf16.xpose.msra.mxu1 %v11886_v38  ;;  %8490 = vmatprep.subr.bf16.mxu0 %v11891_v39  ;;  %v11969_v38 = vld [vmem:[%s13454_s29 + $0xbec] ss:$40 sps:$4 sm:$0xff]  }
 0x2f5   : > { %8695 = vmatprep.subr.bf16.mxu1 %v11894_v20  ;;  %v11972_v39 = vld [vmem:[%s13454_s29 + $0x10ec] ss:$40 sps:$4 sm:$0xff]   ;;  %v11967_v20 = vld [vmem:[%s13454_s29 + $0xbe8] ss:$40 sps:$4 sm:$0xff]  }
 0x2fb   : > { %8491 = vmatpush1.bf16.xpose.msra.mxu0 %v11889_v41  ;;  %v11970_v41 = vld [vmem:[%s13454_s29 + $0x10e8] ss:$40 sps:$4 sm:$0xff]  }
 0x2fc   : > { %8696 = vmatpush1.bf16.xpose.msra.mxu1 %v11892_v42  ;;  %8492 = vmatprep.subr.bf16.mxu0 %v11897_v43  ;;  %v11975_v42 = vld [vmem:[%s13454_s29 + $0xc3c] ss:$40 sps:$4 sm:$0xff]  }
 0x2fd   : > { %8697 = vmatprep.subr.bf16.mxu1 %v11900_v44  ;;  %v11978_v43 = vld [vmem:[%s13454_s29 + $0x113c] ss:$40 sps:$4 sm:$0xff]   ;;  %v11973_v44 = vld [vmem:[%s13454_s29 + $0xc38] ss:$40 sps:$4 sm:$0xff]  }
 0x303   : > { %8493 = vmatpush1.bf16.xpose.msra.mxu0 %v11895_v46  ;;  %v11976_v46 = vld [vmem:[%s13454_s29 + $0x1138] ss:$40 sps:$4 sm:$0xff]  }
 0x304   : > { %8698 = vmatpush1.bf16.xpose.msra.mxu1 %v11898_v47  ;;  %8494 = vmatprep.subr.bf16.mxu0 %v11903_v48  ;;  %v11981_v47 = vld [vmem:[%s13454_s29 + $0xc8c] ss:$40 sps:$4 sm:$0xff]  }
 0x305   : > { %8699 = vmatprep.subr.bf16.mxu1 %v11906_v50  ;;  %v11984_v48 = vld [vmem:[%s13454_s29 + $0x118c] ss:$40 sps:$4 sm:$0xff]   ;;  %v11979_v50 = vld [vmem:[%s13454_s29 + $0xc88] ss:$40 sps:$4 sm:$0xff]  }
 0x30b   : > { %8495 = vmatpush1.bf16.xpose.msra.mxu0 %v11901_v51  ;;  %v11982_v51 = vld [vmem:[%s13454_s29 + $0x1188] ss:$40 sps:$4 sm:$0xff]  }
 0x30c   : > { %8700 = vmatpush1.bf16.xpose.msra.mxu1 %v11904_v53  ;;  %8496 = vmatprep.subr.bf16.mxu0 %v11909_v54  ;;  %v11987_v53 = vld [vmem:[%s13454_s29 + $0xcdc] ss:$40 sps:$4 sm:$0xff]  }
 0x30d   : > { %8701 = vmatprep.subr.bf16.mxu1 %v11912_v55  ;;  %v11990_v54 = vld [vmem:[%s13454_s29 + $0x11dc] ss:$40 sps:$4 sm:$0xff]   ;;  %v11985_v55 = vld [vmem:[%s13454_s29 + $0xcd8] ss:$40 sps:$4 sm:$0xff]  }
 0x313   : > { %8497 = vmatpush1.bf16.xpose.msra.mxu0 %v11907_v56  ;;  %v11988_v56 = vld [vmem:[%s13454_s29 + $0x11d8] ss:$40 sps:$4 sm:$0xff]  }
 0x314   : > { %8702 = vmatpush1.bf16.xpose.msra.mxu1 %v11910_v57  ;;  %8498 = vmatprep.subr.bf16.mxu0 %v11915_v58  ;;  %v11993_v57 = vld [vmem:[%s13454_s29 + $0xd2c] ss:$40 sps:$4 sm:$0xff]  }
 0x315   : > { %8703 = vmatprep.subr.bf16.mxu1 %v11918_v59  ;;  %v11996_v58 = vld [vmem:[%s13454_s29 + $0x122c] ss:$40 sps:$4 sm:$0xff]   ;;  %v11991_v59 = vld [vmem:[%s13454_s29 + $0xd28] ss:$40 sps:$4 sm:$0xff]  }
 0x31b   : > { %8499 = vmatpush1.bf16.xpose.msra.mxu0 %v11913_v60  ;;  %v1501_v60 = vsub.s32 0, %v13482_v25 }
 0x31c   : > { %8704 = vmatpush1.bf16.xpose.msra.mxu1 %v11916_v62  ;;  %8500 = vmatprep.subr.bf16.mxu0 %v11921_v63  ;;  %v1509_v62 = vsub.s32 2, %v13482_v25  ;;  %v11994_v63 = vld [vmem:[%s13454_s29 + $0x1228] ss:$40 sps:$4 sm:$0xff]  }
 0x31d   : > { %8705 = vmatprep.subr.bf16.mxu1 %v11924_v0  ;;  %v1495_v0 = vld [vmem:[%s13984_s7] sm:$0xff] }
 0x323   : > { %8501 = vmatpush1.bf16.xpose.msra.mxu0 %v11919_v1  ;;  %v1505_v1 = vsub.s32 1, %v13482_v25 }
 0x324   : > { %8706 = vmatpush1.bf16.xpose.msra.mxu1 %v11922_v29  ;;  %8502 = vmatprep.subr.bf16.mxu0 %v11927_v45  ;;  %v13348_v29 = vmov 1983009808  }
 0x325   : > { %8707 = vmatprep.subr.bf16.mxu1 %v11930_v2  ;;  %v9721_v45 = vunpack.c.l.s4 %v13348_v29  ;;  %v1513_v2 = vsub.s32 3, %v13482_v25  ;;  %v12035_v29 = vld [vmem:[%s13454_s29 + $0xa64] ss:$40 sps:$4 sm:$0xff]  }
 0x32b   : > { %8503 = vmatpush1.bf16.xpose.msra.mxu0 %v11925_v3  ;;  %v11999_v3 = vld [vmem:[%s13454_s29 + $0xd7c] ss:$40 sps:$4 sm:$0xff]  }
 0x32c   : > { %8708 = vmatpush1.bf16.xpose.msra.mxu1 %v11928_v4  ;;  %8513 = vmatprep.subr.bf16.mxu0 %v11933_v5  ;;  %v12002_v4 = vld [vmem:[%s13454_s29 + $0x127c] ss:$40 sps:$4 sm:$0xff]   ;;  %v1502_v5 = vrot.slane %v1495_v0, %v1501_v60 }
 0x32d   : > { %8718 = vmatprep.subr.bf16.mxu1 %v11936_v6  ;;  %v1510_v6 = vrot.slane %v1495_v0, %v1509_v62 }
 0x332   : > { %8505 = vmatmul.mubr.bf16.vlgmr.msra.gmra.mrb[4].mxu0 %v13547_v13 }
 0x333   : > { %8710 = vmatmul.mubr.bf16.vlgmr.msra.gmra.mrb[4].mxu1 %v13547_v13  ;;  %8514 = vmatpush1.bf16.xpose.msra.mxu0 %v11931_v7  ;;  %v1506_v7 = vrot.slane %v1495_v0, %v1505_v1 }
 0x334   : > { %8719 = vmatpush1.bf16.xpose.msra.mxu1 %v11934_v8  ;;  %8515 = vmatprep.subr.bf16.mxu0 %v11939_v9  ;;  %v9722_v8 = vunpack.c.0.s8 %v9721_v45  ;;  %v1514_v9 = vrot.slane %v1495_v0, %v1513_v2  ;;  %v12030_v0 = vld [vmem:[%s13454_s29 + $0xf10] ss:$40 sps:$4 sm:$0xff]   ;;  %v12038_v45 = vld [vmem:[%s13454_s29 + $0xf64] ss:$40 sps:$4 sm:$0xff]  }
 0x335   : > { %8720 = vmatprep.subr.bf16.mxu1 %v11942_v10  ;;  %8545 = vmatprep.mubr.bf16.mxu0 %v13553_v16 }
 0x336   : > { %8750 = vmatprep.mubr.bf16.mxu1 %v13553_v16 }
 0x33b   : > { %8516 = vmatpush1.bf16.xpose.msra.mxu0 %v11937_v11 }
 0x33c   : > { %8721 = vmatpush1.bf16.xpose.msra.mxu1 %v11940_v12  ;;  %8517 = vmatprep.subr.bf16.mxu0 %v11945_v14 }
 0x33d   : > { %8722 = vmatprep.subr.bf16.mxu1 %v11948_v15 }
 0x343   : > { %8518 = vmatpush1.bf16.xpose.msra.mxu0 %v11943_v17 }
 0x344   : > { %8723 = vmatpush1.bf16.xpose.msra.mxu1 %v11946_v18  ;;  %8519 = vmatprep.subr.bf16.mxu0 %v11951_v19  ;;  %v14004_v19 = vsub.s32 %v9722_v8, %v13482_v25  ;;  %v12042_v8 = vld [vmem:[%s13454_s29 + $0xfb0] ss:$40 sps:$4 sm:$0xff]  }
 0x345   : > { %8724 = vmatprep.subr.bf16.mxu1 %v11954_v21 }
 0x34b   : > { %8520 = vmatpush1.bf16.xpose.msra.mxu0 %v11949_v22 }
 0x34c   : > { %8725 = vmatpush1.bf16.xpose.msra.mxu1 %v11952_v24  ;;  %8521 = vmatprep.subr.bf16.mxu0 %v11957_v26  ;;  %v11997_v26 = vld [vmem:[%s13454_s29 + $0xd78] ss:$40 sps:$4 sm:$0xff]  }
 0x34d   : > { %8726 = vmatprep.subr.bf16.mxu1 %v11960_v27  ;;  %v12000_v27 = vld [vmem:[%s13454_s29 + $0x1278] ss:$40 sps:$4 sm:$0xff]  }
 0x353   : > { %8522 = vmatpush1.bf16.xpose.msra.mxu0 %v11955_v30 }
 0x354   : > { %8727 = vmatpush1.bf16.xpose.msra.mxu1 %v11958_v31  ;;  %8523 = vmatprep.subr.bf16.mxu0 %v11963_v32  ;;  %v12005_v32 = vld [vmem:[%s13454_s29 + $0xdcc] ss:$40 sps:$4 sm:$0xff]  }
 0x355   : > { %8728 = vmatprep.subr.bf16.mxu1 %v11966_v33  ;;  %v12008_v33 = vld [vmem:[%s13454_s29 + $0x12cc] ss:$40 sps:$4 sm:$0xff]  }
 0x35b   : > { %8524 = vmatpush1.bf16.xpose.msra.mxu0 %v11961_v34 }
 0x35c   : > { %8729 = vmatpush1.bf16.xpose.msra.mxu1 %v11964_v36  ;;  %8525 = vmatprep.subr.bf16.mxu0 %v11969_v38 }
 0x35d   : > { %8730 = vmatprep.subr.bf16.mxu1 %v11972_v39 }
 0x363   : > { %8526 = vmatpush1.bf16.xpose.msra.mxu0 %v11967_v20 }
 0x364   : > { %8731 = vmatpush1.bf16.xpose.msra.mxu1 %v11970_v41  ;;  %8527 = vmatprep.subr.bf16.mxu0 %v11975_v42  ;;  %v12003_v41 = vld [vmem:[%s13454_s29 + $0xdc8] ss:$40 sps:$4 sm:$0xff]  }
 0x365   : > { %8732 = vmatprep.subr.bf16.mxu1 %v11978_v43  ;;  %v12006_v42 = vld [vmem:[%s13454_s29 + $0x12c8] ss:$40 sps:$4 sm:$0xff]   ;;  %v12011_v43 = vld [vmem:[%s13454_s29 + $0xe1c] ss:$40 sps:$4 sm:$0xff]  }
 0x36b   : > { %8528 = vmatpush1.bf16.xpose.msra.mxu0 %v11973_v44  ;;  %v12014_v44 = vld [vmem:[%s13454_s29 + $0x131c] ss:$40 sps:$4 sm:$0xff]  }
 0x36c   : > { %8733 = vmatpush1.bf16.xpose.msra.mxu1 %v11976_v46  ;;  %8529 = vmatprep.subr.bf16.mxu0 %v11981_v47  ;;  %v12009_v46 = vld [vmem:[%s13454_s29 + $0xe18] ss:$40 sps:$4 sm:$0xff]  }
 0x36d   : > { %8734 = vmatprep.subr.bf16.mxu1 %v11984_v48  ;;  %v12012_v47 = vld [vmem:[%s13454_s29 + $0x1318] ss:$40 sps:$4 sm:$0xff]   ;;  %v12017_v48 = vld [vmem:[%s13454_s29 + $0xe6c] ss:$40 sps:$4 sm:$0xff]  }
 0x373   : > { %8530 = vmatpush1.bf16.xpose.msra.mxu0 %v11979_v50  ;;  %v12020_v50 = vld [vmem:[%s13454_s29 + $0x136c] ss:$40 sps:$4 sm:$0xff]  }
 0x374   : > { %8735 = vmatpush1.bf16.xpose.msra.mxu1 %v11982_v51  ;;  %8531 = vmatprep.subr.bf16.mxu0 %v11987_v53  ;;  %v12015_v51 = vld [vmem:[%s13454_s29 + $0xe68] ss:$40 sps:$4 sm:$0xff]  }
 0x375   : > { %8736 = vmatprep.subr.bf16.mxu1 %v11990_v54  ;;  %v12018_v53 = vld [vmem:[%s13454_s29 + $0x1368] ss:$40 sps:$4 sm:$0xff]   ;;  %v12023_v54 = vld [vmem:[%s13454_s29 + $0xebc] ss:$40 sps:$4 sm:$0xff]  }
 0x37b   : > { %8532 = vmatpush1.bf16.xpose.msra.mxu0 %v11985_v55  ;;  %v12026_v55 = vld [vmem:[%s13454_s29 + $0x13bc] ss:$40 sps:$4 sm:$0xff]  }
 0x37c   : > { %8737 = vmatpush1.bf16.xpose.msra.mxu1 %v11988_v56  ;;  %8533 = vmatprep.subr.bf16.mxu0 %v11993_v57  ;;  %v12021_v56 = vld [vmem:[%s13454_s29 + $0xeb8] ss:$40 sps:$4 sm:$0xff]  }
 0x37d   : > { %8738 = vmatprep.subr.bf16.mxu1 %v11996_v58  ;;  %v12024_v57 = vld [vmem:[%s13454_s29 + $0x13b8] ss:$40 sps:$4 sm:$0xff]   ;;  %v12029_v58 = vld [vmem:[%s13454_s29 + $0xa14] ss:$40 sps:$4 sm:$0xff]  }
 0x383   : > { %8534 = vmatpush1.bf16.xpose.msra.mxu0 %v11991_v59  ;;  %v12032_v59 = vld [vmem:[%s13454_s29 + $0xf14] ss:$40 sps:$4 sm:$0xff]  }
 0x384   : > { %8739 = vmatpush1.bf16.xpose.msra.mxu1 %v11994_v63  ;;  %8535 = vmatprep.subr.bf16.mxu0 %v11999_v3  ;;  %v12027_v63 = vld [vmem:[%s13454_s29 + $0xa10] ss:$40 sps:$4 sm:$0xff]   ;;  %v12033_v3 = vld [vmem:[%s13454_s29 + $0xa60] ss:$40 sps:$4 sm:$0xff]  }
 0x385   : > { %8740 = vmatprep.subr.bf16.mxu1 %v12002_v4  ;;  %v8260_v10 = vpop.f32.mrb[0].mxu0  ;;  %v12036_v4 = vld [vmem:[%s13454_s29 + $0xf60] ss:$40 sps:$4 sm:$0xff]  }
 0x386   : > { %v8465_v11 = vpop.f32.mrb[0].mxu1  ;;  %v11164_v12 = vadd.f32 %v8260_v10, %v1502_v5  ;;  %v8262_v15 = vpop.f32.mrb[1].mxu0  ;;  %v12041_v5 = vld [vmem:[%s13454_s29 + $0xab4] ss:$40 sps:$4 sm:$0xff]   ;;  %v12050_v10 = vld [vmem:[%s13454_s29 + $0x1004] ss:$40 sps:$4 sm:$0xff]  }
 0x387   : > { %v11166_v14 = vadd.f32 %v8465_v11, %v1510_v6  ;;  %v8467_v17 = vpop.f32.mrb[1].mxu1  ;;  %v11165_v18 = vadd.f32 %v8262_v15, %v1506_v7  ;;  %v8264_v22 = vpop.f32.mrb[2].mxu0  ;;  %v12044_v6 = vld [vmem:[%s13454_s29 + $0xfb4] ss:$40 sps:$4 sm:$0xff]   ;;  %v12039_v7 = vld [vmem:[%s13454_s29 + $0xab0] ss:$40 sps:$4 sm:$0xff]  }
 0x388   : > { %v11167_v21 = vadd.f32 %v8467_v17, %v1514_v9  ;;  %v8469_v24 = vpop.f32.mrb[2].mxu1  ;;  %v8265_v30 = vpop.f32.mrb[3].mxu0  ;;  %v12047_v9 = vld [vmem:[%s13454_s29 + $0xb04] ss:$40 sps:$4 sm:$0xff]   ;;  %v12045_v11 = vld [vmem:[%s13454_s29 + $0xb00] ss:$40 sps:$4 sm:$0xff]  }
 0x389   : > { %v8470_v31 = vpop.f32.mrb[3].mxu1  ;;  %v9718_v34 = vcombine.low %v11164_v12, %v11165_v18  ;;  %v12048_v12 = vld [vmem:[%s13454_s29 + $0x1000] ss:$40 sps:$4 sm:$0xff]   ;;  %v12056_v15 = vld [vmem:[%s13454_s29 + $0x1054] ss:$40 sps:$4 sm:$0xff]  }
 0x38a   : > { %v9719_v36 = vcombine.low %v11166_v14, %v11167_v21  ;;  %v12053_v14 = vld [vmem:[%s13454_s29 + $0xb54] ss:$40 sps:$4 sm:$0xff]   ;;  %v12051_v17 = vld [vmem:[%s13454_s29 + $0xb50] ss:$40 sps:$4 sm:$0xff]   ;;  %v12059_v21 = vld [vmem:[%s13454_s29 + $0xba4] ss:$40 sps:$4 sm:$0xff]  }
 0x38b   : > { %v9726_v38 = vrot.slane %v9718_v34, %v14004_v19  ;;  %8536 = vmatpush1.bf16.xpose.msra.mxu0 %v11997_v26  ;;  %v12054_v18 = vld [vmem:[%s13454_s29 + $0x1050] ss:$40 sps:$4 sm:$0xff]   ;;  %v12062_v22 = vld [vmem:[%s13454_s29 + $0x10a4] ss:$40 sps:$4 sm:$0xff]   ;;  %v12057_v24 = vld [vmem:[%s13454_s29 + $0xba0] ss:$40 sps:$4 sm:$0xff]  }
 0x38c   : > { %v9733_v39 = vrot.slane %v9719_v36, %v14004_v19  ;;  %8741 = vmatpush1.bf16.xpose.msra.mxu1 %v12000_v27  ;;  %8537 = vmatprep.subr.bf16.mxu0 %v12005_v32  ;;  %v12060_v26 = vld [vmem:[%s13454_s29 + $0x10a0] ss:$40 sps:$4 sm:$0xff]   ;;  %v12065_v27 = vld [vmem:[%s13454_s29 + $0xbf4] ss:$40 sps:$4 sm:$0xff]   ;;  %v12063_v31 = vld [vmem:[%s13454_s29 + $0xbf0] ss:$40 sps:$4 sm:$0xff]  }
 0x38d   : > { %8742 = vmatprep.subr.bf16.mxu1 %v12008_v33  ;;  %v12068_v30 = vld [vmem:[%s13454_s29 + $0x10f4] ss:$40 sps:$4 sm:$0xff]   ;;  %v12066_v32 = vld [vmem:[%s13454_s29 + $0x10f0] ss:$40 sps:$4 sm:$0xff]   ;;  %v12071_v33 = vld [vmem:[%s13454_s29 + $0xc44] ss:$40 sps:$4 sm:$0xff]  }
 0x38e   : > { %v9734_v20 = vcombine.low %v9726_v38, %v9733_v39  ;;  %v12074_v34 = vld [vmem:[%s13454_s29 + $0x1144] ss:$40 sps:$4 sm:$0xff]   ;;  %v12069_v36 = vld [vmem:[%s13454_s29 + $0xc40] ss:$40 sps:$4 sm:$0xff]   ;;  %v12077_v39 = vld [vmem:[%s13454_s29 + $0xc94] ss:$40 sps:$4 sm:$0xff]  }
 0x38f   : > { %v12072_v38 = vld [vmem:[%s13454_s29 + $0x1140] ss:$40 sps:$4 sm:$0xff]  }
 0x390   : > { %9790 = vst [vmem:[%s14016_s11] sm:$0xff] %v9734_v20  ;;  %v12080_v20 = vld [vmem:[%s13454_s29 + $0x1194] ss:$40 sps:$4 sm:$0xff]  }
 0x393   : > { %8538 = vmatpush1.bf16.xpose.msra.mxu0 %v12003_v41  ;;  %v12075_v41 = vld [vmem:[%s13454_s29 + $0xc90] ss:$40 sps:$4 sm:$0xff]  }
 0x394   : > { %8743 = vmatpush1.bf16.xpose.msra.mxu1 %v12006_v42  ;;  %8539 = vmatprep.subr.bf16.mxu0 %v12011_v43  ;;  %v12078_v42 = vld [vmem:[%s13454_s29 + $0x1190] ss:$40 sps:$4 sm:$0xff]   ;;  %v12083_v43 = vld [vmem:[%s13454_s29 + $0xce4] ss:$40 sps:$4 sm:$0xff]  }
 0x395   : > { %8744 = vmatprep.subr.bf16.mxu1 %v12014_v44  ;;  %v12086_v44 = vld [vmem:[%s13454_s29 + $0x11e4] ss:$40 sps:$4 sm:$0xff]  }
 0x39b   : > { %8540 = vmatpush1.bf16.xpose.msra.mxu0 %v12009_v46  ;;  %v12081_v46 = vld [vmem:[%s13454_s29 + $0xce0] ss:$40 sps:$4 sm:$0xff]  }
 0x39c   : > { %8745 = vmatpush1.bf16.xpose.msra.mxu1 %v12012_v47  ;;  %8541 = vmatprep.subr.bf16.mxu0 %v12017_v48  ;;  %v12084_v47 = vld [vmem:[%s13454_s29 + $0x11e0] ss:$40 sps:$4 sm:$0xff]   ;;  %v12089_v48 = vld [vmem:[%s13454_s29 + $0xd34] ss:$40 sps:$4 sm:$0xff]  }
 0x39d   : > { %8746 = vmatprep.subr.bf16.mxu1 %v12020_v50  ;;  %v12092_v50 = vld [vmem:[%s13454_s29 + $0x1234] ss:$40 sps:$4 sm:$0xff]  }
 0x3a3   : > { %8542 = vmatpush1.bf16.xpose.msra.mxu0 %v12015_v51  ;;  %v12087_v51 = vld [vmem:[%s13454_s29 + $0xd30] ss:$40 sps:$4 sm:$0xff]  }
 0x3a4   : > { %8747 = vmatpush1.bf16.xpose.msra.mxu1 %v12018_v53  ;;  %8543 = vmatprep.subr.bf16.mxu0 %v12023_v54  ;;  %v12090_v53 = vld [vmem:[%s13454_s29 + $0x1230] ss:$40 sps:$4 sm:$0xff]   ;;  %v12095_v54 = vld [vmem:[%s13454_s29 + $0xd84] ss:$40 sps:$4 sm:$0xff]  }
 0x3a5   : > { %8748 = vmatprep.subr.bf16.mxu1 %v12026_v55  ;;  %v12098_v55 = vld [vmem:[%s13454_s29 + $0x1284] ss:$40 sps:$4 sm:$0xff]  }
 0x3ab   : > { %8544 = vmatpush1.bf16.xpose.msra.mxu0 %v12021_v56  ;;  %v12093_v56 = vld [vmem:[%s13454_s29 + $0xd80] ss:$40 sps:$4 sm:$0xff]  }
 0x3ac   : > { %8749 = vmatpush1.bf16.xpose.msra.mxu1 %v12024_v57  ;;  %8554 = vmatprep.subr.bf16.mxu0 %v12029_v58  ;;  %v12096_v57 = vld [vmem:[%s13454_s29 + $0x1280] ss:$40 sps:$4 sm:$0xff]   ;;  %v12101_v58 = vld [vmem:[%s13454_s29 + $0xdd4] ss:$40 sps:$4 sm:$0xff]  }
 0x3ad   : > { %8759 = vmatprep.subr.bf16.mxu1 %v12032_v59  ;;  %v12104_v59 = vld [vmem:[%s13454_s29 + $0x12d4] ss:$40 sps:$4 sm:$0xff]  }
 0x3b2   : > { %8546 = vmatmul.mubr.bf16.vlgmr.msra.gmra.mrb[4].mxu0 %v13629_v23 }
 0x3b3   : > { %8751 = vmatmul.mubr.bf16.vlgmr.msra.gmra.mrb[4].mxu1 %v13629_v23  ;;  %8555 = vmatpush1.bf16.xpose.msra.mxu0 %v12027_v63  ;;  %v12099_v63 = vld [vmem:[%s13454_s29 + $0xdd0] ss:$40 sps:$4 sm:$0xff]  }
 0x3b4   : > { %8760 = vmatpush1.bf16.xpose.msra.mxu1 %v12030_v0  ;;  %8556 = vmatprep.subr.bf16.mxu0 %v12035_v29  ;;  %v12102_v0 = vld [vmem:[%s13454_s29 + $0x12d0] ss:$40 sps:$4 sm:$0xff]   ;;  %v12107_v29 = vld [vmem:[%s13454_s29 + $0xe24] ss:$40 sps:$4 sm:$0xff]  }
 0x3b5   : > { %8761 = vmatprep.subr.bf16.mxu1 %v12038_v45  ;;  %8586 = vmatprep.mubr.bf16.mxu0 %v13636_v28  ;;  %v12110_v45 = vld [vmem:[%s13454_s29 + $0x1324] ss:$40 sps:$4 sm:$0xff]  }
 0x3b6   : > { %8791 = vmatprep.mubr.bf16.mxu1 %v13636_v28 }
 0x3bb   : > { %8557 = vmatpush1.bf16.xpose.msra.mxu0 %v12033_v3  ;;  %v12105_v3 = vld [vmem:[%s13454_s29 + $0xe20] ss:$40 sps:$4 sm:$0xff]  }
 0x3bc   : > { %8762 = vmatpush1.bf16.xpose.msra.mxu1 %v12036_v4  ;;  %8558 = vmatprep.subr.bf16.mxu0 %v12041_v5  ;;  %v12108_v4 = vld [vmem:[%s13454_s29 + $0x1320] ss:$40 sps:$4 sm:$0xff]   ;;  %v12113_v5 = vld [vmem:[%s13454_s29 + $0xe74] ss:$40 sps:$4 sm:$0xff]  }
 0x3bd   : > { %8763 = vmatprep.subr.bf16.mxu1 %v12044_v6  ;;  %v12116_v6 = vld [vmem:[%s13454_s29 + $0x1374] ss:$40 sps:$4 sm:$0xff]  }
 0x3c3   : > { %8559 = vmatpush1.bf16.xpose.msra.mxu0 %v12039_v7  ;;  %v12111_v7 = vld [vmem:[%s13454_s29 + $0xe70] ss:$40 sps:$4 sm:$0xff]  }
 0x3c4   : > { %8764 = vmatpush1.bf16.xpose.msra.mxu1 %v12042_v8  ;;  %8560 = vmatprep.subr.bf16.mxu0 %v12047_v9  ;;  %v12114_v8 = vld [vmem:[%s13454_s29 + $0x1370] ss:$40 sps:$4 sm:$0xff]   ;;  %v12119_v9 = vld [vmem:[%s13454_s29 + $0xec4] ss:$40 sps:$4 sm:$0xff]  }
 0x3c5   : > { %8765 = vmatprep.subr.bf16.mxu1 %v12050_v10  ;;  %v12122_v10 = vld [vmem:[%s13454_s29 + $0x13c4] ss:$40 sps:$4 sm:$0xff]  }
 0x3cb   : > { %8561 = vmatpush1.bf16.xpose.msra.mxu0 %v12045_v11  ;;  %v12117_v11 = vld [vmem:[%s13454_s29 + $0xec0] ss:$40 sps:$4 sm:$0xff]  }
 0x3cc   : > { %8766 = vmatpush1.bf16.xpose.msra.mxu1 %v12048_v12  ;;  %8562 = vmatprep.subr.bf16.mxu0 %v12053_v14  ;;  %v12120_v12 = vld [vmem:[%s13454_s29 + $0x13c0] ss:$40 sps:$4 sm:$0xff]   ;;  %v12125_v14 = vld [vmem:[%s13454_s29 + $0xa1c] ss:$40 sps:$4 sm:$0xff]  }
 0x3cd   : > { %8767 = vmatprep.subr.bf16.mxu1 %v12056_v15  ;;  %v12128_v15 = vld [vmem:[%s13454_s29 + $0xf1c] ss:$40 sps:$4 sm:$0xff]  }
 0x3d3   : > { %8563 = vmatpush1.bf16.xpose.msra.mxu0 %v12051_v17  ;;  %v12123_v17 = vld [vmem:[%s13454_s29 + $0xa18] ss:$40 sps:$4 sm:$0xff]  }
 0x3d4   : > { %8768 = vmatpush1.bf16.xpose.msra.mxu1 %v12054_v18  ;;  %8564 = vmatprep.subr.bf16.mxu0 %v12059_v21  ;;  %v12126_v18 = vld [vmem:[%s13454_s29 + $0xf18] ss:$40 sps:$4 sm:$0xff]   ;;  %v12131_v21 = vld [vmem:[%s13454_s29 + $0xa6c] ss:$40 sps:$4 sm:$0xff]  }
 0x3d5   : > { %8769 = vmatprep.subr.bf16.mxu1 %v12062_v22  ;;  %v12134_v22 = vld [vmem:[%s13454_s29 + $0xf6c] ss:$40 sps:$4 sm:$0xff]  }
 0x3db   : > { %8565 = vmatpush1.bf16.xpose.msra.mxu0 %v12057_v24  ;;  %v12129_v24 = vld [vmem:[%s13454_s29 + $0xa68] ss:$40 sps:$4 sm:$0xff]  }
 0x3dc   : > { %8770 = vmatpush1.bf16.xpose.msra.mxu1 %v12060_v26  ;;  %8566 = vmatprep.subr.bf16.mxu0 %v12065_v27  ;;  %v12132_v26 = vld [vmem:[%s13454_s29 + $0xf68] ss:$40 sps:$4 sm:$0xff]   ;;  %v12137_v27 = vld [vmem:[%s13454_s29 + $0xabc] ss:$40 sps:$4 sm:$0xff]  }
 0x3dd   : > { %8771 = vmatprep.subr.bf16.mxu1 %v12068_v30  ;;  %v12140_v30 = vld [vmem:[%s13454_s29 + $0xfbc] ss:$40 sps:$4 sm:$0xff]  }
 0x3e3   : > { %8567 = vmatpush1.bf16.xpose.msra.mxu0 %v12063_v31  ;;  %v12135_v31 = vld [vmem:[%s13454_s29 + $0xab8] ss:$40 sps:$4 sm:$0xff]  }
 0x3e4   : > { %8772 = vmatpush1.bf16.xpose.msra.mxu1 %v12066_v32  ;;  %8568 = vmatprep.subr.bf16.mxu0 %v12071_v33  ;;  %v12138_v32 = vld [vmem:[%s13454_s29 + $0xfb8] ss:$40 sps:$4 sm:$0xff]   ;;  %v12143_v33 = vld [vmem:[%s13454_s29 + $0xb0c] ss:$40 sps:$4 sm:$0xff]  }
 0x3e5   : > { %8773 = vmatprep.subr.bf16.mxu1 %v12074_v34  ;;  %v12146_v34 = vld [vmem:[%s13454_s29 + $0x100c] ss:$40 sps:$4 sm:$0xff]  }
 0x3eb   : > { %8569 = vmatpush1.bf16.xpose.msra.mxu0 %v12069_v36  ;;  %v12141_v36 = vld [vmem:[%s13454_s29 + $0xb08] ss:$40 sps:$4 sm:$0xff]  }
 0x3ec   : > { %8774 = vmatpush1.bf16.xpose.msra.mxu1 %v12072_v38  ;;  %8570 = vmatprep.subr.bf16.mxu0 %v12077_v39  ;;  %v12144_v38 = vld [vmem:[%s13454_s29 + $0x1008] ss:$40 sps:$4 sm:$0xff]   ;;  %v12149_v39 = vld [vmem:[%s13454_s29 + $0xb5c] ss:$40 sps:$4 sm:$0xff]  }
 0x3ed   : > { %8775 = vmatprep.subr.bf16.mxu1 %v12080_v20  ;;  %v12152_v20 = vld [vmem:[%s13454_s29 + $0x105c] ss:$40 sps:$4 sm:$0xff]  }
 0x3f3   : > { %8571 = vmatpush1.bf16.xpose.msra.mxu0 %v12075_v41  ;;  %v12147_v41 = vld [vmem:[%s13454_s29 + $0xb58] ss:$40 sps:$4 sm:$0xff]  }
 0x3f4   : > { %8776 = vmatpush1.bf16.xpose.msra.mxu1 %v12078_v42  ;;  %8572 = vmatprep.subr.bf16.mxu0 %v12083_v43  ;;  %v12150_v42 = vld [vmem:[%s13454_s29 + $0x1058] ss:$40 sps:$4 sm:$0xff]   ;;  %v12155_v43 = vld [vmem:[%s13454_s29 + $0xbac] ss:$40 sps:$4 sm:$0xff]  }
 0x3f5   : > { %8777 = vmatprep.subr.bf16.mxu1 %v12086_v44  ;;  %v12158_v44 = vld [vmem:[%s13454_s29 + $0x10ac] ss:$40 sps:$4 sm:$0xff]  }
 0x3fb   : > { %8573 = vmatpush1.bf16.xpose.msra.mxu0 %v12081_v46  ;;  %v12153_v46 = vld [vmem:[%s13454_s29 + $0xba8] ss:$40 sps:$4 sm:$0xff]  }
 0x3fc   : > { %8778 = vmatpush1.bf16.xpose.msra.mxu1 %v12084_v47  ;;  %8574 = vmatprep.subr.bf16.mxu0 %v12089_v48  ;;  %v12156_v47 = vld [vmem:[%s13454_s29 + $0x10a8] ss:$40 sps:$4 sm:$0xff]   ;;  %v12161_v48 = vld [vmem:[%s13454_s29 + $0xbfc] ss:$40 sps:$4 sm:$0xff]  }
 0x3fd   : > { %8779 = vmatprep.subr.bf16.mxu1 %v12092_v50  ;;  %v12164_v50 = vld [vmem:[%s13454_s29 + $0x10fc] ss:$40 sps:$4 sm:$0xff]  }
 0x403   : > { %8575 = vmatpush1.bf16.xpose.msra.mxu0 %v12087_v51  ;;  %v12159_v51 = vld [vmem:[%s13454_s29 + $0xbf8] ss:$40 sps:$4 sm:$0xff]  }
 0x404   : > { %8780 = vmatpush1.bf16.xpose.msra.mxu1 %v12090_v53  ;;  %8576 = vmatprep.subr.bf16.mxu0 %v12095_v54  ;;  %v12162_v53 = vld [vmem:[%s13454_s29 + $0x10f8] ss:$40 sps:$4 sm:$0xff]   ;;  %v12167_v54 = vld [vmem:[%s13454_s29 + $0xc4c] ss:$40 sps:$4 sm:$0xff]  }
 0x405   : > { %8781 = vmatprep.subr.bf16.mxu1 %v12098_v55  ;;  %v12170_v55 = vld [vmem:[%s13454_s29 + $0x114c] ss:$40 sps:$4 sm:$0xff]  }
 0x40b   : > { %8577 = vmatpush1.bf16.xpose.msra.mxu0 %v12093_v56  ;;  %v12165_v56 = vld [vmem:[%s13454_s29 + $0xc48] ss:$40 sps:$4 sm:$0xff]  }
 0x40c   : > { %8782 = vmatpush1.bf16.xpose.msra.mxu1 %v12096_v57  ;;  %8578 = vmatprep.subr.bf16.mxu0 %v12101_v58  ;;  %v12168_v57 = vld [vmem:[%s13454_s29 + $0x1148] ss:$40 sps:$4 sm:$0xff]   ;;  %v12173_v58 = vld [vmem:[%s13454_s29 + $0xc9c] ss:$40 sps:$4 sm:$0xff]  }
 0x40d   : > { %8783 = vmatprep.subr.bf16.mxu1 %v12104_v59  ;;  %v12176_v59 = vld [vmem:[%s13454_s29 + $0x119c] ss:$40 sps:$4 sm:$0xff]  }
 0x413   : > { %8579 = vmatpush1.bf16.xpose.msra.mxu0 %v12099_v63  ;;  %v12171_v63 = vld [vmem:[%s13454_s29 + $0xc98] ss:$40 sps:$4 sm:$0xff]  }
 0x414   : > { %8784 = vmatpush1.bf16.xpose.msra.mxu1 %v12102_v0  ;;  %8580 = vmatprep.subr.bf16.mxu0 %v12107_v29  ;;  %v12174_v0 = vld [vmem:[%s13454_s29 + $0x1198] ss:$40 sps:$4 sm:$0xff]   ;;  %v12179_v29 = vld [vmem:[%s13454_s29 + $0xcec] ss:$40 sps:$4 sm:$0xff]  }
 0x415   : > { %8785 = vmatprep.subr.bf16.mxu1 %v12110_v45  ;;  %v12182_v45 = vld [vmem:[%s13454_s29 + $0x11ec] ss:$40 sps:$4 sm:$0xff]  }
 0x41b   : > { %8581 = vmatpush1.bf16.xpose.msra.mxu0 %v12105_v3  ;;  %v12177_v3 = vld [vmem:[%s13454_s29 + $0xce8] ss:$40 sps:$4 sm:$0xff]  }
 0x41c   : > { %8786 = vmatpush1.bf16.xpose.msra.mxu1 %v12108_v4  ;;  %8582 = vmatprep.subr.bf16.mxu0 %v12113_v5  ;;  %v12180_v4 = vld [vmem:[%s13454_s29 + $0x11e8] ss:$40 sps:$4 sm:$0xff]   ;;  %v12185_v5 = vld [vmem:[%s13454_s29 + $0xd3c] ss:$40 sps:$4 sm:$0xff]  }
 0x41d   : > { %8787 = vmatprep.subr.bf16.mxu1 %v12116_v6  ;;  %v12188_v6 = vld [vmem:[%s13454_s29 + $0x123c] ss:$40 sps:$4 sm:$0xff]  }
 0x423   : > { %8583 = vmatpush1.bf16.xpose.msra.mxu0 %v12111_v7  ;;  %v12183_v7 = vld [vmem:[%s13454_s29 + $0xd38] ss:$40 sps:$4 sm:$0xff]  }
 0x424   : > { %8788 = vmatpush1.bf16.xpose.msra.mxu1 %v12114_v8  ;;  %8584 = vmatprep.subr.bf16.mxu0 %v12119_v9  ;;  %v12186_v8 = vld [vmem:[%s13454_s29 + $0x1238] ss:$40 sps:$4 sm:$0xff]   ;;  %v12191_v9 = vld [vmem:[%s13454_s29 + $0xd8c] ss:$40 sps:$4 sm:$0xff]  }
 0x425   : > { %8789 = vmatprep.subr.bf16.mxu1 %v12122_v10  ;;  %v12194_v10 = vld [vmem:[%s13454_s29 + $0x128c] ss:$40 sps:$4 sm:$0xff]  }
 0x42b   : > { %8585 = vmatpush1.bf16.xpose.msra.mxu0 %v12117_v11  ;;  %v12189_v11 = vld [vmem:[%s13454_s29 + $0xd88] ss:$40 sps:$4 sm:$0xff]  }
 0x42c   : > { %8790 = vmatpush1.bf16.xpose.msra.mxu1 %v12120_v12  ;;  %8595 = vmatprep.subr.bf16.mxu0 %v12125_v14  ;;  %v12192_v12 = vld [vmem:[%s13454_s29 + $0x1288] ss:$40 sps:$4 sm:$0xff]   ;;  %v12197_v14 = vld [vmem:[%s13454_s29 + $0xddc] ss:$40 sps:$4 sm:$0xff]  }
 0x42d   : > { %8800 = vmatprep.subr.bf16.mxu1 %v12128_v15  ;;  %v12200_v15 = vld [vmem:[%s13454_s29 + $0x12dc] ss:$40 sps:$4 sm:$0xff]  }
 0x432   : > { %8587 = vmatmul.mubr.bf16.vlgmr.msra.gmra.mrb[4].mxu0 %v13706_v37 }
 0x433   : > { %8792 = vmatmul.mubr.bf16.vlgmr.msra.gmra.mrb[4].mxu1 %v13706_v37  ;;  %8596 = vmatpush1.bf16.xpose.msra.mxu0 %v12123_v17  ;;  %v12195_v17 = vld [vmem:[%s13454_s29 + $0xdd8] ss:$40 sps:$4 sm:$0xff]  }
 0x434   : > { %8801 = vmatpush1.bf16.xpose.msra.mxu1 %v12126_v18  ;;  %8597 = vmatprep.subr.bf16.mxu0 %v12131_v21  ;;  %v12198_v18 = vld [vmem:[%s13454_s29 + $0x12d8] ss:$40 sps:$4 sm:$0xff]   ;;  %v12203_v21 = vld [vmem:[%s13454_s29 + $0xe2c] ss:$40 sps:$4 sm:$0xff]  }
 0x435   : > { %8802 = vmatprep.subr.bf16.mxu1 %v12134_v22  ;;  %8627 = vmatprep.mubr.bf16.mxu0 %v13712_v40  ;;  %v12206_v22 = vld [vmem:[%s13454_s29 + $0x132c] ss:$40 sps:$4 sm:$0xff]  }
 0x436   : > { %8832 = vmatprep.mubr.bf16.mxu1 %v13712_v40 }
 0x43b   : > { %8598 = vmatpush1.bf16.xpose.msra.mxu0 %v12129_v24  ;;  %v12201_v24 = vld [vmem:[%s13454_s29 + $0xe28] ss:$40 sps:$4 sm:$0xff]  }
 0x43c   : > { %8803 = vmatpush1.bf16.xpose.msra.mxu1 %v12132_v26  ;;  %8599 = vmatprep.subr.bf16.mxu0 %v12137_v27  ;;  %v12204_v26 = vld [vmem:[%s13454_s29 + $0x1328] ss:$40 sps:$4 sm:$0xff]   ;;  %v12209_v27 = vld [vmem:[%s13454_s29 + $0xe7c] ss:$40 sps:$4 sm:$0xff]  }
 0x43d   : > { %8804 = vmatprep.subr.bf16.mxu1 %v12140_v30  ;;  %v12212_v30 = vld [vmem:[%s13454_s29 + $0x137c] ss:$40 sps:$4 sm:$0xff]  }
 0x443   : > { %8600 = vmatpush1.bf16.xpose.msra.mxu0 %v12135_v31  ;;  %v12207_v31 = vld [vmem:[%s13454_s29 + $0xe78] ss:$40 sps:$4 sm:$0xff]  }
 0x444   : > { %8805 = vmatpush1.bf16.xpose.msra.mxu1 %v12138_v32  ;;  %8601 = vmatprep.subr.bf16.mxu0 %v12143_v33  ;;  %v12210_v32 = vld [vmem:[%s13454_s29 + $0x1378] ss:$40 sps:$4 sm:$0xff]   ;;  %v12215_v33 = vld [vmem:[%s13454_s29 + $0xecc] ss:$40 sps:$4 sm:$0xff]  }
 0x445   : > { %8806 = vmatprep.subr.bf16.mxu1 %v12146_v34  ;;  %v12218_v34 = vld [vmem:[%s13454_s29 + $0x13cc] ss:$40 sps:$4 sm:$0xff]  }
 0x44b   : > { %8602 = vmatpush1.bf16.xpose.msra.mxu0 %v12141_v36  ;;  %v12213_v36 = vld [vmem:[%s13454_s29 + $0xec8] ss:$40 sps:$4 sm:$0xff]  }
 0x44c   : > { %8807 = vmatpush1.bf16.xpose.msra.mxu1 %v12144_v38  ;;  %8603 = vmatprep.subr.bf16.mxu0 %v12149_v39  ;;  %v12216_v38 = vld [vmem:[%s13454_s29 + $0x13c8] ss:$40 sps:$4 sm:$0xff]   ;;  %v12221_v39 = vld [vmem:[%s13454_s29 + $0xa24] ss:$40 sps:$4 sm:$0xff]  }
 0x44d   : > { %8808 = vmatprep.subr.bf16.mxu1 %v12152_v20  ;;  %v12224_v20 = vld [vmem:[%s13454_s29 + $0xf24] ss:$40 sps:$4 sm:$0xff]  }
 0x453   : > { %8604 = vmatpush1.bf16.xpose.msra.mxu0 %v12147_v41  ;;  %v12219_v41 = vld [vmem:[%s13454_s29 + $0xa20] ss:$40 sps:$4 sm:$0xff]  }
 0x454   : > { %8809 = vmatpush1.bf16.xpose.msra.mxu1 %v12150_v42  ;;  %8605 = vmatprep.subr.bf16.mxu0 %v12155_v43  ;;  %v12222_v42 = vld [vmem:[%s13454_s29 + $0xf20] ss:$40 sps:$4 sm:$0xff]   ;;  %v12227_v43 = vld [vmem:[%s13454_s29 + $0xa74] ss:$40 sps:$4 sm:$0xff]  }
 0x455   : > { %8810 = vmatprep.subr.bf16.mxu1 %v12158_v44  ;;  %v12230_v44 = vld [vmem:[%s13454_s29 + $0xf74] ss:$40 sps:$4 sm:$0xff]  }
 0x45b   : > { %8606 = vmatpush1.bf16.xpose.msra.mxu0 %v12153_v46  ;;  %v12225_v46 = vld [vmem:[%s13454_s29 + $0xa70] ss:$40 sps:$4 sm:$0xff]  }
 0x45c   : > { %8811 = vmatpush1.bf16.xpose.msra.mxu1 %v12156_v47  ;;  %8607 = vmatprep.subr.bf16.mxu0 %v12161_v48  ;;  %v12228_v47 = vld [vmem:[%s13454_s29 + $0xf70] ss:$40 sps:$4 sm:$0xff]   ;;  %v12233_v48 = vld [vmem:[%s13454_s29 + $0xac4] ss:$40 sps:$4 sm:$0xff]  }
 0x45d   : > { %8812 = vmatprep.subr.bf16.mxu1 %v12164_v50  ;;  %v12236_v50 = vld [vmem:[%s13454_s29 + $0xfc4] ss:$40 sps:$4 sm:$0xff]  }
 0x463   : > { %8608 = vmatpush1.bf16.xpose.msra.mxu0 %v12159_v51  ;;  %v12231_v51 = vld [vmem:[%s13454_s29 + $0xac0] ss:$40 sps:$4 sm:$0xff]  }
 0x464   : > { %8813 = vmatpush1.bf16.xpose.msra.mxu1 %v12162_v53  ;;  %8609 = vmatprep.subr.bf16.mxu0 %v12167_v54  ;;  %v12234_v53 = vld [vmem:[%s13454_s29 + $0xfc0] ss:$40 sps:$4 sm:$0xff]   ;;  %v12239_v54 = vld [vmem:[%s13454_s29 + $0xb14] ss:$40 sps:$4 sm:$0xff]  }
 0x465   : > { %8814 = vmatprep.subr.bf16.mxu1 %v12170_v55  ;;  %v12242_v55 = vld [vmem:[%s13454_s29 + $0x1014] ss:$40 sps:$4 sm:$0xff]  }
 0x46b   : > { %8610 = vmatpush1.bf16.xpose.msra.mxu0 %v12165_v56  ;;  %v12237_v56 = vld [vmem:[%s13454_s29 + $0xb10] ss:$40 sps:$4 sm:$0xff]  }
 0x46c   : > { %8815 = vmatpush1.bf16.xpose.msra.mxu1 %v12168_v57  ;;  %8611 = vmatprep.subr.bf16.mxu0 %v12173_v58  ;;  %v12240_v57 = vld [vmem:[%s13454_s29 + $0x1010] ss:$40 sps:$4 sm:$0xff]   ;;  %v12245_v58 = vld [vmem:[%s13454_s29 + $0xb64] ss:$40 sps:$4 sm:$0xff]  }
 0x46d   : > { %8816 = vmatprep.subr.bf16.mxu1 %v12176_v59  ;;  %v12248_v59 = vld [vmem:[%s13454_s29 + $0x1064] ss:$40 sps:$4 sm:$0xff]  }
 0x473   : > { %8612 = vmatpush1.bf16.xpose.msra.mxu0 %v12171_v63  ;;  %v12243_v63 = vld [vmem:[%s13454_s29 + $0xb60] ss:$40 sps:$4 sm:$0xff]  }
 0x474   : > { %8817 = vmatpush1.bf16.xpose.msra.mxu1 %v12174_v0  ;;  %8613 = vmatprep.subr.bf16.mxu0 %v12179_v29  ;;  %v12246_v0 = vld [vmem:[%s13454_s29 + $0x1060] ss:$40 sps:$4 sm:$0xff]   ;;  %v12251_v29 = vld [vmem:[%s13454_s29 + $0xbb4] ss:$40 sps:$4 sm:$0xff]  }
 0x475   : > { %8818 = vmatprep.subr.bf16.mxu1 %v12182_v45  ;;  %v12254_v45 = vld [vmem:[%s13454_s29 + $0x10b4] ss:$40 sps:$4 sm:$0xff]  }
 0x47b   : > { %8614 = vmatpush1.bf16.xpose.msra.mxu0 %v12177_v3  ;;  %v12249_v3 = vld [vmem:[%s13454_s29 + $0xbb0] ss:$40 sps:$4 sm:$0xff]  }
 0x47c   : > { %8819 = vmatpush1.bf16.xpose.msra.mxu1 %v12180_v4  ;;  %8615 = vmatprep.subr.bf16.mxu0 %v12185_v5  ;;  %v12252_v4 = vld [vmem:[%s13454_s29 + $0x10b0] ss:$40 sps:$4 sm:$0xff]   ;;  %v12257_v5 = vld [vmem:[%s13454_s29 + $0xc04] ss:$40 sps:$4 sm:$0xff]  }
 0x47d   : > { %8820 = vmatprep.subr.bf16.mxu1 %v12188_v6  ;;  %v12260_v6 = vld [vmem:[%s13454_s29 + $0x1104] ss:$40 sps:$4 sm:$0xff]  }
 0x483   : > { %8616 = vmatpush1.bf16.xpose.msra.mxu0 %v12183_v7  ;;  %v12255_v7 = vld [vmem:[%s13454_s29 + $0xc00] ss:$40 sps:$4 sm:$0xff]  }
 0x484   : > { %8821 = vmatpush1.bf16.xpose.msra.mxu1 %v12186_v8  ;;  %8617 = vmatprep.subr.bf16.mxu0 %v12191_v9  ;;  %v12258_v8 = vld [vmem:[%s13454_s29 + $0x1100] ss:$40 sps:$4 sm:$0xff]   ;;  %v12263_v9 = vld [vmem:[%s13454_s29 + $0xc54] ss:$40 sps:$4 sm:$0xff]  }
 0x485   : > { %8822 = vmatprep.subr.bf16.mxu1 %v12194_v10  ;;  %v12266_v10 = vld [vmem:[%s13454_s29 + $0x1154] ss:$40 sps:$4 sm:$0xff]  }
 0x48b   : > { %8618 = vmatpush1.bf16.xpose.msra.mxu0 %v12189_v11  ;;  %v12261_v11 = vld [vmem:[%s13454_s29 + $0xc50] ss:$40 sps:$4 sm:$0xff]  }
 0x48c   : > { %8823 = vmatpush1.bf16.xpose.msra.mxu1 %v12192_v12  ;;  %8619 = vmatprep.subr.bf16.mxu0 %v12197_v14  ;;  %v12264_v12 = vld [vmem:[%s13454_s29 + $0x1150] ss:$40 sps:$4 sm:$0xff]   ;;  %v12269_v14 = vld [vmem:[%s13454_s29 + $0xca4] ss:$40 sps:$4 sm:$0xff]  }
 0x48d   : > { %8824 = vmatprep.subr.bf16.mxu1 %v12200_v15  ;;  %v12272_v15 = vld [vmem:[%s13454_s29 + $0x11a4] ss:$40 sps:$4 sm:$0xff]  }
 0x493   : > { %8620 = vmatpush1.bf16.xpose.msra.mxu0 %v12195_v17  ;;  %v12267_v17 = vld [vmem:[%s13454_s29 + $0xca0] ss:$40 sps:$4 sm:$0xff]  }
 0x494   : > { %8825 = vmatpush1.bf16.xpose.msra.mxu1 %v12198_v18  ;;  %8621 = vmatprep.subr.bf16.mxu0 %v12203_v21  ;;  %v12270_v18 = vld [vmem:[%s13454_s29 + $0x11a0] ss:$40 sps:$4 sm:$0xff]   ;;  %v12275_v21 = vld [vmem:[%s13454_s29 + $0xcf4] ss:$40 sps:$4 sm:$0xff]  }
 0x495   : > { %8826 = vmatprep.subr.bf16.mxu1 %v12206_v22  ;;  %v12278_v22 = vld [vmem:[%s13454_s29 + $0x11f4] ss:$40 sps:$4 sm:$0xff]  }
 0x49b   : > { %8622 = vmatpush1.bf16.xpose.msra.mxu0 %v12201_v24  ;;  %v12273_v24 = vld [vmem:[%s13454_s29 + $0xcf0] ss:$40 sps:$4 sm:$0xff]  }
 0x49c   : > { %8827 = vmatpush1.bf16.xpose.msra.mxu1 %v12204_v26  ;;  %8623 = vmatprep.subr.bf16.mxu0 %v12209_v27  ;;  %v12276_v26 = vld [vmem:[%s13454_s29 + $0x11f0] ss:$40 sps:$4 sm:$0xff]   ;;  %v12281_v27 = vld [vmem:[%s13454_s29 + $0xd44] ss:$40 sps:$4 sm:$0xff]  }
 0x49d   : > { %8828 = vmatprep.subr.bf16.mxu1 %v12212_v30  ;;  %v12284_v30 = vld [vmem:[%s13454_s29 + $0x1244] ss:$40 sps:$4 sm:$0xff]  }
 0x4a3   : > { %8624 = vmatpush1.bf16.xpose.msra.mxu0 %v12207_v31  ;;  %v12279_v31 = vld [vmem:[%s13454_s29 + $0xd40] ss:$40 sps:$4 sm:$0xff]  }
 0x4a4   : > { %8829 = vmatpush1.bf16.xpose.msra.mxu1 %v12210_v32  ;;  %8625 = vmatprep.subr.bf16.mxu0 %v12215_v33  ;;  %v12282_v32 = vld [vmem:[%s13454_s29 + $0x1240] ss:$40 sps:$4 sm:$0xff]   ;;  %v12287_v33 = vld [vmem:[%s13454_s29 + $0xd94] ss:$40 sps:$4 sm:$0xff]  }
 0x4a5   : > { %8830 = vmatprep.subr.bf16.mxu1 %v12218_v34  ;;  %v12290_v34 = vld [vmem:[%s13454_s29 + $0x1294] ss:$40 sps:$4 sm:$0xff]  }
 0x4ab   : > { %8626 = vmatpush1.bf16.xpose.msra.mxu0 %v12213_v36  ;;  %v12285_v36 = vld [vmem:[%s13454_s29 + $0xd90] ss:$40 sps:$4 sm:$0xff]  }
 0x4ac   : > { %8831 = vmatpush1.bf16.xpose.msra.mxu1 %v12216_v38  ;;  %8636 = vmatprep.subr.bf16.mxu0 %v12221_v39  ;;  %v12288_v38 = vld [vmem:[%s13454_s29 + $0x1290] ss:$40 sps:$4 sm:$0xff]   ;;  %v12293_v39 = vld [vmem:[%s13454_s29 + $0xde4] ss:$40 sps:$4 sm:$0xff]  }
 0x4ad   : > { %8841 = vmatprep.subr.bf16.mxu1 %v12224_v20  ;;  %v12296_v20 = vld [vmem:[%s13454_s29 + $0x12e4] ss:$40 sps:$4 sm:$0xff]  }
 0x4b2   : > { %8628 = vmatmul.mubr.bf16.vlgmr.msra.gmra.mrb[4].mxu0 %v13789_v49 }
 0x4b3   : > { %8833 = vmatmul.mubr.bf16.vlgmr.msra.gmra.mrb[4].mxu1 %v13789_v49  ;;  %8637 = vmatpush1.bf16.xpose.msra.mxu0 %v12219_v41  ;;  %v12291_v41 = vld [vmem:[%s13454_s29 + $0xde0] ss:$40 sps:$4 sm:$0xff]  }
 0x4b4   : > { %8842 = vmatpush1.bf16.xpose.msra.mxu1 %v12222_v42  ;;  %8638 = vmatprep.subr.bf16.mxu0 %v12227_v43  ;;  %v12294_v42 = vld [vmem:[%s13454_s29 + $0x12e0] ss:$40 sps:$4 sm:$0xff]   ;;  %v12299_v43 = vld [vmem:[%s13454_s29 + $0xe34] ss:$40 sps:$4 sm:$0xff]  }
 0x4b5   : > { %8843 = vmatprep.subr.bf16.mxu1 %v12230_v44  ;;  %8668 = vmatprep.mubr.bf16.mxu0 %v13794_v52  ;;  %v12302_v44 = vld [vmem:[%s13454_s29 + $0x1334] ss:$40 sps:$4 sm:$0xff]  }
 0x4b6   : > { %8873 = vmatprep.mubr.bf16.mxu1 %v13794_v52 }
 0x4bb   : > { %8639 = vmatpush1.bf16.xpose.msra.mxu0 %v12225_v46  ;;  %v12297_v46 = vld [vmem:[%s13454_s29 + $0xe30] ss:$40 sps:$4 sm:$0xff]  }
 0x4bc   : > { %8844 = vmatpush1.bf16.xpose.msra.mxu1 %v12228_v47  ;;  %8640 = vmatprep.subr.bf16.mxu0 %v12233_v48  ;;  %v12300_v47 = vld [vmem:[%s13454_s29 + $0x1330] ss:$40 sps:$4 sm:$0xff]   ;;  %v12305_v48 = vld [vmem:[%s13454_s29 + $0xe84] ss:$40 sps:$4 sm:$0xff]  }
 0x4bd   : > { %8845 = vmatprep.subr.bf16.mxu1 %v12236_v50  ;;  %v12308_v50 = vld [vmem:[%s13454_s29 + $0x1384] ss:$40 sps:$4 sm:$0xff]  }
 0x4c3   : > { %8641 = vmatpush1.bf16.xpose.msra.mxu0 %v12231_v51  ;;  %v12303_v51 = vld [vmem:[%s13454_s29 + $0xe80] ss:$40 sps:$4 sm:$0xff]  }
 0x4c4   : > { %8846 = vmatpush1.bf16.xpose.msra.mxu1 %v12234_v53  ;;  %8642 = vmatprep.subr.bf16.mxu0 %v12239_v54  ;;  %v12306_v53 = vld [vmem:[%s13454_s29 + $0x1380] ss:$40 sps:$4 sm:$0xff]   ;;  %v12311_v54 = vld [vmem:[%s13454_s29 + $0xed4] ss:$40 sps:$4 sm:$0xff]  }
 0x4c5   : > { %8847 = vmatprep.subr.bf16.mxu1 %v12242_v55  ;;  %v12314_v55 = vld [vmem:[%s13454_s29 + $0x13d4] ss:$40 sps:$4 sm:$0xff]  }
 0x4cb   : > { %8643 = vmatpush1.bf16.xpose.msra.mxu0 %v12237_v56  ;;  %v12309_v56 = vld [vmem:[%s13454_s29 + $0xed0] ss:$40 sps:$4 sm:$0xff]  }
 0x4cc   : > { %8848 = vmatpush1.bf16.xpose.msra.mxu1 %v12240_v57  ;;  %8644 = vmatprep.subr.bf16.mxu0 %v12245_v58  ;;  %v12312_v57 = vld [vmem:[%s13454_s29 + $0x13d0] ss:$40 sps:$4 sm:$0xff]   ;;  %v12317_v58 = vld [vmem:[%s13454_s29 + $0x1404] ss:$40 sps:$4 sm:$0xff]  }
 0x4cd   : > { %8849 = vmatprep.subr.bf16.mxu1 %v12248_v59  ;;  %v12320_v59 = vld [vmem:[%s13454_s29 + $0x1904] ss:$40 sps:$4 sm:$0xff]  }
 0x4d3   : > { %8645 = vmatpush1.bf16.xpose.msra.mxu0 %v12243_v63  ;;  %v12315_v63 = vld [vmem:[%s13454_s29 + $0x1400] ss:$40 sps:$4 sm:$0xff]  }
 0x4d4   : > { %8850 = vmatpush1.bf16.xpose.msra.mxu1 %v12246_v0  ;;  %8646 = vmatprep.subr.bf16.mxu0 %v12251_v29  ;;  %v12318_v0 = vld [vmem:[%s13454_s29 + $0x1900] ss:$40 sps:$4 sm:$0xff]   ;;  %v12323_v29 = vld [vmem:[%s13454_s29 + $0x1454] ss:$40 sps:$4 sm:$0xff]  }
 0x4d5   : > { %8851 = vmatprep.subr.bf16.mxu1 %v12254_v45  ;;  %v12326_v45 = vld [vmem:[%s13454_s29 + $0x1954] ss:$40 sps:$4 sm:$0xff]  }
 0x4db   : > { %8647 = vmatpush1.bf16.xpose.msra.mxu0 %v12249_v3  ;;  %v12321_v3 = vld [vmem:[%s13454_s29 + $0x1450] ss:$40 sps:$4 sm:$0xff]  }
 0x4dc   : > { %8852 = vmatpush1.bf16.xpose.msra.mxu1 %v12252_v4  ;;  %8648 = vmatprep.subr.bf16.mxu0 %v12257_v5  ;;  %v12324_v4 = vld [vmem:[%s13454_s29 + $0x1950] ss:$40 sps:$4 sm:$0xff]   ;;  %v12329_v5 = vld [vmem:[%s13454_s29 + $0x14a4] ss:$40 sps:$4 sm:$0xff]  }
 0x4dd   : > { %8853 = vmatprep.subr.bf16.mxu1 %v12260_v6  ;;  %v12332_v6 = vld [vmem:[%s13454_s29 + $0x19a4] ss:$40 sps:$4 sm:$0xff]  }
 0x4e3   : > { %8649 = vmatpush1.bf16.xpose.msra.mxu0 %v12255_v7  ;;  %v12327_v7 = vld [vmem:[%s13454_s29 + $0x14a0] ss:$40 sps:$4 sm:$0xff]  }
 0x4e4   : > { %8854 = vmatpush1.bf16.xpose.msra.mxu1 %v12258_v8  ;;  %8650 = vmatprep.subr.bf16.mxu0 %v12263_v9  ;;  %v12330_v8 = vld [vmem:[%s13454_s29 + $0x19a0] ss:$40 sps:$4 sm:$0xff]   ;;  %v12335_v9 = vld [vmem:[%s13454_s29 + $0x14f4] ss:$40 sps:$4 sm:$0xff]  }
 0x4e5   : > { %8855 = vmatprep.subr.bf16.mxu1 %v12266_v10  ;;  %v12338_v10 = vld [vmem:[%s13454_s29 + $0x19f4] ss:$40 sps:$4 sm:$0xff]  }
 0x4eb   : > { %8651 = vmatpush1.bf16.xpose.msra.mxu0 %v12261_v11  ;;  %v12333_v11 = vld [vmem:[%s13454_s29 + $0x14f0] ss:$40 sps:$4 sm:$0xff]  }
 0x4ec   : > { %8856 = vmatpush1.bf16.xpose.msra.mxu1 %v12264_v12  ;;  %8652 = vmatprep.subr.bf16.mxu0 %v12269_v14  ;;  %v12336_v12 = vld [vmem:[%s13454_s29 + $0x19f0] ss:$40 sps:$4 sm:$0xff]   ;;  %v12341_v14 = vld [vmem:[%s13454_s29 + $0x1544] ss:$40 sps:$4 sm:$0xff]  }
 0x4ed   : > { %8857 = vmatprep.subr.bf16.mxu1 %v12272_v15  ;;  %v12344_v15 = vld [vmem:[%s13454_s29 + $0x1a44] ss:$40 sps:$4 sm:$0xff]  }
 0x4f3   : > { %8653 = vmatpush1.bf16.xpose.msra.mxu0 %v12267_v17  ;;  %v12339_v17 = vld [vmem:[%s13454_s29 + $0x1540] ss:$40 sps:$4 sm:$0xff]  }
 0x4f4   : > { %8858 = vmatpush1.bf16.xpose.msra.mxu1 %v12270_v18  ;;  %8654 = vmatprep.subr.bf16.mxu0 %v12275_v21  ;;  %v12342_v18 = vld [vmem:[%s13454_s29 + $0x1a40] ss:$40 sps:$4 sm:$0xff]   ;;  %v12347_v21 = vld [vmem:[%s13454_s29 + $0x1594] ss:$40 sps:$4 sm:$0xff]  }
 0x4f5   : > { %8859 = vmatprep.subr.bf16.mxu1 %v12278_v22  ;;  %v12350_v22 = vld [vmem:[%s13454_s29 + $0x1a94] ss:$40 sps:$4 sm:$0xff]  }
 0x4fb   : > { %8655 = vmatpush1.bf16.xpose.msra.mxu0 %v12273_v24  ;;  %v12345_v24 = vld [vmem:[%s13454_s29 + $0x1590] ss:$40 sps:$4 sm:$0xff]  }
 0x4fc   : > { %8860 = vmatpush1.bf16.xpose.msra.mxu1 %v12276_v26  ;;  %8656 = vmatprep.subr.bf16.mxu0 %v12281_v27  ;;  %v12348_v26 = vld [vmem:[%s13454_s29 + $0x1a90] ss:$40 sps:$4 sm:$0xff]   ;;  %v12353_v27 = vld [vmem:[%s13454_s29 + $0x15e4] ss:$40 sps:$4 sm:$0xff]  }
 0x4fd   : > { %8861 = vmatprep.subr.bf16.mxu1 %v12284_v30  ;;  %v12356_v30 = vld [vmem:[%s13454_s29 + $0x1ae4] ss:$40 sps:$4 sm:$0xff]  }
 0x503   : > { %8657 = vmatpush1.bf16.xpose.msra.mxu0 %v12279_v31  ;;  %v12351_v31 = vld [vmem:[%s13454_s29 + $0x15e0] ss:$40 sps:$4 sm:$0xff]  }
 0x504   : > { %8862 = vmatpush1.bf16.xpose.msra.mxu1 %v12282_v32  ;;  %8658 = vmatprep.subr.bf16.mxu0 %v12287_v33  ;;  %v12354_v32 = vld [vmem:[%s13454_s29 + $0x1ae0] ss:$40 sps:$4 sm:$0xff]   ;;  %v12359_v33 = vld [vmem:[%s13454_s29 + $0x1634] ss:$40 sps:$4 sm:$0xff]  }
 0x505   : > { %8863 = vmatprep.subr.bf16.mxu1 %v12290_v34  ;;  %v12362_v34 = vld [vmem:[%s13454_s29 + $0x1b34] ss:$40 sps:$4 sm:$0xff]  }
 0x50b   : > { %8659 = vmatpush1.bf16.xpose.msra.mxu0 %v12285_v36  ;;  %v12357_v36 = vld [vmem:[%s13454_s29 + $0x1630] ss:$40 sps:$4 sm:$0xff]  }
 0x50c   : > { %8864 = vmatpush1.bf16.xpose.msra.mxu1 %v12288_v38  ;;  %8660 = vmatprep.subr.bf16.mxu0 %v12293_v39  ;;  %v12360_v38 = vld [vmem:[%s13454_s29 + $0x1b30] ss:$40 sps:$4 sm:$0xff]   ;;  %v12365_v39 = vld [vmem:[%s13454_s29 + $0x1684] ss:$40 sps:$4 sm:$0xff]  }
 0x50d   : > { %8865 = vmatprep.subr.bf16.mxu1 %v12296_v20  ;;  %v12368_v20 = vld [vmem:[%s13454_s29 + $0x1b84] ss:$40 sps:$4 sm:$0xff]  }
 0x513   : > { %8661 = vmatpush1.bf16.xpose.msra.mxu0 %v12291_v41  ;;  %v12363_v41 = vld [vmem:[%s13454_s29 + $0x1680] ss:$40 sps:$4 sm:$0xff]  }
 0x514   : > { %8866 = vmatpush1.bf16.xpose.msra.mxu1 %v12294_v42  ;;  %8662 = vmatprep.subr.bf16.mxu0 %v12299_v43  ;;  %v12366_v42 = vld [vmem:[%s13454_s29 + $0x1b80] ss:$40 sps:$4 sm:$0xff]   ;;  %v12371_v43 = vld [vmem:[%s13454_s29 + $0x16d4] ss:$40 sps:$4 sm:$0xff]  }
 0x515   : > { %8867 = vmatprep.subr.bf16.mxu1 %v12302_v44  ;;  %v12374_v44 = vld [vmem:[%s13454_s29 + $0x1bd4] ss:$40 sps:$4 sm:$0xff]  }
 0x51b   : > { %8663 = vmatpush1.bf16.xpose.msra.mxu0 %v12297_v46  ;;  %v12369_v46 = vld [vmem:[%s13454_s29 + $0x16d0] ss:$40 sps:$4 sm:$0xff]  }
 0x51c   : > { %8868 = vmatpush1.bf16.xpose.msra.mxu1 %v12300_v47  ;;  %8664 = vmatprep.subr.bf16.mxu0 %v12305_v48  ;;  %v12372_v47 = vld [vmem:[%s13454_s29 + $0x1bd0] ss:$40 sps:$4 sm:$0xff]   ;;  %v12377_v48 = vld [vmem:[%s13454_s29 + $0x1724] ss:$40 sps:$4 sm:$0xff]  }
 0x51d   : > { %8869 = vmatprep.subr.bf16.mxu1 %v12308_v50  ;;  %v12380_v50 = vld [vmem:[%s13454_s29 + $0x1c24] ss:$40 sps:$4 sm:$0xff]  }
 0x523   : > { %8665 = vmatpush1.bf16.xpose.msra.mxu0 %v12303_v51  ;;  %v12375_v51 = vld [vmem:[%s13454_s29 + $0x1720] ss:$40 sps:$4 sm:$0xff]  }
 0x524   : > { %8870 = vmatpush1.bf16.xpose.msra.mxu1 %v12306_v53  ;;  %8666 = vmatprep.subr.bf16.mxu0 %v12311_v54  ;;  %v12378_v53 = vld [vmem:[%s13454_s29 + $0x1c20] ss:$40 sps:$4 sm:$0xff]   ;;  %v12383_v54 = vld [vmem:[%s13454_s29 + $0x1774] ss:$40 sps:$4 sm:$0xff]  }
 0x525   : > { %8871 = vmatprep.subr.bf16.mxu1 %v12314_v55  ;;  %v12386_v55 = vld [vmem:[%s13454_s29 + $0x1c74] ss:$40 sps:$4 sm:$0xff]  }
 0x52b   : > { %8667 = vmatpush1.bf16.xpose.msra.mxu0 %v12309_v56  ;;  %v12381_v56 = vld [vmem:[%s13454_s29 + $0x1770] ss:$40 sps:$4 sm:$0xff]  }
 0x52c   : > { %8872 = vmatpush1.bf16.xpose.msra.mxu1 %v12312_v57  ;;  %8882 = vmatprep.subr.bf16.mxu0 %v12317_v58  ;;  %v12384_v57 = vld [vmem:[%s13454_s29 + $0x1c70] ss:$40 sps:$4 sm:$0xff]   ;;  %v12389_v58 = vld [vmem:[%s13454_s29 + $0x17c4] ss:$40 sps:$4 sm:$0xff]  }
 0x52d   : > { %9087 = vmatprep.subr.bf16.mxu1 %v12320_v59  ;;  %v12392_v59 = vld [vmem:[%s13454_s29 + $0x1cc4] ss:$40 sps:$4 sm:$0xff]  }
 0x532   : > { %8669 = vmatmul.mubr.bf16.vlgmr.msra.gmra.mrb[4].mxu0 %v13862_v61 }
 0x533   : > { %8874 = vmatmul.mubr.bf16.vlgmr.msra.gmra.mrb[4].mxu1 %v13862_v61  ;;  %8883 = vmatpush1.bf16.xpose.msra.mxu0 %v12315_v63  ;;  %v12387_v63 = vld [vmem:[%s13454_s29 + $0x17c0] ss:$40 sps:$4 sm:$0xff]  }
 0x534   : > { %9088 = vmatpush1.bf16.xpose.msra.mxu1 %v12318_v0  ;;  %8884 = vmatprep.subr.bf16.mxu0 %v12323_v29  ;;  %v12390_v0 = vld [vmem:[%s13454_s29 + $0x1cc0] ss:$40 sps:$4 sm:$0xff]   ;;  %v12395_v29 = vld [vmem:[%s13454_s29 + $0x1814] ss:$40 sps:$4 sm:$0xff]  }
 0x535   : > { %9089 = vmatprep.subr.bf16.mxu1 %v12326_v45  ;;  %8914 = vmatprep.mubr.bf16.mxu0 %v13500_v35  ;;  %v12398_v45 = vld [vmem:[%s13454_s29 + $0x1d14] ss:$40 sps:$4 sm:$0xff]  }
 0x536   : > { %9119 = vmatprep.mubr.bf16.mxu1 %v13500_v35 }
 0x53b   : > { %8885 = vmatpush1.bf16.xpose.msra.mxu0 %v12321_v3  ;;  %v12393_v3 = vld [vmem:[%s13454_s29 + $0x1810] ss:$40 sps:$4 sm:$0xff]  }
 0x53c   : > { %9090 = vmatpush1.bf16.xpose.msra.mxu1 %v12324_v4  ;;  %8886 = vmatprep.subr.bf16.mxu0 %v12329_v5  ;;  %v12396_v4 = vld [vmem:[%s13454_s29 + $0x1d10] ss:$40 sps:$4 sm:$0xff]   ;;  %v12401_v5 = vld [vmem:[%s13454_s29 + $0x1864] ss:$40 sps:$4 sm:$0xff]  }
 0x53d   : > { %9091 = vmatprep.subr.bf16.mxu1 %v12332_v6  ;;  %v12404_v6 = vld [vmem:[%s13454_s29 + $0x1d64] ss:$40 sps:$4 sm:$0xff]  }
 0x543   : > { %8887 = vmatpush1.bf16.xpose.msra.mxu0 %v12327_v7  ;;  %v12399_v7 = vld [vmem:[%s13454_s29 + $0x1860] ss:$40 sps:$4 sm:$0xff]  }
 0x544   : > { %9092 = vmatpush1.bf16.xpose.msra.mxu1 %v12330_v8  ;;  %8888 = vmatprep.subr.bf16.mxu0 %v12335_v9  ;;  %v12402_v8 = vld [vmem:[%s13454_s29 + $0x1d60] ss:$40 sps:$4 sm:$0xff]   ;;  %v12407_v9 = vld [vmem:[%s13454_s29 + $0x18b4] ss:$40 sps:$4 sm:$0xff]  }
 0x545   : > { %9093 = vmatprep.subr.bf16.mxu1 %v12338_v10  ;;  %v12410_v10 = vld [vmem:[%s13454_s29 + $0x1db4] ss:$40 sps:$4 sm:$0xff]  }
 0x54b   : > { %8889 = vmatpush1.bf16.xpose.msra.mxu0 %v12333_v11  ;;  %v12405_v11 = vld [vmem:[%s13454_s29 + $0x18b0] ss:$40 sps:$4 sm:$0xff]  }
 0x54c   : > { %9094 = vmatpush1.bf16.xpose.msra.mxu1 %v12336_v12  ;;  %8890 = vmatprep.subr.bf16.mxu0 %v12341_v14  ;;  %v12408_v12 = vld [vmem:[%s13454_s29 + $0x1db0] ss:$40 sps:$4 sm:$0xff]   ;;  %v12413_v14 = vld [vmem:[%s13454_s29 + $0x140c] ss:$40 sps:$4 sm:$0xff]  }
 0x54d   : > { %9095 = vmatprep.subr.bf16.mxu1 %v12344_v15  ;;  %v12416_v15 = vld [vmem:[%s13454_s29 + $0x190c] ss:$40 sps:$4 sm:$0xff]  }
 0x553   : > { %8891 = vmatpush1.bf16.xpose.msra.mxu0 %v12339_v17  ;;  %v12411_v17 = vld [vmem:[%s13454_s29 + $0x1408] ss:$40 sps:$4 sm:$0xff]  }
 0x554   : > { %9096 = vmatpush1.bf16.xpose.msra.mxu1 %v12342_v18  ;;  %8892 = vmatprep.subr.bf16.mxu0 %v12347_v21  ;;  %v12414_v18 = vld [vmem:[%s13454_s29 + $0x1908] ss:$40 sps:$4 sm:$0xff]   ;;  %v12419_v21 = vld [vmem:[%s13454_s29 + $0x145c] ss:$40 sps:$4 sm:$0xff]  }
 0x555   : > { %9097 = vmatprep.subr.bf16.mxu1 %v12350_v22  ;;  %v12422_v22 = vld [vmem:[%s13454_s29 + $0x195c] ss:$40 sps:$4 sm:$0xff]  }
 0x55b   : > { %8893 = vmatpush1.bf16.xpose.msra.mxu0 %v12345_v24  ;;  %v12417_v24 = vld [vmem:[%s13454_s29 + $0x1458] ss:$40 sps:$4 sm:$0xff]  }
 0x55c   : > { %9098 = vmatpush1.bf16.xpose.msra.mxu1 %v12348_v26  ;;  %8894 = vmatprep.subr.bf16.mxu0 %v12353_v27  ;;  %v12420_v26 = vld [vmem:[%s13454_s29 + $0x1958] ss:$40 sps:$4 sm:$0xff]   ;;  %v12425_v27 = vld [vmem:[%s13454_s29 + $0x14ac] ss:$40 sps:$4 sm:$0xff]  }
 0x55d   : > { %9099 = vmatprep.subr.bf16.mxu1 %v12356_v30  ;;  %v12428_v30 = vld [vmem:[%s13454_s29 + $0x19ac] ss:$40 sps:$4 sm:$0xff]  }
 0x563   : > { %8895 = vmatpush1.bf16.xpose.msra.mxu0 %v12351_v31  ;;  %v12423_v31 = vld [vmem:[%s13454_s29 + $0x14a8] ss:$40 sps:$4 sm:$0xff]  }
 0x564   : > { %9100 = vmatpush1.bf16.xpose.msra.mxu1 %v12354_v32  ;;  %8896 = vmatprep.subr.bf16.mxu0 %v12359_v33  ;;  %v12426_v32 = vld [vmem:[%s13454_s29 + $0x19a8] ss:$40 sps:$4 sm:$0xff]   ;;  %v12431_v33 = vld [vmem:[%s13454_s29 + $0x14fc] ss:$40 sps:$4 sm:$0xff]  }
 0x565   : > { %9101 = vmatprep.subr.bf16.mxu1 %v12362_v34  ;;  %v12434_v34 = vld [vmem:[%s13454_s29 + $0x19fc] ss:$40 sps:$4 sm:$0xff]  }
 0x56b   : > { %8897 = vmatpush1.bf16.xpose.msra.mxu0 %v12357_v36  ;;  %v12429_v36 = vld [vmem:[%s13454_s29 + $0x14f8] ss:$40 sps:$4 sm:$0xff]  }
 0x56c   : > { %9102 = vmatpush1.bf16.xpose.msra.mxu1 %v12360_v38  ;;  %8898 = vmatprep.subr.bf16.mxu0 %v12365_v39  ;;  %v12432_v38 = vld [vmem:[%s13454_s29 + $0x19f8] ss:$40 sps:$4 sm:$0xff]   ;;  %v12437_v39 = vld [vmem:[%s13454_s29 + $0x154c] ss:$40 sps:$4 sm:$0xff]  }
 0x56d   : > { %9103 = vmatprep.subr.bf16.mxu1 %v12368_v20  ;;  %v12440_v20 = vld [vmem:[%s13454_s29 + $0x1a4c] ss:$40 sps:$4 sm:$0xff]  }
 0x573   : > { %8899 = vmatpush1.bf16.xpose.msra.mxu0 %v12363_v41  ;;  %v12435_v41 = vld [vmem:[%s13454_s29 + $0x1548] ss:$40 sps:$4 sm:$0xff]  }
 0x574   : > { %9104 = vmatpush1.bf16.xpose.msra.mxu1 %v12366_v42  ;;  %8900 = vmatprep.subr.bf16.mxu0 %v12371_v43  ;;  %v12438_v42 = vld [vmem:[%s13454_s29 + $0x1a48] ss:$40 sps:$4 sm:$0xff]   ;;  %v12443_v43 = vld [vmem:[%s13454_s29 + $0x159c] ss:$40 sps:$4 sm:$0xff]  }
 0x575   : > { %9105 = vmatprep.subr.bf16.mxu1 %v12374_v44  ;;  %v12446_v44 = vld [vmem:[%s13454_s29 + $0x1a9c] ss:$40 sps:$4 sm:$0xff]  }
 0x57b   : > { %8901 = vmatpush1.bf16.xpose.msra.mxu0 %v12369_v46  ;;  %v12441_v46 = vld [vmem:[%s13454_s29 + $0x1598] ss:$40 sps:$4 sm:$0xff]  }
 0x57c   : > { %9106 = vmatpush1.bf16.xpose.msra.mxu1 %v12372_v47  ;;  %8902 = vmatprep.subr.bf16.mxu0 %v12377_v48  ;;  %v12444_v47 = vld [vmem:[%s13454_s29 + $0x1a98] ss:$40 sps:$4 sm:$0xff]   ;;  %v12449_v48 = vld [vmem:[%s13454_s29 + $0x15ec] ss:$40 sps:$4 sm:$0xff]  }
 0x57d   : > { %9107 = vmatprep.subr.bf16.mxu1 %v12380_v50  ;;  %v12452_v50 = vld [vmem:[%s13454_s29 + $0x1aec] ss:$40 sps:$4 sm:$0xff]  }
 0x583   : > { %8903 = vmatpush1.bf16.xpose.msra.mxu0 %v12375_v51  ;;  %v12447_v51 = vld [vmem:[%s13454_s29 + $0x15e8] ss:$40 sps:$4 sm:$0xff]  }
 0x584   : > { %9108 = vmatpush1.bf16.xpose.msra.mxu1 %v12378_v53  ;;  %8904 = vmatprep.subr.bf16.mxu0 %v12383_v54  ;;  %v12450_v53 = vld [vmem:[%s13454_s29 + $0x1ae8] ss:$40 sps:$4 sm:$0xff]   ;;  %v12455_v54 = vld [vmem:[%s13454_s29 + $0x163c] ss:$40 sps:$4 sm:$0xff]  }
 0x585   : > { %9109 = vmatprep.subr.bf16.mxu1 %v12386_v55  ;;  %v12458_v55 = vld [vmem:[%s13454_s29 + $0x1b3c] ss:$40 sps:$4 sm:$0xff]  }
 0x58b   : > { %8905 = vmatpush1.bf16.xpose.msra.mxu0 %v12381_v56  ;;  %v12453_v56 = vld [vmem:[%s13454_s29 + $0x1638] ss:$40 sps:$4 sm:$0xff]  }
 0x58c   : > { %9110 = vmatpush1.bf16.xpose.msra.mxu1 %v12384_v57  ;;  %8906 = vmatprep.subr.bf16.mxu0 %v12389_v58  ;;  %v12456_v57 = vld [vmem:[%s13454_s29 + $0x1b38] ss:$40 sps:$4 sm:$0xff]   ;;  %v12461_v58 = vld [vmem:[%s13454_s29 + $0x168c] ss:$40 sps:$4 sm:$0xff]  }
 0x58d   : > { %9111 = vmatprep.subr.bf16.mxu1 %v12392_v59  ;;  %v12464_v59 = vld [vmem:[%s13454_s29 + $0x1b8c] ss:$40 sps:$4 sm:$0xff]  }
 0x593   : > { %8907 = vmatpush1.bf16.xpose.msra.mxu0 %v12387_v63  ;;  %v12459_v63 = vld [vmem:[%s13454_s29 + $0x1688] ss:$40 sps:$4 sm:$0xff]  }
 0x594   : > { %9112 = vmatpush1.bf16.xpose.msra.mxu1 %v12390_v0  ;;  %8908 = vmatprep.subr.bf16.mxu0 %v12395_v29  ;;  %v12462_v0 = vld [vmem:[%s13454_s29 + $0x1b88] ss:$40 sps:$4 sm:$0xff]   ;;  %v12467_v29 = vld [vmem:[%s13454_s29 + $0x16dc] ss:$40 sps:$4 sm:$0xff]  }
 0x595   : > { %9113 = vmatprep.subr.bf16.mxu1 %v12398_v45  ;;  %v12470_v45 = vld [vmem:[%s13454_s29 + $0x1bdc] ss:$40 sps:$4 sm:$0xff]  }
 0x59b   : > { %8909 = vmatpush1.bf16.xpose.msra.mxu0 %v12393_v3  ;;  %v12465_v3 = vld [vmem:[%s13454_s29 + $0x16d8] ss:$40 sps:$4 sm:$0xff]  }
 0x59c   : > { %9114 = vmatpush1.bf16.xpose.msra.mxu1 %v12396_v4  ;;  %8910 = vmatprep.subr.bf16.mxu0 %v12401_v5  ;;  %v12468_v4 = vld [vmem:[%s13454_s29 + $0x1bd8] ss:$40 sps:$4 sm:$0xff]   ;;  %v12473_v5 = vld [vmem:[%s13454_s29 + $0x172c] ss:$40 sps:$4 sm:$0xff]  }
 0x59d   : > { %9115 = vmatprep.subr.bf16.mxu1 %v12404_v6  ;;  %v12476_v6 = vld [vmem:[%s13454_s29 + $0x1c2c] ss:$40 sps:$4 sm:$0xff]  }
 0x5a3   : > { %8911 = vmatpush1.bf16.xpose.msra.mxu0 %v12399_v7  ;;  %v1517_v7 = vsub.s32 4, %v13482_v25 }
 0x5a4   : > { %9116 = vmatpush1.bf16.xpose.msra.mxu1 %v12402_v8  ;;  %8912 = vmatprep.subr.bf16.mxu0 %v12407_v9  ;;  %v1525_v8 = vsub.s32 6, %v13482_v25  ;;  %v12471_v9 = vld [vmem:[%s13454_s29 + $0x1728] ss:$40 sps:$4 sm:$0xff]  }
 0x5a5   : > { %9117 = vmatprep.subr.bf16.mxu1 %v12410_v10  ;;  %v12474_v10 = vld [vmem:[%s13454_s29 + $0x1c28] ss:$40 sps:$4 sm:$0xff]  }
 0x5ab   : > { %8913 = vmatpush1.bf16.xpose.msra.mxu0 %v12405_v11  ;;  %v1521_v11 = vsub.s32 5, %v13482_v25 }
 0x5ac   : > { %9118 = vmatpush1.bf16.xpose.msra.mxu1 %v12408_v12  ;;  %8923 = vmatprep.subr.bf16.mxu0 %v12413_v14  ;;  %v1529_v12 = vsub.s32 7, %v13482_v25  ;;  %v12479_v14 = vld [vmem:[%s13454_s29 + $0x177c] ss:$40 sps:$4 sm:$0xff]  }
 0x5ad   : > { %9128 = vmatprep.subr.bf16.mxu1 %v12416_v15  ;;  %v12482_v15 = vld [vmem:[%s13454_s29 + $0x1c7c] ss:$40 sps:$4 sm:$0xff]  }
 0x5b2   : > { %8915 = vmatmul.mubr.bf16.vlgmr.msra.gmra.mrb[8].mxu0 %v13547_v13 }
 0x5b3   : > { %9120 = vmatmul.mubr.bf16.vlgmr.msra.gmra.mrb[8].mxu1 %v13547_v13  ;;  %8924 = vmatpush1.bf16.xpose.msra.mxu0 %v12411_v17  ;;  %v13276_v17 = vld [vmem:[%s13984_s7] sm:$0xff] }
 0x5b4   : > { %9129 = vmatpush1.bf16.xpose.msra.mxu1 %v12414_v18  ;;  %8925 = vmatprep.subr.bf16.mxu0 %v12419_v21  ;;  %v1518_v18 = vrot.slane %v13276_v17, %v1517_v7  ;;  %v1526_v21 = vrot.slane %v13276_v17, %v1525_v8 }
 0x5b5   : > { %9130 = vmatprep.subr.bf16.mxu1 %v12422_v22  ;;  %8955 = vmatprep.mubr.bf16.mxu0 %v13553_v16  ;;  %v1522_v22 = vrot.slane %v13276_v17, %v1521_v11 }
 0x5b6   : > { %9160 = vmatprep.mubr.bf16.mxu1 %v13553_v16 }
 0x5bb   : > { %8926 = vmatpush1.bf16.xpose.msra.mxu0 %v12417_v24  ;;  %v1530_v24 = vrot.slane %v13276_v17, %v1529_v12  ;;  %v12515_v17 = vld [vmem:[%s13454_s29 + $0x1464] ss:$40 sps:$4 sm:$0xff]  }
 0x5bc   : > { %9131 = vmatpush1.bf16.xpose.msra.mxu1 %v12420_v26  ;;  %8927 = vmatprep.subr.bf16.mxu0 %v12425_v27 }
 0x5bd   : > { %9132 = vmatprep.subr.bf16.mxu1 %v12428_v30 }
 0x5c3   : > { %8928 = vmatpush1.bf16.xpose.msra.mxu0 %v12423_v31 }
 0x5c4   : > { %9133 = vmatpush1.bf16.xpose.msra.mxu1 %v12426_v32  ;;  %8929 = vmatprep.subr.bf16.mxu0 %v12431_v33 }
 0x5c5   : > { %9134 = vmatprep.subr.bf16.mxu1 %v12434_v34 }
 0x5cb   : > { %8930 = vmatpush1.bf16.xpose.msra.mxu0 %v12429_v36 }
 0x5cc   : > { %9135 = vmatpush1.bf16.xpose.msra.mxu1 %v12432_v38  ;;  %8931 = vmatprep.subr.bf16.mxu0 %v12437_v39 }
 0x5cd   : > { %9136 = vmatprep.subr.bf16.mxu1 %v12440_v20  ;;  %v12477_v20 = vld [vmem:[%s13454_s29 + $0x1778] ss:$40 sps:$4 sm:$0xff]  }
 0x5d3   : > { %8932 = vmatpush1.bf16.xpose.msra.mxu0 %v12435_v41  ;;  %v12480_v41 = vld [vmem:[%s13454_s29 + $0x1c78] ss:$40 sps:$4 sm:$0xff]  }
 0x5d4   : > { %9137 = vmatpush1.bf16.xpose.msra.mxu1 %v12438_v42  ;;  %8933 = vmatprep.subr.bf16.mxu0 %v12443_v43 }
 0x5d5   : > { %9138 = vmatprep.subr.bf16.mxu1 %v12446_v44  ;;  %v12485_v44 = vld [vmem:[%s13454_s29 + $0x17cc] ss:$40 sps:$4 sm:$0xff]  }
 0x5db   : > { %8934 = vmatpush1.bf16.xpose.msra.mxu0 %v12441_v46  ;;  %v12488_v46 = vld [vmem:[%s13454_s29 + $0x1ccc] ss:$40 sps:$4 sm:$0xff]  }
 0x5dc   : > { %9139 = vmatpush1.bf16.xpose.msra.mxu1 %v12444_v47  ;;  %8935 = vmatprep.subr.bf16.mxu0 %v12449_v48 }
 0x5dd   : > { %9140 = vmatprep.subr.bf16.mxu1 %v12452_v50 }
 0x5e3   : > { %8936 = vmatpush1.bf16.xpose.msra.mxu0 %v12447_v51 }
 0x5e4   : > { %9141 = vmatpush1.bf16.xpose.msra.mxu1 %v12450_v53  ;;  %8937 = vmatprep.subr.bf16.mxu0 %v12455_v54  ;;  %v12483_v54 = vld [vmem:[%s13454_s29 + $0x17c8] ss:$40 sps:$4 sm:$0xff]  }
 0x5e5   : > { %9142 = vmatprep.subr.bf16.mxu1 %v12458_v55  ;;  %v12486_v55 = vld [vmem:[%s13454_s29 + $0x1cc8] ss:$40 sps:$4 sm:$0xff]  }
 0x5eb   : > { %8938 = vmatpush1.bf16.xpose.msra.mxu0 %v12453_v56  ;;  %v12491_v56 = vld [vmem:[%s13454_s29 + $0x181c] ss:$40 sps:$4 sm:$0xff]  }
 0x5ec   : > { %9143 = vmatpush1.bf16.xpose.msra.mxu1 %v12456_v57  ;;  %8939 = vmatprep.subr.bf16.mxu0 %v12461_v58  ;;  %v12494_v57 = vld [vmem:[%s13454_s29 + $0x1d1c] ss:$40 sps:$4 sm:$0xff]   ;;  %v12489_v58 = vld [vmem:[%s13454_s29 + $0x1818] ss:$40 sps:$4 sm:$0xff]  }
 0x5ed   : > { %9144 = vmatprep.subr.bf16.mxu1 %v12464_v59  ;;  %v12492_v59 = vld [vmem:[%s13454_s29 + $0x1d18] ss:$40 sps:$4 sm:$0xff]  }
 0x5f3   : > { %8940 = vmatpush1.bf16.xpose.msra.mxu0 %v12459_v63  ;;  %v12497_v63 = vld [vmem:[%s13454_s29 + $0x186c] ss:$40 sps:$4 sm:$0xff]  }
 0x5f4   : > { %9145 = vmatpush1.bf16.xpose.msra.mxu1 %v12462_v0  ;;  %8941 = vmatprep.subr.bf16.mxu0 %v12467_v29  ;;  %v12500_v0 = vld [vmem:[%s13454_s29 + $0x1d6c] ss:$40 sps:$4 sm:$0xff]   ;;  %v12495_v29 = vld [vmem:[%s13454_s29 + $0x1868] ss:$40 sps:$4 sm:$0xff]  }
 0x5f5   : > { %9146 = vmatprep.subr.bf16.mxu1 %v12470_v45  ;;  %v12498_v45 = vld [vmem:[%s13454_s29 + $0x1d68] ss:$40 sps:$4 sm:$0xff]  }
 0x5fb   : > { %8942 = vmatpush1.bf16.xpose.msra.mxu0 %v12465_v3  ;;  %v12503_v3 = vld [vmem:[%s13454_s29 + $0x18bc] ss:$40 sps:$4 sm:$0xff]  }
 0x5fc   : > { %9147 = vmatpush1.bf16.xpose.msra.mxu1 %v12468_v4  ;;  %8943 = vmatprep.subr.bf16.mxu0 %v12473_v5  ;;  %v12506_v4 = vld [vmem:[%s13454_s29 + $0x1dbc] ss:$40 sps:$4 sm:$0xff]   ;;  %v12501_v5 = vld [vmem:[%s13454_s29 + $0x18b8] ss:$40 sps:$4 sm:$0xff]  }
 0x5fd   : > { %9148 = vmatprep.subr.bf16.mxu1 %v12476_v6  ;;  %v12504_v6 = vld [vmem:[%s13454_s29 + $0x1db8] ss:$40 sps:$4 sm:$0xff]  }
 0x603   : > { %8944 = vmatpush1.bf16.xpose.msra.mxu0 %v12471_v9  ;;  %v12509_v9 = vld [vmem:[%s13454_s29 + $0x1414] ss:$40 sps:$4 sm:$0xff]  }
 0x604   : > { %9149 = vmatpush1.bf16.xpose.msra.mxu1 %v12474_v10  ;;  %8945 = vmatprep.subr.bf16.mxu0 %v12479_v14  ;;  %v12512_v10 = vld [vmem:[%s13454_s29 + $0x1914] ss:$40 sps:$4 sm:$0xff]   ;;  %v12507_v14 = vld [vmem:[%s13454_s29 + $0x1410] ss:$40 sps:$4 sm:$0xff]  }
 0x605   : > { %9150 = vmatprep.subr.bf16.mxu1 %v12482_v15  ;;  %v8670_v26 = vpop.f32.mrb[4].mxu0  ;;  %v12510_v15 = vld [vmem:[%s13454_s29 + $0x1910] ss:$40 sps:$4 sm:$0xff]  }
 0x606   : > { %v8875_v27 = vpop.f32.mrb[4].mxu1  ;;  %v11168_v30 = vadd.f32 %v8670_v26, %v1518_v18  ;;  %v8672_v32 = vpop.f32.mrb[5].mxu0  ;;  %v12518_v18 = vld [vmem:[%s13454_s29 + $0x1964] ss:$40 sps:$4 sm:$0xff]   ;;  %v12524_v26 = vld [vmem:[%s13454_s29 + $0x19b4] ss:$40 sps:$4 sm:$0xff]  }
 0x607   : > { %v11170_v31 = vadd.f32 %v8875_v27, %v1526_v21  ;;  %v8877_v33 = vpop.f32.mrb[5].mxu1  ;;  %v11169_v34 = vadd.f32 %v8672_v32, %v1522_v22  ;;  %v8674_v38 = vpop.f32.mrb[6].mxu0  ;;  %v12513_v21 = vld [vmem:[%s13454_s29 + $0x1460] ss:$40 sps:$4 sm:$0xff]   ;;  %v12519_v27 = vld [vmem:[%s13454_s29 + $0x14b0] ss:$40 sps:$4 sm:$0xff]  }
 0x608   : > { %v11171_v36 = vadd.f32 %v8877_v33, %v1530_v24  ;;  %v8879_v39 = vpop.f32.mrb[6].mxu1  ;;  %v8675_v42 = vpop.f32.mrb[7].mxu0  ;;  %v12516_v22 = vld [vmem:[%s13454_s29 + $0x1960] ss:$40 sps:$4 sm:$0xff]   ;;  %v12521_v24 = vld [vmem:[%s13454_s29 + $0x14b4] ss:$40 sps:$4 sm:$0xff]  }
 0x609   : > { %v8880_v43 = vpop.f32.mrb[7].mxu1  ;;  %v9735_v47 = vcombine.low %v11168_v30, %v11169_v34  ;;  %v12522_v30 = vld [vmem:[%s13454_s29 + $0x19b0] ss:$40 sps:$4 sm:$0xff]   ;;  %v12530_v32 = vld [vmem:[%s13454_s29 + $0x1a04] ss:$40 sps:$4 sm:$0xff]  }
 0x60a   : > { %v9736_v48 = vcombine.low %v11170_v31, %v11171_v36  ;;  %v12527_v31 = vld [vmem:[%s13454_s29 + $0x1504] ss:$40 sps:$4 sm:$0xff]   ;;  %v12525_v33 = vld [vmem:[%s13454_s29 + $0x1500] ss:$40 sps:$4 sm:$0xff]   ;;  %v12533_v36 = vld [vmem:[%s13454_s29 + $0x1554] ss:$40 sps:$4 sm:$0xff]  }
 0x60b   : > { %v9743_v50 = vrot.slane %v9735_v47, %v14004_v19  ;;  %8946 = vmatpush1.bf16.xpose.msra.mxu0 %v12477_v20  ;;  %v12528_v34 = vld [vmem:[%s13454_s29 + $0x1a00] ss:$40 sps:$4 sm:$0xff]   ;;  %v12536_v38 = vld [vmem:[%s13454_s29 + $0x1a54] ss:$40 sps:$4 sm:$0xff]   ;;  %v12531_v39 = vld [vmem:[%s13454_s29 + $0x1550] ss:$40 sps:$4 sm:$0xff]  }
 0x60c   : > { %v9750_v51 = vrot.slane %v9736_v48, %v14004_v19  ;;  %9151 = vmatpush1.bf16.xpose.msra.mxu1 %v12480_v41  ;;  %8947 = vmatprep.subr.bf16.mxu0 %v12485_v44  ;;  %v12534_v20 = vld [vmem:[%s13454_s29 + $0x1a50] ss:$40 sps:$4 sm:$0xff]   ;;  %v12539_v41 = vld [vmem:[%s13454_s29 + $0x15a4] ss:$40 sps:$4 sm:$0xff]   ;;  %v12537_v43 = vld [vmem:[%s13454_s29 + $0x15a0] ss:$40 sps:$4 sm:$0xff]  }
 0x60d   : > { %9152 = vmatprep.subr.bf16.mxu1 %v12488_v46  ;;  %v12542_v42 = vld [vmem:[%s13454_s29 + $0x1aa4] ss:$40 sps:$4 sm:$0xff]   ;;  %v12540_v44 = vld [vmem:[%s13454_s29 + $0x1aa0] ss:$40 sps:$4 sm:$0xff]   ;;  %v12545_v46 = vld [vmem:[%s13454_s29 + $0x15f4] ss:$40 sps:$4 sm:$0xff]  }
 0x60e   : > { %v9751_v53 = vcombine.low %v9743_v50, %v9750_v51  ;;  %v12548_v47 = vld [vmem:[%s13454_s29 + $0x1af4] ss:$40 sps:$4 sm:$0xff]   ;;  %v12543_v48 = vld [vmem:[%s13454_s29 + $0x15f0] ss:$40 sps:$4 sm:$0xff]   ;;  %v12551_v51 = vld [vmem:[%s13454_s29 + $0x1644] ss:$40 sps:$4 sm:$0xff]  }
 0x60f   : > { %v12546_v50 = vld [vmem:[%s13454_s29 + $0x1af0] ss:$40 sps:$4 sm:$0xff]  }
 0x610   : > { %9791 = vst [vmem:[%s14016_s11 + $0x8] sm:$0xff] %v9751_v53  ;;  %v12554_v53 = vld [vmem:[%s13454_s29 + $0x1b44] ss:$40 sps:$4 sm:$0xff]  }
 0x613   : > { %8948 = vmatpush1.bf16.xpose.msra.mxu0 %v12483_v54  ;;  %v12549_v54 = vld [vmem:[%s13454_s29 + $0x1640] ss:$40 sps:$4 sm:$0xff]  }
 0x614   : > { %9153 = vmatpush1.bf16.xpose.msra.mxu1 %v12486_v55  ;;  %8949 = vmatprep.subr.bf16.mxu0 %v12491_v56  ;;  %v12552_v55 = vld [vmem:[%s13454_s29 + $0x1b40] ss:$40 sps:$4 sm:$0xff]   ;;  %v12557_v56 = vld [vmem:[%s13454_s29 + $0x1694] ss:$40 sps:$4 sm:$0xff]  }
 0x615   : > { %9154 = vmatprep.subr.bf16.mxu1 %v12494_v57  ;;  %v12560_v57 = vld [vmem:[%s13454_s29 + $0x1b94] ss:$40 sps:$4 sm:$0xff]  }
 0x61b   : > { %8950 = vmatpush1.bf16.xpose.msra.mxu0 %v12489_v58  ;;  %v12555_v58 = vld [vmem:[%s13454_s29 + $0x1690] ss:$40 sps:$4 sm:$0xff]  }
 0x61c   : > { %9155 = vmatpush1.bf16.xpose.msra.mxu1 %v12492_v59  ;;  %8951 = vmatprep.subr.bf16.mxu0 %v12497_v63  ;;  %v12558_v59 = vld [vmem:[%s13454_s29 + $0x1b90] ss:$40 sps:$4 sm:$0xff]   ;;  %v12563_v63 = vld [vmem:[%s13454_s29 + $0x16e4] ss:$40 sps:$4 sm:$0xff]  }
 0x61d   : > { %9156 = vmatprep.subr.bf16.mxu1 %v12500_v0  ;;  %v12566_v0 = vld [vmem:[%s13454_s29 + $0x1be4] ss:$40 sps:$4 sm:$0xff]  }
 0x623   : > { %8952 = vmatpush1.bf16.xpose.msra.mxu0 %v12495_v29  ;;  %v12561_v29 = vld [vmem:[%s13454_s29 + $0x16e0] ss:$40 sps:$4 sm:$0xff]  }
 0x624   : > { %9157 = vmatpush1.bf16.xpose.msra.mxu1 %v12498_v45  ;;  %8953 = vmatprep.subr.bf16.mxu0 %v12503_v3  ;;  %v12564_v45 = vld [vmem:[%s13454_s29 + $0x1be0] ss:$40 sps:$4 sm:$0xff]   ;;  %v12569_v3 = vld [vmem:[%s13454_s29 + $0x1734] ss:$40 sps:$4 sm:$0xff]  }
 0x625   : > { %9158 = vmatprep.subr.bf16.mxu1 %v12506_v4  ;;  %v12572_v4 = vld [vmem:[%s13454_s29 + $0x1c34] ss:$40 sps:$4 sm:$0xff]  }
 0x62b   : > { %8954 = vmatpush1.bf16.xpose.msra.mxu0 %v12501_v5  ;;  %v12567_v5 = vld [vmem:[%s13454_s29 + $0x1730] ss:$40 sps:$4 sm:$0xff]  }
 0x62c   : > { %9159 = vmatpush1.bf16.xpose.msra.mxu1 %v12504_v6  ;;  %8964 = vmatprep.subr.bf16.mxu0 %v12509_v9  ;;  %v12570_v6 = vld [vmem:[%s13454_s29 + $0x1c30] ss:$40 sps:$4 sm:$0xff]   ;;  %v12575_v9 = vld [vmem:[%s13454_s29 + $0x1784] ss:$40 sps:$4 sm:$0xff]  }
 0x62d   : > { %9169 = vmatprep.subr.bf16.mxu1 %v12512_v10  ;;  %v12578_v10 = vld [vmem:[%s13454_s29 + $0x1c84] ss:$40 sps:$4 sm:$0xff]  }
 0x632   : > { %8956 = vmatmul.mubr.bf16.vlgmr.msra.gmra.mrb[8].mxu0 %v13629_v23 }
 0x633   : > { %9161 = vmatmul.mubr.bf16.vlgmr.msra.gmra.mrb[8].mxu1 %v13629_v23  ;;  %8965 = vmatpush1.bf16.xpose.msra.mxu0 %v12507_v14  ;;  %v12573_v14 = vld [vmem:[%s13454_s29 + $0x1780] ss:$40 sps:$4 sm:$0xff]  }
 0x634   : > { %9170 = vmatpush1.bf16.xpose.msra.mxu1 %v12510_v15  ;;  %8966 = vmatprep.subr.bf16.mxu0 %v12515_v17  ;;  %v12576_v15 = vld [vmem:[%s13454_s29 + $0x1c80] ss:$40 sps:$4 sm:$0xff]   ;;  %v12581_v17 = vld [vmem:[%s13454_s29 + $0x17d4] ss:$40 sps:$4 sm:$0xff]  }
 0x635   : > { %9171 = vmatprep.subr.bf16.mxu1 %v12518_v18  ;;  %8996 = vmatprep.mubr.bf16.mxu0 %v13636_v28  ;;  %v12584_v18 = vld [vmem:[%s13454_s29 + $0x1cd4] ss:$40 sps:$4 sm:$0xff]  }
 0x636   : > { %9201 = vmatprep.mubr.bf16.mxu1 %v13636_v28 }
 0x63b   : > { %8967 = vmatpush1.bf16.xpose.msra.mxu0 %v12513_v21  ;;  %v12579_v21 = vld [vmem:[%s13454_s29 + $0x17d0] ss:$40 sps:$4 sm:$0xff]  }
 0x63c   : > { %9172 = vmatpush1.bf16.xpose.msra.mxu1 %v12516_v22  ;;  %8968 = vmatprep.subr.bf16.mxu0 %v12521_v24  ;;  %v12582_v22 = vld [vmem:[%s13454_s29 + $0x1cd0] ss:$40 sps:$4 sm:$0xff]   ;;  %v12587_v24 = vld [vmem:[%s13454_s29 + $0x1824] ss:$40 sps:$4 sm:$0xff]  }
 0x63d   : > { %9173 = vmatprep.subr.bf16.mxu1 %v12524_v26  ;;  %v12590_v26 = vld [vmem:[%s13454_s29 + $0x1d24] ss:$40 sps:$4 sm:$0xff]  }
 0x643   : > { %8969 = vmatpush1.bf16.xpose.msra.mxu0 %v12519_v27  ;;  %v12585_v27 = vld [vmem:[%s13454_s29 + $0x1820] ss:$40 sps:$4 sm:$0xff]  }
 0x644   : > { %9174 = vmatpush1.bf16.xpose.msra.mxu1 %v12522_v30  ;;  %8970 = vmatprep.subr.bf16.mxu0 %v12527_v31  ;;  %v12588_v30 = vld [vmem:[%s13454_s29 + $0x1d20] ss:$40 sps:$4 sm:$0xff]   ;;  %v12593_v31 = vld [vmem:[%s13454_s29 + $0x1874] ss:$40 sps:$4 sm:$0xff]  }
 0x645   : > { %9175 = vmatprep.subr.bf16.mxu1 %v12530_v32  ;;  %v12596_v32 = vld [vmem:[%s13454_s29 + $0x1d74] ss:$40 sps:$4 sm:$0xff]  }
 0x64b   : > { %8971 = vmatpush1.bf16.xpose.msra.mxu0 %v12525_v33  ;;  %v12591_v33 = vld [vmem:[%s13454_s29 + $0x1870] ss:$40 sps:$4 sm:$0xff]  }
 0x64c   : > { %9176 = vmatpush1.bf16.xpose.msra.mxu1 %v12528_v34  ;;  %8972 = vmatprep.subr.bf16.mxu0 %v12533_v36  ;;  %v12594_v34 = vld [vmem:[%s13454_s29 + $0x1d70] ss:$40 sps:$4 sm:$0xff]   ;;  %v12599_v36 = vld [vmem:[%s13454_s29 + $0x18c4] ss:$40 sps:$4 sm:$0xff]  }
 0x64d   : > { %9177 = vmatprep.subr.bf16.mxu1 %v12536_v38  ;;  %v12602_v38 = vld [vmem:[%s13454_s29 + $0x1dc4] ss:$40 sps:$4 sm:$0xff]  }
 0x653   : > { %8973 = vmatpush1.bf16.xpose.msra.mxu0 %v12531_v39  ;;  %v12597_v39 = vld [vmem:[%s13454_s29 + $0x18c0] ss:$40 sps:$4 sm:$0xff]  }
 0x654   : > { %9178 = vmatpush1.bf16.xpose.msra.mxu1 %v12534_v20  ;;  %8974 = vmatprep.subr.bf16.mxu0 %v12539_v41  ;;  %v12600_v20 = vld [vmem:[%s13454_s29 + $0x1dc0] ss:$40 sps:$4 sm:$0xff]   ;;  %v12605_v41 = vld [vmem:[%s13454_s29 + $0x141c] ss:$40 sps:$4 sm:$0xff]  }
 0x655   : > { %9179 = vmatprep.subr.bf16.mxu1 %v12542_v42  ;;  %v12608_v42 = vld [vmem:[%s13454_s29 + $0x191c] ss:$40 sps:$4 sm:$0xff]  }
 0x65b   : > { %8975 = vmatpush1.bf16.xpose.msra.mxu0 %v12537_v43  ;;  %v12603_v43 = vld [vmem:[%s13454_s29 + $0x1418] ss:$40 sps:$4 sm:$0xff]  }
 0x65c   : > { %9180 = vmatpush1.bf16.xpose.msra.mxu1 %v12540_v44  ;;  %8976 = vmatprep.subr.bf16.mxu0 %v12545_v46  ;;  %v12606_v44 = vld [vmem:[%s13454_s29 + $0x1918] ss:$40 sps:$4 sm:$0xff]   ;;  %v12611_v46 = vld [vmem:[%s13454_s29 + $0x146c] ss:$40 sps:$4 sm:$0xff]  }
 0x65d   : > { %9181 = vmatprep.subr.bf16.mxu1 %v12548_v47  ;;  %v12614_v47 = vld [vmem:[%s13454_s29 + $0x196c] ss:$40 sps:$4 sm:$0xff]  }
 0x663   : > { %8977 = vmatpush1.bf16.xpose.msra.mxu0 %v12543_v48  ;;  %v12609_v48 = vld [vmem:[%s13454_s29 + $0x1468] ss:$40 sps:$4 sm:$0xff]  }
 0x664   : > { %9182 = vmatpush1.bf16.xpose.msra.mxu1 %v12546_v50  ;;  %8978 = vmatprep.subr.bf16.mxu0 %v12551_v51  ;;  %v12612_v50 = vld [vmem:[%s13454_s29 + $0x1968] ss:$40 sps:$4 sm:$0xff]   ;;  %v12617_v51 = vld [vmem:[%s13454_s29 + $0x14bc] ss:$40 sps:$4 sm:$0xff]  }
 0x665   : > { %9183 = vmatprep.subr.bf16.mxu1 %v12554_v53  ;;  %v12620_v53 = vld [vmem:[%s13454_s29 + $0x19bc] ss:$40 sps:$4 sm:$0xff]  }
 0x66b   : > { %8979 = vmatpush1.bf16.xpose.msra.mxu0 %v12549_v54  ;;  %v12615_v54 = vld [vmem:[%s13454_s29 + $0x14b8] ss:$40 sps:$4 sm:$0xff]  }
 0x66c   : > { %9184 = vmatpush1.bf16.xpose.msra.mxu1 %v12552_v55  ;;  %8980 = vmatprep.subr.bf16.mxu0 %v12557_v56  ;;  %v12618_v55 = vld [vmem:[%s13454_s29 + $0x19b8] ss:$40 sps:$4 sm:$0xff]   ;;  %v12623_v56 = vld [vmem:[%s13454_s29 + $0x150c] ss:$40 sps:$4 sm:$0xff]  }
 0x66d   : > { %9185 = vmatprep.subr.bf16.mxu1 %v12560_v57  ;;  %v12626_v57 = vld [vmem:[%s13454_s29 + $0x1a0c] ss:$40 sps:$4 sm:$0xff]  }
 0x673   : > { %8981 = vmatpush1.bf16.xpose.msra.mxu0 %v12555_v58  ;;  %v12621_v58 = vld [vmem:[%s13454_s29 + $0x1508] ss:$40 sps:$4 sm:$0xff]  }
 0x674   : > { %9186 = vmatpush1.bf16.xpose.msra.mxu1 %v12558_v59  ;;  %8982 = vmatprep.subr.bf16.mxu0 %v12563_v63  ;;  %v12624_v59 = vld [vmem:[%s13454_s29 + $0x1a08] ss:$40 sps:$4 sm:$0xff]   ;;  %v12629_v63 = vld [vmem:[%s13454_s29 + $0x155c] ss:$40 sps:$4 sm:$0xff]  }
 0x675   : > { %9187 = vmatprep.subr.bf16.mxu1 %v12566_v0  ;;  %v12632_v0 = vld [vmem:[%s13454_s29 + $0x1a5c] ss:$40 sps:$4 sm:$0xff]  }
 0x67b   : > { %8983 = vmatpush1.bf16.xpose.msra.mxu0 %v12561_v29  ;;  %v12627_v29 = vld [vmem:[%s13454_s29 + $0x1558] ss:$40 sps:$4 sm:$0xff]  }
 0x67c   : > { %9188 = vmatpush1.bf16.xpose.msra.mxu1 %v12564_v45  ;;  %8984 = vmatprep.subr.bf16.mxu0 %v12569_v3  ;;  %v12630_v45 = vld [vmem:[%s13454_s29 + $0x1a58] ss:$40 sps:$4 sm:$0xff]   ;;  %v12635_v3 = vld [vmem:[%s13454_s29 + $0x15ac] ss:$40 sps:$4 sm:$0xff]  }
 0x67d   : > { %9189 = vmatprep.subr.bf16.mxu1 %v12572_v4  ;;  %v12638_v4 = vld [vmem:[%s13454_s29 + $0x1aac] ss:$40 sps:$4 sm:$0xff]  }
 0x683   : > { %8985 = vmatpush1.bf16.xpose.msra.mxu0 %v12567_v5  ;;  %v12633_v5 = vld [vmem:[%s13454_s29 + $0x15a8] ss:$40 sps:$4 sm:$0xff]  }
 0x684   : > { %9190 = vmatpush1.bf16.xpose.msra.mxu1 %v12570_v6  ;;  %8986 = vmatprep.subr.bf16.mxu0 %v12575_v9  ;;  %v12636_v6 = vld [vmem:[%s13454_s29 + $0x1aa8] ss:$40 sps:$4 sm:$0xff]   ;;  %v12641_v9 = vld [vmem:[%s13454_s29 + $0x15fc] ss:$40 sps:$4 sm:$0xff]  }
 0x685   : > { %9191 = vmatprep.subr.bf16.mxu1 %v12578_v10  ;;  %v12644_v10 = vld [vmem:[%s13454_s29 + $0x1afc] ss:$40 sps:$4 sm:$0xff]  }
 0x68b   : > { %8987 = vmatpush1.bf16.xpose.msra.mxu0 %v12573_v14  ;;  %v12639_v14 = vld [vmem:[%s13454_s29 + $0x15f8] ss:$40 sps:$4 sm:$0xff]  }
 0x68c   : > { %9192 = vmatpush1.bf16.xpose.msra.mxu1 %v12576_v15  ;;  %8988 = vmatprep.subr.bf16.mxu0 %v12581_v17  ;;  %v12642_v15 = vld [vmem:[%s13454_s29 + $0x1af8] ss:$40 sps:$4 sm:$0xff]   ;;  %v12647_v17 = vld [vmem:[%s13454_s29 + $0x164c] ss:$40 sps:$4 sm:$0xff]  }
 0x68d   : > { %9193 = vmatprep.subr.bf16.mxu1 %v12584_v18  ;;  %v12650_v18 = vld [vmem:[%s13454_s29 + $0x1b4c] ss:$40 sps:$4 sm:$0xff]  }
 0x693   : > { %8989 = vmatpush1.bf16.xpose.msra.mxu0 %v12579_v21  ;;  %v12645_v21 = vld [vmem:[%s13454_s29 + $0x1648] ss:$40 sps:$4 sm:$0xff]  }
 0x694   : > { %9194 = vmatpush1.bf16.xpose.msra.mxu1 %v12582_v22  ;;  %8990 = vmatprep.subr.bf16.mxu0 %v12587_v24  ;;  %v12648_v22 = vld [vmem:[%s13454_s29 + $0x1b48] ss:$40 sps:$4 sm:$0xff]   ;;  %v12653_v24 = vld [vmem:[%s13454_s29 + $0x169c] ss:$40 sps:$4 sm:$0xff]  }
 0x695   : > { %9195 = vmatprep.subr.bf16.mxu1 %v12590_v26  ;;  %v12656_v26 = vld [vmem:[%s13454_s29 + $0x1b9c] ss:$40 sps:$4 sm:$0xff]  }
 0x69b   : > { %8991 = vmatpush1.bf16.xpose.msra.mxu0 %v12585_v27  ;;  %v12651_v27 = vld [vmem:[%s13454_s29 + $0x1698] ss:$40 sps:$4 sm:$0xff]  }
 0x69c   : > { %9196 = vmatpush1.bf16.xpose.msra.mxu1 %v12588_v30  ;;  %8992 = vmatprep.subr.bf16.mxu0 %v12593_v31  ;;  %v12654_v30 = vld [vmem:[%s13454_s29 + $0x1b98] ss:$40 sps:$4 sm:$0xff]   ;;  %v12659_v31 = vld [vmem:[%s13454_s29 + $0x16ec] ss:$40 sps:$4 sm:$0xff]  }
 0x69d   : > { %9197 = vmatprep.subr.bf16.mxu1 %v12596_v32  ;;  %v12662_v32 = vld [vmem:[%s13454_s29 + $0x1bec] ss:$40 sps:$4 sm:$0xff]  }
 0x6a3   : > { %8993 = vmatpush1.bf16.xpose.msra.mxu0 %v12591_v33  ;;  %v12657_v33 = vld [vmem:[%s13454_s29 + $0x16e8] ss:$40 sps:$4 sm:$0xff]  }
 0x6a4   : > { %9198 = vmatpush1.bf16.xpose.msra.mxu1 %v12594_v34  ;;  %8994 = vmatprep.subr.bf16.mxu0 %v12599_v36  ;;  %v12660_v34 = vld [vmem:[%s13454_s29 + $0x1be8] ss:$40 sps:$4 sm:$0xff]   ;;  %v12665_v36 = vld [vmem:[%s13454_s29 + $0x173c] ss:$40 sps:$4 sm:$0xff]  }
 0x6a5   : > { %9199 = vmatprep.subr.bf16.mxu1 %v12602_v38  ;;  %v12668_v38 = vld [vmem:[%s13454_s29 + $0x1c3c] ss:$40 sps:$4 sm:$0xff]  }
 0x6ab   : > { %8995 = vmatpush1.bf16.xpose.msra.mxu0 %v12597_v39  ;;  %v12663_v39 = vld [vmem:[%s13454_s29 + $0x1738] ss:$40 sps:$4 sm:$0xff]  }
 0x6ac   : > { %9200 = vmatpush1.bf16.xpose.msra.mxu1 %v12600_v20  ;;  %9005 = vmatprep.subr.bf16.mxu0 %v12605_v41  ;;  %v12666_v20 = vld [vmem:[%s13454_s29 + $0x1c38] ss:$40 sps:$4 sm:$0xff]   ;;  %v12671_v41 = vld [vmem:[%s13454_s29 + $0x178c] ss:$40 sps:$4 sm:$0xff]  }
 0x6ad   : > { %9210 = vmatprep.subr.bf16.mxu1 %v12608_v42  ;;  %v12674_v42 = vld [vmem:[%s13454_s29 + $0x1c8c] ss:$40 sps:$4 sm:$0xff]  }
 0x6b2   : > { %8997 = vmatmul.mubr.bf16.vlgmr.msra.gmra.mrb[8].mxu0 %v13706_v37 }
 0x6b3   : > { %9202 = vmatmul.mubr.bf16.vlgmr.msra.gmra.mrb[8].mxu1 %v13706_v37  ;;  %9006 = vmatpush1.bf16.xpose.msra.mxu0 %v12603_v43  ;;  %v12669_v43 = vld [vmem:[%s13454_s29 + $0x1788] ss:$40 sps:$4 sm:$0xff]  }
 0x6b4   : > { %9211 = vmatpush1.bf16.xpose.msra.mxu1 %v12606_v44  ;;  %9007 = vmatprep.subr.bf16.mxu0 %v12611_v46  ;;  %v12672_v44 = vld [vmem:[%s13454_s29 + $0x1c88] ss:$40 sps:$4 sm:$0xff]   ;;  %v12677_v46 = vld [vmem:[%s13454_s29 + $0x17dc] ss:$40 sps:$4 sm:$0xff]  }
 0x6b5   : > { %9212 = vmatprep.subr.bf16.mxu1 %v12614_v47  ;;  %9037 = vmatprep.mubr.bf16.mxu0 %v13712_v40  ;;  %v12680_v47 = vld [vmem:[%s13454_s29 + $0x1cdc] ss:$40 sps:$4 sm:$0xff]  }
 0x6b6   : > { %9242 = vmatprep.mubr.bf16.mxu1 %v13712_v40 }
 0x6bb   : > { %9008 = vmatpush1.bf16.xpose.msra.mxu0 %v12609_v48  ;;  %v12675_v48 = vld [vmem:[%s13454_s29 + $0x17d8] ss:$40 sps:$4 sm:$0xff]  }
 0x6bc   : > { %9213 = vmatpush1.bf16.xpose.msra.mxu1 %v12612_v50  ;;  %9009 = vmatprep.subr.bf16.mxu0 %v12617_v51  ;;  %v12678_v50 = vld [vmem:[%s13454_s29 + $0x1cd8] ss:$40 sps:$4 sm:$0xff]   ;;  %v12683_v51 = vld [vmem:[%s13454_s29 + $0x182c] ss:$40 sps:$4 sm:$0xff]  }
 0x6bd   : > { %9214 = vmatprep.subr.bf16.mxu1 %v12620_v53  ;;  %v12686_v53 = vld [vmem:[%s13454_s29 + $0x1d2c] ss:$40 sps:$4 sm:$0xff]  }
 0x6c3   : > { %9010 = vmatpush1.bf16.xpose.msra.mxu0 %v12615_v54  ;;  %v12681_v54 = vld [vmem:[%s13454_s29 + $0x1828] ss:$40 sps:$4 sm:$0xff]  }
 0x6c4   : > { %9215 = vmatpush1.bf16.xpose.msra.mxu1 %v12618_v55  ;;  %9011 = vmatprep.subr.bf16.mxu0 %v12623_v56  ;;  %v12684_v55 = vld [vmem:[%s13454_s29 + $0x1d28] ss:$40 sps:$4 sm:$0xff]   ;;  %v12689_v56 = vld [vmem:[%s13454_s29 + $0x187c] ss:$40 sps:$4 sm:$0xff]  }
 0x6c5   : > { %9216 = vmatprep.subr.bf16.mxu1 %v12626_v57  ;;  %v12692_v57 = vld [vmem:[%s13454_s29 + $0x1d7c] ss:$40 sps:$4 sm:$0xff]  }
 0x6cb   : > { %9012 = vmatpush1.bf16.xpose.msra.mxu0 %v12621_v58  ;;  %v12687_v58 = vld [vmem:[%s13454_s29 + $0x1878] ss:$40 sps:$4 sm:$0xff]  }
 0x6cc   : > { %9217 = vmatpush1.bf16.xpose.msra.mxu1 %v12624_v59  ;;  %9013 = vmatprep.subr.bf16.mxu0 %v12629_v63  ;;  %v12690_v59 = vld [vmem:[%s13454_s29 + $0x1d78] ss:$40 sps:$4 sm:$0xff]   ;;  %v12695_v63 = vld [vmem:[%s13454_s29 + $0x18cc] ss:$40 sps:$4 sm:$0xff]  }
 0x6cd   : > { %9218 = vmatprep.subr.bf16.mxu1 %v12632_v0  ;;  %v12698_v0 = vld [vmem:[%s13454_s29 + $0x1dcc] ss:$40 sps:$4 sm:$0xff]  }
 0x6d3   : > { %9014 = vmatpush1.bf16.xpose.msra.mxu0 %v12627_v29  ;;  %v12693_v29 = vld [vmem:[%s13454_s29 + $0x18c8] ss:$40 sps:$4 sm:$0xff]  }
 0x6d4   : > { %9219 = vmatpush1.bf16.xpose.msra.mxu1 %v12630_v45  ;;  %9015 = vmatprep.subr.bf16.mxu0 %v12635_v3  ;;  %v12696_v45 = vld [vmem:[%s13454_s29 + $0x1dc8] ss:$40 sps:$4 sm:$0xff]   ;;  %v12701_v3 = vld [vmem:[%s13454_s29 + $0x1424] ss:$40 sps:$4 sm:$0xff]  }
 0x6d5   : > { %9220 = vmatprep.subr.bf16.mxu1 %v12638_v4  ;;  %v12704_v4 = vld [vmem:[%s13454_s29 + $0x1924] ss:$40 sps:$4 sm:$0xff]  }
 0x6db   : > { %9016 = vmatpush1.bf16.xpose.msra.mxu0 %v12633_v5  ;;  %v12699_v5 = vld [vmem:[%s13454_s29 + $0x1420] ss:$40 sps:$4 sm:$0xff]  }
 0x6dc   : > { %9221 = vmatpush1.bf16.xpose.msra.mxu1 %v12636_v6  ;;  %9017 = vmatprep.subr.bf16.mxu0 %v12641_v9  ;;  %v12702_v6 = vld [vmem:[%s13454_s29 + $0x1920] ss:$40 sps:$4 sm:$0xff]   ;;  %v12707_v9 = vld [vmem:[%s13454_s29 + $0x1474] ss:$40 sps:$4 sm:$0xff]  }
 0x6dd   : > { %9222 = vmatprep.subr.bf16.mxu1 %v12644_v10  ;;  %v12710_v10 = vld [vmem:[%s13454_s29 + $0x1974] ss:$40 sps:$4 sm:$0xff]  }
 0x6e3   : > { %9018 = vmatpush1.bf16.xpose.msra.mxu0 %v12639_v14  ;;  %v12705_v14 = vld [vmem:[%s13454_s29 + $0x1470] ss:$40 sps:$4 sm:$0xff]  }
 0x6e4   : > { %9223 = vmatpush1.bf16.xpose.msra.mxu1 %v12642_v15  ;;  %9019 = vmatprep.subr.bf16.mxu0 %v12647_v17  ;;  %v12708_v15 = vld [vmem:[%s13454_s29 + $0x1970] ss:$40 sps:$4 sm:$0xff]   ;;  %v12713_v17 = vld [vmem:[%s13454_s29 + $0x14c4] ss:$40 sps:$4 sm:$0xff]  }
 0x6e5   : > { %9224 = vmatprep.subr.bf16.mxu1 %v12650_v18  ;;  %v12716_v18 = vld [vmem:[%s13454_s29 + $0x19c4] ss:$40 sps:$4 sm:$0xff]  }
 0x6eb   : > { %9020 = vmatpush1.bf16.xpose.msra.mxu0 %v12645_v21  ;;  %v12711_v21 = vld [vmem:[%s13454_s29 + $0x14c0] ss:$40 sps:$4 sm:$0xff]  }
 0x6ec   : > { %9225 = vmatpush1.bf16.xpose.msra.mxu1 %v12648_v22  ;;  %9021 = vmatprep.subr.bf16.mxu0 %v12653_v24  ;;  %v12714_v22 = vld [vmem:[%s13454_s29 + $0x19c0] ss:$40 sps:$4 sm:$0xff]   ;;  %v12719_v24 = vld [vmem:[%s13454_s29 + $0x1514] ss:$40 sps:$4 sm:$0xff]  }
 0x6ed   : > { %9226 = vmatprep.subr.bf16.mxu1 %v12656_v26  ;;  %v12722_v26 = vld [vmem:[%s13454_s29 + $0x1a14] ss:$40 sps:$4 sm:$0xff]  }
 0x6f3   : > { %9022 = vmatpush1.bf16.xpose.msra.mxu0 %v12651_v27  ;;  %v12717_v27 = vld [vmem:[%s13454_s29 + $0x1510] ss:$40 sps:$4 sm:$0xff]  }
 0x6f4   : > { %9227 = vmatpush1.bf16.xpose.msra.mxu1 %v12654_v30  ;;  %9023 = vmatprep.subr.bf16.mxu0 %v12659_v31  ;;  %v12720_v30 = vld [vmem:[%s13454_s29 + $0x1a10] ss:$40 sps:$4 sm:$0xff]   ;;  %v12725_v31 = vld [vmem:[%s13454_s29 + $0x1564] ss:$40 sps:$4 sm:$0xff]  }
 0x6f5   : > { %9228 = vmatprep.subr.bf16.mxu1 %v12662_v32  ;;  %v12728_v32 = vld [vmem:[%s13454_s29 + $0x1a64] ss:$40 sps:$4 sm:$0xff]  }
 0x6fb   : > { %9024 = vmatpush1.bf16.xpose.msra.mxu0 %v12657_v33  ;;  %v12723_v33 = vld [vmem:[%s13454_s29 + $0x1560] ss:$40 sps:$4 sm:$0xff]  }
 0x6fc   : > { %9229 = vmatpush1.bf16.xpose.msra.mxu1 %v12660_v34  ;;  %9025 = vmatprep.subr.bf16.mxu0 %v12665_v36  ;;  %v12726_v34 = vld [vmem:[%s13454_s29 + $0x1a60] ss:$40 sps:$4 sm:$0xff]   ;;  %v12731_v36 = vld [vmem:[%s13454_s29 + $0x15b4] ss:$40 sps:$4 sm:$0xff]  }
 0x6fd   : > { %9230 = vmatprep.subr.bf16.mxu1 %v12668_v38  ;;  %v12734_v38 = vld [vmem:[%s13454_s29 + $0x1ab4] ss:$40 sps:$4 sm:$0xff]  }
 0x703   : > { %9026 = vmatpush1.bf16.xpose.msra.mxu0 %v12663_v39  ;;  %v12729_v39 = vld [vmem:[%s13454_s29 + $0x15b0] ss:$40 sps:$4 sm:$0xff]  }
 0x704   : > { %9231 = vmatpush1.bf16.xpose.msra.mxu1 %v12666_v20  ;;  %9027 = vmatprep.subr.bf16.mxu0 %v12671_v41  ;;  %v12732_v20 = vld [vmem:[%s13454_s29 + $0x1ab0] ss:$40 sps:$4 sm:$0xff]   ;;  %v12737_v41 = vld [vmem:[%s13454_s29 + $0x1604] ss:$40 sps:$4 sm:$0xff]  }
 0x705   : > { %9232 = vmatprep.subr.bf16.mxu1 %v12674_v42  ;;  %v12740_v42 = vld [vmem:[%s13454_s29 + $0x1b04] ss:$40 sps:$4 sm:$0xff]  }
 0x70b   : > { %9028 = vmatpush1.bf16.xpose.msra.mxu0 %v12669_v43  ;;  %v12735_v43 = vld [vmem:[%s13454_s29 + $0x1600] ss:$40 sps:$4 sm:$0xff]  }
 0x70c   : > { %9233 = vmatpush1.bf16.xpose.msra.mxu1 %v12672_v44  ;;  %9029 = vmatprep.subr.bf16.mxu0 %v12677_v46  ;;  %v12738_v44 = vld [vmem:[%s13454_s29 + $0x1b00] ss:$40 sps:$4 sm:$0xff]   ;;  %v12743_v46 = vld [vmem:[%s13454_s29 + $0x1654] ss:$40 sps:$4 sm:$0xff]  }
 0x70d   : > { %9234 = vmatprep.subr.bf16.mxu1 %v12680_v47  ;;  %v12746_v47 = vld [vmem:[%s13454_s29 + $0x1b54] ss:$40 sps:$4 sm:$0xff]  }
 0x713   : > { %9030 = vmatpush1.bf16.xpose.msra.mxu0 %v12675_v48  ;;  %v12741_v48 = vld [vmem:[%s13454_s29 + $0x1650] ss:$40 sps:$4 sm:$0xff]  }
 0x714   : > { %9235 = vmatpush1.bf16.xpose.msra.mxu1 %v12678_v50  ;;  %9031 = vmatprep.subr.bf16.mxu0 %v12683_v51  ;;  %v12744_v50 = vld [vmem:[%s13454_s29 + $0x1b50] ss:$40 sps:$4 sm:$0xff]   ;;  %v12749_v51 = vld [vmem:[%s13454_s29 + $0x16a4] ss:$40 sps:$4 sm:$0xff]  }
 0x715   : > { %9236 = vmatprep.subr.bf16.mxu1 %v12686_v53  ;;  %v12752_v53 = vld [vmem:[%s13454_s29 + $0x1ba4] ss:$40 sps:$4 sm:$0xff]  }
 0x71b   : > { %9032 = vmatpush1.bf16.xpose.msra.mxu0 %v12681_v54  ;;  %v12747_v54 = vld [vmem:[%s13454_s29 + $0x16a0] ss:$40 sps:$4 sm:$0xff]  }
 0x71c   : > { %9237 = vmatpush1.bf16.xpose.msra.mxu1 %v12684_v55  ;;  %9033 = vmatprep.subr.bf16.mxu0 %v12689_v56  ;;  %v12750_v55 = vld [vmem:[%s13454_s29 + $0x1ba0] ss:$40 sps:$4 sm:$0xff]   ;;  %v12755_v56 = vld [vmem:[%s13454_s29 + $0x16f4] ss:$40 sps:$4 sm:$0xff]  }
 0x71d   : > { %9238 = vmatprep.subr.bf16.mxu1 %v12692_v57  ;;  %v12758_v57 = vld [vmem:[%s13454_s29 + $0x1bf4] ss:$40 sps:$4 sm:$0xff]  }
 0x723   : > { %9034 = vmatpush1.bf16.xpose.msra.mxu0 %v12687_v58  ;;  %v12753_v58 = vld [vmem:[%s13454_s29 + $0x16f0] ss:$40 sps:$4 sm:$0xff]  }
 0x724   : > { %9239 = vmatpush1.bf16.xpose.msra.mxu1 %v12690_v59  ;;  %9035 = vmatprep.subr.bf16.mxu0 %v12695_v63  ;;  %v12756_v59 = vld [vmem:[%s13454_s29 + $0x1bf0] ss:$40 sps:$4 sm:$0xff]   ;;  %v12761_v63 = vld [vmem:[%s13454_s29 + $0x1744] ss:$40 sps:$4 sm:$0xff]  }
 0x725   : > { %9240 = vmatprep.subr.bf16.mxu1 %v12698_v0  ;;  %v12764_v0 = vld [vmem:[%s13454_s29 + $0x1c44] ss:$40 sps:$4 sm:$0xff]  }
 0x72b   : > { %9036 = vmatpush1.bf16.xpose.msra.mxu0 %v12693_v29  ;;  %v12759_v29 = vld [vmem:[%s13454_s29 + $0x1740] ss:$40 sps:$4 sm:$0xff]  }
 0x72c   : > { %9241 = vmatpush1.bf16.xpose.msra.mxu1 %v12696_v45  ;;  %9046 = vmatprep.subr.bf16.mxu0 %v12701_v3  ;;  %v12762_v45 = vld [vmem:[%s13454_s29 + $0x1c40] ss:$40 sps:$4 sm:$0xff]   ;;  %v12767_v3 = vld [vmem:[%s13454_s29 + $0x1794] ss:$40 sps:$4 sm:$0xff]  }
 0x72d   : > { %9251 = vmatprep.subr.bf16.mxu1 %v12704_v4  ;;  %v12770_v4 = vld [vmem:[%s13454_s29 + $0x1c94] ss:$40 sps:$4 sm:$0xff]  }
 0x732   : > { %9038 = vmatmul.mubr.bf16.vlgmr.msra.gmra.mrb[8].mxu0 %v13789_v49 }
 0x733   : > { %9243 = vmatmul.mubr.bf16.vlgmr.msra.gmra.mrb[8].mxu1 %v13789_v49  ;;  %9047 = vmatpush1.bf16.xpose.msra.mxu0 %v12699_v5  ;;  %v12765_v5 = vld [vmem:[%s13454_s29 + $0x1790] ss:$40 sps:$4 sm:$0xff]  }
 0x734   : > { %9252 = vmatpush1.bf16.xpose.msra.mxu1 %v12702_v6  ;;  %9048 = vmatprep.subr.bf16.mxu0 %v12707_v9  ;;  %v12768_v6 = vld [vmem:[%s13454_s29 + $0x1c90] ss:$40 sps:$4 sm:$0xff]   ;;  %v12773_v9 = vld [vmem:[%s13454_s29 + $0x17e4] ss:$40 sps:$4 sm:$0xff]  }
 0x735   : > { %9253 = vmatprep.subr.bf16.mxu1 %v12710_v10  ;;  %9078 = vmatprep.mubr.bf16.mxu0 %v13794_v52  ;;  %v12776_v10 = vld [vmem:[%s13454_s29 + $0x1ce4] ss:$40 sps:$4 sm:$0xff]  }
 0x736   : > { %9283 = vmatprep.mubr.bf16.mxu1 %v13794_v52 }
 0x73b   : > { %9049 = vmatpush1.bf16.xpose.msra.mxu0 %v12705_v14  ;;  %v12771_v14 = vld [vmem:[%s13454_s29 + $0x17e0] ss:$40 sps:$4 sm:$0xff]  }
 0x73c   : > { %9254 = vmatpush1.bf16.xpose.msra.mxu1 %v12708_v15  ;;  %9050 = vmatprep.subr.bf16.mxu0 %v12713_v17  ;;  %v12774_v15 = vld [vmem:[%s13454_s29 + $0x1ce0] ss:$40 sps:$4 sm:$0xff]   ;;  %v12779_v17 = vld [vmem:[%s13454_s29 + $0x1834] ss:$40 sps:$4 sm:$0xff]  }
 0x73d   : > { %9255 = vmatprep.subr.bf16.mxu1 %v12716_v18  ;;  %v12782_v18 = vld [vmem:[%s13454_s29 + $0x1d34] ss:$40 sps:$4 sm:$0xff]  }
 0x743   : > { %9051 = vmatpush1.bf16.xpose.msra.mxu0 %v12711_v21  ;;  %v12777_v21 = vld [vmem:[%s13454_s29 + $0x1830] ss:$40 sps:$4 sm:$0xff]  }
 0x744   : > { %9256 = vmatpush1.bf16.xpose.msra.mxu1 %v12714_v22  ;;  %9052 = vmatprep.subr.bf16.mxu0 %v12719_v24  ;;  %v12780_v22 = vld [vmem:[%s13454_s29 + $0x1d30] ss:$40 sps:$4 sm:$0xff]   ;;  %v12785_v24 = vld [vmem:[%s13454_s29 + $0x1884] ss:$40 sps:$4 sm:$0xff]  }
 0x745   : > { %9257 = vmatprep.subr.bf16.mxu1 %v12722_v26  ;;  %v12788_v26 = vld [vmem:[%s13454_s29 + $0x1d84] ss:$40 sps:$4 sm:$0xff]  }
 0x74b   : > { %9053 = vmatpush1.bf16.xpose.msra.mxu0 %v12717_v27  ;;  %v12783_v27 = vld [vmem:[%s13454_s29 + $0x1880] ss:$40 sps:$4 sm:$0xff]  }
 0x74c   : > { %9258 = vmatpush1.bf16.xpose.msra.mxu1 %v12720_v30  ;;  %9054 = vmatprep.subr.bf16.mxu0 %v12725_v31  ;;  %v12786_v30 = vld [vmem:[%s13454_s29 + $0x1d80] ss:$40 sps:$4 sm:$0xff]   ;;  %v12791_v31 = vld [vmem:[%s13454_s29 + $0x18d4] ss:$40 sps:$4 sm:$0xff]  }
 0x74d   : > { %9259 = vmatprep.subr.bf16.mxu1 %v12728_v32  ;;  %v12794_v32 = vld [vmem:[%s13454_s29 + $0x1dd4] ss:$40 sps:$4 sm:$0xff]  }
 0x753   : > { %9055 = vmatpush1.bf16.xpose.msra.mxu0 %v12723_v33  ;;  %v12789_v33 = vld [vmem:[%s13454_s29 + $0x18d0] ss:$40 sps:$4 sm:$0xff]  }
 0x754   : > { %9260 = vmatpush1.bf16.xpose.msra.mxu1 %v12726_v34  ;;  %9056 = vmatprep.subr.bf16.mxu0 %v12731_v36  ;;  %v12792_v34 = vld [vmem:[%s13454_s29 + $0x1dd0] ss:$40 sps:$4 sm:$0xff]   ;;  %v12797_v36 = vld [vmem:[%s13454_s29 + $0x1e04] ss:$40 sps:$4 sm:$0xff]  }
 0x755   : > { %9261 = vmatprep.subr.bf16.mxu1 %v12734_v38  ;;  %v12800_v38 = vld [vmem:[%s13454_s29 + $0x2304] ss:$40 sps:$4 sm:$0xff]  }
 0x75b   : > { %9057 = vmatpush1.bf16.xpose.msra.mxu0 %v12729_v39  ;;  %v12795_v39 = vld [vmem:[%s13454_s29 + $0x1e00] ss:$40 sps:$4 sm:$0xff]  }
 0x75c   : > { %9262 = vmatpush1.bf16.xpose.msra.mxu1 %v12732_v20  ;;  %9058 = vmatprep.subr.bf16.mxu0 %v12737_v41  ;;  %v12798_v20 = vld [vmem:[%s13454_s29 + $0x2300] ss:$40 sps:$4 sm:$0xff]   ;;  %v12803_v41 = vld [vmem:[%s13454_s29 + $0x1e54] ss:$40 sps:$4 sm:$0xff]  }
 0x75d   : > { %9263 = vmatprep.subr.bf16.mxu1 %v12740_v42  ;;  %v12806_v42 = vld [vmem:[%s13454_s29 + $0x2354] ss:$40 sps:$4 sm:$0xff]  }
 0x763   : > { %9059 = vmatpush1.bf16.xpose.msra.mxu0 %v12735_v43  ;;  %v12801_v43 = vld [vmem:[%s13454_s29 + $0x1e50] ss:$40 sps:$4 sm:$0xff]  }
 0x764   : > { %9264 = vmatpush1.bf16.xpose.msra.mxu1 %v12738_v44  ;;  %9060 = vmatprep.subr.bf16.mxu0 %v12743_v46  ;;  %v12804_v44 = vld [vmem:[%s13454_s29 + $0x2350] ss:$40 sps:$4 sm:$0xff]   ;;  %v12809_v46 = vld [vmem:[%s13454_s29 + $0x1ea4] ss:$40 sps:$4 sm:$0xff]  }
 0x765   : > { %9265 = vmatprep.subr.bf16.mxu1 %v12746_v47  ;;  %v12812_v47 = vld [vmem:[%s13454_s29 + $0x23a4] ss:$40 sps:$4 sm:$0xff]  }
 0x76b   : > { %9061 = vmatpush1.bf16.xpose.msra.mxu0 %v12741_v48  ;;  %v12807_v48 = vld [vmem:[%s13454_s29 + $0x1ea0] ss:$40 sps:$4 sm:$0xff]  }
 0x76c   : > { %9266 = vmatpush1.bf16.xpose.msra.mxu1 %v12744_v50  ;;  %9062 = vmatprep.subr.bf16.mxu0 %v12749_v51  ;;  %v12810_v50 = vld [vmem:[%s13454_s29 + $0x23a0] ss:$40 sps:$4 sm:$0xff]   ;;  %v12815_v51 = vld [vmem:[%s13454_s29 + $0x1ef4] ss:$40 sps:$4 sm:$0xff]  }
 0x76d   : > { %9267 = vmatprep.subr.bf16.mxu1 %v12752_v53  ;;  %v12818_v53 = vld [vmem:[%s13454_s29 + $0x23f4] ss:$40 sps:$4 sm:$0xff]  }
 0x773   : > { %9063 = vmatpush1.bf16.xpose.msra.mxu0 %v12747_v54  ;;  %v12816_v54 = vld [vmem:[%s13454_s29 + $0x23f0] ss:$40 sps:$4 sm:$0xff]  }
 0x774   : > { %9268 = vmatpush1.bf16.xpose.msra.mxu1 %v12750_v55  ;;  %9064 = vmatprep.subr.bf16.mxu0 %v12755_v56  ;;  %v12821_v55 = vld [vmem:[%s13454_s29 + $0x1f44] ss:$40 sps:$4 sm:$0xff]  }
 0x775   : > { %9269 = vmatprep.subr.bf16.mxu1 %v12758_v57  ;;  %v12824_v56 = vld [vmem:[%s13454_s29 + $0x2444] ss:$40 sps:$4 sm:$0xff]   ;;  %v12819_v57 = vld [vmem:[%s13454_s29 + $0x1f40] ss:$40 sps:$4 sm:$0xff]  }
 0x77b   : > { %9065 = vmatpush1.bf16.xpose.msra.mxu0 %v12753_v58  ;;  %v12822_v58 = vld [vmem:[%s13454_s29 + $0x2440] ss:$40 sps:$4 sm:$0xff]  }
 0x77c   : > { %9270 = vmatpush1.bf16.xpose.msra.mxu1 %v12756_v59  ;;  %9066 = vmatprep.subr.bf16.mxu0 %v12761_v63  ;;  %v12827_v59 = vld [vmem:[%s13454_s29 + $0x1f94] ss:$40 sps:$4 sm:$0xff]  }
 0x77d   : > { %9271 = vmatprep.subr.bf16.mxu1 %v12764_v0  ;;  %v12830_v63 = vld [vmem:[%s13454_s29 + $0x2494] ss:$40 sps:$4 sm:$0xff]   ;;  %v12825_v0 = vld [vmem:[%s13454_s29 + $0x1f90] ss:$40 sps:$4 sm:$0xff]  }
 0x783   : > { %9067 = vmatpush1.bf16.xpose.msra.mxu0 %v12759_v29  ;;  %v12828_v29 = vld [vmem:[%s13454_s29 + $0x2490] ss:$40 sps:$4 sm:$0xff]  }
 0x784   : > { %9272 = vmatpush1.bf16.xpose.msra.mxu1 %v12762_v45  ;;  %9068 = vmatprep.subr.bf16.mxu0 %v12767_v3  ;;  %v12833_v45 = vld [vmem:[%s13454_s29 + $0x1fe4] ss:$40 sps:$4 sm:$0xff]  }
 0x785   : > { %9273 = vmatprep.subr.bf16.mxu1 %v12770_v4  ;;  %v12836_v3 = vld [vmem:[%s13454_s29 + $0x24e4] ss:$40 sps:$4 sm:$0xff]   ;;  %v12831_v4 = vld [vmem:[%s13454_s29 + $0x1fe0] ss:$40 sps:$4 sm:$0xff]  }
 0x78b   : > { %9069 = vmatpush1.bf16.xpose.msra.mxu0 %v12765_v5  ;;  %v12834_v5 = vld [vmem:[%s13454_s29 + $0x24e0] ss:$40 sps:$4 sm:$0xff]  }
 0x78c   : > { %9274 = vmatpush1.bf16.xpose.msra.mxu1 %v12768_v6  ;;  %9070 = vmatprep.subr.bf16.mxu0 %v12773_v9  ;;  %v12839_v6 = vld [vmem:[%s13454_s29 + $0x2034] ss:$40 sps:$4 sm:$0xff]  }
 0x78d   : > { %9275 = vmatprep.subr.bf16.mxu1 %v12776_v10  ;;  %v12842_v9 = vld [vmem:[%s13454_s29 + $0x2534] ss:$40 sps:$4 sm:$0xff]   ;;  %v12837_v10 = vld [vmem:[%s13454_s29 + $0x2030] ss:$40 sps:$4 sm:$0xff]  }
 0x793   : > { %9071 = vmatpush1.bf16.xpose.msra.mxu0 %v12771_v14  ;;  %v12840_v14 = vld [vmem:[%s13454_s29 + $0x2530] ss:$40 sps:$4 sm:$0xff]  }
 0x794   : > { %9276 = vmatpush1.bf16.xpose.msra.mxu1 %v12774_v15  ;;  %9072 = vmatprep.subr.bf16.mxu0 %v12779_v17  ;;  %v12845_v15 = vld [vmem:[%s13454_s29 + $0x2084] ss:$40 sps:$4 sm:$0xff]  }
 0x795   : > { %9277 = vmatprep.subr.bf16.mxu1 %v12782_v18  ;;  %v12848_v17 = vld [vmem:[%s13454_s29 + $0x2584] ss:$40 sps:$4 sm:$0xff]   ;;  %v12843_v18 = vld [vmem:[%s13454_s29 + $0x2080] ss:$40 sps:$4 sm:$0xff]  }
 0x79b   : > { %9073 = vmatpush1.bf16.xpose.msra.mxu0 %v12777_v21  ;;  %v12846_v21 = vld [vmem:[%s13454_s29 + $0x2580] ss:$40 sps:$4 sm:$0xff]  }
 0x79c   : > { %9278 = vmatpush1.bf16.xpose.msra.mxu1 %v12780_v22  ;;  %9074 = vmatprep.subr.bf16.mxu0 %v12785_v24  ;;  %v12851_v22 = vld [vmem:[%s13454_s29 + $0x20d4] ss:$40 sps:$4 sm:$0xff]  }
 0x79d   : > { %9279 = vmatprep.subr.bf16.mxu1 %v12788_v26  ;;  %v12854_v24 = vld [vmem:[%s13454_s29 + $0x25d4] ss:$40 sps:$4 sm:$0xff]   ;;  %v12849_v26 = vld [vmem:[%s13454_s29 + $0x20d0] ss:$40 sps:$4 sm:$0xff]  }
 0x7a3   : > { %9075 = vmatpush1.bf16.xpose.msra.mxu0 %v12783_v27  ;;  %v12852_v27 = vld [vmem:[%s13454_s29 + $0x25d0] ss:$40 sps:$4 sm:$0xff]  }
 0x7a4   : > { %9280 = vmatpush1.bf16.xpose.msra.mxu1 %v12786_v30  ;;  %9076 = vmatprep.subr.bf16.mxu0 %v12791_v31  ;;  %v12857_v30 = vld [vmem:[%s13454_s29 + $0x2124] ss:$40 sps:$4 sm:$0xff]  }
 0x7a5   : > { %9281 = vmatprep.subr.bf16.mxu1 %v12794_v32  ;;  %v12860_v31 = vld [vmem:[%s13454_s29 + $0x2624] ss:$40 sps:$4 sm:$0xff]   ;;  %v12855_v32 = vld [vmem:[%s13454_s29 + $0x2120] ss:$40 sps:$4 sm:$0xff]  }
 0x7ab   : > { %9077 = vmatpush1.bf16.xpose.msra.mxu0 %v12789_v33  ;;  %v12858_v33 = vld [vmem:[%s13454_s29 + $0x2620] ss:$40 sps:$4 sm:$0xff]  }
 0x7ac   : > { %9282 = vmatpush1.bf16.xpose.msra.mxu1 %v12792_v34  ;;  %9292 = vmatprep.subr.bf16.mxu0 %v12797_v36  ;;  %v12863_v34 = vld [vmem:[%s13454_s29 + $0x2174] ss:$40 sps:$4 sm:$0xff]  }
 0x7ad   : > { %9497 = vmatprep.subr.bf16.mxu1 %v12800_v38  ;;  %v12866_v36 = vld [vmem:[%s13454_s29 + $0x2674] ss:$40 sps:$4 sm:$0xff]   ;;  %v12861_v38 = vld [vmem:[%s13454_s29 + $0x2170] ss:$40 sps:$4 sm:$0xff]  }
 0x7b2   : > { %9079 = vmatmul.mubr.bf16.vlgmr.msra.gmra.mrb[8].mxu0 %v13862_v61 }
 0x7b3   : > { %9284 = vmatmul.mubr.bf16.vlgmr.msra.gmra.mrb[8].mxu1 %v13862_v61  ;;  %9293 = vmatpush1.bf16.xpose.msra.mxu0 %v12795_v39  ;;  %v12864_v39 = vld [vmem:[%s13454_s29 + $0x2670] ss:$40 sps:$4 sm:$0xff]  }
 0x7b4   : > { %9498 = vmatpush1.bf16.xpose.msra.mxu1 %v12798_v20  ;;  %9294 = vmatprep.subr.bf16.mxu0 %v12803_v41  ;;  %v12869_v20 = vld [vmem:[%s13454_s29 + $0x21c4] ss:$40 sps:$4 sm:$0xff]  }
 0x7b5   : > { %9499 = vmatprep.subr.bf16.mxu1 %v12806_v42  ;;  %9324 = vmatprep.mubr.bf16.mxu0 %v13500_v35  ;;  %v12872_v41 = vld [vmem:[%s13454_s29 + $0x26c4] ss:$40 sps:$4 sm:$0xff]   ;;  %v12867_v42 = vld [vmem:[%s13454_s29 + $0x21c0] ss:$40 sps:$4 sm:$0xff]  }
 0x7b6   : > { %9529 = vmatprep.mubr.bf16.mxu1 %v13500_v35  ;;  %v12813_v35 = vld [vmem:[%s13454_s29 + $0x1ef0] ss:$40 sps:$4 sm:$0xff]  }
 0x7bb   : > { %9295 = vmatpush1.bf16.xpose.msra.mxu0 %v12801_v43  ;;  %v12870_v43 = vld [vmem:[%s13454_s29 + $0x26c0] ss:$40 sps:$4 sm:$0xff]  }
 0x7bc   : > { %9500 = vmatpush1.bf16.xpose.msra.mxu1 %v12804_v44  ;;  %9296 = vmatprep.subr.bf16.mxu0 %v12809_v46  ;;  %v12875_v44 = vld [vmem:[%s13454_s29 + $0x2214] ss:$40 sps:$4 sm:$0xff]  }
 0x7bd   : > { %9501 = vmatprep.subr.bf16.mxu1 %v12812_v47  ;;  %v12878_v46 = vld [vmem:[%s13454_s29 + $0x2714] ss:$40 sps:$4 sm:$0xff]   ;;  %v12873_v47 = vld [vmem:[%s13454_s29 + $0x2210] ss:$40 sps:$4 sm:$0xff]  }
 0x7c3   : > { %9297 = vmatpush1.bf16.xpose.msra.mxu0 %v12807_v48  ;;  %v12876_v48 = vld [vmem:[%s13454_s29 + $0x2710] ss:$40 sps:$4 sm:$0xff]  }
 0x7c4   : > { %9502 = vmatpush1.bf16.xpose.msra.mxu1 %v12810_v50  ;;  %9298 = vmatprep.subr.bf16.mxu0 %v12815_v51  ;;  %v12881_v50 = vld [vmem:[%s13454_s29 + $0x2264] ss:$40 sps:$4 sm:$0xff]  }
 0x7c5   : > { %9503 = vmatprep.subr.bf16.mxu1 %v12818_v53  ;;  %v12884_v51 = vld [vmem:[%s13454_s29 + $0x2764] ss:$40 sps:$4 sm:$0xff]   ;;  %v12879_v53 = vld [vmem:[%s13454_s29 + $0x2260] ss:$40 sps:$4 sm:$0xff]  }
 0x7cb   : > { %9299 = vmatpush1.bf16.xpose.msra.mxu0 %v12813_v35  ;;  %v12882_v35 = vld [vmem:[%s13454_s29 + $0x2760] ss:$40 sps:$4 sm:$0xff]  }
 0x7cc   : > { %9504 = vmatpush1.bf16.xpose.msra.mxu1 %v12816_v54  ;;  %9300 = vmatprep.subr.bf16.mxu0 %v12821_v55  ;;  %v12887_v54 = vld [vmem:[%s13454_s29 + $0x22b4] ss:$40 sps:$4 sm:$0xff]  }
 0x7cd   : > { %9505 = vmatprep.subr.bf16.mxu1 %v12824_v56  ;;  %v12890_v55 = vld [vmem:[%s13454_s29 + $0x27b4] ss:$40 sps:$4 sm:$0xff]   ;;  %v12885_v56 = vld [vmem:[%s13454_s29 + $0x22b0] ss:$40 sps:$4 sm:$0xff]  }
 0x7d3   : > { %9301 = vmatpush1.bf16.xpose.msra.mxu0 %v12819_v57  ;;  %v12888_v57 = vld [vmem:[%s13454_s29 + $0x27b0] ss:$40 sps:$4 sm:$0xff]  }
 0x7d4   : > { %9506 = vmatpush1.bf16.xpose.msra.mxu1 %v12822_v58  ;;  %9302 = vmatprep.subr.bf16.mxu0 %v12827_v59  ;;  %v12893_v58 = vld [vmem:[%s13454_s29 + $0x1e0c] ss:$40 sps:$4 sm:$0xff]  }
 0x7d5   : > { %9507 = vmatprep.subr.bf16.mxu1 %v12830_v63  ;;  %v12896_v59 = vld [vmem:[%s13454_s29 + $0x230c] ss:$40 sps:$4 sm:$0xff]   ;;  %v12891_v63 = vld [vmem:[%s13454_s29 + $0x1e08] ss:$40 sps:$4 sm:$0xff]  }
 0x7db   : > { %9303 = vmatpush1.bf16.xpose.msra.mxu0 %v12825_v0  ;;  %v12894_v0 = vld [vmem:[%s13454_s29 + $0x2308] ss:$40 sps:$4 sm:$0xff]  }
 0x7dc   : > { %9508 = vmatpush1.bf16.xpose.msra.mxu1 %v12828_v29  ;;  %9304 = vmatprep.subr.bf16.mxu0 %v12833_v45  ;;  %v12899_v29 = vld [vmem:[%s13454_s29 + $0x1e5c] ss:$40 sps:$4 sm:$0xff]  }
 0x7dd   : > { %9509 = vmatprep.subr.bf16.mxu1 %v12836_v3  ;;  %v12902_v45 = vld [vmem:[%s13454_s29 + $0x235c] ss:$40 sps:$4 sm:$0xff]   ;;  %v12897_v3 = vld [vmem:[%s13454_s29 + $0x1e58] ss:$40 sps:$4 sm:$0xff]  }
 0x7e3   : > { %9305 = vmatpush1.bf16.xpose.msra.mxu0 %v12831_v4  ;;  %v12900_v4 = vld [vmem:[%s13454_s29 + $0x2358] ss:$40 sps:$4 sm:$0xff]  }
 0x7e4   : > { %9510 = vmatpush1.bf16.xpose.msra.mxu1 %v12834_v5  ;;  %9306 = vmatprep.subr.bf16.mxu0 %v12839_v6  ;;  %v12905_v5 = vld [vmem:[%s13454_s29 + $0x1eac] ss:$40 sps:$4 sm:$0xff]  }
 0x7e5   : > { %9511 = vmatprep.subr.bf16.mxu1 %v12842_v9  ;;  %v12908_v6 = vld [vmem:[%s13454_s29 + $0x23ac] ss:$40 sps:$4 sm:$0xff]   ;;  %v12906_v9 = vld [vmem:[%s13454_s29 + $0x23a8] ss:$40 sps:$4 sm:$0xff]  }
 0x7eb   : > { %9307 = vmatpush1.bf16.xpose.msra.mxu0 %v12837_v10  ;;  %v12911_v10 = vld [vmem:[%s13454_s29 + $0x1efc] ss:$40 sps:$4 sm:$0xff]  }
 0x7ec   : > { %9512 = vmatpush1.bf16.xpose.msra.mxu1 %v12840_v14  ;;  %9308 = vmatprep.subr.bf16.mxu0 %v12845_v15  ;;  %v12914_v14 = vld [vmem:[%s13454_s29 + $0x23fc] ss:$40 sps:$4 sm:$0xff]   ;;  %v12912_v15 = vld [vmem:[%s13454_s29 + $0x23f8] ss:$40 sps:$4 sm:$0xff]  }
 0x7ed   : > { %9513 = vmatprep.subr.bf16.mxu1 %v12848_v17  ;;  %v12917_v17 = vld [vmem:[%s13454_s29 + $0x1f4c] ss:$40 sps:$4 sm:$0xff]  }
 0x7f3   : > { %9309 = vmatpush1.bf16.xpose.msra.mxu0 %v12843_v18  ;;  %v12920_v18 = vld [vmem:[%s13454_s29 + $0x244c] ss:$40 sps:$4 sm:$0xff]  }
 0x7f4   : > { %9514 = vmatpush1.bf16.xpose.msra.mxu1 %v12846_v21  ;;  %9310 = vmatprep.subr.bf16.mxu0 %v12851_v22  ;;  %v12915_v21 = vld [vmem:[%s13454_s29 + $0x1f48] ss:$40 sps:$4 sm:$0xff]  }
 0x7f5   : > { %9515 = vmatprep.subr.bf16.mxu1 %v12854_v24  ;;  %v12918_v22 = vld [vmem:[%s13454_s29 + $0x2448] ss:$40 sps:$4 sm:$0xff]   ;;  %v12923_v24 = vld [vmem:[%s13454_s29 + $0x1f9c] ss:$40 sps:$4 sm:$0xff]  }
 0x7fb   : > { %9311 = vmatpush1.bf16.xpose.msra.mxu0 %v12849_v26  ;;  %v12926_v26 = vld [vmem:[%s13454_s29 + $0x249c] ss:$40 sps:$4 sm:$0xff]  }
 0x7fc   : > { %9516 = vmatpush1.bf16.xpose.msra.mxu1 %v12852_v27  ;;  %9312 = vmatprep.subr.bf16.mxu0 %v12857_v30  ;;  %v12921_v27 = vld [vmem:[%s13454_s29 + $0x1f98] ss:$40 sps:$4 sm:$0xff]  }
 0x7fd   : > { %9517 = vmatprep.subr.bf16.mxu1 %v12860_v31  ;;  %v12924_v30 = vld [vmem:[%s13454_s29 + $0x2498] ss:$40 sps:$4 sm:$0xff]   ;;  %v12929_v31 = vld [vmem:[%s13454_s29 + $0x1fec] ss:$40 sps:$4 sm:$0xff]  }
 0x803   : > { %9313 = vmatpush1.bf16.xpose.msra.mxu0 %v12855_v32  ;;  %v12932_v32 = vld [vmem:[%s13454_s29 + $0x24ec] ss:$40 sps:$4 sm:$0xff]  }
 0x804   : > { %9518 = vmatpush1.bf16.xpose.msra.mxu1 %v12858_v33  ;;  %9314 = vmatprep.subr.bf16.mxu0 %v12863_v34  ;;  %v12927_v33 = vld [vmem:[%s13454_s29 + $0x1fe8] ss:$40 sps:$4 sm:$0xff]  }
 0x805   : > { %9519 = vmatprep.subr.bf16.mxu1 %v12866_v36  ;;  %v12930_v34 = vld [vmem:[%s13454_s29 + $0x24e8] ss:$40 sps:$4 sm:$0xff]   ;;  %v12935_v36 = vld [vmem:[%s13454_s29 + $0x203c] ss:$40 sps:$4 sm:$0xff]  }
 0x80b   : > { %9315 = vmatpush1.bf16.xpose.msra.mxu0 %v12861_v38  ;;  %v12938_v38 = vld [vmem:[%s13454_s29 + $0x253c] ss:$40 sps:$4 sm:$0xff]  }
 0x80c   : > { %9520 = vmatpush1.bf16.xpose.msra.mxu1 %v12864_v39  ;;  %9316 = vmatprep.subr.bf16.mxu0 %v12869_v20  ;;  %v12933_v39 = vld [vmem:[%s13454_s29 + $0x2038] ss:$40 sps:$4 sm:$0xff]  }
 0x80d   : > { %9521 = vmatprep.subr.bf16.mxu1 %v12872_v41  ;;  %v12936_v20 = vld [vmem:[%s13454_s29 + $0x2538] ss:$40 sps:$4 sm:$0xff]   ;;  %v12941_v41 = vld [vmem:[%s13454_s29 + $0x208c] ss:$40 sps:$4 sm:$0xff]  }
 0x813   : > { %9317 = vmatpush1.bf16.xpose.msra.mxu0 %v12867_v42  ;;  %v12944_v42 = vld [vmem:[%s13454_s29 + $0x258c] ss:$40 sps:$4 sm:$0xff]  }
 0x814   : > { %9522 = vmatpush1.bf16.xpose.msra.mxu1 %v12870_v43  ;;  %9318 = vmatprep.subr.bf16.mxu0 %v12875_v44  ;;  %v12939_v43 = vld [vmem:[%s13454_s29 + $0x2088] ss:$40 sps:$4 sm:$0xff]  }
 0x815   : > { %9523 = vmatprep.subr.bf16.mxu1 %v12878_v46  ;;  %v12942_v44 = vld [vmem:[%s13454_s29 + $0x2588] ss:$40 sps:$4 sm:$0xff]   ;;  %v12947_v46 = vld [vmem:[%s13454_s29 + $0x20dc] ss:$40 sps:$4 sm:$0xff]  }
 0x81b   : > { %9319 = vmatpush1.bf16.xpose.msra.mxu0 %v12873_v47  ;;  %v12950_v47 = vld [vmem:[%s13454_s29 + $0x25dc] ss:$40 sps:$4 sm:$0xff]  }
 0x81c   : > { %9524 = vmatpush1.bf16.xpose.msra.mxu1 %v12876_v48  ;;  %9320 = vmatprep.subr.bf16.mxu0 %v12881_v50  ;;  %v12945_v48 = vld [vmem:[%s13454_s29 + $0x20d8] ss:$40 sps:$4 sm:$0xff]  }
 0x81d   : > { %9525 = vmatprep.subr.bf16.mxu1 %v12884_v51  ;;  %v12948_v50 = vld [vmem:[%s13454_s29 + $0x25d8] ss:$40 sps:$4 sm:$0xff]   ;;  %v12953_v51 = vld [vmem:[%s13454_s29 + $0x212c] ss:$40 sps:$4 sm:$0xff]  }
 0x823   : > { %9321 = vmatpush1.bf16.xpose.msra.mxu0 %v12879_v53  ;;  %v12956_v53 = vld [vmem:[%s13454_s29 + $0x262c] ss:$40 sps:$4 sm:$0xff]  }
 0x824   : > { %9526 = vmatpush1.bf16.xpose.msra.mxu1 %v12882_v35  ;;  %9322 = vmatprep.subr.bf16.mxu0 %v12887_v54  ;;  %v12951_v35 = vld [vmem:[%s13454_s29 + $0x2128] ss:$40 sps:$4 sm:$0xff]  }
 0x825   : > { %9527 = vmatprep.subr.bf16.mxu1 %v12890_v55  ;;  %v12954_v54 = vld [vmem:[%s13454_s29 + $0x2628] ss:$40 sps:$4 sm:$0xff]  }
 0x826   : > { %v14710_v55 = vld [vmem:[%s13984_s7 + $0x8] sm:$0xff] }
 0x82b   : > { %9323 = vmatpush1.bf16.xpose.msra.mxu0 %v12885_v56  ;;  %v12959_v56 = vld [vmem:[%s13454_s29 + $0x217c] ss:$40 sps:$4 sm:$0xff]  }
 0x82c   : > { %9528 = vmatpush1.bf16.xpose.msra.mxu1 %v12888_v57  ;;  %9333 = vmatprep.subr.bf16.mxu0 %v12893_v58  ;;  %v12962_v57 = vld [vmem:[%s13454_s29 + $0x267c] ss:$40 sps:$4 sm:$0xff]   ;;  %v1534_v58 = vrot.slane %v14710_v55, %v1501_v60 }
 0x82d   : > { %9538 = vmatprep.subr.bf16.mxu1 %v12896_v59  ;;  %v1542_v59 = vrot.slane %v14710_v55, %v1509_v62 }
 0x832   : > { %9325 = vmatmul.mubr.bf16.vlgmr.msra.gmra.mrb[12].mxu0 %v13547_v13 }
 0x833   : > { %9530 = vmatmul.mubr.bf16.vlgmr.msra.gmra.mrb[12].mxu1 %v13547_v13  ;;  %9334 = vmatpush1.bf16.xpose.msra.mxu0 %v12891_v63  ;;  %v12903_v13 = vld [vmem:[%s13454_s29 + $0x1ea8] ss:$40 sps:$4 sm:$0xff]   ;;  %v1538_v63 = vrot.slane %v14710_v55, %v1505_v1  ;;  %v12957_v1 = vld [vmem:[%s13454_s29 + $0x2178] ss:$40 sps:$4 sm:$0xff]  }
 0x834   : > { %9539 = vmatpush1.bf16.xpose.msra.mxu1 %v12894_v0  ;;  %9335 = vmatprep.subr.bf16.mxu0 %v12899_v29  ;;  %v1546_v0 = vrot.slane %v14710_v55, %v1513_v2 }
 0x835   : > { %9540 = vmatprep.subr.bf16.mxu1 %v12902_v45  ;;  %9365 = vmatprep.mubr.bf16.mxu0 %v13553_v16 }
 0x836   : > { %9570 = vmatprep.mubr.bf16.mxu1 %v13553_v16  ;;  %v12909_v16 = vld [vmem:[%s13454_s29 + $0x1ef8] ss:$40 sps:$4 sm:$0xff]  }
 0x83b   : > { %9336 = vmatpush1.bf16.xpose.msra.mxu0 %v12897_v3 }
 0x83c   : > { %9541 = vmatpush1.bf16.xpose.msra.mxu1 %v12900_v4  ;;  %9337 = vmatprep.subr.bf16.mxu0 %v12905_v5 }
 0x83d   : > { %9542 = vmatprep.subr.bf16.mxu1 %v12908_v6 }
 0x843   : > { %9338 = vmatpush1.bf16.xpose.msra.mxu0 %v12903_v13 }
 0x844   : > { %9543 = vmatpush1.bf16.xpose.msra.mxu1 %v12906_v9  ;;  %9339 = vmatprep.subr.bf16.mxu0 %v12911_v10  ;;  %v12960_v10 = vld [vmem:[%s13454_s29 + $0x2678] ss:$40 sps:$4 sm:$0xff]  }
 0x845   : > { %9544 = vmatprep.subr.bf16.mxu1 %v12914_v14 }
 0x84b   : > { %9340 = vmatpush1.bf16.xpose.msra.mxu0 %v12909_v16  ;;  %v12965_v16 = vld [vmem:[%s13454_s29 + $0x21cc] ss:$40 sps:$4 sm:$0xff]  }
 0x84c   : > { %9545 = vmatpush1.bf16.xpose.msra.mxu1 %v12912_v15  ;;  %9341 = vmatprep.subr.bf16.mxu0 %v12917_v17  ;;  %v12968_v15 = vld [vmem:[%s13454_s29 + $0x26cc] ss:$40 sps:$4 sm:$0xff]  }
 0x84d   : > { %9546 = vmatprep.subr.bf16.mxu1 %v12920_v18 }
 0x853   : > { %9342 = vmatpush1.bf16.xpose.msra.mxu0 %v12915_v21 }
 0x854   : > { %9547 = vmatpush1.bf16.xpose.msra.mxu1 %v12918_v22  ;;  %9343 = vmatprep.subr.bf16.mxu0 %v12923_v24 }
 0x855   : > { %9548 = vmatprep.subr.bf16.mxu1 %v12926_v26  ;;  %v12963_v26 = vld [vmem:[%s13454_s29 + $0x21c8] ss:$40 sps:$4 sm:$0xff]  }
 0x85b   : > { %9344 = vmatpush1.bf16.xpose.msra.mxu0 %v12921_v27  ;;  %v12966_v27 = vld [vmem:[%s13454_s29 + $0x26c8] ss:$40 sps:$4 sm:$0xff]  }
 0x85c   : > { %9549 = vmatpush1.bf16.xpose.msra.mxu1 %v12924_v30  ;;  %9345 = vmatprep.subr.bf16.mxu0 %v12929_v31  ;;  %v12971_v30 = vld [vmem:[%s13454_s29 + $0x221c] ss:$40 sps:$4 sm:$0xff]  }
 0x85d   : > { %9550 = vmatprep.subr.bf16.mxu1 %v12932_v32  ;;  %v12974_v31 = vld [vmem:[%s13454_s29 + $0x271c] ss:$40 sps:$4 sm:$0xff]   ;;  %v12969_v32 = vld [vmem:[%s13454_s29 + $0x2218] ss:$40 sps:$4 sm:$0xff]  }
 0x863   : > { %9346 = vmatpush1.bf16.xpose.msra.mxu0 %v12927_v33  ;;  %v12972_v33 = vld [vmem:[%s13454_s29 + $0x2718] ss:$40 sps:$4 sm:$0xff]  }
 0x864   : > { %9551 = vmatpush1.bf16.xpose.msra.mxu1 %v12930_v34  ;;  %9347 = vmatprep.subr.bf16.mxu0 %v12935_v36  ;;  %v12977_v34 = vld [vmem:[%s13454_s29 + $0x226c] ss:$40 sps:$4 sm:$0xff]  }
 0x865   : > { %9552 = vmatprep.subr.bf16.mxu1 %v12938_v38  ;;  %v12980_v36 = vld [vmem:[%s13454_s29 + $0x276c] ss:$40 sps:$4 sm:$0xff]   ;;  %v12975_v38 = vld [vmem:[%s13454_s29 + $0x2268] ss:$40 sps:$4 sm:$0xff]  }
 0x86b   : > { %9348 = vmatpush1.bf16.xpose.msra.mxu0 %v12933_v39  ;;  %v12978_v39 = vld [vmem:[%s13454_s29 + $0x2768] ss:$40 sps:$4 sm:$0xff]  }
 0x86c   : > { %9553 = vmatpush1.bf16.xpose.msra.mxu1 %v12936_v20  ;;  %9349 = vmatprep.subr.bf16.mxu0 %v12941_v41  ;;  %v12983_v20 = vld [vmem:[%s13454_s29 + $0x22bc] ss:$40 sps:$4 sm:$0xff]  }
 0x86d   : > { %9554 = vmatprep.subr.bf16.mxu1 %v12944_v42  ;;  %v12986_v41 = vld [vmem:[%s13454_s29 + $0x27bc] ss:$40 sps:$4 sm:$0xff]   ;;  %v12981_v42 = vld [vmem:[%s13454_s29 + $0x22b8] ss:$40 sps:$4 sm:$0xff]  }
 0x873   : > { %9350 = vmatpush1.bf16.xpose.msra.mxu0 %v12939_v43  ;;  %v12984_v43 = vld [vmem:[%s13454_s29 + $0x27b8] ss:$40 sps:$4 sm:$0xff]  }
 0x874   : > { %9555 = vmatpush1.bf16.xpose.msra.mxu1 %v12942_v44  ;;  %9351 = vmatprep.subr.bf16.mxu0 %v12947_v46  ;;  %v12989_v44 = vld [vmem:[%s13454_s29 + $0x1e14] ss:$40 sps:$4 sm:$0xff]  }
 0x875   : > { %9556 = vmatprep.subr.bf16.mxu1 %v12950_v47  ;;  %v12992_v46 = vld [vmem:[%s13454_s29 + $0x2314] ss:$40 sps:$4 sm:$0xff]   ;;  %v12987_v47 = vld [vmem:[%s13454_s29 + $0x1e10] ss:$40 sps:$4 sm:$0xff]  }
 0x87b   : > { %9352 = vmatpush1.bf16.xpose.msra.mxu0 %v12945_v48  ;;  %v12990_v48 = vld [vmem:[%s13454_s29 + $0x2310] ss:$40 sps:$4 sm:$0xff]  }
 0x87c   : > { %9557 = vmatpush1.bf16.xpose.msra.mxu1 %v12948_v50  ;;  %9353 = vmatprep.subr.bf16.mxu0 %v12953_v51  ;;  %v12995_v50 = vld [vmem:[%s13454_s29 + $0x1e64] ss:$40 sps:$4 sm:$0xff]  }
 0x87d   : > { %9558 = vmatprep.subr.bf16.mxu1 %v12956_v53  ;;  %v12998_v51 = vld [vmem:[%s13454_s29 + $0x2364] ss:$40 sps:$4 sm:$0xff]   ;;  %v12993_v53 = vld [vmem:[%s13454_s29 + $0x1e60] ss:$40 sps:$4 sm:$0xff]  }
 0x883   : > { %9354 = vmatpush1.bf16.xpose.msra.mxu0 %v12951_v35  ;;  %v12996_v35 = vld [vmem:[%s13454_s29 + $0x2360] ss:$40 sps:$4 sm:$0xff]  }
 0x884   : > { %9559 = vmatpush1.bf16.xpose.msra.mxu1 %v12954_v54  ;;  %9355 = vmatprep.subr.bf16.mxu0 %v12959_v56  ;;  %v13001_v54 = vld [vmem:[%s13454_s29 + $0x1eb4] ss:$40 sps:$4 sm:$0xff]  }
 0x885   : > { %9560 = vmatprep.subr.bf16.mxu1 %v12962_v57  ;;  %v9080_v60 = vpop.f32.mrb[8].mxu0  ;;  %v13004_v56 = vld [vmem:[%s13454_s29 + $0x23b4] ss:$40 sps:$4 sm:$0xff]   ;;  %v13002_v57 = vld [vmem:[%s13454_s29 + $0x23b0] ss:$40 sps:$4 sm:$0xff]  }
 0x886   : > { %v9285_v29 = vpop.f32.mrb[8].mxu1  ;;  %v11172_v45 = vadd.f32 %v9080_v60, %v1534_v58  ;;  %v9082_v3 = vpop.f32.mrb[9].mxu0  ;;  %v13007_v58 = vld [vmem:[%s13454_s29 + $0x1f04] ss:$40 sps:$4 sm:$0xff]   ;;  %v13016_v60 = vld [vmem:[%s13454_s29 + $0x2454] ss:$40 sps:$4 sm:$0xff]  }
 0x887   : > { %v11174_v62 = vadd.f32 %v9285_v29, %v1542_v59  ;;  %v9287_v4 = vpop.f32.mrb[9].mxu1  ;;  %v11173_v5 = vadd.f32 %v9082_v3, %v1538_v63  ;;  %v9084_v13 = vpop.f32.mrb[10].mxu0  ;;  %v13010_v59 = vld [vmem:[%s13454_s29 + $0x2404] ss:$40 sps:$4 sm:$0xff]   ;;  %v13008_v63 = vld [vmem:[%s13454_s29 + $0x2400] ss:$40 sps:$4 sm:$0xff]  }
 0x888   : > { %v11175_v6 = vadd.f32 %v9287_v4, %v1546_v0  ;;  %v9289_v9 = vpop.f32.mrb[10].mxu1  ;;  %v9085_v2 = vpop.f32.mrb[11].mxu0  ;;  %v13013_v0 = vld [vmem:[%s13454_s29 + $0x1f54] ss:$40 sps:$4 sm:$0xff]   ;;  %v13011_v29 = vld [vmem:[%s13454_s29 + $0x1f50] ss:$40 sps:$4 sm:$0xff]  }
 0x889   : > { %v9290_v14 = vpop.f32.mrb[11].mxu1  ;;  %v9752_v17 = vcombine.low %v11172_v45, %v11173_v5  ;;  %v13014_v45 = vld [vmem:[%s13454_s29 + $0x2450] ss:$40 sps:$4 sm:$0xff]   ;;  %v13022_v3 = vld [vmem:[%s13454_s29 + $0x24a4] ss:$40 sps:$4 sm:$0xff]  }
 0x88a   : > { %v9753_v18 = vcombine.low %v11174_v62, %v11175_v6  ;;  %v13019_v62 = vld [vmem:[%s13454_s29 + $0x1fa4] ss:$40 sps:$4 sm:$0xff]   ;;  %v13017_v4 = vld [vmem:[%s13454_s29 + $0x1fa0] ss:$40 sps:$4 sm:$0xff]   ;;  %v13025_v6 = vld [vmem:[%s13454_s29 + $0x1ff4] ss:$40 sps:$4 sm:$0xff]  }
 0x88b   : > { %v9760_v21 = vrot.slane %v9752_v17, %v14004_v19  ;;  %9356 = vmatpush1.bf16.xpose.msra.mxu0 %v12957_v1  ;;  %v13020_v5 = vld [vmem:[%s13454_s29 + $0x24a0] ss:$40 sps:$4 sm:$0xff]   ;;  %v13028_v13 = vld [vmem:[%s13454_s29 + $0x24f4] ss:$40 sps:$4 sm:$0xff]   ;;  %v13023_v9 = vld [vmem:[%s13454_s29 + $0x1ff0] ss:$40 sps:$4 sm:$0xff]  }
 0x88c   : > { %v9767_v22 = vrot.slane %v9753_v18, %v14004_v19  ;;  %9561 = vmatpush1.bf16.xpose.msra.mxu1 %v12960_v10  ;;  %9357 = vmatprep.subr.bf16.mxu0 %v12965_v16  ;;  %v13026_v1 = vld [vmem:[%s13454_s29 + $0x24f0] ss:$40 sps:$4 sm:$0xff]   ;;  %v13031_v10 = vld [vmem:[%s13454_s29 + $0x2044] ss:$40 sps:$4 sm:$0xff]   ;;  %v13029_v14 = vld [vmem:[%s13454_s29 + $0x2040] ss:$40 sps:$4 sm:$0xff]  }
 0x88d   : > { %9562 = vmatprep.subr.bf16.mxu1 %v12968_v15  ;;  %v13034_v2 = vld [vmem:[%s13454_s29 + $0x2544] ss:$40 sps:$4 sm:$0xff]   ;;  %v13032_v16 = vld [vmem:[%s13454_s29 + $0x2540] ss:$40 sps:$4 sm:$0xff]   ;;  %v13037_v15 = vld [vmem:[%s13454_s29 + $0x2094] ss:$40 sps:$4 sm:$0xff]  }
 0x88e   : > { %v9768_v24 = vcombine.low %v9760_v21, %v9767_v22  ;;  %v13040_v17 = vld [vmem:[%s13454_s29 + $0x2594] ss:$40 sps:$4 sm:$0xff]   ;;  %v13035_v18 = vld [vmem:[%s13454_s29 + $0x2090] ss:$40 sps:$4 sm:$0xff]   ;;  %v13043_v22 = vld [vmem:[%s13454_s29 + $0x20e4] ss:$40 sps:$4 sm:$0xff]  }
 0x88f   : > { %v13038_v21 = vld [vmem:[%s13454_s29 + $0x2590] ss:$40 sps:$4 sm:$0xff]  }
 0x890   : > { %9792 = vst [vmem:[%s14016_s11 + $0x10] sm:$0xff] %v9768_v24  ;;  %v13046_v24 = vld [vmem:[%s13454_s29 + $0x25e4] ss:$40 sps:$4 sm:$0xff]  }
 0x893   : > { %9358 = vmatpush1.bf16.xpose.msra.mxu0 %v12963_v26  ;;  %v13041_v26 = vld [vmem:[%s13454_s29 + $0x20e0] ss:$40 sps:$4 sm:$0xff]  }
 0x894   : > { %9563 = vmatpush1.bf16.xpose.msra.mxu1 %v12966_v27  ;;  %9359 = vmatprep.subr.bf16.mxu0 %v12971_v30  ;;  %v13044_v27 = vld [vmem:[%s13454_s29 + $0x25e0] ss:$40 sps:$4 sm:$0xff]   ;;  %v13049_v30 = vld [vmem:[%s13454_s29 + $0x2134] ss:$40 sps:$4 sm:$0xff]  }
 0x895   : > { %9564 = vmatprep.subr.bf16.mxu1 %v12974_v31  ;;  %v13052_v31 = vld [vmem:[%s13454_s29 + $0x2634] ss:$40 sps:$4 sm:$0xff]  }
 0x89b   : > { %9360 = vmatpush1.bf16.xpose.msra.mxu0 %v12969_v32  ;;  %v13047_v32 = vld [vmem:[%s13454_s29 + $0x2130] ss:$40 sps:$4 sm:$0xff]  }
 0x89c   : > { %9565 = vmatpush1.bf16.xpose.msra.mxu1 %v12972_v33  ;;  %9361 = vmatprep.subr.bf16.mxu0 %v12977_v34  ;;  %v13050_v33 = vld [vmem:[%s13454_s29 + $0x2630] ss:$40 sps:$4 sm:$0xff]   ;;  %v13055_v34 = vld [vmem:[%s13454_s29 + $0x2184] ss:$40 sps:$4 sm:$0xff]  }
 0x89d   : > { %9566 = vmatprep.subr.bf16.mxu1 %v12980_v36  ;;  %v13058_v36 = vld [vmem:[%s13454_s29 + $0x2684] ss:$40 sps:$4 sm:$0xff]  }
 0x8a3   : > { %9362 = vmatpush1.bf16.xpose.msra.mxu0 %v12975_v38  ;;  %v13053_v38 = vld [vmem:[%s13454_s29 + $0x2180] ss:$40 sps:$4 sm:$0xff]  }
 0x8a4   : > { %9567 = vmatpush1.bf16.xpose.msra.mxu1 %v12978_v39  ;;  %9363 = vmatprep.subr.bf16.mxu0 %v12983_v20  ;;  %v13056_v39 = vld [vmem:[%s13454_s29 + $0x2680] ss:$40 sps:$4 sm:$0xff]   ;;  %v13061_v20 = vld [vmem:[%s13454_s29 + $0x21d4] ss:$40 sps:$4 sm:$0xff]  }
 0x8a5   : > { %9568 = vmatprep.subr.bf16.mxu1 %v12986_v41  ;;  %v13064_v41 = vld [vmem:[%s13454_s29 + $0x26d4] ss:$40 sps:$4 sm:$0xff]  }
 0x8ab   : > { %9364 = vmatpush1.bf16.xpose.msra.mxu0 %v12981_v42  ;;  %v13059_v42 = vld [vmem:[%s13454_s29 + $0x21d0] ss:$40 sps:$4 sm:$0xff]  }
 0x8ac   : > { %9569 = vmatpush1.bf16.xpose.msra.mxu1 %v12984_v43  ;;  %9374 = vmatprep.subr.bf16.mxu0 %v12989_v44  ;;  %v13062_v43 = vld [vmem:[%s13454_s29 + $0x26d0] ss:$40 sps:$4 sm:$0xff]   ;;  %v13067_v44 = vld [vmem:[%s13454_s29 + $0x2224] ss:$40 sps:$4 sm:$0xff]  }
 0x8ad   : > { %9579 = vmatprep.subr.bf16.mxu1 %v12992_v46  ;;  %v13070_v46 = vld [vmem:[%s13454_s29 + $0x2724] ss:$40 sps:$4 sm:$0xff]  }
 0x8b2   : > { %9366 = vmatmul.mubr.bf16.vlgmr.msra.gmra.mrb[12].mxu0 %v13629_v23 }
 0x8b3   : > { %9571 = vmatmul.mubr.bf16.vlgmr.msra.gmra.mrb[12].mxu1 %v13629_v23  ;;  %9375 = vmatpush1.bf16.xpose.msra.mxu0 %v12987_v47  ;;  %v12999_v23 = vld [vmem:[%s13454_s29 + $0x1eb0] ss:$40 sps:$4 sm:$0xff]   ;;  %v13065_v47 = vld [vmem:[%s13454_s29 + $0x2220] ss:$40 sps:$4 sm:$0xff]  }
 0x8b4   : > { %9580 = vmatpush1.bf16.xpose.msra.mxu1 %v12990_v48  ;;  %9376 = vmatprep.subr.bf16.mxu0 %v12995_v50  ;;  %v13068_v48 = vld [vmem:[%s13454_s29 + $0x2720] ss:$40 sps:$4 sm:$0xff]   ;;  %v13073_v50 = vld [vmem:[%s13454_s29 + $0x2274] ss:$40 sps:$4 sm:$0xff]  }
 0x8b5   : > { %9581 = vmatprep.subr.bf16.mxu1 %v12998_v51  ;;  %9406 = vmatprep.mubr.bf16.mxu0 %v13636_v28  ;;  %v13076_v51 = vld [vmem:[%s13454_s29 + $0x2774] ss:$40 sps:$4 sm:$0xff]  }
 0x8b6   : > { %9611 = vmatprep.mubr.bf16.mxu1 %v13636_v28  ;;  %v13005_v28 = vld [vmem:[%s13454_s29 + $0x1f00] ss:$40 sps:$4 sm:$0xff]  }
 0x8bb   : > { %9377 = vmatpush1.bf16.xpose.msra.mxu0 %v12993_v53  ;;  %v13071_v53 = vld [vmem:[%s13454_s29 + $0x2270] ss:$40 sps:$4 sm:$0xff]  }
 0x8bc   : > { %9582 = vmatpush1.bf16.xpose.msra.mxu1 %v12996_v35  ;;  %9378 = vmatprep.subr.bf16.mxu0 %v13001_v54  ;;  %v13074_v35 = vld [vmem:[%s13454_s29 + $0x2770] ss:$40 sps:$4 sm:$0xff]   ;;  %v13079_v54 = vld [vmem:[%s13454_s29 + $0x22c4] ss:$40 sps:$4 sm:$0xff]  }
 0x8bd   : > { %9583 = vmatprep.subr.bf16.mxu1 %v13004_v56  ;;  %v13082_v56 = vld [vmem:[%s13454_s29 + $0x27c4] ss:$40 sps:$4 sm:$0xff]  }
 0x8c3   : > { %9379 = vmatpush1.bf16.xpose.msra.mxu0 %v12999_v23  ;;  %v13077_v23 = vld [vmem:[%s13454_s29 + $0x22c0] ss:$40 sps:$4 sm:$0xff]  }
 0x8c4   : > { %9584 = vmatpush1.bf16.xpose.msra.mxu1 %v13002_v57  ;;  %9380 = vmatprep.subr.bf16.mxu0 %v13007_v58  ;;  %v13080_v57 = vld [vmem:[%s13454_s29 + $0x27c0] ss:$40 sps:$4 sm:$0xff]   ;;  %v13085_v58 = vld [vmem:[%s13454_s29 + $0x1e1c] ss:$40 sps:$4 sm:$0xff]  }
 0x8c5   : > { %9585 = vmatprep.subr.bf16.mxu1 %v13010_v59  ;;  %v13088_v59 = vld [vmem:[%s13454_s29 + $0x231c] ss:$40 sps:$4 sm:$0xff]  }
 0x8cb   : > { %9381 = vmatpush1.bf16.xpose.msra.mxu0 %v13005_v28  ;;  %v13083_v28 = vld [vmem:[%s13454_s29 + $0x1e18] ss:$40 sps:$4 sm:$0xff]  }
 0x8cc   : > { %9586 = vmatpush1.bf16.xpose.msra.mxu1 %v13008_v63  ;;  %9382 = vmatprep.subr.bf16.mxu0 %v13013_v0  ;;  %v13086_v63 = vld [vmem:[%s13454_s29 + $0x2318] ss:$40 sps:$4 sm:$0xff]   ;;  %v13091_v0 = vld [vmem:[%s13454_s29 + $0x1e6c] ss:$40 sps:$4 sm:$0xff]  }
 0x8cd   : > { %9587 = vmatprep.subr.bf16.mxu1 %v13016_v60  ;;  %v13094_v60 = vld [vmem:[%s13454_s29 + $0x236c] ss:$40 sps:$4 sm:$0xff]  }
 0x8d3   : > { %9383 = vmatpush1.bf16.xpose.msra.mxu0 %v13011_v29  ;;  %v13089_v29 = vld [vmem:[%s13454_s29 + $0x1e68] ss:$40 sps:$4 sm:$0xff]  }
 0x8d4   : > { %9588 = vmatpush1.bf16.xpose.msra.mxu1 %v13014_v45  ;;  %9384 = vmatprep.subr.bf16.mxu0 %v13019_v62  ;;  %v13092_v45 = vld [vmem:[%s13454_s29 + $0x2368] ss:$40 sps:$4 sm:$0xff]   ;;  %v13097_v62 = vld [vmem:[%s13454_s29 + $0x1ebc] ss:$40 sps:$4 sm:$0xff]  }
 0x8d5   : > { %9589 = vmatprep.subr.bf16.mxu1 %v13022_v3  ;;  %v13100_v3 = vld [vmem:[%s13454_s29 + $0x23bc] ss:$40 sps:$4 sm:$0xff]  }
 0x8db   : > { %9385 = vmatpush1.bf16.xpose.msra.mxu0 %v13017_v4  ;;  %v13098_v4 = vld [vmem:[%s13454_s29 + $0x23b8] ss:$40 sps:$4 sm:$0xff]  }
 0x8dc   : > { %9590 = vmatpush1.bf16.xpose.msra.mxu1 %v13020_v5  ;;  %9386 = vmatprep.subr.bf16.mxu0 %v13025_v6  ;;  %v13103_v5 = vld [vmem:[%s13454_s29 + $0x1f0c] ss:$40 sps:$4 sm:$0xff]  }
 0x8dd   : > { %9591 = vmatprep.subr.bf16.mxu1 %v13028_v13  ;;  %v13106_v6 = vld [vmem:[%s13454_s29 + $0x240c] ss:$40 sps:$4 sm:$0xff]   ;;  %v13104_v13 = vld [vmem:[%s13454_s29 + $0x2408] ss:$40 sps:$4 sm:$0xff]  }
 0x8e3   : > { %9387 = vmatpush1.bf16.xpose.msra.mxu0 %v13023_v9  ;;  %v13109_v9 = vld [vmem:[%s13454_s29 + $0x1f5c] ss:$40 sps:$4 sm:$0xff]  }
 0x8e4   : > { %9592 = vmatpush1.bf16.xpose.msra.mxu1 %v13026_v1  ;;  %9388 = vmatprep.subr.bf16.mxu0 %v13031_v10  ;;  %v13112_v1 = vld [vmem:[%s13454_s29 + $0x245c] ss:$40 sps:$4 sm:$0xff]   ;;  %v13107_v10 = vld [vmem:[%s13454_s29 + $0x1f58] ss:$40 sps:$4 sm:$0xff]  }
 0x8e5   : > { %9593 = vmatprep.subr.bf16.mxu1 %v13034_v2  ;;  %v13110_v2 = vld [vmem:[%s13454_s29 + $0x2458] ss:$40 sps:$4 sm:$0xff]  }
 0x8eb   : > { %9389 = vmatpush1.bf16.xpose.msra.mxu0 %v13029_v14  ;;  %v13115_v14 = vld [vmem:[%s13454_s29 + $0x1fac] ss:$40 sps:$4 sm:$0xff]  }
 0x8ec   : > { %9594 = vmatpush1.bf16.xpose.msra.mxu1 %v13032_v16  ;;  %9390 = vmatprep.subr.bf16.mxu0 %v13037_v15  ;;  %v13118_v16 = vld [vmem:[%s13454_s29 + $0x24ac] ss:$40 sps:$4 sm:$0xff]   ;;  %v13113_v15 = vld [vmem:[%s13454_s29 + $0x1fa8] ss:$40 sps:$4 sm:$0xff]  }
 0x8ed   : > { %9595 = vmatprep.subr.bf16.mxu1 %v13040_v17  ;;  %v13116_v17 = vld [vmem:[%s13454_s29 + $0x24a8] ss:$40 sps:$4 sm:$0xff]  }
 0x8f3   : > { %9391 = vmatpush1.bf16.xpose.msra.mxu0 %v13035_v18  ;;  %v13121_v18 = vld [vmem:[%s13454_s29 + $0x1ffc] ss:$40 sps:$4 sm:$0xff]  }
 0x8f4   : > { %9596 = vmatpush1.bf16.xpose.msra.mxu1 %v13038_v21  ;;  %9392 = vmatprep.subr.bf16.mxu0 %v13043_v22  ;;  %v13124_v21 = vld [vmem:[%s13454_s29 + $0x24fc] ss:$40 sps:$4 sm:$0xff]   ;;  %v13119_v22 = vld [vmem:[%s13454_s29 + $0x1ff8] ss:$40 sps:$4 sm:$0xff]  }
 0x8f5   : > { %9597 = vmatprep.subr.bf16.mxu1 %v13046_v24  ;;  %v13122_v24 = vld [vmem:[%s13454_s29 + $0x24f8] ss:$40 sps:$4 sm:$0xff]  }
 0x8fb   : > { %9393 = vmatpush1.bf16.xpose.msra.mxu0 %v13041_v26  ;;  %v13127_v26 = vld [vmem:[%s13454_s29 + $0x204c] ss:$40 sps:$4 sm:$0xff]  }
 0x8fc   : > { %9598 = vmatpush1.bf16.xpose.msra.mxu1 %v13044_v27  ;;  %9394 = vmatprep.subr.bf16.mxu0 %v13049_v30  ;;  %v13130_v27 = vld [vmem:[%s13454_s29 + $0x254c] ss:$40 sps:$4 sm:$0xff]   ;;  %v13125_v30 = vld [vmem:[%s13454_s29 + $0x2048] ss:$40 sps:$4 sm:$0xff]  }
 0x8fd   : > { %9599 = vmatprep.subr.bf16.mxu1 %v13052_v31  ;;  %v13128_v31 = vld [vmem:[%s13454_s29 + $0x2548] ss:$40 sps:$4 sm:$0xff]  }
 0x903   : > { %9395 = vmatpush1.bf16.xpose.msra.mxu0 %v13047_v32  ;;  %v13133_v32 = vld [vmem:[%s13454_s29 + $0x209c] ss:$40 sps:$4 sm:$0xff]  }
 0x904   : > { %9600 = vmatpush1.bf16.xpose.msra.mxu1 %v13050_v33  ;;  %9396 = vmatprep.subr.bf16.mxu0 %v13055_v34  ;;  %v13136_v33 = vld [vmem:[%s13454_s29 + $0x259c] ss:$40 sps:$4 sm:$0xff]   ;;  %v13131_v34 = vld [vmem:[%s13454_s29 + $0x2098] ss:$40 sps:$4 sm:$0xff]  }
 0x905   : > { %9601 = vmatprep.subr.bf16.mxu1 %v13058_v36  ;;  %v13134_v36 = vld [vmem:[%s13454_s29 + $0x2598] ss:$40 sps:$4 sm:$0xff]  }
 0x90b   : > { %9397 = vmatpush1.bf16.xpose.msra.mxu0 %v13053_v38  ;;  %v13139_v38 = vld [vmem:[%s13454_s29 + $0x20ec] ss:$40 sps:$4 sm:$0xff]  }
 0x90c   : > { %9602 = vmatpush1.bf16.xpose.msra.mxu1 %v13056_v39  ;;  %9398 = vmatprep.subr.bf16.mxu0 %v13061_v20  ;;  %v13142_v39 = vld [vmem:[%s13454_s29 + $0x25ec] ss:$40 sps:$4 sm:$0xff]   ;;  %v13137_v20 = vld [vmem:[%s13454_s29 + $0x20e8] ss:$40 sps:$4 sm:$0xff]  }
 0x90d   : > { %9603 = vmatprep.subr.bf16.mxu1 %v13064_v41  ;;  %v13140_v41 = vld [vmem:[%s13454_s29 + $0x25e8] ss:$40 sps:$4 sm:$0xff]  }
 0x913   : > { %9399 = vmatpush1.bf16.xpose.msra.mxu0 %v13059_v42  ;;  %v13145_v42 = vld [vmem:[%s13454_s29 + $0x213c] ss:$40 sps:$4 sm:$0xff]  }
 0x914   : > { %9604 = vmatpush1.bf16.xpose.msra.mxu1 %v13062_v43  ;;  %9400 = vmatprep.subr.bf16.mxu0 %v13067_v44  ;;  %v13148_v43 = vld [vmem:[%s13454_s29 + $0x263c] ss:$40 sps:$4 sm:$0xff]   ;;  %v13143_v44 = vld [vmem:[%s13454_s29 + $0x2138] ss:$40 sps:$4 sm:$0xff]  }
 0x915   : > { %9605 = vmatprep.subr.bf16.mxu1 %v13070_v46  ;;  %v13146_v46 = vld [vmem:[%s13454_s29 + $0x2638] ss:$40 sps:$4 sm:$0xff]  }
 0x91b   : > { %9401 = vmatpush1.bf16.xpose.msra.mxu0 %v13065_v47  ;;  %v13151_v47 = vld [vmem:[%s13454_s29 + $0x218c] ss:$40 sps:$4 sm:$0xff]  }
 0x91c   : > { %9606 = vmatpush1.bf16.xpose.msra.mxu1 %v13068_v48  ;;  %9402 = vmatprep.subr.bf16.mxu0 %v13073_v50  ;;  %v13154_v48 = vld [vmem:[%s13454_s29 + $0x268c] ss:$40 sps:$4 sm:$0xff]   ;;  %v13149_v50 = vld [vmem:[%s13454_s29 + $0x2188] ss:$40 sps:$4 sm:$0xff]  }
 0x91d   : > { %9607 = vmatprep.subr.bf16.mxu1 %v13076_v51  ;;  %v13152_v51 = vld [vmem:[%s13454_s29 + $0x2688] ss:$40 sps:$4 sm:$0xff]  }
 0x923   : > { %9403 = vmatpush1.bf16.xpose.msra.mxu0 %v13071_v53  ;;  %v13157_v53 = vld [vmem:[%s13454_s29 + $0x21dc] ss:$40 sps:$4 sm:$0xff]  }
 0x924   : > { %9608 = vmatpush1.bf16.xpose.msra.mxu1 %v13074_v35  ;;  %9404 = vmatprep.subr.bf16.mxu0 %v13079_v54  ;;  %v13160_v35 = vld [vmem:[%s13454_s29 + $0x26dc] ss:$40 sps:$4 sm:$0xff]   ;;  %v13155_v54 = vld [vmem:[%s13454_s29 + $0x21d8] ss:$40 sps:$4 sm:$0xff]  }
 0x925   : > { %9609 = vmatprep.subr.bf16.mxu1 %v13082_v56  ;;  %v13158_v56 = vld [vmem:[%s13454_s29 + $0x26d8] ss:$40 sps:$4 sm:$0xff]  }
 0x92b   : > { %9405 = vmatpush1.bf16.xpose.msra.mxu0 %v13077_v23  ;;  %v13163_v23 = vld [vmem:[%s13454_s29 + $0x222c] ss:$40 sps:$4 sm:$0xff]  }
 0x92c   : > { %9610 = vmatpush1.bf16.xpose.msra.mxu1 %v13080_v57  ;;  %9415 = vmatprep.subr.bf16.mxu0 %v13085_v58  ;;  %v13166_v57 = vld [vmem:[%s13454_s29 + $0x272c] ss:$40 sps:$4 sm:$0xff]   ;;  %v13161_v58 = vld [vmem:[%s13454_s29 + $0x2228] ss:$40 sps:$4 sm:$0xff]  }
 0x92d   : > { %9620 = vmatprep.subr.bf16.mxu1 %v13088_v59  ;;  %v13164_v59 = vld [vmem:[%s13454_s29 + $0x2728] ss:$40 sps:$4 sm:$0xff]  }
 0x932   : > { %9407 = vmatmul.mubr.bf16.vlgmr.msra.gmra.mrb[12].mxu0 %v13706_v37 }
 0x933   : > { %9612 = vmatmul.mubr.bf16.vlgmr.msra.gmra.mrb[12].mxu1 %v13706_v37  ;;  %9416 = vmatpush1.bf16.xpose.msra.mxu0 %v13083_v28  ;;  %v13095_v37 = vld [vmem:[%s13454_s29 + $0x1eb8] ss:$40 sps:$4 sm:$0xff]   ;;  %v13169_v28 = vld [vmem:[%s13454_s29 + $0x227c] ss:$40 sps:$4 sm:$0xff]  }
 0x934   : > { %9621 = vmatpush1.bf16.xpose.msra.mxu1 %v13086_v63  ;;  %9417 = vmatprep.subr.bf16.mxu0 %v13091_v0  ;;  %v13172_v63 = vld [vmem:[%s13454_s29 + $0x277c] ss:$40 sps:$4 sm:$0xff]   ;;  %v13167_v0 = vld [vmem:[%s13454_s29 + $0x2278] ss:$40 sps:$4 sm:$0xff]  }
 0x935   : > { %9622 = vmatprep.subr.bf16.mxu1 %v13094_v60  ;;  %9447 = vmatprep.mubr.bf16.mxu0 %v13712_v40  ;;  %v13170_v60 = vld [vmem:[%s13454_s29 + $0x2778] ss:$40 sps:$4 sm:$0xff]  }
 0x936   : > { %9652 = vmatprep.mubr.bf16.mxu1 %v13712_v40  ;;  %v13101_v40 = vld [vmem:[%s13454_s29 + $0x1f08] ss:$40 sps:$4 sm:$0xff]  }
 0x93b   : > { %9418 = vmatpush1.bf16.xpose.msra.mxu0 %v13089_v29  ;;  %v13175_v29 = vld [vmem:[%s13454_s29 + $0x22cc] ss:$40 sps:$4 sm:$0xff]  }
 0x93c   : > { %9623 = vmatpush1.bf16.xpose.msra.mxu1 %v13092_v45  ;;  %9419 = vmatprep.subr.bf16.mxu0 %v13097_v62  ;;  %v13178_v45 = vld [vmem:[%s13454_s29 + $0x27cc] ss:$40 sps:$4 sm:$0xff]   ;;  %v13173_v62 = vld [vmem:[%s13454_s29 + $0x22c8] ss:$40 sps:$4 sm:$0xff]  }
 0x93d   : > { %9624 = vmatprep.subr.bf16.mxu1 %v13100_v3  ;;  %v13176_v3 = vld [vmem:[%s13454_s29 + $0x27c8] ss:$40 sps:$4 sm:$0xff]  }
 0x943   : > { %9420 = vmatpush1.bf16.xpose.msra.mxu0 %v13095_v37  ;;  %v13181_v37 = vld [vmem:[%s13454_s29 + $0x1e24] ss:$40 sps:$4 sm:$0xff]  }
 0x944   : > { %9625 = vmatpush1.bf16.xpose.msra.mxu1 %v13098_v4  ;;  %9421 = vmatprep.subr.bf16.mxu0 %v13103_v5  ;;  %v13184_v4 = vld [vmem:[%s13454_s29 + $0x2324] ss:$40 sps:$4 sm:$0xff]   ;;  %v13179_v5 = vld [vmem:[%s13454_s29 + $0x1e20] ss:$40 sps:$4 sm:$0xff]  }
 0x945   : > { %9626 = vmatprep.subr.bf16.mxu1 %v13106_v6  ;;  %v13182_v6 = vld [vmem:[%s13454_s29 + $0x2320] ss:$40 sps:$4 sm:$0xff]  }
 0x94b   : > { %9422 = vmatpush1.bf16.xpose.msra.mxu0 %v13101_v40  ;;  %v13187_v40 = vld [vmem:[%s13454_s29 + $0x1e74] ss:$40 sps:$4 sm:$0xff]  }
 0x94c   : > { %9627 = vmatpush1.bf16.xpose.msra.mxu1 %v13104_v13  ;;  %9423 = vmatprep.subr.bf16.mxu0 %v13109_v9  ;;  %v13190_v13 = vld [vmem:[%s13454_s29 + $0x2374] ss:$40 sps:$4 sm:$0xff]   ;;  %v13185_v9 = vld [vmem:[%s13454_s29 + $0x1e70] ss:$40 sps:$4 sm:$0xff]  }
 0x94d   : > { %9628 = vmatprep.subr.bf16.mxu1 %v13112_v1  ;;  %v13188_v1 = vld [vmem:[%s13454_s29 + $0x2370] ss:$40 sps:$4 sm:$0xff]  }
 0x953   : > { %9424 = vmatpush1.bf16.xpose.msra.mxu0 %v13107_v10  ;;  %v13193_v10 = vld [vmem:[%s13454_s29 + $0x1ec4] ss:$40 sps:$4 sm:$0xff]  }
 0x954   : > { %9629 = vmatpush1.bf16.xpose.msra.mxu1 %v13110_v2  ;;  %9425 = vmatprep.subr.bf16.mxu0 %v13115_v14  ;;  %v13196_v2 = vld [vmem:[%s13454_s29 + $0x23c4] ss:$40 sps:$4 sm:$0xff]   ;;  %v13194_v14 = vld [vmem:[%s13454_s29 + $0x23c0] ss:$40 sps:$4 sm:$0xff]  }
 0x955   : > { %9630 = vmatprep.subr.bf16.mxu1 %v13118_v16  ;;  %v13199_v16 = vld [vmem:[%s13454_s29 + $0x1f14] ss:$40 sps:$4 sm:$0xff]  }
 0x95b   : > { %9426 = vmatpush1.bf16.xpose.msra.mxu0 %v13113_v15  ;;  %v13202_v15 = vld [vmem:[%s13454_s29 + $0x2414] ss:$40 sps:$4 sm:$0xff]  }
 0x95c   : > { %9631 = vmatpush1.bf16.xpose.msra.mxu1 %v13116_v17  ;;  %9427 = vmatprep.subr.bf16.mxu0 %v13121_v18  ;;  %v13200_v17 = vld [vmem:[%s13454_s29 + $0x2410] ss:$40 sps:$4 sm:$0xff]   ;;  %v13205_v18 = vld [vmem:[%s13454_s29 + $0x1f64] ss:$40 sps:$4 sm:$0xff]  }
 0x95d   : > { %9632 = vmatprep.subr.bf16.mxu1 %v13124_v21  ;;  %v13208_v21 = vld [vmem:[%s13454_s29 + $0x2464] ss:$40 sps:$4 sm:$0xff]  }
 0x963   : > { %9428 = vmatpush1.bf16.xpose.msra.mxu0 %v13119_v22  ;;  %v13203_v22 = vld [vmem:[%s13454_s29 + $0x1f60] ss:$40 sps:$4 sm:$0xff]  }
 0x964   : > { %9633 = vmatpush1.bf16.xpose.msra.mxu1 %v13122_v24  ;;  %9429 = vmatprep.subr.bf16.mxu0 %v13127_v26  ;;  %v13206_v24 = vld [vmem:[%s13454_s29 + $0x2460] ss:$40 sps:$4 sm:$0xff]   ;;  %v13211_v26 = vld [vmem:[%s13454_s29 + $0x1fb4] ss:$40 sps:$4 sm:$0xff]  }
 0x965   : > { %9634 = vmatprep.subr.bf16.mxu1 %v13130_v27  ;;  %v13214_v27 = vld [vmem:[%s13454_s29 + $0x24b4] ss:$40 sps:$4 sm:$0xff]  }
 0x96b   : > { %9430 = vmatpush1.bf16.xpose.msra.mxu0 %v13125_v30  ;;  %v13209_v30 = vld [vmem:[%s13454_s29 + $0x1fb0] ss:$40 sps:$4 sm:$0xff]  }
 0x96c   : > { %9635 = vmatpush1.bf16.xpose.msra.mxu1 %v13128_v31  ;;  %9431 = vmatprep.subr.bf16.mxu0 %v13133_v32  ;;  %v13212_v31 = vld [vmem:[%s13454_s29 + $0x24b0] ss:$40 sps:$4 sm:$0xff]   ;;  %v13217_v32 = vld [vmem:[%s13454_s29 + $0x2004] ss:$40 sps:$4 sm:$0xff]  }
 0x96d   : > { %9636 = vmatprep.subr.bf16.mxu1 %v13136_v33  ;;  %v13220_v33 = vld [vmem:[%s13454_s29 + $0x2504] ss:$40 sps:$4 sm:$0xff]  }
 0x973   : > { %9432 = vmatpush1.bf16.xpose.msra.mxu0 %v13131_v34  ;;  %v13215_v34 = vld [vmem:[%s13454_s29 + $0x2000] ss:$40 sps:$4 sm:$0xff]  }
 0x974   : > { %9637 = vmatpush1.bf16.xpose.msra.mxu1 %v13134_v36  ;;  %9433 = vmatprep.subr.bf16.mxu0 %v13139_v38  ;;  %v13218_v36 = vld [vmem:[%s13454_s29 + $0x2500] ss:$40 sps:$4 sm:$0xff]   ;;  %v13223_v38 = vld [vmem:[%s13454_s29 + $0x2054] ss:$40 sps:$4 sm:$0xff]  }
 0x975   : > { %9638 = vmatprep.subr.bf16.mxu1 %v13142_v39  ;;  %v13226_v39 = vld [vmem:[%s13454_s29 + $0x2554] ss:$40 sps:$4 sm:$0xff]  }
 0x97b   : > { %9434 = vmatpush1.bf16.xpose.msra.mxu0 %v13137_v20  ;;  %v13221_v20 = vld [vmem:[%s13454_s29 + $0x2050] ss:$40 sps:$4 sm:$0xff]  }
 0x97c   : > { %9639 = vmatpush1.bf16.xpose.msra.mxu1 %v13140_v41  ;;  %9435 = vmatprep.subr.bf16.mxu0 %v13145_v42  ;;  %v13224_v41 = vld [vmem:[%s13454_s29 + $0x2550] ss:$40 sps:$4 sm:$0xff]   ;;  %v13229_v42 = vld [vmem:[%s13454_s29 + $0x20a4] ss:$40 sps:$4 sm:$0xff]  }
 0x97d   : > { %9640 = vmatprep.subr.bf16.mxu1 %v13148_v43  ;;  %v13232_v43 = vld [vmem:[%s13454_s29 + $0x25a4] ss:$40 sps:$4 sm:$0xff]  }
 0x983   : > { %9436 = vmatpush1.bf16.xpose.msra.mxu0 %v13143_v44  ;;  %v13227_v44 = vld [vmem:[%s13454_s29 + $0x20a0] ss:$40 sps:$4 sm:$0xff]  }
 0x984   : > { %9641 = vmatpush1.bf16.xpose.msra.mxu1 %v13146_v46  ;;  %9437 = vmatprep.subr.bf16.mxu0 %v13151_v47  ;;  %v13230_v46 = vld [vmem:[%s13454_s29 + $0x25a0] ss:$40 sps:$4 sm:$0xff]   ;;  %v13235_v47 = vld [vmem:[%s13454_s29 + $0x20f4] ss:$40 sps:$4 sm:$0xff]  }
 0x985   : > { %9642 = vmatprep.subr.bf16.mxu1 %v13154_v48  ;;  %v13238_v48 = vld [vmem:[%s13454_s29 + $0x25f4] ss:$40 sps:$4 sm:$0xff]  }
 0x98b   : > { %9438 = vmatpush1.bf16.xpose.msra.mxu0 %v13149_v50  ;;  %v13233_v50 = vld [vmem:[%s13454_s29 + $0x20f0] ss:$40 sps:$4 sm:$0xff]  }
 0x98c   : > { %9643 = vmatpush1.bf16.xpose.msra.mxu1 %v13152_v51  ;;  %9439 = vmatprep.subr.bf16.mxu0 %v13157_v53  ;;  %v13236_v51 = vld [vmem:[%s13454_s29 + $0x25f0] ss:$40 sps:$4 sm:$0xff]   ;;  %v13241_v53 = vld [vmem:[%s13454_s29 + $0x2144] ss:$40 sps:$4 sm:$0xff]  }
 0x98d   : > { %9644 = vmatprep.subr.bf16.mxu1 %v13160_v35  ;;  %v13244_v35 = vld [vmem:[%s13454_s29 + $0x2644] ss:$40 sps:$4 sm:$0xff]  }
 0x993   : > { %9440 = vmatpush1.bf16.xpose.msra.mxu0 %v13155_v54  ;;  %v13239_v54 = vld [vmem:[%s13454_s29 + $0x2140] ss:$40 sps:$4 sm:$0xff]  }
 0x994   : > { %9645 = vmatpush1.bf16.xpose.msra.mxu1 %v13158_v56  ;;  %9441 = vmatprep.subr.bf16.mxu0 %v13163_v23  ;;  %v13242_v56 = vld [vmem:[%s13454_s29 + $0x2640] ss:$40 sps:$4 sm:$0xff]   ;;  %v13247_v23 = vld [vmem:[%s13454_s29 + $0x2194] ss:$40 sps:$4 sm:$0xff]  }
 0x995   : > { %9646 = vmatprep.subr.bf16.mxu1 %v13166_v57  ;;  %v13250_v57 = vld [vmem:[%s13454_s29 + $0x2694] ss:$40 sps:$4 sm:$0xff]  }
 0x99b   : > { %9442 = vmatpush1.bf16.xpose.msra.mxu0 %v13161_v58  ;;  %v13245_v58 = vld [vmem:[%s13454_s29 + $0x2190] ss:$40 sps:$4 sm:$0xff]  }
 0x99c   : > { %9647 = vmatpush1.bf16.xpose.msra.mxu1 %v13164_v59  ;;  %9443 = vmatprep.subr.bf16.mxu0 %v13169_v28  ;;  %v13248_v59 = vld [vmem:[%s13454_s29 + $0x2690] ss:$40 sps:$4 sm:$0xff]   ;;  %v13253_v28 = vld [vmem:[%s13454_s29 + $0x21e4] ss:$40 sps:$4 sm:$0xff]  }
 0x99d   : > { %9648 = vmatprep.subr.bf16.mxu1 %v13172_v63  ;;  %v13256_v63 = vld [vmem:[%s13454_s29 + $0x26e4] ss:$40 sps:$4 sm:$0xff]  }
 0x9a3   : > { %9444 = vmatpush1.bf16.xpose.msra.mxu0 %v13167_v0  ;;  %v13251_v0 = vld [vmem:[%s13454_s29 + $0x21e0] ss:$40 sps:$4 sm:$0xff]  }
 0x9a4   : > { %9649 = vmatpush1.bf16.xpose.msra.mxu1 %v13170_v60  ;;  %9445 = vmatprep.subr.bf16.mxu0 %v13175_v29  ;;  %v13254_v60 = vld [vmem:[%s13454_s29 + $0x26e0] ss:$40 sps:$4 sm:$0xff]   ;;  %v13259_v29 = vld [vmem:[%s13454_s29 + $0x2234] ss:$40 sps:$4 sm:$0xff]  }
 0x9a5   : > { %9650 = vmatprep.subr.bf16.mxu1 %v13178_v45  ;;  %v13262_v45 = vld [vmem:[%s13454_s29 + $0x2734] ss:$40 sps:$4 sm:$0xff]  }
 0x9ab   : > { %9446 = vmatpush1.bf16.xpose.msra.mxu0 %v13173_v62  ;;  %v13257_v62 = vld [vmem:[%s13454_s29 + $0x2230] ss:$40 sps:$4 sm:$0xff]  }
 0x9ac   : > { %9651 = vmatpush1.bf16.xpose.msra.mxu1 %v13176_v3  ;;  %9456 = vmatprep.subr.bf16.mxu0 %v13181_v37  ;;  %v13260_v3 = vld [vmem:[%s13454_s29 + $0x2730] ss:$40 sps:$4 sm:$0xff]   ;;  %v13265_v37 = vld [vmem:[%s13454_s29 + $0x2284] ss:$40 sps:$4 sm:$0xff]  }
 0x9ad   : > { %9661 = vmatprep.subr.bf16.mxu1 %v13184_v4  ;;  %v13268_v4 = vld [vmem:[%s13454_s29 + $0x2784] ss:$40 sps:$4 sm:$0xff]  }
 0x9b2   : > { %9448 = vmatmul.mubr.bf16.vlgmr.msra.gmra.mrb[12].mxu0 %v13789_v49 }
 0x9b3   : > { %9653 = vmatmul.mubr.bf16.vlgmr.msra.gmra.mrb[12].mxu1 %v13789_v49  ;;  %9457 = vmatpush1.bf16.xpose.msra.mxu0 %v13179_v5  ;;  %v13191_v49 = vld [vmem:[%s13454_s29 + $0x1ec0] ss:$40 sps:$4 sm:$0xff]  }
 0x9b4   : > { %9662 = vmatpush1.bf16.xpose.msra.mxu1 %v13182_v6  ;;  %9458 = vmatprep.subr.bf16.mxu0 %v13187_v40  ;;  %v13263_v5 = vld [vmem:[%s13454_s29 + $0x2280] ss:$40 sps:$4 sm:$0xff]   ;;  %v13271_v40 = vld [vmem:[%s13454_s29 + $0x22d4] ss:$40 sps:$4 sm:$0xff]  }
 0x9b5   : > { %9663 = vmatprep.subr.bf16.mxu1 %v13190_v13  ;;  %9488 = vmatprep.mubr.bf16.mxu0 %v13794_v52  ;;  %v13266_v6 = vld [vmem:[%s13454_s29 + $0x2780] ss:$40 sps:$4 sm:$0xff]   ;;  %v13274_v13 = vld [vmem:[%s13454_s29 + $0x27d4] ss:$40 sps:$4 sm:$0xff]  }
 0x9b6   : > { %9693 = vmatprep.mubr.bf16.mxu1 %v13794_v52  ;;  %v13197_v52 = vld [vmem:[%s13454_s29 + $0x1f10] ss:$40 sps:$4 sm:$0xff]  }
 0x9bb   : > { %9459 = vmatpush1.bf16.xpose.msra.mxu0 %v13185_v9  ;;  %v13269_v9 = vld [vmem:[%s13454_s29 + $0x22d0] ss:$40 sps:$4 sm:$0xff]  }
 0x9bc   : > { %9664 = vmatpush1.bf16.xpose.msra.mxu1 %v13188_v1  ;;  %9460 = vmatprep.subr.bf16.mxu0 %v13193_v10  ;;  %v13272_v1 = vld [vmem:[%s13454_s29 + $0x27d0] ss:$40 sps:$4 sm:$0xff]   ;;  %v1550_v10 = vrot.slane %v14710_v55, %v1517_v7 }
 0x9bd   : > { %9665 = vmatprep.subr.bf16.mxu1 %v13196_v2  ;;  %v1558_v2 = vrot.slane %v14710_v55, %v1525_v8 }
 0x9c3   : > { %9461 = vmatpush1.bf16.xpose.msra.mxu0 %v13191_v49  ;;  %v1554_v49 = vrot.slane %v14710_v55, %v1521_v11 }
 0x9c4   : > { %9666 = vmatpush1.bf16.xpose.msra.mxu1 %v13194_v14  ;;  %9462 = vmatprep.subr.bf16.mxu0 %v13199_v16  ;;  %v1562_v14 = vrot.slane %v14710_v55, %v1529_v12 }
 0x9c5   : > { %9667 = vmatprep.subr.bf16.mxu1 %v13202_v15 }
 0x9cb   : > { %9463 = vmatpush1.bf16.xpose.msra.mxu0 %v13197_v52 }
 0x9cc   : > { %9668 = vmatpush1.bf16.xpose.msra.mxu1 %v13200_v17  ;;  %9464 = vmatprep.subr.bf16.mxu0 %v13205_v18 }
 0x9cd   : > { %9669 = vmatprep.subr.bf16.mxu1 %v13208_v21 }
 0x9d3   : > { %9465 = vmatpush1.bf16.xpose.msra.mxu0 %v13203_v22 }
 0x9d4   : > { %9670 = vmatpush1.bf16.xpose.msra.mxu1 %v13206_v24  ;;  %9466 = vmatprep.subr.bf16.mxu0 %v13211_v26 }
 0x9d5   : > { %9671 = vmatprep.subr.bf16.mxu1 %v13214_v27 }
 0x9db   : > { %9467 = vmatpush1.bf16.xpose.msra.mxu0 %v13209_v30 }
 0x9dc   : > { %9672 = vmatpush1.bf16.xpose.msra.mxu1 %v13212_v31  ;;  %9468 = vmatprep.subr.bf16.mxu0 %v13217_v32 }
 0x9dd   : > { %9673 = vmatprep.subr.bf16.mxu1 %v13220_v33 }
 0x9e3   : > { %9469 = vmatpush1.bf16.xpose.msra.mxu0 %v13215_v34 }
 0x9e4   : > { %9674 = vmatpush1.bf16.xpose.msra.mxu1 %v13218_v36  ;;  %9470 = vmatprep.subr.bf16.mxu0 %v13223_v38 }
 0x9e5   : > { %9675 = vmatprep.subr.bf16.mxu1 %v13226_v39 }
 0x9eb   : > { %9471 = vmatpush1.bf16.xpose.msra.mxu0 %v13221_v20 }
 0x9ec   : > { %9676 = vmatpush1.bf16.xpose.msra.mxu1 %v13224_v41  ;;  %9472 = vmatprep.subr.bf16.mxu0 %v13229_v42 }
 0x9ed   : > { %9677 = vmatprep.subr.bf16.mxu1 %v13232_v43 }
 0x9f3   : > { %9473 = vmatpush1.bf16.xpose.msra.mxu0 %v13227_v44 }
 0x9f4   : > { %9678 = vmatpush1.bf16.xpose.msra.mxu1 %v13230_v46  ;;  %9474 = vmatprep.subr.bf16.mxu0 %v13235_v47 }
 0x9f5   : > { %9679 = vmatprep.subr.bf16.mxu1 %v13238_v48 }
 0x9fb   : > { %9475 = vmatpush1.bf16.xpose.msra.mxu0 %v13233_v50 }
 0x9fc   : > { %9680 = vmatpush1.bf16.xpose.msra.mxu1 %v13236_v51  ;;  %9476 = vmatprep.subr.bf16.mxu0 %v13241_v53 }
 0x9fd   : > { %9681 = vmatprep.subr.bf16.mxu1 %v13244_v35 }
 0xa03   : > { %9477 = vmatpush1.bf16.xpose.msra.mxu0 %v13239_v54 }
 0xa04   : > { %9682 = vmatpush1.bf16.xpose.msra.mxu1 %v13242_v56  ;;  %9478 = vmatprep.subr.bf16.mxu0 %v13247_v23 }
 0xa05   : > { %9683 = vmatprep.subr.bf16.mxu1 %v13250_v57 }
 0xa0b   : > { %9479 = vmatpush1.bf16.xpose.msra.mxu0 %v13245_v58 }
 0xa0c   : > { %9684 = vmatpush1.bf16.xpose.msra.mxu1 %v13248_v59  ;;  %9480 = vmatprep.subr.bf16.mxu0 %v13253_v28 }
 0xa0d   : > { %9685 = vmatprep.subr.bf16.mxu1 %v13256_v63 }
 0xa13   : > { %9481 = vmatpush1.bf16.xpose.msra.mxu0 %v13251_v0 }
 0xa14   : > { %9686 = vmatpush1.bf16.xpose.msra.mxu1 %v13254_v60  ;;  %9482 = vmatprep.subr.bf16.mxu0 %v13259_v29 }
 0xa15   : > { %9687 = vmatprep.subr.bf16.mxu1 %v13262_v45 }
 0xa1b   : > { %9483 = vmatpush1.bf16.xpose.msra.mxu0 %v13257_v62 }
 0xa1c   : > { %9688 = vmatpush1.bf16.xpose.msra.mxu1 %v13260_v3  ;;  %9484 = vmatprep.subr.bf16.mxu0 %v13265_v37 }
 0xa1d   : > { %9689 = vmatprep.subr.bf16.mxu1 %v13268_v4 }
 0xa23   : > { %9485 = vmatpush1.bf16.xpose.msra.mxu0 %v13263_v5 }
 0xa24   : > { %9690 = vmatpush1.bf16.xpose.msra.mxu1 %v13266_v6  ;;  %9486 = vmatprep.subr.bf16.mxu0 %v13271_v40 }
 0xa25   : > { %9691 = vmatprep.subr.bf16.mxu1 %v13274_v13 }
 0xa2b   : > { %9487 = vmatpush1.bf16.xpose.msra.mxu0 %v13269_v9 }
 0xa2c   : > { %9692 = vmatpush1.bf16.xpose.msra.mxu1 %v13272_v1 }
 0xa32   : > { %9489 = vmatmul.mubr.bf16.vlgmr.msra.gmra.mrb[12].mxu0 %v13862_v61 }
 0xa33   : > { %9694 = vmatmul.mubr.bf16.vlgmr.msra.gmra.mrb[12].mxu1 %v13862_v61 }
 0xb05   : > { %v9490_v16 = vpop.f32.mrb[12].mxu0 }
 0xb06   : > { %v9695_v15 = vpop.f32.mrb[12].mxu1  ;;  %v11176_v61 = vadd.f32 %v9490_v16, %v1550_v10  ;;  %v9492_v17 = vpop.f32.mrb[13].mxu0 }
 0xb07   : > { %v11178_v52 = vadd.f32 %v9695_v15, %v1558_v2  ;;  %v9697_v18 = vpop.f32.mrb[13].mxu1  ;;  %v11177_v7 = vadd.f32 %v9492_v17, %v1554_v49  ;;  %v9494_v22 = vpop.f32.mrb[14].mxu0 }
 0xb08   : > { %v11179_v21 = vadd.f32 %v9697_v18, %v1562_v14  ;;  %v9699_v24 = vpop.f32.mrb[14].mxu1  ;;  %v9495_v8 = vpop.f32.mrb[15].mxu0 }
 0xb09   : > { %v9700_v26 = vpop.f32.mrb[15].mxu1  ;;  %v9769_v27 = vcombine.low %v11176_v61, %v11177_v7 }
 0xb0a   : > { %v9770_v30 = vcombine.low %v11178_v52, %v11179_v21 }
 0xb0b   : > { %v9777_v11 = vrot.slane %v9769_v27, %v14004_v19 }
 0xb0c   : > { %v9784_v25 = vrot.slane %v9770_v30, %v14004_v19 }
 0xb0e   : > { %v9785_v12 = vcombine.low %v9777_v11, %v9784_v25 }
 0xb10   : > { %9793 = vst [vmem:[%s14016_s11 + $0x18] sm:$0xff] %v9785_v12 }
 0xb11 PF: > { %p13_p8 = scmp.ge.s32.totalorder %s13389_s17, 10   ;;  %s14988_s12 = smov %s13334_s13 }
 0xb12   : > { %s14989_s13 = smov %s13338_s14  ;;  %s14990_s14 = smov %s13399_s20 }
 0xb13   : > { %s14991_s15 = smov %s13389_s17  ;;  %15 = sbr.rel (!%p13_p8) target bundleno = 3 (0x3), region = 75 }
 0xb1a   :  { %9816 = vsyncpa [#allocation3], 1 }
 0xb1b   :  { %9818 = vsyncpa [#allocation3 + $0x1], 1 }

</bundles_post_ra>
